<compile_context>
chip_gen: v6e
topology: v6e:2x2x1
jax: 0.10.0
libtpu: 0.0.40
codegen_flags: <defaults>
</compile_context>

<pallas_src>
import functools
import math

import jax
import jax.numpy as jnp
from jax.experimental import pallas as pl
from jax.experimental.pallas import tpu as pltpu


# ----------------------------------------------------------------------------
# Pallas kernel: fused conv (shifted matmuls) + peephole ConvLSTM gating.
# ----------------------------------------------------------------------------
def convlstm_cell_kernel(zpad_ref, w_ref, b_ref, wci_ref, wcf_ref, wco_ref,
                         cprev_ref, hc_ref, *, kh, kw, hh, ww, cout,
                         activation):
    """One batch-tile of the ConvLSTM cell.

    zpad_ref : (TB, H+2p, W+2p, Ctot)  bf16  padded NHWC concat([X, H_prev])
    w_ref    : (kh*kw, Ctot, 4*Cout)   bf16  per-tap weights, gates [i, f, g, o]
    b_ref    : (1, 4*Cout)             f32
    wci/wcf/wco_ref : (H*W, Cout)      f32   peepholes (shared across batch)
    cprev_ref: (TB, H*W, Cout)         f32
    hc_ref   : (TB, H*W, 2*Cout)       f32   combined [H | C] output slab
    """
    act = jnp.tanh if activation == "tanh" else (lambda v: jnp.maximum(v, 0.0))

    tb = cprev_ref.shape[0]
    hw = hh * ww
    r = tb * hw
    ctot = zpad_ref.shape[-1]

    # --- Convolution as kh*kw shifted matmuls (fused im2col, f32 accumulate).
    acc = jnp.zeros((r, 4 * cout), jnp.float32)
    for dy in range(kh):
        for dx in range(kw):
            patch = zpad_ref[:, dy:dy + hh, dx:dx + ww, :]   # (TB, H, W, Ctot)
            lhs = patch.reshape(r, ctot)                     # leading-dim merge
            acc = acc + jnp.dot(lhs, w_ref[dy * kw + dx],
                                preferred_element_type=jnp.float32)
    conv = (acc + b_ref[...]).reshape(tb, hw, 4 * cout)

    # --- Peephole LSTM gating (all f32). ------------------------------------
    c_prev = cprev_ref[...]
    wci = wci_ref[...][None]          # (1, HW, Cout) -> broadcast over TB
    wcf = wcf_ref[...][None]
    wco = wco_ref[...][None]

    i_gate = jax.nn.sigmoid(conv[..., 0 * cout:1 * cout] + wci * c_prev)
    f_gate = jax.nn.sigmoid(conv[..., 1 * cout:2 * cout] + wcf * c_prev)
    g_val = act(conv[..., 2 * cout:3 * cout])
    c_new = f_gate * c_prev + i_gate * g_val
    o_gate = jax.nn.sigmoid(conv[..., 3 * cout:4 * cout] + wco * c_new)
    h_new = o_gate * act(c_new)

    # Single wider output slab: fewer, denser stores than two Cout-wide ones.
    hc_ref[...] = jnp.concatenate([h_new, c_new], axis=-1)


def _pick_batch_tile(b, per_batch_bytes, hw):
    """Largest divisor of b whose tile stays well under VMEM, preferring
    >= 2 grid steps so the BlockSpec pipeline can overlap DMA with compute."""
    budget = 4 << 20          # keep tiles modest: v7x has only 64 MiB VMEM
    best = 1
    for d in range(1, b + 1):
        if b % d == 0 and d * per_batch_bytes <= budget and d * hw <= 8192:
            best = d
    if best == b and b > 1:   # prefer at least 2 grid steps for pipelining
        for d in range(b - 1, 0, -1):
            if b % d == 0:
                best = d
                break
    return best


def convlstm_cell_pallas(z_pad, wtaps, bias2d, wci, wcf, wco, c_prev, *,
                         kh, kw, hh, ww, cout, activation, batch_tile):
    b, hp, wp, ctot = z_pad.shape
    hw = hh * ww
    assert b % batch_tile == 0
    grid = (b // batch_tile,)

    kern = functools.partial(convlstm_cell_kernel, kh=kh, kw=kw, hh=hh, ww=ww,
                             cout=cout, activation=activation)

    # Explicit VMEM budget: double-buffered tiles + resident weights + margin.
    tile_bytes = (batch_tile * hp * wp * ctot * 2      # z_pad tile (bf16)
                  + batch_tile * hw * cout * 4         # c_prev tile (f32)
                  + batch_tile * hw * 2 * cout * 4)    # [H|C] tile (f32)
    resident = (kh * kw * ctot * 4 * cout * 2          # conv weights (bf16)
                + 4 * cout * 4                         # bias
                + 3 * hw * cout * 4)                   # peepholes
    vmem_limit = int(min(max(4 * tile_bytes + 2 * resident, 8 << 20), 48 << 20))

    return pl.pallas_call(
        kern,
        out_shape=jax.ShapeDtypeStruct((b, hw, 2 * cout), jnp.float32),
        grid=grid,
        in_specs=[
            pl.BlockSpec((batch_tile, hp, wp, ctot), lambda i: (i, 0, 0, 0)),
            pl.BlockSpec((kh * kw, ctot, 4 * cout), lambda i: (0, 0, 0)),
            pl.BlockSpec((1, 4 * cout), lambda i: (0, 0)),
            pl.BlockSpec((hw, cout), lambda i: (0, 0)),
            pl.BlockSpec((hw, cout), lambda i: (0, 0)),
            pl.BlockSpec((hw, cout), lambda i: (0, 0)),
            pl.BlockSpec((batch_tile, hw, cout), lambda i: (i, 0, 0)),
        ],
        out_specs=pl.BlockSpec((batch_tile, hw, 2 * cout), lambda i: (i, 0, 0)),
        compiler_params=pltpu.CompilerParams(
            dimension_semantics=("parallel",),
            vmem_limit_bytes=vmem_limit),
    )(z_pad, wtaps, bias2d, wci, wcf, wco, c_prev)


# ----------------------------------------------------------------------------
# ConvLSTM module (parameters initialized deterministically in-script).
# ----------------------------------------------------------------------------
class ConvLSTMPallas:
    def __init__(self, in_channels, out_channels, kernel_size, padding,
                 activation, frame_size, bias, w_init, key):
        self.in_channels = in_channels
        self.out_channels = out_channels
        self.kh = self.kw = kernel_size
        self.padding = padding
        self.activation = activation
        self.frame_size = frame_size
        self.use_bias = bias

        k_w, k_b, k_ci, k_cf, k_co = jax.random.split(key, 5)
        ic_total = in_channels + out_channels
        oc_total = 4 * out_channels
        fan_in = ic_total * self.kh * self.kw

        # Conv2d weight, PyTorch layout (OC, IC, kh, kw).
        if w_init:
            # kaiming_uniform_(mode='fan_in', nonlinearity='relu')
            bound = math.sqrt(2.0) * math.sqrt(3.0 / fan_in)
        else:
            # PyTorch default Conv2d init bound (kaiming_uniform_ a=sqrt(5))
            bound = 1.0 / math.sqrt(fan_in)
        self.w_torch = jax.random.uniform(
            k_w, (oc_total, ic_total, self.kh, self.kw),
            minval=-bound, maxval=bound, dtype=jnp.float32)

        # Conv bias: zero when w_init=True (nn.init.constant_), PyTorch default
        # U(-1/sqrt(fan_in), 1/sqrt(fan_in)) otherwise, zero when bias=False.
        if bias and not w_init:
            bb = 1.0 / math.sqrt(fan_in)
            self.b = jax.random.uniform(k_b, (oc_total,), minval=-bb,
                                        maxval=bb, dtype=jnp.float32)
        else:
            self.b = jnp.zeros((oc_total,), jnp.float32)

        # Peephole weights (Cout, H, W).
        # TODO(synk): in the original code these nn.Parameter(torch.Tensor(...))
        # are uninitialized memory; here we use a deterministic small uniform.
        pshape = (out_channels, frame_size[0], frame_size[1])
        self.W_ci = jax.random.uniform(k_ci, pshape, minval=-0.1, maxval=0.1)
        self.W_cf = jax.random.uniform(k_cf, pshape, minval=-0.1, maxval=0.1)
        self.W_co = jax.random.uniform(k_co, pshape, minval=-0.1, maxval=0.1)

        # Kernel-side layouts:
        #   per-tap conv weights (kh*kw, IC_total, 4*Cout) in bf16,
        #   bias as (1, 4*Cout) f32, peepholes flattened to (H*W, Cout) f32.
        self.wtaps = jnp.transpose(self.w_torch, (2, 3, 1, 0)).reshape(
            self.kh * self.kw, ic_total, oc_total).astype(jnp.bfloat16)
        self.bias2d = self.b.reshape(1, oc_total)
        hw = frame_size[0] * frame_size[1]
        self.wci_flat = jnp.transpose(self.W_ci, (1, 2, 0)).reshape(hw, out_channels)
        self.wcf_flat = jnp.transpose(self.W_cf, (1, 2, 0)).reshape(hw, out_channels)
        self.wco_flat = jnp.transpose(self.W_co, (1, 2, 0)).reshape(hw, out_channels)

    def __call__(self, X, previous_H=None, previous_C=None):
        # X: NCHW (B, Cin, H, W), like the PyTorch module.
        b, _, hh, ww = X.shape
        co = self.out_channels
        p = self.padding
        # The module's state/peephole shapes only make sense for 'same' conv.
        assert 2 * p == self.kh - 1, "ConvLSTM requires 'same' padding"

        x_nhwc = jnp.transpose(X.astype(jnp.float32), (0, 2, 3, 1))
        if previous_H is None:
            h_nhwc = jnp.zeros((b, hh, ww, co), jnp.float32)
        else:
            h_nhwc = jnp.transpose(previous_H.astype(jnp.float32), (0, 2, 3, 1))
        if previous_C is None:
            c_nhwc = jnp.zeros((b, hh, ww, co), jnp.float32)
        else:
            c_nhwc = jnp.transpose(previous_C.astype(jnp.float32), (0, 2, 3, 1))

        # Conv input: padded NHWC concat([X, H_prev]) in bf16 (half HBM bytes,
        # MXU-native). No HBM im2col -- patch extraction happens in-kernel.
        z = jnp.concatenate([x_nhwc, h_nhwc], axis=-1).astype(jnp.bfloat16)
        z_pad = jnp.pad(z, ((0, 0), (p, p), (p, p), (0, 0)))
        c_prev = c_nhwc.reshape(b, hh * ww, co)

        hp, wp, ctot = z_pad.shape[1:]
        per_batch_bytes = hp * wp * ctot * 2 + hh * ww * co * 4 + hh * ww * 2 * co * 4
        batch_tile = _pick_batch_tile(b, per_batch_bytes, hh * ww)

        hc = convlstm_cell_pallas(
            z_pad, self.wtaps, self.bias2d,
            self.wci_flat, self.wcf_flat, self.wco_flat, c_prev,
            kh=self.kh, kw=self.kw, hh=hh, ww=ww, cout=co,
            activation=self.activation, batch_tile=batch_tile)

        h_flat = hc[..., :co].reshape(b, hh, ww, co)
        c_flat = hc[..., co:].reshape(b, hh, ww, co)
        H_out = jnp.transpose(h_flat, (0, 3, 1, 2))
        C_out = jnp.transpose(c_flat, (0, 3, 1, 2))
        # forward() returns (output, C) with output = H
        return H_out, C_out


# ----------------------------------------------------------------------------
# Pure-JAX reference (lax.conv, f32) for correctness check.
# ----------------------------------------------------------------------------
def ref_forward(model, X, Hprev, Cprev):
    Z = jnp.concatenate([X, Hprev], axis=1)  # NCHW
    conv = jax.lax.conv_general_dilated(
        Z, model.w_torch, (1, 1),
        [(model.padding, model.padding)] * 2,
        dimension_numbers=("NCHW", "OIHW", "NCHW"),
    ) + model.b[None, :, None, None]
    act = jnp.tanh if model.activation == "tanh" else jax.nn.relu
    i_c, f_c, g_c, o_c = jnp.split(conv, 4, axis=1)
    i_g = jax.nn.sigmoid(i_c + model.W_ci[None] * Cprev)
    f_g = jax.nn.sigmoid(f_c + model.W_cf[None] * Cprev)
    C = f_g * Cprev + i_g * act(g_c)
    o_g = jax.nn.sigmoid(o_c + model.W_co[None] * C)
    H = o_g * act(C)
    return H, C


if __name__ == "__main__":
    key = jax.random.PRNGKey(0)
    k_param, k_x = jax.random.split(key)

    batch, in_ch, out_ch, hh, ww = 2, 4, 32, 16, 16
    model = ConvLSTMPallas(
        in_channels=in_ch, out_channels=out_ch, kernel_size=3, padding=1,
        activation="tanh", frame_size=(hh, ww), bias=True, w_init=True,
        key=k_param)

    X = jax.random.normal(k_x, (batch, in_ch, hh, ww), dtype=jnp.float32)

    H_out, C_out = model(X)
    H_out = jax.block_until_ready(H_out)
    C_out = jax.block_until_ready(C_out)

    # Correctness check against a pure-f32 JAX reference (kernel uses bf16
    # conv inputs/weights, so tolerance is widened accordingly).
    Hz = jnp.zeros((batch, out_ch, hh, ww), jnp.float32)
    Cz = jnp.zeros((batch, out_ch, hh, ww), jnp.float32)
    H_ref, C_ref = ref_forward(model, X, Hz, Cz)
    assert H_out.shape == (batch, out_ch, hh, ww)
    assert C_out.shape == (batch, out_ch, hh, ww)
    assert jnp.allclose(H_out, H_ref, rtol=2e-2, atol=2e-2)
    assert jnp.allclose(C_out, C_ref, rtol=2e-2, atol=2e-2)

    print("KERNEL_OK")
</pallas_src>

<mosaic_0001>
module attributes {stable_mosaic.version = 11 : i64} {
  func.func @convlstm_cell_kernel(%arg0: i32, %arg1: memref<1x18x18x36xbf16, #tpu.memory_space<vmem>>, %arg2: memref<9x36x128xbf16, #tpu.memory_space<vmem>>, %arg3: memref<1x128xf32, #tpu.memory_space<vmem>>, %arg4: memref<256x32xf32, #tpu.memory_space<vmem>>, %arg5: memref<256x32xf32, #tpu.memory_space<vmem>>, %arg6: memref<256x32xf32, #tpu.memory_space<vmem>>, %arg7: memref<1x256x32xf32, #tpu.memory_space<vmem>>, %arg8: memref<1x256x64xf32, #tpu.memory_space<vmem>>) attributes {dimension_semantics = [#tpu.dimension_semantics<parallel>], iteration_bounds = array<i64: 2>, scalar_prefetch = 0 : i64, scratch_operands = 0 : i64, tpu.core_type = #tpu.core_type<tc>, window_params = [{transform_indices = @transform_0, window_bounds = array<i64: 1, 18, 18, 36>}, {pipeline_mode = #tpu.pipeline_mode<synchronous>, transform_indices = @transform_1, window_bounds = array<i64: 9, 36, 128>}, {pipeline_mode = #tpu.pipeline_mode<synchronous>, transform_indices = @transform_2, window_bounds = array<i64: 1, 128>}, {pipeline_mode = #tpu.pipeline_mode<synchronous>, transform_indices = @transform_3, window_bounds = array<i64: 256, 32>}, {pipeline_mode = #tpu.pipeline_mode<synchronous>, transform_indices = @transform_4, window_bounds = array<i64: 256, 32>}, {pipeline_mode = #tpu.pipeline_mode<synchronous>, transform_indices = @transform_5, window_bounds = array<i64: 256, 32>}, {transform_indices = @transform_6, window_bounds = array<i64: 1, 256, 32>}, {transform_indices = @transform_7, window_bounds = array<i64: 1, 256, 64>}]} {
    %cst = arith.constant 0.000000e+00 : f32
    %0 = vector.broadcast %cst : f32 to vector<256x128xf32>
    %c0 = arith.constant 0 : index
    %c0_0 = arith.constant 0 : index
    %c0_1 = arith.constant 0 : index
    %c0_2 = arith.constant 0 : index
    %1 = vector.load %arg1[%c0, %c0_0, %c0_1, %c0_2] : memref<1x18x18x36xbf16, #tpu.memory_space<vmem>>, vector<1x16x16x36xbf16>
    %2 = vector.shape_cast %1 : vector<1x16x16x36xbf16> to vector<256x36xbf16>
    %c0_3 = arith.constant 0 : index
    %c0_4 = arith.constant 0 : index
    %c0_5 = arith.constant 0 : index
    %3 = vector.load %arg2[%c0_3, %c0_4, %c0_5] : memref<9x36x128xbf16, #tpu.memory_space<vmem>>, vector<1x36x128xbf16>
    %4 = vector.shape_cast %3 : vector<1x36x128xbf16> to vector<36x128xbf16>
    %cst_6 = arith.constant dense<0.000000e+00> : vector<256x128xf32>
    %5 = tpu.matmul %2, %4, %cst_6 {dimension_numbers = #tpu.dot_dimension_numbers<[1], [0], [0], [1], [0, 0, 1, 1], [], []>} : vector<256x36xbf16>, vector<36x128xbf16>, vector<256x128xf32> -> vector<256x128xf32>
    %6 = arith.addf %0, %5 : vector<256x128xf32>
    %c0_7 = arith.constant 0 : index
    %c0_8 = arith.constant 0 : index
    %c1 = arith.constant 1 : index
    %c0_9 = arith.constant 0 : index
    %7 = vector.load %arg1[%c0_7, %c0_8, %c1, %c0_9] : memref<1x18x18x36xbf16, #tpu.memory_space<vmem>>, vector<1x16x16x36xbf16>
    %8 = vector.shape_cast %7 : vector<1x16x16x36xbf16> to vector<256x36xbf16>
    %c1_10 = arith.constant 1 : index
    %c0_11 = arith.constant 0 : index
    %c0_12 = arith.constant 0 : index
    %9 = vector.load %arg2[%c1_10, %c0_11, %c0_12] : memref<9x36x128xbf16, #tpu.memory_space<vmem>>, vector<1x36x128xbf16>
    %10 = vector.shape_cast %9 : vector<1x36x128xbf16> to vector<36x128xbf16>
    %cst_13 = arith.constant dense<0.000000e+00> : vector<256x128xf32>
    %11 = tpu.matmul %8, %10, %cst_13 {dimension_numbers = #tpu.dot_dimension_numbers<[1], [0], [0], [1], [0, 0, 1, 1], [], []>} : vector<256x36xbf16>, vector<36x128xbf16>, vector<256x128xf32> -> vector<256x128xf32>
    %12 = arith.addf %6, %11 : vector<256x128xf32>
    %c0_14 = arith.constant 0 : index
    %c0_15 = arith.constant 0 : index
    %c2 = arith.constant 2 : index
    %c0_16 = arith.constant 0 : index
    %13 = vector.load %arg1[%c0_14, %c0_15, %c2, %c0_16] : memref<1x18x18x36xbf16, #tpu.memory_space<vmem>>, vector<1x16x16x36xbf16>
    %14 = vector.shape_cast %13 : vector<1x16x16x36xbf16> to vector<256x36xbf16>
    %c2_17 = arith.constant 2 : index
    %c0_18 = arith.constant 0 : index
    %c0_19 = arith.constant 0 : index
    %15 = vector.load %arg2[%c2_17, %c0_18, %c0_19] : memref<9x36x128xbf16, #tpu.memory_space<vmem>>, vector<1x36x128xbf16>
    %16 = vector.shape_cast %15 : vector<1x36x128xbf16> to vector<36x128xbf16>
    %cst_20 = arith.constant dense<0.000000e+00> : vector<256x128xf32>
    %17 = tpu.matmul %14, %16, %cst_20 {dimension_numbers = #tpu.dot_dimension_numbers<[1], [0], [0], [1], [0, 0, 1, 1], [], []>} : vector<256x36xbf16>, vector<36x128xbf16>, vector<256x128xf32> -> vector<256x128xf32>
    %18 = arith.addf %12, %17 : vector<256x128xf32>
    %c0_21 = arith.constant 0 : index
    %c1_22 = arith.constant 1 : index
    %c0_23 = arith.constant 0 : index
    %c0_24 = arith.constant 0 : index
    %19 = vector.load %arg1[%c0_21, %c1_22, %c0_23, %c0_24] : memref<1x18x18x36xbf16, #tpu.memory_space<vmem>>, vector<1x16x16x36xbf16>
    %20 = vector.shape_cast %19 : vector<1x16x16x36xbf16> to vector<256x36xbf16>
    %c3 = arith.constant 3 : index
    %c0_25 = arith.constant 0 : index
    %c0_26 = arith.constant 0 : index
    %21 = vector.load %arg2[%c3, %c0_25, %c0_26] : memref<9x36x128xbf16, #tpu.memory_space<vmem>>, vector<1x36x128xbf16>
    %22 = vector.shape_cast %21 : vector<1x36x128xbf16> to vector<36x128xbf16>
    %cst_27 = arith.constant dense<0.000000e+00> : vector<256x128xf32>
    %23 = tpu.matmul %20, %22, %cst_27 {dimension_numbers = #tpu.dot_dimension_numbers<[1], [0], [0], [1], [0, 0, 1, 1], [], []>} : vector<256x36xbf16>, vector<36x128xbf16>, vector<256x128xf32> -> vector<256x128xf32>
    %24 = arith.addf %18, %23 : vector<256x128xf32>
    %c0_28 = arith.constant 0 : index
    %c1_29 = arith.constant 1 : index
    %c1_30 = arith.constant 1 : index
    %c0_31 = arith.constant 0 : index
    %25 = vector.load %arg1[%c0_28, %c1_29, %c1_30, %c0_31] : memref<1x18x18x36xbf16, #tpu.memory_space<vmem>>, vector<1x16x16x36xbf16>
    %26 = vector.shape_cast %25 : vector<1x16x16x36xbf16> to vector<256x36xbf16>
    %c4 = arith.constant 4 : index
    %c0_32 = arith.constant 0 : index
    %c0_33 = arith.constant 0 : index
    %27 = vector.load %arg2[%c4, %c0_32, %c0_33] : memref<9x36x128xbf16, #tpu.memory_space<vmem>>, vector<1x36x128xbf16>
    %28 = vector.shape_cast %27 : vector<1x36x128xbf16> to vector<36x128xbf16>
    %cst_34 = arith.constant dense<0.000000e+00> : vector<256x128xf32>
    %29 = tpu.matmul %26, %28, %cst_34 {dimension_numbers = #tpu.dot_dimension_numbers<[1], [0], [0], [1], [0, 0, 1, 1], [], []>} : vector<256x36xbf16>, vector<36x128xbf16>, vector<256x128xf32> -> vector<256x128xf32>
    %30 = arith.addf %24, %29 : vector<256x128xf32>
    %c0_35 = arith.constant 0 : index
    %c1_36 = arith.constant 1 : index
    %c2_37 = arith.constant 2 : index
    %c0_38 = arith.constant 0 : index
    %31 = vector.load %arg1[%c0_35, %c1_36, %c2_37, %c0_38] : memref<1x18x18x36xbf16, #tpu.memory_space<vmem>>, vector<1x16x16x36xbf16>
    %32 = vector.shape_cast %31 : vector<1x16x16x36xbf16> to vector<256x36xbf16>
    %c5 = arith.constant 5 : index
    %c0_39 = arith.constant 0 : index
    %c0_40 = arith.constant 0 : index
    %33 = vector.load %arg2[%c5, %c0_39, %c0_40] : memref<9x36x128xbf16, #tpu.memory_space<vmem>>, vector<1x36x128xbf16>
    %34 = vector.shape_cast %33 : vector<1x36x128xbf16> to vector<36x128xbf16>
    %cst_41 = arith.constant dense<0.000000e+00> : vector<256x128xf32>
    %35 = tpu.matmul %32, %34, %cst_41 {dimension_numbers = #tpu.dot_dimension_numbers<[1], [0], [0], [1], [0, 0, 1, 1], [], []>} : vector<256x36xbf16>, vector<36x128xbf16>, vector<256x128xf32> -> vector<256x128xf32>
    %36 = arith.addf %30, %35 : vector<256x128xf32>
    %c0_42 = arith.constant 0 : index
    %c2_43 = arith.constant 2 : index
    %c0_44 = arith.constant 0 : index
    %c0_45 = arith.constant 0 : index
    %37 = vector.load %arg1[%c0_42, %c2_43, %c0_44, %c0_45] : memref<1x18x18x36xbf16, #tpu.memory_space<vmem>>, vector<1x16x16x36xbf16>
    %38 = vector.shape_cast %37 : vector<1x16x16x36xbf16> to vector<256x36xbf16>
    %c6 = arith.constant 6 : index
    %c0_46 = arith.constant 0 : index
    %c0_47 = arith.constant 0 : index
    %39 = vector.load %arg2[%c6, %c0_46, %c0_47] : memref<9x36x128xbf16, #tpu.memory_space<vmem>>, vector<1x36x128xbf16>
    %40 = vector.shape_cast %39 : vector<1x36x128xbf16> to vector<36x128xbf16>
    %cst_48 = arith.constant dense<0.000000e+00> : vector<256x128xf32>
    %41 = tpu.matmul %38, %40, %cst_48 {dimension_numbers = #tpu.dot_dimension_numbers<[1], [0], [0], [1], [0, 0, 1, 1], [], []>} : vector<256x36xbf16>, vector<36x128xbf16>, vector<256x128xf32> -> vector<256x128xf32>
    %42 = arith.addf %36, %41 : vector<256x128xf32>
    %c0_49 = arith.constant 0 : index
    %c2_50 = arith.constant 2 : index
    %c1_51 = arith.constant 1 : index
    %c0_52 = arith.constant 0 : index
    %43 = vector.load %arg1[%c0_49, %c2_50, %c1_51, %c0_52] : memref<1x18x18x36xbf16, #tpu.memory_space<vmem>>, vector<1x16x16x36xbf16>
    %44 = vector.shape_cast %43 : vector<1x16x16x36xbf16> to vector<256x36xbf16>
    %c7 = arith.constant 7 : index
    %c0_53 = arith.constant 0 : index
    %c0_54 = arith.constant 0 : index
    %45 = vector.load %arg2[%c7, %c0_53, %c0_54] : memref<9x36x128xbf16, #tpu.memory_space<vmem>>, vector<1x36x128xbf16>
    %46 = vector.shape_cast %45 : vector<1x36x128xbf16> to vector<36x128xbf16>
    %cst_55 = arith.constant dense<0.000000e+00> : vector<256x128xf32>
    %47 = tpu.matmul %44, %46, %cst_55 {dimension_numbers = #tpu.dot_dimension_numbers<[1], [0], [0], [1], [0, 0, 1, 1], [], []>} : vector<256x36xbf16>, vector<36x128xbf16>, vector<256x128xf32> -> vector<256x128xf32>
    %48 = arith.addf %42, %47 : vector<256x128xf32>
    %c0_56 = arith.constant 0 : index
    %c2_57 = arith.constant 2 : index
    %c2_58 = arith.constant 2 : index
    %c0_59 = arith.constant 0 : index
    %49 = vector.load %arg1[%c0_56, %c2_57, %c2_58, %c0_59] : memref<1x18x18x36xbf16, #tpu.memory_space<vmem>>, vector<1x16x16x36xbf16>
    %50 = vector.shape_cast %49 : vector<1x16x16x36xbf16> to vector<256x36xbf16>
    %c8 = arith.constant 8 : index
    %c0_60 = arith.constant 0 : index
    %c0_61 = arith.constant 0 : index
    %51 = vector.load %arg2[%c8, %c0_60, %c0_61] : memref<9x36x128xbf16, #tpu.memory_space<vmem>>, vector<1x36x128xbf16>
    %52 = vector.shape_cast %51 : vector<1x36x128xbf16> to vector<36x128xbf16>
    %cst_62 = arith.constant dense<0.000000e+00> : vector<256x128xf32>
    %53 = tpu.matmul %50, %52, %cst_62 {dimension_numbers = #tpu.dot_dimension_numbers<[1], [0], [0], [1], [0, 0, 1, 1], [], []>} : vector<256x36xbf16>, vector<36x128xbf16>, vector<256x128xf32> -> vector<256x128xf32>
    %54 = arith.addf %48, %53 : vector<256x128xf32>
    %c0_63 = arith.constant 0 : index
    %c0_64 = arith.constant 0 : index
    %55 = vector.load %arg3[%c0_63, %c0_64] : memref<1x128xf32, #tpu.memory_space<vmem>>, vector<1x128xf32>
    %56 = vector.broadcast %55 : vector<1x128xf32> to vector<256x128xf32>
    %57 = arith.addf %54, %56 : vector<256x128xf32>
    %58 = vector.shape_cast %57 : vector<256x128xf32> to vector<1x256x128xf32>
    %c0_65 = arith.constant 0 : index
    %c0_66 = arith.constant 0 : index
    %c0_67 = arith.constant 0 : index
    %59 = vector.load %arg7[%c0_65, %c0_66, %c0_67] : memref<1x256x32xf32, #tpu.memory_space<vmem>>, vector<1x256x32xf32>
    %c0_68 = arith.constant 0 : index
    %c0_69 = arith.constant 0 : index
    %60 = vector.load %arg4[%c0_68, %c0_69] : memref<256x32xf32, #tpu.memory_space<vmem>>, vector<256x32xf32>
    %61 = vector.shape_cast %60 : vector<256x32xf32> to vector<1x256x32xf32>
    %c0_70 = arith.constant 0 : index
    %c0_71 = arith.constant 0 : index
    %62 = vector.load %arg5[%c0_70, %c0_71] : memref<256x32xf32, #tpu.memory_space<vmem>>, vector<256x32xf32>
    %63 = vector.shape_cast %62 : vector<256x32xf32> to vector<1x256x32xf32>
    %c0_72 = arith.constant 0 : index
    %c0_73 = arith.constant 0 : index
    %64 = vector.load %arg6[%c0_72, %c0_73] : memref<256x32xf32, #tpu.memory_space<vmem>>, vector<256x32xf32>
    %65 = vector.shape_cast %64 : vector<256x32xf32> to vector<1x256x32xf32>
    %66 = vector.extract_strided_slice %58 {offsets = [0, 0, 0], sizes = [1, 256, 32], strides = [1, 1, 1]} : vector<1x256x128xf32> to vector<1x256x32xf32>
    %67 = arith.mulf %61, %59 : vector<1x256x32xf32>
    %68 = arith.addf %66, %67 : vector<1x256x32xf32>
    %69 = arith.negf %68 : vector<1x256x32xf32>
    %70 = math.exp %69 : vector<1x256x32xf32>
    %cst_74 = arith.constant 1.000000e+00 : f32
    %71 = vector.broadcast %cst_74 : f32 to vector<1x256x32xf32>
    %72 = arith.addf %71, %70 : vector<1x256x32xf32>
    %73 = arith.divf %71, %72 : vector<1x256x32xf32>
    %74 = vector.extract_strided_slice %58 {offsets = [0, 0, 32], sizes = [1, 256, 32], strides = [1, 1, 1]} : vector<1x256x128xf32> to vector<1x256x32xf32>
    %75 = arith.mulf %63, %59 : vector<1x256x32xf32>
    %76 = arith.addf %74, %75 : vector<1x256x32xf32>
    %77 = arith.negf %76 : vector<1x256x32xf32>
    %78 = math.exp %77 : vector<1x256x32xf32>
    %cst_75 = arith.constant 1.000000e+00 : f32
    %79 = vector.broadcast %cst_75 : f32 to vector<1x256x32xf32>
    %80 = arith.addf %79, %78 : vector<1x256x32xf32>
    %81 = arith.divf %79, %80 : vector<1x256x32xf32>
    %82 = vector.extract_strided_slice %58 {offsets = [0, 0, 64], sizes = [1, 256, 32], strides = [1, 1, 1]} : vector<1x256x128xf32> to vector<1x256x32xf32>
    %83 = math.tanh %82 : vector<1x256x32xf32>
    %84 = arith.mulf %81, %59 : vector<1x256x32xf32>
    %85 = arith.mulf %73, %83 : vector<1x256x32xf32>
    %86 = arith.addf %84, %85 : vector<1x256x32xf32>
    %87 = vector.extract_strided_slice %58 {offsets = [0, 0, 96], sizes = [1, 256, 32], strides = [1, 1, 1]} : vector<1x256x128xf32> to vector<1x256x32xf32>
    %88 = arith.mulf %65, %86 : vector<1x256x32xf32>
    %89 = arith.addf %87, %88 : vector<1x256x32xf32>
    %90 = arith.negf %89 : vector<1x256x32xf32>
    %91 = math.exp %90 : vector<1x256x32xf32>
    %cst_76 = arith.constant 1.000000e+00 : f32
    %92 = vector.broadcast %cst_76 : f32 to vector<1x256x32xf32>
    %93 = arith.addf %92, %91 : vector<1x256x32xf32>
    %94 = arith.divf %92, %93 : vector<1x256x32xf32>
    %95 = math.tanh %86 : vector<1x256x32xf32>
    %96 = arith.mulf %94, %95 : vector<1x256x32xf32>
    %97 = tpu.concatenate %96, %86 in 2 : vector<1x256x32xf32>, vector<1x256x32xf32> -> vector<1x256x64xf32>
    %c0_77 = arith.constant 0 : index
    %c0_78 = arith.constant 0 : index
    %c0_79 = arith.constant 0 : index
    %98 = vector.load %arg8[%c0_77, %c0_78, %c0_79] : memref<1x256x64xf32, #tpu.memory_space<vmem>>, vector<1x256x64xf32>
    tpu.vector_store %arg8[%c0_77, %c0_78, %c0_79], %97 {strides = array<i32>} : memref<1x256x64xf32, #tpu.memory_space<vmem>>, vector<1x256x64xf32>,
    return
  }
  func.func @transform_0(%arg0: i32) -> (i32, i32, i32, i32) {
    %c0_i32 = arith.constant 0 : i32
    %c0_i32_0 = arith.constant 0 : i32
    %c0_i32_1 = arith.constant 0 : i32
    %c0_i32_2 = arith.constant 0 : i32
    return %arg0, %c0_i32, %c0_i32_0, %c0_i32_1 : i32, i32, i32, i32
  }
  func.func @transform_1(%arg0: i32) -> (i32, i32, i32) {
    %c0_i32 = arith.constant 0 : i32
    %c0_i32_0 = arith.constant 0 : i32
    %c0_i32_1 = arith.constant 0 : i32
    %c0_i32_2 = arith.constant 0 : i32
    return %c0_i32, %c0_i32_0, %c0_i32_1 : i32, i32, i32
  }
  func.func @transform_2(%arg0: i32) -> (i32, i32) {
    %c0_i32 = arith.constant 0 : i32
    %c0_i32_0 = arith.constant 0 : i32
    %c0_i32_1 = arith.constant 0 : i32
    return %c0_i32, %c0_i32_0 : i32, i32
  }
  func.func @transform_3(%arg0: i32) -> (i32, i32) {
    %c0_i32 = arith.constant 0 : i32
    %c0_i32_0 = arith.constant 0 : i32
    %c0_i32_1 = arith.constant 0 : i32
    return %c0_i32, %c0_i32_0 : i32, i32
  }
  func.func @transform_4(%arg0: i32) -> (i32, i32) {
    %c0_i32 = arith.constant 0 : i32
    %c0_i32_0 = arith.constant 0 : i32
    %c0_i32_1 = arith.constant 0 : i32
    return %c0_i32, %c0_i32_0 : i32, i32
  }
  func.func @transform_5(%arg0: i32) -> (i32, i32) {
    %c0_i32 = arith.constant 0 : i32
    %c0_i32_0 = arith.constant 0 : i32
    %c0_i32_1 = arith.constant 0 : i32
    return %c0_i32, %c0_i32_0 : i32, i32
  }
  func.func @transform_6(%arg0: i32) -> (i32, i32, i32) {
    %c0_i32 = arith.constant 0 : i32
    %c0_i32_0 = arith.constant 0 : i32
    %c0_i32_1 = arith.constant 0 : i32
    return %arg0, %c0_i32, %c0_i32_0 : i32, i32, i32
  }
  func.func @transform_7(%arg0: i32) -> (i32, i32, i32) {
    %c0_i32 = arith.constant 0 : i32
    %c0_i32_0 = arith.constant 0 : i32
    %c0_i32_1 = arith.constant 0 : i32
    return %arg0, %c0_i32, %c0_i32_0 : i32, i32, i32
  }
}

</mosaic_0001>

<bundles_post_ra>
// kernel: tpu_custom_call.1
= control target key start
LH: loop header
LB: loop body
LE: loop exit
PB: predicated region body
PF: predicated region fallthrough
CT: control target
= control target key end

     0   :  { %s9236_s24 = smov 0   ;;  %s13277_s0 = inlined_call_operand.vmem [shape: bf16[2,18,18,36], index: 0, kind: input, shape index: {}]   ;;  %s13278_s1 = inlined_call_operand.vmem [shape: bf16[9,36,128], index: 1, kind: input, shape index: {}]   ;;  %s13279_s2 = inlined_call_operand.vmem [shape: f32[1,128], index: 2, kind: input, shape index: {}]   ;;  %s13280_s3 = inlined_call_operand.vmem [shape: f32[256,32], index: 3, kind: input, shape index: {}]   ;;  %s13281_s4 = inlined_call_operand.vmem [shape: f32[256,32], index: 4, kind: input, shape index: {}]   ;;  %s13282_s5 = inlined_call_operand.vmem [shape: f32[256,32], index: 5, kind: input, shape index: {}]   ;;  %s13283_s6 = inlined_call_operand.vmem [shape: f32[2,256,32], index: 6, kind: input, shape index: {}]   ;;  %s13284_s7 = inlined_call_operand.vmem [shape: f32[2,256,64], index: 7, kind: output, shape index: {}]  }
   0x1 LB: > { %s7314_s25 = sadd.s32 4294967295, %s9191_s24   ;;  %p7318_p0 = scmp.ge.s32.totalorder %s9191_s24, 1  ;;  %s9191_s24 = sphi %s9236_s24, %s17_s24  }
   0x2   : > { %p247_p1 = scmp.lt.s32.totalorder %s9191_s24, 3 }
   0x4   : > { %p248_p2 = pnand %p7318_p0, %p247_p1 }
   0x6   : > { %251 = sbr.rel (%p248_p2) target bundleno = 1249 (0x4e1), region = 48 }
   0xb   : > { %v8561_v0 = vld [vmem:[%s13278_s1 + $0x24] ss:$0 sps:$4 sm:$0x33]   ;;  %vm858_vm0 = vcmask 1041408   ;;  %v8562_v1 = vld [vmem:[%s13278_s1 + $0x1c] sm:$0xff]   ;;  %p284_p3 = scmp.lt.s32.totalorder %s7314_s25, 1 }
   0xc   : > { %8540 = vmatprep.subr.msk.bf16.mxu1 %vm858_vm0, %v8561_v0  ;;  %8539 = vmatprep.subr.msk.bf16.mxu0 %vm858_vm0, %v8561_v0  ;;  %v860_v2 = vsel %vm858_vm0, %v8561_v0, 0  ;;  %vm353_vm1 = vsmask.f32 3328  ;;  %v8563_v3 = vld [vmem:[%s13278_s1 + $0x14] sm:$0xff]   ;;  %vm354_vm2 = vsmask.f32 7440 }
   0xd   : > { %8536 = vmatpush3.bf16.msra.mxu1 %v860_v2  ;;  %8192 = vmatpush3.bf16.msra.mxu0 %v860_v2  ;;  %s13711_s25 = smov (!%p284_p3, %s7314_s25), 1  ;;  %v8564_v4 = vld [vmem:[%s13278_s1 + $0x10] ss:$0 sps:$4 sm:$0x33]   ;;  %vm809_vm3 = vcmask 293888   ;;  %vm9314_vm4 = vmor %vm353_vm1, %vm354_vm2  ;;  %vm1378_vm5 = vcmask 1042432  }
   0xe   : > { %8534 = vmatprep.subr.bf16.mxu1 %v8562_v1  ;;  %8193 = vmatprep.subr.bf16.mxu0 %v8562_v1  ;;  %s8549_s11 = smul.u32 216, %s13711_s25  ;;  %v8565_v5 = vld [vmem:[%s13278_s1 + $0x38] ss:$0 sps:$4 sm:$0x33]   ;;  %v9271_v6 = vsel %vm858_vm0, %v8564_v4, 0  ;;  %vm1379_vm6 = vcmask 1046532  }
   0xf   : > { %v9297_v18 = vsel %vm858_vm0, %v8565_v5, 0  ;;  %vm9606_vm7 = vmor %vm1378_vm5, %vm1379_vm6  ;;  %s8018_s21 = sshll.u32 %s13711_s25, 8  ;;  %s9193_s8 = smov 32   ;;  %v5152_v33 = vld [vmem:[%s13281_s4 + $0x98] sm:$0xff]  ;;  %vm7181_vm8 = vcmask 261120   ;;  %vm7214_vm9 = vcmask 523264  }
  0x10   : > { %s9268_s16 = scalar_lea.vmem %s13277_s0, %s8549_s11  ;;  %s11200_s26 = scalar_lea.vmem %s13283_s6, %s8018_s21 }
  0x11   : > { %8537 = vmatpush3.bf16.msra.mxu1 %v8562_v1  ;;  %8194 = vmatpush3.bf16.msra.mxu0 %v8562_v1  ;;  %v9274_v7 = vld [vmem:[%s9268_s16] sm:$0xf]  ;;  %v9277_v8 = vld [vmem:[%s9268_s16 + $0x4] sm:$0xf]  ;;  %v9280_v9 = vld [vmem:[%s9268_s16 + $0x8] sm:$0x1]  ;;  %s13140_s10 = scalar_lea.vmem %s13284_s7, %s8018_s21 }
  0x12   : > { %8535 = vmatprep.subr.bf16.mxu1 %v8563_v3  ;;  %8195 = vmatprep.subr.bf16.mxu0 %v8563_v3  ;;  %v357_v10 = vshrl.u32 %v9274_v7, 16  ;;  %v360_v11 = vshll.u32 %v9274_v7, 16  ;;  %v366_v12 = vshll.u32 %v9277_v8, 16  ;;  %v370_v13 = vshrl.u32 %v9277_v8, 16  ;;  %v9287_v14 = vld [vmem:[%s9268_s16 + $0x60] sm:$0xf] }
  0x13   : > { %v376_v15 = vshll.u32 %v9280_v9, 16  ;;  %v9291_v16 = vld [vmem:[%s9268_s16 + $0x64] sm:$0xf]  ;;  %v9294_v17 = vld [vmem:[%s9268_s16 + $0x68] sm:$0x1]  ;;  %v549_v24 = vshrl.u32 %v9287_v14, 16 }
  0x14   : > { %v359_v19 = vrot.slane %v357_v10, 4  ;;  %v362_v20 = vrot.slane %v360_v11, 5  ;;  %v368_v21 = vrot.slane %v366_v12, 5  ;;  %v372_v22 = vrot.slane %v370_v13, 4  ;;  %v9307_v31 = vld [vmem:[%s9268_s16 + $0xc] sm:$0xf] }
  0x15   : > { %8538 = vmatpush3.bf16.msra.mxu1 %v8563_v3  ;;  %8196 = vmatpush3.bf16.msra.mxu0 %v8563_v3  ;;  %v378_v23 = vrot.slane %v376_v15, 5  ;;  %v552_v25 = vshll.u32 %v9287_v14, 16  ;;  %v558_v26 = vshll.u32 %v9291_v16, 16  ;;  %v562_v29 = vshrl.u32 %v9291_v16, 16  ;;  %v9310_v32 = vld [vmem:[%s9268_s16 + $0x10] sm:$0xf] }
  0x16   : > { %8541 = vmatprep.subr.msk.bf16.mxu1 %vm858_vm0, %v8564_v4  ;;  %8542 = vmatprep.subr.msk.bf16.mxu0 %vm858_vm0, %v8565_v5  ;;  %v363_v27 = vor.u32 %v362_v20, %v359_v19  ;;  %v373_v28 = vor.u32 %v372_v22, %v368_v21  ;;  %v568_v30 = vshll.u32 %v9294_v17, 16  ;;  %v551_v35 = vrot.slane %v549_v24, 4  ;;  %v9320_v43 = vld [vmem:[%s9268_s16 + $0x14] sm:$0x1]  ;;  %v318_v55 = vld [vmem:[%s9268_s16 + $0x6c] sm:$0xf] }
  0x17   : > { %v554_v36 = vrot.slane %v552_v25, 5  ;;  %v560_v37 = vrot.slane %v558_v26, 5  ;;  %v564_v40 = vrot.slane %v562_v29, 4  ;;  %v381_v44 = vshrl.u32 %v9307_v31, 16  ;;  %v9333_v60 = vld [vmem:[%s9268_s16 + $0x70] sm:$0xf] }
  0x18   : > { %v364_v38 = vrot.slane %v363_v27, 4  ;;  %v374_v39 = vrot.slane %v373_v28, 4  ;;  %v570_v41 = vrot.slane %v568_v30, 5  ;;  %v384_v45 = vshll.u32 %v9307_v31, 16  ;;  %v9341_v1 = vld [vmem:[%s9268_s16 + $0x74] sm:$0x1] }
  0x19   : > { %v555_v42 = vor.u32 %v554_v36, %v551_v35  ;;  %v390_v46 = vshll.u32 %v9310_v32, 16  ;;  %v565_v49 = vor.u32 %v564_v40, %v560_v37  ;;  %v394_v50 = vshrl.u32 %v9310_v32, 16  ;;  %v9346_v10 = vld [vmem:[%s9268_s16 + $0x18] sm:$0xf]  ;;  %v9358_v27 = vld [vmem:[%s9268_s16 + $0x20] sm:$0x1] }
  0x1a   : > { %v369_v47 = vsel %vm9314_vm4, %v364_v38, %v368_v21  ;;  %v379_v48 = vsel %vm9314_vm4, %v374_v39, %v378_v23  ;;  %v383_v53 = vrot.slane %v381_v44, 4  ;;  %v386_v54 = vrot.slane %v384_v45, 5  ;;  %v9352_v23 = vld [vmem:[%s9268_s16 + $0x1c] sm:$0xf]  ;;  %v9540_v0 = vld [vmem:[%s9268_s16 + $0xac] sm:$0xf] }
  0x1b   : > { %v7329_v51 = vcombine.low %v369_v47, %v379_v48  ;;  %v556_v52 = vrot.slane %v555_v42, 4  ;;  %v566_v56 = vrot.slane %v565_v49, 4  ;;  %v392_v57 = vrot.slane %v390_v46, 5  ;;  %v8567_v42 = vld [vmem:[%s13278_s1 + $0x30] sm:$0xff]   ;;  %v9372_v48 = vld [vmem:[%s9268_s16 + $0x7c] sm:$0xf] }
  0x1c   : > { %v396_v58 = vrot.slane %v394_v50, 4  ;;  %v400_v59 = vshll.u32 %v9320_v43, 16  ;;  %v387_v62 = vor.u32 %v386_v54, %v383_v53  ;;  %v573_v5 = vshrl.u32 %v318_v55, 16  ;;  %13359 = vst [vmem:[#allocation2_spill] sm:$0xff] %v9372_v48  ;;  %13367 = vst [vmem:[#allocation10_spill] sm:$0xff] %v9540_v0  ;;  %s9194_s18 = smov 64  }
  0x1d   : > { %8197 = vmatprep.mubr.msk.bf16.mxu0 %vm809_vm3, %v7329_v51  ;;  %v561_v61 = vsel %vm9314_vm4, %v556_v52, %v560_v37  ;;  %v571_v2 = vsel %vm9314_vm4, %v566_v56, %v570_v41  ;;  %v576_v13 = vshll.u32 %v318_v55, 16  ;;  %v582_v15 = vshll.u32 %v9333_v60, 16  ;;  %v320_v37 = vld [vmem:[%s9268_s16 + $0x78] sm:$0xf] }
  0x1e   : > { %v397_v3 = vor.u32 %v396_v58, %v392_v57  ;;  %v402_v4 = vrot.slane %v400_v59, 5  ;;  %v7337_v11 = vcombine.low %v561_v61, %v571_v2  ;;  %v388_v12 = vrot.slane %v387_v62, 4  ;;  %v9383_v2 = vld [vmem:[%s9268_s16 + $0x24] sm:$0xf] }
  0x1f   : > { %v575_v20 = vrot.slane %v573_v5, 4  ;;  %v586_v21 = vshrl.u32 %v9333_v60, 16  ;;  %v592_v22 = vshll.u32 %v9341_v1, 16  ;;  %v578_v25 = vrot.slane %v576_v13, 5 }
  0x20   : > { %v398_v19 = vrot.slane %v397_v3, 4  ;;  %8213 = vmatprep.mubr.msk.bf16.mxu1 %vm809_vm3, %v7337_v11  ;;  %v393_v24 = vsel %vm9314_vm4, %v388_v12, %v392_v57  ;;  %v584_v26 = vrot.slane %v582_v15, 5  ;;  %v405_v28 = vshrl.u32 %v9346_v10, 16  ;;  %v9377_v57 = vld [vmem:[%s9268_s16 + $0x80] sm:$0x1] }
  0x21   : > { %v588_v30 = vrot.slane %v586_v21, 4  ;;  %v594_v35 = vrot.slane %v592_v22, 5  ;;  %v408_v36 = vshll.u32 %v9346_v10, 16  ;;  %v579_v39 = vor.u32 %v578_v25, %v575_v20  ;;  %13360 = vst [vmem:[#allocation3_spill] sm:$0xff] %v9377_v57  ;;  %v9392_v12 = vld [vmem:[%s9268_s16 + $0x28] sm:$0xf] }
  0x22   : > { %v403_v29 = vsel %vm9314_vm4, %v398_v19, %v402_v4  ;;  %v407_v40 = vrot.slane %v405_v28, 4  ;;  %v414_v41 = vshll.u32 %v9352_v23, 16  ;;  %v418_v46 = vshrl.u32 %v9352_v23, 16  ;;  %v9396_v21 = vld [vmem:[%s9268_s16 + $0x2c] sm:$0x1] }
  0x23   : > { %v7330_v38 = vcombine.low %v393_v24, %v403_v29  ;;  %v589_v44 = vor.u32 %v588_v30, %v584_v26  ;;  %v410_v45 = vrot.slane %v408_v36, 5  ;;  %v424_v47 = vshll.u32 %v9358_v27, 16  ;;  %v8566_v22 = vld [vmem:[%s13278_s1 + $0x8] sm:$0xff]   ;;  %v9405_v29 = vld [vmem:[%s9268_s16 + $0x84] sm:$0xf] }
  0x24   : > { %v580_v49 = vrot.slane %v579_v39, 4  ;;  %v416_v50 = vrot.slane %v414_v41, 5  ;;  %v597_v51 = vshrl.u32 %v320_v37, 16  ;;  %v600_v52 = vshll.u32 %v320_v37, 16 }
  0x25   : > { %8198 = vmatmul.mubr.msk.bf16.vlgmr.msra.gmra.mxu0 %vm809_vm3, %v7330_v38  ;;  %v590_v53 = vrot.slane %v589_v44, 4  ;;  %v411_v54 = vor.u32 %v410_v45, %v407_v40  ;;  %v420_v55 = vrot.slane %v418_v46, 4  ;;  %v426_v56 = vrot.slane %v424_v47, 5 }
  0x26   : > { %8268 = vmatpush3.bf16.msra.mxu0 %v9297_v18  ;;  %v585_v58 = vsel %vm9314_vm4, %v580_v49, %v584_v26  ;;  %v599_v59 = vrot.slane %v597_v51, 4  ;;  %v602_v61 = vrot.slane %v600_v52, 5  ;;  %v606_v62 = vshll.u32 %v9372_v48, 16  ;;  %v8569_v18 = vld [vmem:[%s13278_s1 + $0x28] sm:$0xff]  }
  0x27   : > { %8269 = vmatprep.subr.bf16.mxu0 %v8567_v42  ;;  %v595_v3 = vsel %vm9314_vm4, %v590_v53, %v594_v35  ;;  %v412_v4 = vrot.slane %v411_v54, 4  ;;  %v421_v5 = vor.u32 %v420_v55, %v416_v50  ;;  %v610_v11 = vshrl.u32 %v9372_v48, 16  ;;  %v9424_v52 = vld [vmem:[%s9268_s16 + $0x8c] sm:$0x1] }
  0x28   : > { %v7338_v13 = vcombine.low %v585_v58, %v595_v3  ;;  %v603_v15 = vor.u32 %v602_v61, %v599_v59  ;;  %v608_v19 = vrot.slane %v606_v62, 5  ;;  %v616_v20 = vshll.u32 %v9377_v57, 16  ;;  %v9432_v59 = vld [vmem:[%s9268_s16 + $0x30] sm:$0xf] }
  0x29   : > { %v417_v24 = vsel %vm9314_vm4, %v412_v4, %v416_v50  ;;  %v422_v25 = vrot.slane %v421_v5, 4  ;;  %v612_v26 = vrot.slane %v610_v11, 4  ;;  %v429_v28 = vshrl.u32 %v9383_v2, 16 }
  0x2a   : > { %8270 = vmatpush3.bf16.msra.mxu0 %v8567_v42  ;;  %8214 = vmatmul.mubr.msk.bf16.vlgmr.msra.gmra.mxu1 %vm809_vm3, %v7338_v13  ;;  %v604_v30 = vrot.slane %v603_v15, 4  ;;  %v618_v35 = vrot.slane %v616_v20, 5  ;;  %v432_v36 = vshll.u32 %v9383_v2, 16  ;;  %v438_v37 = vshll.u32 %v9392_v12, 16  ;;  %v9415_v42 = vld [vmem:[%s9268_s16 + $0x88] sm:$0xf] }
  0x2b   : > { %8271 = vmatprep.subr.bf16.mxu0 %v8569_v18  ;;  %8230 = vmatpush3.bf16.msra.mxu1 %v9271_v6  ;;  %v427_v38 = vsel %vm9314_vm4, %v422_v25, %v426_v56  ;;  %v613_v39 = vor.u32 %v612_v26, %v608_v19  ;;  %v431_v40 = vrot.slane %v429_v28, 4  ;;  %v442_v41 = vshrl.u32 %v9392_v12, 16  ;;  %v8568_v6 = vld [vmem:[%s13278_s1] sm:$0xff]   ;;  %v9445_v28 = vld [vmem:[%s9268_s16 + $0x38] sm:$0x1] }
  0x2c   : > { %v7331_v44 = vcombine.low %v417_v24, %v427_v38  ;;  %v609_v45 = vsel %vm9314_vm4, %v604_v30, %v608_v19  ;;  %v434_v46 = vrot.slane %v432_v36, 5  ;;  %v440_v47 = vrot.slane %v438_v37, 5  ;;  %8231 = vmatprep.subr.bf16.mxu1 %v8566_v22  ;;  %v9450_v36 = vld [vmem:[%s9268_s16 + $0x90] sm:$0xf] }
  0x2d   : > { %v614_v49 = vrot.slane %v613_v39, 4  ;;  %v444_v50 = vrot.slane %v442_v41, 4  ;;  %v448_v51 = vshll.u32 %v9396_v21, 16  ;;  %v621_v53 = vshrl.u32 %v9405_v29, 16  ;;  %13361 = vst [vmem:[#allocation4_spill] sm:$0xff] %v9450_v36 }
  0x2e   : > { %8272 = vmatpush3.bf16.msra.mxu0 %v8569_v18  ;;  %8201 = vmatprep.mubr.msk.bf16.mxu0 %vm809_vm3, %v7331_v44  ;;  %v435_v54 = vor.u32 %v434_v46, %v431_v40  ;;  %v624_v55 = vshll.u32 %v9405_v29, 16  ;;  %v630_v56 = vshll.u32 %v9415_v42, 16  ;;  %v634_v58 = vshrl.u32 %v9415_v42, 16  ;;  %v9437_v18 = vld [vmem:[%s9268_s16 + $0x34] sm:$0xf] }
  0x2f   : > { %v619_v61 = vsel %vm9314_vm4, %v614_v49, %v618_v35  ;;  %v445_v62 = vor.u32 %v444_v50, %v440_v47  ;;  %v450_v3 = vrot.slane %v448_v51, 5  ;;  %v623_v4 = vrot.slane %v621_v53, 4  ;;  %8232 = vmatpush3.bf16.msra.mxu1 %v8566_v22  ;;  %v9455_v41 = vld [vmem:[%s9268_s16 + $0x94] sm:$0xf]  ;;  %v9458_v49 = vld [vmem:[%s9268_s16 + $0x98] sm:$0x1] }
  0x30   : > { %v7339_v5 = vcombine.low %v609_v45, %v619_v61  ;;  %v436_v11 = vrot.slane %v435_v54, 4  ;;  %v626_v13 = vrot.slane %v624_v55, 5  ;;  %v632_v15 = vrot.slane %v630_v56, 5  ;;  %8233 = vmatprep.subr.bf16.mxu1 %v8568_v6  ;;  %13362 = vst [vmem:[#allocation5_spill] sm:$0xff] %v9458_v49  ;;  %v9464_v55 = vld [vmem:[%s9268_s16 + $0x3c] sm:$0xf] }
  0x31   : > { %v446_v19 = vrot.slane %v445_v62, 4  ;;  %v636_v20 = vrot.slane %v634_v58, 4  ;;  %v640_v24 = vshll.u32 %v9424_v52, 16  ;;  %v453_v25 = vshrl.u32 %v9432_v59, 16  ;;  %v9472_v62 = vld [vmem:[%s9268_s16 + $0x40] sm:$0xf] }
  0x32   : > { %8217 = vmatprep.mubr.msk.bf16.mxu1 %vm809_vm3, %v7339_v5  ;;  %v441_v22 = vsel %vm9314_vm4, %v436_v11, %v440_v47  ;;  %v627_v26 = vor.u32 %v626_v13, %v623_v4  ;;  %v456_v30 = vshll.u32 %v9432_v59, 16  ;;  %v462_v35 = vshll.u32 %v9437_v18, 16  ;;  %v9479_v13 = vld [vmem:[%s13278_s1 + $0x4c] ss:$0 sps:$4 sm:$0x33]  }
  0x33   : > { %v451_v37 = vsel %vm9314_vm4, %v446_v19, %v450_v3  ;;  %v637_v38 = vor.u32 %v636_v20, %v632_v15  ;;  %v642_v39 = vrot.slane %v640_v24, 5  ;;  %v455_v40 = vrot.slane %v453_v25, 4  ;;  %8234 = vmatpush3.bf16.msra.mxu1 %v8568_v6 }
  0x34   : > { %v7332_v44 = vcombine.low %v441_v22, %v451_v37  ;;  %v628_v45 = vrot.slane %v627_v26, 4  ;;  %v458_v46 = vrot.slane %v456_v30, 5  ;;  %v464_v47 = vrot.slane %v462_v35, 5  ;;  %8543 = vmatprep.subr.msk.bf16.mxu1 %vm858_vm0, %v9479_v13  ;;  %v9489_v35 = vld [vmem:[%s13278_s1 + $0x60] ss:$0 sps:$4 sm:$0x33]  }
  0x35   : > { %v638_v50 = vrot.slane %v637_v38, 4  ;;  %v466_v51 = vshrl.u32 %v9437_v18, 16  ;;  %v472_v53 = vshll.u32 %v9445_v28, 16  ;;  %v645_v54 = vshrl.u32 %v9450_v36, 16  ;;  %8544 = vmatprep.subr.msk.bf16.mxu0 %vm858_vm0, %v9489_v35 }
  0x36   : > { %8202 = vmatmul.mubr.msk.bf16.gmra.mxu0 %vm809_vm3, %v7332_v44  ;;  %v633_v6 = vsel %vm9314_vm4, %v628_v45, %v632_v15  ;;  %v459_v56 = vor.u32 %v458_v46, %v455_v40  ;;  %v648_v58 = vshll.u32 %v9450_v36, 16  ;;  %v654_v61 = vshll.u32 %v9455_v41, 16  ;;  %v9500_v45 = vld [vmem:[%s9268_s16 + $0x9c] sm:$0xf] }
  0x37   : > { %v643_v3 = vsel %vm9314_vm4, %v638_v50, %v642_v39  ;;  %v468_v4 = vrot.slane %v466_v51, 4  ;;  %v474_v5 = vrot.slane %v472_v53, 5  ;;  %v647_v11 = vrot.slane %v645_v54, 4  ;;  %v9495_v39 = vld [vmem:[%s9268_s16 + $0x44] sm:$0x1]  ;;  %13363 = vst [vmem:[#allocation6_spill] sm:$0xff] %v9500_v45 }
  0x38   : > { %v7340_v15 = vcombine.low %v633_v6, %v643_v3  ;;  %v460_v19 = vrot.slane %v459_v56, 4  ;;  %v650_v20 = vrot.slane %v648_v58, 5  ;;  %v656_v24 = vrot.slane %v654_v61, 5  ;;  %v9503_v54 = vld [vmem:[%s9268_s16 + $0xa0] sm:$0xf] }
  0x39   : > { %v469_v25 = vor.u32 %v468_v4, %v464_v47  ;;  %v658_v22 = vshrl.u32 %v9455_v41, 16  ;;  %v664_v26 = vshll.u32 %v9458_v49, 16  ;;  %v477_v30 = vshrl.u32 %v9464_v55, 16  ;;  %13364 = vst [vmem:[#allocation7_spill] sm:$0xff] %v9503_v54  ;;  %v9509_v61 = vld [vmem:[%s9268_s16 + $0xa4] sm:$0x1] }
  0x3a   : > { %8218 = vmatmul.mubr.msk.bf16.gmra.mxu1 %vm809_vm3, %v7340_v15  ;;  %v465_v37 = vsel %vm9314_vm4, %v460_v19, %v464_v47  ;;  %v651_v38 = vor.u32 %v650_v20, %v647_v11  ;;  %v480_v40 = vshll.u32 %v9464_v55, 16  ;;  %v486_v44 = vshll.u32 %v9472_v62, 16  ;;  %13365 = vst [vmem:[#allocation8_spill] sm:$0xff] %v9509_v61  ;;  %v1331_v49 = vld [vmem:[%s9268_s16 + $0xc] sm:$0xe] }
  0x3b   : > { %v470_v46 = vrot.slane %v469_v25, 4  ;;  %v660_v50 = vrot.slane %v658_v22, 4  ;;  %v666_v51 = vrot.slane %v664_v26, 5  ;;  %v479_v53 = vrot.slane %v477_v30, 4  ;;  %v9518_v26 = vld [vmem:[%s9268_s16 + $0x48] sm:$0xf] }
  0x3c   : > { %v652_v47 = vrot.slane %v651_v38, 4  ;;  %v482_v6 = vrot.slane %v480_v40, 5  ;;  %v488_v56 = vrot.slane %v486_v44, 5  ;;  %v490_v58 = vshrl.u32 %v9472_v62, 16 }
  0x3d   : > { %v475_v3 = vsel %vm9314_vm4, %v470_v46, %v474_v5  ;;  %v661_v4 = vor.u32 %v660_v50, %v656_v24  ;;  %v496_v11 = vshll.u32 %v9495_v39, 16  ;;  %v669_v15 = vshrl.u32 %v9500_v45, 16 }
  0x3e   : > { %v7333_v19 = vcombine.low %v465_v37, %v475_v3  ;;  %v657_v20 = vsel %vm9314_vm4, %v652_v47, %v656_v24  ;;  %v483_v25 = vor.u32 %v482_v6, %v479_v53  ;;  %v492_v22 = vrot.slane %v490_v58, 4  ;;  %v9528_v6 = vld [vmem:[%s9268_s16 + $0x4c] sm:$0xf] }
  0x3f   : > { %v662_v30 = vrot.slane %v661_v4, 4  ;;  %v498_v38 = vrot.slane %v496_v11, 5  ;;  %v671_v40 = vrot.slane %v669_v15, 4  ;;  %v672_v5 = vshll.u32 %v9500_v45, 16 }
  0x40   : > { %8205 = vmatprep.mubr.msk.bf16.mxu0 %vm809_vm3, %v7333_v19  ;;  %v484_v44 = vrot.slane %v483_v25, 4  ;;  %v493_v46 = vor.u32 %v492_v22, %v488_v56  ;;  %v678_v37 = vshll.u32 %v9503_v54, 16  ;;  %v682_v24 = vshrl.u32 %v9503_v54, 16  ;;  %v9534_v19 = vld [vmem:[%s9268_s16 + $0x50] sm:$0x1] }
  0x41   : > { %v667_v50 = vsel %vm9314_vm4, %v662_v30, %v666_v51  ;;  %v674_v53 = vrot.slane %v672_v5, 5  ;;  %v688_v47 = vshll.u32 %v9509_v61, 16  ;;  %v501_v58 = vshrl.u32 %v9518_v26, 16  ;;  %v9537_v25 = vld [vmem:[%s9268_s16 + $0xa8] sm:$0xf] }
  0x42   : > { %v7341_v3 = vcombine.low %v657_v20, %v667_v50  ;;  %v489_v4 = vsel %vm9314_vm4, %v484_v44, %v488_v56  ;;  %v494_v11 = vrot.slane %v493_v46, 4  ;;  %v680_v15 = vrot.slane %v678_v37, 5  ;;  %13366 = vst [vmem:[#allocation9_spill] sm:$0xff] %v9537_v25  ;;  %v9549_v46 = vld [vmem:[%s9268_s16 + $0xb0] sm:$0x1] }
  0x43   : > { %v675_v22 = vor.u32 %v674_v53, %v671_v40  ;;  %v684_v51 = vrot.slane %v682_v24, 4  ;;  %v690_v30 = vrot.slane %v688_v47, 5  ;;  %v503_v5 = vrot.slane %v501_v58, 4  ;;  %13368 = vst [vmem:[#allocation11_spill] sm:$0xff] %v9549_v46 }
  0x44   : > { %8221 = vmatprep.mubr.msk.bf16.mxu1 %vm809_vm3, %v7341_v3  ;;  %v499_v20 = vsel %vm9314_vm4, %v494_v11, %v498_v38  ;;  %v504_v50 = vshll.u32 %v9518_v26, 16  ;;  %v510_v56 = vshll.u32 %v9528_v6, 16  ;;  %v514_v44 = vshrl.u32 %v9528_v6, 16 }
  0x45   : > { %v7334_v37 = vcombine.low %v489_v4, %v499_v20  ;;  %v676_v40 = vrot.slane %v675_v22, 4  ;;  %v685_v24 = vor.u32 %v684_v51, %v680_v15  ;;  %v520_v53 = vshll.u32 %v9534_v19, 16 }
  0x46   : > { %v506_v47 = vrot.slane %v504_v50, 5  ;;  %v512_v58 = vrot.slane %v510_v56, 5  ;;  %v516_v3 = vrot.slane %v514_v44, 4  ;;  %v693_v38 = vshrl.u32 %v9537_v25, 16  ;;  %v9559_v50 = vld [vmem:[%s9268_s16 + $0x54] sm:$0xf] }
  0x47   : > { %8206 = vmatmul.mubr.msk.bf16.gmra.mxu0 %vm809_vm3, %v7334_v37  ;;  %v681_v11 = vsel %vm9314_vm4, %v676_v40, %v680_v15  ;;  %v686_v34 = vrot.slane %v685_v24, 4  ;;  %v522_v63 = vrot.slane %v520_v53, 5  ;;  %v696_v4 = vshll.u32 %v9537_v25, 16  ;;  %v9562_v56 = vld [vmem:[%s9268_s16 + $0x58] sm:$0xf] }
  0x48   : > { %v507_v22 = vor.u32 %v506_v47, %v503_v5  ;;  %v517_v51 = vor.u32 %v516_v3, %v512_v58  ;;  %v695_v20 = vrot.slane %v693_v38, 4  ;;  %v702_v57 = vshll.u32 %v9540_v0, 16  ;;  %v9569_v40 = vld [vmem:[%s9268_s16 + $0x5c] sm:$0x1] }
  0x49   : > { %v691_v44 = vsel %vm9314_vm4, %v686_v34, %v690_v30  ;;  %v698_v37 = vrot.slane %v696_v4, 5  ;;  %v706_v48 = vshrl.u32 %v9540_v0, 16  ;;  %v712_v15 = vshll.u32 %v9549_v46, 16 }
  0x4a   : > { %v7342_v5 = vcombine.low %v681_v11, %v691_v44  ;;  %v508_v24 = vrot.slane %v507_v22, 4  ;;  %v518_v53 = vrot.slane %v517_v51, 4  ;;  %v704_v47 = vrot.slane %v702_v57, 5  ;;  %v9580_v22 = vld [vmem:[%s9268_s16 + $0xb4] sm:$0xf] }
  0x4b   : > { %v699_v3 = vor.u32 %v698_v37, %v695_v20  ;;  %v708_v38 = vrot.slane %v706_v48, 4  ;;  %v714_v25 = vrot.slane %v712_v15, 5  ;;  %v525_v61 = vshrl.u32 %v9559_v50, 16  ;;  %13369 = vst [vmem:[#allocation12_spill] sm:$0xff] %v9580_v22  ;;  %v9583_v44 = vld [vmem:[%s9268_s16 + $0xb8] sm:$0xf] }
  0x4c   : > { %8222 = vmatmul.mubr.msk.bf16.gmra.mxu1 %vm809_vm3, %v7342_v5  ;;  %v513_v34 = vsel %vm9314_vm4, %v508_v24, %v512_v58  ;;  %v523_v30 = vsel %vm9314_vm4, %v518_v53, %v522_v63  ;;  %v528_v11 = vshll.u32 %v9559_v50, 16  ;;  %v534_v4 = vshll.u32 %v9562_v56, 16  ;;  %v9591_v53 = vld [vmem:[%s9268_s16 + $0xbc] sm:$0x1] }
  0x4d   : > { %v7335_v57 = vcombine.low %v513_v34, %v523_v30  ;;  %v700_v48 = vrot.slane %v699_v3, 4  ;;  %v709_v51 = vor.u32 %v708_v38, %v704_v47  ;;  %v527_v20 = vrot.slane %v525_v61, 4 }
  0x4e   : > { %v530_v37 = vrot.slane %v528_v11, 5  ;;  %v536_v15 = vrot.slane %v534_v4, 5  ;;  %v538_v58 = vshrl.u32 %v9562_v56, 16  ;;  %v544_v63 = vshll.u32 %v9569_v40, 16 }
  0x4f   : > { %8209 = vmatprep.mubr.msk.bf16.mxu0 %vm809_vm3, %v7335_v57  ;;  %v705_v5 = vsel %vm9314_vm4, %v700_v48, %v704_v47  ;;  %v710_v24 = vrot.slane %v709_v51, 4  ;;  %v717_v61 = vshrl.u32 %v9580_v22, 16  ;;  %v720_v3 = vshll.u32 %v9580_v22, 16  ;;  %v1330_v48 = vld [vmem:[%s9268_s16] sm:$0xe] }
  0x50   : > { %v531_v38 = vor.u32 %v530_v37, %v527_v20  ;;  %v540_v34 = vrot.slane %v538_v58, 4  ;;  %v546_v30 = vrot.slane %v544_v63, 5  ;;  %v726_v11 = vshll.u32 %v9583_v44, 16  ;;  %v5150_v58 = vld [vmem:[%s13281_s4 + $0x88] sm:$0xff] }
  0x51   : > { %v715_v4 = vsel %vm9314_vm4, %v710_v24, %v714_v25  ;;  %v719_v57 = vrot.slane %v717_v61, 4  ;;  %v722_v46 = vrot.slane %v720_v3, 5  ;;  %v730_v47 = vshrl.u32 %v9583_v44, 16 }
  0x52   : > { %v7343_v51 = vcombine.low %v705_v5, %v715_v4  ;;  %v532_v0 = vrot.slane %v531_v38, 4  ;;  %v541_v45 = vor.u32 %v540_v34, %v536_v15  ;;  %v728_v54 = vrot.slane %v726_v11, 5 }
  0x53   : > { %v723_v36 = vor.u32 %v722_v46, %v719_v57  ;;  %v732_v22 = vrot.slane %v730_v47, 4  ;;  %v736_v20 = vshll.u32 %v9591_v53, 16  ;;  %v7399_v63 = vrot.slane %v1330_v48, 9  ;;  %v1332_v57 = vld [vmem:[%s9268_s16 + $0x18] sm:$0xe] }
  0x54   : > { %8225 = vmatprep.mubr.msk.bf16.mxu1 %vm809_vm3, %v7343_v51  ;;  %v537_v25 = vsel %vm9314_vm4, %v532_v0, %v536_v15  ;;  %v542_v37 = vrot.slane %v541_v45, 4  ;;  %v1383_v5 = vrot.slane %v9277_v8, 5  ;;  %v7365_v3 = vcombine.low %v9307_v31, %v9310_v32 }
  0x55   : > { %v724_v46 = vrot.slane %v723_v36, 4  ;;  %v733_v24 = vor.u32 %v732_v22, %v728_v54  ;;  %v738_v61 = vrot.slane %v736_v20, 5  ;;  %v7400_v15 = vrot.slane %v1331_v49, 9 }
  0x56   : > { %v547_v38 = vsel %vm9314_vm4, %v542_v37, %v546_v30  ;;  %v1384_v0 = vsel %vm9606_vm7, %v7399_v63, %v1383_v5  ;;  %v1385_v45 = vrot.slane %v1383_v5, 4  ;;  %v13372_v22 = vrot.slane %v9310_v32, 5 }
  0x57   : > { %v7336_v34 = vcombine.low %v537_v25, %v547_v38  ;;  %v729_v11 = vsel %vm9314_vm4, %v724_v46, %v728_v54  ;;  %v734_v36 = vrot.slane %v733_v24, 4  ;;  %v7364_v47 = vcombine.low %v9274_v7, %v9277_v8  ;;  %v1334_v46 = vld [vmem:[%s9268_s16 + $0x30] sm:$0xe] }
  0x58   : > { %v1392_v4 = vrot.slane %v13372_v22, 4  ;;  %v13373_v30 = vrot.slane %v9280_v9, 5  ;;  %v13374_v49 = vmov %v13372_v22  ;;  %v13375_v25 = vrot.slane %v9320_v43, 5  ;;  %v1333_v9 = vld [vmem:[%s9268_s16 + $0x24] sm:$0xe] }
  0x59   : > { %v1391_v51 = vsel %vm9606_vm7, %v7400_v15, %v13374_v49  ;;  %8210 = vmatmul.mubr.msk.bf16.gmra.mxu0 %vm809_vm3, %v7336_v34  ;;  %v739_v54 = vsel %vm9314_vm4, %v734_v36, %v738_v61  ;;  %v7366_v8 = vcombine.low %v9346_v10, %v9352_v23  ;;  %v7401_v63 = vrot.slane %v1332_v57, 9  ;;  %v1336_v22 = vld [vmem:[%s9268_s16 + $0x48] sm:$0xe] }
  0x5a   : > { %v1387_v48 = vsel %vm9606_vm7, %v1385_v45, %v13373_v30  ;;  %v1394_v7 = vsel %vm9606_vm7, %v1392_v4, %v13375_v25  ;;  %v7344_v37 = vcombine.low %v729_v11, %v739_v54  ;;  %v1397_v5 = vrot.slane %v9352_v23, 5  ;;  %v1335_v45 = vld [vmem:[%s9268_s16 + $0x3c] sm:$0xe] }
  0x5b   : > { %v7420_v20 = vcombine.low %v1384_v0, %v1387_v48  ;;  %v1400_v24 = vrot.slane %v9358_v27, 5  ;;  %v1404_v43 = vrot.slane %v9392_v12, 5  ;;  %v7421_v61 = vcombine.low %v1391_v51, %v1394_v7 }
  0x5c   : > { %8226 = vmatmul.mubr.msk.bf16.gmra.mxu1 %vm809_vm3, %v7344_v37  ;;  %v1398_v38 = vsel %vm9606_vm7, %v7401_v63, %v1397_v5  ;;  %v1399_v10 = vrot.slane %v1397_v5, 4  ;;  %v7402_v0 = vrot.slane %v1333_v9, 9  ;;  %v1407_v15 = vrot.slane %v9396_v21, 5  ;;  %v8580_v21 = vld [vmem:[%s13278_s1 + $0x58] sm:$0xff]   ;;  %v8578_v9 = vld [vmem:[%s13278_s1 + $0x44] sm:$0xff]  }
  0x5d   : > { %8273 = vmatprep.mubr.msk.bf16.mxu0 %vm809_vm3, %v7420_v20  ;;  %8235 = vmatprep.mubr.msk.bf16.mxu1 %vm809_vm3, %v7364_v47  ;;  %v1406_v23 = vrot.slane %v1404_v43, 4  ;;  %v7403_v34 = vrot.slane %v1334_v46, 9  ;;  %v1411_v11 = vrot.slane %v9437_v18, 5  ;;  %v1414_v36 = vrot.slane %v9445_v28, 5  ;;  %v1337_v20 = vld [vmem:[%s9268_s16 + $0x54] sm:$0xe] }
  0x5e   : > { %v1401_v27 = vsel %vm9606_vm7, %v1399_v10, %v1400_v24  ;;  %v1989_v4 = vsel %vm858_vm0, %v9479_v13, 0  ;;  %v2734_v57 = vsel %vm858_vm0, %v9489_v35, 0  ;;  %v1405_v48 = vsel %vm9606_vm7, %v7402_v0, %v1404_v43  ;;  %v1338_v24 = vld [vmem:[%s9268_s16 + $0x60] sm:$0xe]  ;;  %v8587_v43 = vld [vmem:[%s13278_s1 + $0x50] sm:$0xff]  }
  0x5f   : > { %v7422_v47 = vcombine.low %v1398_v38, %v1401_v27  ;;  %v1413_v30 = vrot.slane %v1411_v11, 4  ;;  %v7404_v49 = vrot.slane %v1335_v45, 9  ;;  %v1418_v51 = vrot.slane %v9472_v62, 5 }
  0x60   : > { %v1408_v28 = vsel %vm9606_vm7, %v1406_v23, %v1407_v15  ;;  %v1412_v13 = vsel %vm9606_vm7, %v7403_v34, %v1411_v11  ;;  %v1421_v35 = vrot.slane %v9495_v39, 5  ;;  %v1425_v54 = vrot.slane %v9528_v6, 5  ;;  %v8586_v23 = vld [vmem:[%s13278_s1 + $0x3c] sm:$0xff]  }
  0x61   : > { %8274 = vmatmul.mubr.msk.bf16.vlgmr.msra.gmra.mxu0 %vm809_vm3, %v7421_v61  ;;  %v1415_v25 = vsel %vm9606_vm7, %v1413_v30, %v1414_v36  ;;  %v1420_v7 = vrot.slane %v1418_v51, 4  ;;  %v7405_v37 = vrot.slane %v1336_v22, 9  ;;  %v1428_v63 = vrot.slane %v9534_v19, 5  ;;  %v1341_v36 = vld [vmem:[%s9268_s16 + $0x84] sm:$0xe] }
  0x62   : > { %8344 = vmatpush3.bf16.msra.mxu0 %v2734_v57  ;;  %8277 = vmatprep.mubr.msk.bf16.mxu0 %vm809_vm3, %v7422_v47  ;;  %v1442_v5 = vrot.slane %v9294_v17, 5  ;;  %v1427_v39 = vrot.slane %v1425_v54, 4  ;;  %v1432_v46 = vrot.slane %v9562_v56, 5  ;;  %v7367_v19 = vcombine.low %v9383_v2, %v9392_v12  ;;  %v9742_v57 = vld [vmem:[%s13278_s1 + $0x88] ss:$0 sps:$4 sm:$0x33]  }
  0x63   : > { %8345 = vmatprep.subr.bf16.mxu0 %v8580_v21  ;;  %v7406_v61 = vrot.slane %v1337_v20, 9  ;;  %v1435_v38 = vrot.slane %v9569_v40, 5  ;;  %v7423_v10 = vcombine.low %v1405_v48, %v1408_v28  ;;  %v7424_v0 = vcombine.low %v1412_v13, %v1415_v25 }
  0x64   : > { %8236 = vmatmul.mubr.msk.bf16.vlgmr.msra.gmra.mxu1 %vm809_vm3, %v7365_v3  ;;  %v9699_v45 = vsel %vm9606_vm7, %v7404_v49, %v1418_v51  ;;  %v1434_v31 = vrot.slane %v1432_v46, 4  ;;  %v9703_v32 = vsel %vm9606_vm7, %v1420_v7, %v1421_v35  ;;  %v9707_v2 = vsel %vm9606_vm7, %v7405_v37, %v1425_v54  ;;  %v1339_v3 = vld [vmem:[%s9268_s16 + $0x6c] sm:$0xe]  ;;  %v9755_v49 = vld [vmem:[%s13278_s1 + $0x74] ss:$0 sps:$4 sm:$0x33]  }
  0x65   : > { %8306 = vmatpush3.bf16.msra.mxu1 %v1989_v4  ;;  %8239 = vmatprep.mubr.msk.bf16.mxu1 %vm809_vm3, %v7366_v8  ;;  %v9711_v12 = vsel %vm9606_vm7, %v1427_v39, %v1428_v63  ;;  %v1439_v40 = vrot.slane %v9291_v16, 5  ;;  %v9716_v8 = vld [vmem:[%s9268_s16 + $0x78] sm:$0xe]  ;;  %v7368_v15 = vcombine.low %v9432_v59, %v9437_v18  ;;  %v7369_v34 = vcombine.low %v9464_v55, %v9472_v62 }
  0x66   : > { %8307 = vmatprep.subr.bf16.mxu1 %v8578_v9  ;;  %8346 = vmatpush3.bf16.msra.mxu0 %v8580_v21  ;;  %v7370_v11 = vcombine.low %v9518_v26, %v9528_v6  ;;  %v7407_v27 = vrot.slane %v1338_v24, 9  ;;  %v7371_v22 = vcombine.low %v9559_v50, %v9562_v56  ;;  %v9732_v4 = vsel %vm9606_vm7, %v7406_v61, %v1432_v46  ;;  %v1344_v24 = vld [vmem:[%s9268_s16 + $0xa8] sm:$0xe] }
  0x67   : > { %8347 = vmatprep.subr.bf16.mxu0 %v8587_v43  ;;  %v9736_v59 = vsel %vm9606_vm7, %v1434_v31, %v1435_v38  ;;  %v1446_v18 = vrot.slane %v9333_v60, 5  ;;  %v7425_v47 = vcombine.low %v9699_v45, %v9703_v32  ;;  %v7426_v30 = vcombine.low %v9707_v2, %v9711_v12  ;;  %v1342_v60 = vld [vmem:[%s9268_s16 + $0x90] sm:$0xe]  ;;  %v13378_v31 = vld [vmem:[#allocation7_spill] sm:$0xff]  ;;  %v13379_v32 = vld [vmem:[#allocation6_spill] sm:$0xff] }
  0x68   : > { %v7372_v21 = vcombine.low %v9287_v14, %v9291_v16  ;;  %v7408_v48 = vrot.slane %v1339_v3, 9  ;;  %v1441_v51 = vrot.slane %v1439_v40, 4  ;;  %v7375_v28 = vcombine.low %v9405_v29, %v9415_v42  ;;  %v1345_v2 = vld [vmem:[%s9268_s16 + $0xb4] sm:$0xe] }
  0x69   : > { %8278 = vmatmul.mubr.msk.bf16.gmra.mxu0 %vm809_vm3, %v7423_v10  ;;  %8308 = vmatpush3.bf16.msra.mxu1 %v8578_v9  ;;  %v7410_v13 = vrot.slane %v1341_v36, 9  ;;  %v1460_v35 = vrot.slane %v9415_v42, 5  ;;  %v7427_v54 = vcombine.low %v9732_v4, %v9736_v59  ;;  %v9765_v20 = vsel %vm9606_vm7, %v7407_v27, %v1439_v40  ;;  %v1343_v9 = vld [vmem:[%s9268_s16 + $0x9c] sm:$0xe]  ;;  %v13381_v27 = vld [vmem:[#allocation10_spill] sm:$0xff] }
  0x6a   : > { %8281 = vmatprep.mubr.msk.bf16.mxu0 %vm809_vm3, %v7424_v0  ;;  %8309 = vmatprep.subr.bf16.mxu1 %v8586_v23  ;;  %v1449_v25 = vrot.slane %v9341_v1, 5  ;;  %v7409_v7 = vrot.slane %v9716_v8, 9  ;;  %v1448_v37 = vrot.slane %v1446_v18, 4  ;;  %v1463_v46 = vrot.slane %v9424_v52, 5  ;;  %v13377_v0 = vld [vmem:[#allocation5_spill] sm:$0xff] }
  0x6b   : > { %8348 = vmatpush3.bf16.msra.mxu0 %v8587_v43  ;;  %v9773_v63 = vsel %vm9606_vm7, %v7410_v13, %v1460_v35  ;;  %v1462_v39 = vrot.slane %v1460_v35, 4  ;;  %v9782_v1 = vsel %vm9606_vm7, %v7408_v48, %v1446_v18  ;;  %v13376_v43 = vld [vmem:[#allocation4_spill] sm:$0xff]  ;;  %v7411_v61 = vrot.slane %v1342_v60, 9  ;;  %v13382_v36 = vld [vmem:[#allocation9_spill] sm:$0xff]  ;;  %v13383_v13 = vld [vmem:[#allocation11_spill] sm:$0xff] }
  0x6c   : > { %8240 = vmatmul.mubr.msk.bf16.gmra.mxu1 %vm809_vm3, %v7367_v19  ;;  %8546 = vmatprep.subr.msk.bf16.mxu0 %vm858_vm0, %v9742_v57  ;;  %v1467_v38 = vrot.slane %v9455_v41, 5  ;;  %v1443_v52 = vsel %vm9606_vm7, %v1441_v51, %v1442_v5  ;;  %v1470_v45 = vrot.slane %v13377_v0, 5  ;;  %v7412_v40 = vrot.slane %v1343_v9, 9  ;;  %v13384_v9 = vld [vmem:[#allocation12_spill] sm:$0xff]  ;;  %v9964_v19 = vld [vmem:[%s9268_s16 + $0x4c] sm:$0xf] }
  0x6d   : > { %8243 = vmatprep.mubr.msk.bf16.mxu1 %vm809_vm3, %v7368_v15  ;;  %8310 = vmatpush3.bf16.msra.mxu1 %v8586_v23  ;;  %v9793_v10 = vsel %vm9606_vm7, %v1462_v39, %v1463_v46  ;;  %v1474_v3 = vrot.slane %v13378_v31, 5  ;;  %v13380_v23 = vld [vmem:[#allocation8_spill] sm:$0xff]  ;;  %v7413_v48 = vrot.slane %v1344_v24, 9  ;;  %v1481_v51 = vrot.slane %v13381_v27, 5  ;;  %v7527_v46 = vld [vmem:[%s9268_s16 + $0xc] sm:$0xf] }
  0x6e   : > { %8545 = vmatprep.subr.msk.bf16.mxu1 %vm858_vm0, %v9755_v49  ;;  %v7431_v17 = vcombine.low %v9773_v63, %v9793_v10  ;;  %v9804_v5 = vsel %vm9606_vm7, %v7411_v61, %v1467_v38  ;;  %v1469_v12 = vrot.slane %v1467_v38, 4  ;;  %v1477_v15 = vrot.slane %v13380_v23, 5  ;;  %v9821_v61 = vld [vmem:[%s9268_s16 + $0x10] sm:$0xf]  ;;  %v13385_v24 = vld [vmem:[#allocation2_spill] sm:$0xff] }
  0x6f   : > { %v1484_v35 = vrot.slane %v13383_v13, 5  ;;  %v9829_v0 = vsel %vm9606_vm7, %v7412_v40, %v1474_v3  ;;  %v7428_v23 = vcombine.low %v9765_v20, %v1443_v52  ;;  %v13386_v13 = vld [vmem:[#allocation3_spill] sm:$0xff]  ;;  %v9836_v18 = vsel %vm9606_vm7, %v7413_v48, %v1481_v51  ;;  %v9998_v10 = vld [vmem:[%s9268_s16 + $0x50] sm:$0x1] }
  0x70   : > { %v9813_v60 = vsel %vm9606_vm7, %v1469_v12, %v1470_v45  ;;  %v1476_v45 = vrot.slane %v1474_v3, 4  ;;  %v7530_v12 = vld [vmem:[%s9268_s16 + $0x18] sm:$0xf]  ;;  %v1456_v39 = vrot.slane %v13386_v13, 5  ;;  %v2233_v20 = vshrl.u32 %v7527_v46, 16 }
  0x71   : > { %8282 = vmatmul.mubr.msk.bf16.gmra.mxu0 %vm809_vm3, %v7425_v47  ;;  %v1453_v47 = vrot.slane %v13385_v24, 5  ;;  %v7432_v38 = vcombine.low %v9804_v5, %v9813_v60  ;;  %v9840_v24 = vld [vmem:[%s9268_s16 + $0x1c] sm:$0xf]  ;;  %v2236_v52 = vshll.u32 %v7527_v46, 16  ;;  %v2242_v3 = vshll.u32 %v9821_v61, 16 }
  0x72   : > { %8285 = vmatprep.mubr.msk.bf16.mxu0 %vm809_vm3, %v7426_v30  ;;  %v1483_v30 = vrot.slane %v1481_v51, 4  ;;  %v9848_v40 = vsel %vm9606_vm7, %v1476_v45, %v1477_v15  ;;  %v1450_v48 = vsel %vm9606_vm7, %v1448_v37, %v1449_v25  ;;  %v2235_v26 = vrot.slane %v2233_v20, 4  ;;  %v9871_v25 = vld [vmem:[%s9268_s16 + $0x14] sm:$0x1]  ;;  %v10004_v5 = vld [vmem:[%s9268_s16 + $0x58] sm:$0xf] }
  0x73   : > { %v1455_v15 = vrot.slane %v1453_v47, 4  ;;  %v2238_v6 = vrot.slane %v2236_v52, 5  ;;  %v9873_v37 = vrot.slane %v2242_v3, 5  ;;  %v2257_v46 = vshrl.u32 %v7530_v12, 16  ;;  %v7533_v52 = vld [vmem:[%s9268_s16 + $0x24] sm:$0xf] }
  0x74   : > { %8244 = vmatmul.mubr.msk.bf16.gmra.mxu1 %vm809_vm3, %v7369_v34  ;;  %v9861_v62 = vsel %vm9606_vm7, %v1483_v30, %v1484_v35  ;;  %v1488_v34 = vrot.slane %v9583_v44, 5  ;;  %v2246_v35 = vshrl.u32 %v9821_v61, 16  ;;  %v7414_v45 = vrot.slane %v1345_v2, 9 }
  0x75   : > { %8247 = vmatprep.mubr.msk.bf16.mxu1 %vm809_vm3, %v7370_v11  ;;  %v1454_v11 = vsel %vm9606_vm7, %v7409_v7, %v1453_v47  ;;  %v1491_v13 = vrot.slane %v9591_v53, 5  ;;  %v2260_v30 = vshll.u32 %v7530_v12, 16  ;;  %v2266_v20 = vshll.u32 %v9840_v24, 16 }
  0x76   : > { %v1490_v8 = vrot.slane %v1488_v34, 4  ;;  %v2248_v7 = vrot.slane %v2246_v35, 4  ;;  %v2259_v47 = vrot.slane %v2257_v46, 4  ;;  %v2270_v2 = vshrl.u32 %v9840_v24, 16  ;;  %v9892_v35 = vld [vmem:[%s9268_s16 + $0x28] sm:$0xf] }
  0x77   : > { %v1457_v53 = vsel %vm9606_vm7, %v1455_v15, %v1456_v39  ;;  %v2239_v12 = vor.u32 %v2238_v6, %v2235_v26  ;;  %v2252_v3 = vshll.u32 %v9871_v25, 16  ;;  %v2262_v4 = vrot.slane %v2260_v30, 5  ;;  %v9149_v46 = vld [vmem:[%s9268_s16 + $0x70] sm:$0xf]  ;;  %v7532_v26 = vld [vmem:[%s9268_s16 + $0x20] sm:$0x1] }
  0x78   : > { %v2249_v59 = vor.u32 %v2248_v7, %v9873_v37  ;;  %v2272_v51 = vrot.slane %v2270_v2, 4  ;;  %v7429_v15 = vcombine.low %v9782_v1, %v1450_v48  ;;  %v9903_v30 = vld [vmem:[%s9268_s16 + $0x2c] sm:$0x1]  ;;  %v7430_v7 = vcombine.low %v1454_v11, %v1457_v53  ;;  %v7536_v1 = vld [vmem:[%s9268_s16 + $0x30] sm:$0xf] }
  0x79   : > { %8286 = vmatmul.mubr.msk.bf16.gmra.mxu0 %vm809_vm3, %v7427_v54  ;;  %v9889_v54 = vrot.slane %v2266_v20, 5  ;;  %v2263_v6 = vor.u32 %v2262_v4, %v2259_v47  ;;  %v2281_v20 = vshrl.u32 %v7533_v52, 16  ;;  %v9911_v50 = vsel %vm9606_vm7, %v7414_v45, %v1488_v34  ;;  %v9151_v4 = vld [vmem:[%s9268_s16 + $0x7c] sm:$0xf] }
  0x7a   : > { %8289 = vmatprep.mubr.msk.bf16.mxu0 %vm809_vm3, %v7428_v23  ;;  %v9148_v23 = vld [vmem:[%s9268_s16 + $0x6c] sm:$0xf]  ;;  %v9915_v56 = vsel %vm9606_vm7, %v1490_v8, %v1491_v13  ;;  %v2240_v48 = vrot.slane %v2239_v12, 4  ;;  %v2254_v47 = vrot.slane %v2252_v3, 5  ;;  %v2290_v14 = vshll.u32 %v9892_v35, 16 }
  0x7b   : > { %v7373_v39 = vcombine.low %v9148_v23, %v9149_v46  ;;  %v2294_v16 = vshrl.u32 %v9892_v35, 16  ;;  %v2273_v11 = vor.u32 %v2272_v51, %v9889_v54  ;;  %v2276_v34 = vshll.u32 %v7532_v26, 16  ;;  %v9926_v13 = vld [vmem:[%s9268_s16 + $0x34] sm:$0xf]  ;;  %v7539_v12 = vld [vmem:[%s9268_s16 + $0x3c] sm:$0xf] }
  0x7c   : > { %8248 = vmatmul.mubr.msk.bf16.gmra.mxu1 %vm809_vm3, %v7371_v22  ;;  %v2284_v22 = vshll.u32 %v7533_v52, 16  ;;  %v9923_v45 = vsel %vm858_vm0, %v9755_v49, 0  ;;  %v2264_v52 = vrot.slane %v2263_v6, 4  ;;  %v2283_v8 = vrot.slane %v2281_v20, 4  ;;  %v9150_v3 = vld [vmem:[%s9268_s16 + $0x78] sm:$0xf] }
  0x7d   : > { %8251 = vmatprep.mubr.msk.bf16.mxu1 %vm809_vm3, %v7372_v21  ;;  %v2250_v21 = vrot.slane %v2249_v59, 4  ;;  %v2300_v53 = vshll.u32 %v9903_v30, 16  ;;  %v7374_v51 = vcombine.low %v9150_v3, %v9151_v4  ;;  %v2305_v49 = vshrl.u32 %v7536_v1, 16 }
  0x7e   : > { %v2286_v2 = vrot.slane %v2284_v22, 5  ;;  %v2308_v23 = vshll.u32 %v7536_v1, 16  ;;  %v9936_v46 = vrot.slane %v2290_v14, 5  ;;  %v2296_v26 = vrot.slane %v2294_v16, 4  ;;  %v9951_v14 = vld [vmem:[%s9268_s16 + $0x40] sm:$0xf] }
  0x7f   : > { %v2314_v6 = vshll.u32 %v9926_v13, 16  ;;  %v2245_v20 = vsel %vm9314_vm4, %v2240_v48, %v9873_v37  ;;  %v2274_v22 = vrot.slane %v2273_v11, 4  ;;  %v2278_v3 = vrot.slane %v2276_v34, 5  ;;  %v7542_v37 = vld [vmem:[%s9268_s16 + $0x48] sm:$0xf] }
  0x80   : > { %v9945_v1 = vsel %vm858_vm0, %v9742_v57, 0  ;;  %v2287_v16 = vor.u32 %v2286_v2, %v2283_v8  ;;  %v9954_v4 = vrot.slane %v2300_v53, 5  ;;  %v2307_v59 = vrot.slane %v2305_v49, 4  ;;  %v9970_v53 = vld [vmem:[%s9268_s16 + $0x44] sm:$0x1] }
  0x81   : > { %8290 = vmatmul.mubr.msk.bf16.gmra.mxu0 %vm809_vm3, %v7429_v15  ;;  %v2318_v15 = vshrl.u32 %v9926_v13, 16  ;;  %v2329_v55 = vshrl.u32 %v7539_v12, 16  ;;  %v2255_v57 = vsel %vm9314_vm4, %v2250_v21, %v2254_v47  ;;  %v2269_v48 = vsel %vm9314_vm4, %v2264_v52, %v9889_v54  ;;  %v7545_v52 = vld [vmem:[%s9268_s16 + $0x54] sm:$0xf] }
  0x82   : > { %8293 = vmatprep.mubr.msk.bf16.mxu0 %vm809_vm3, %v7430_v7  ;;  %v9948_v7 = vld [vmem:[%s9268_s16 + $0x38] sm:$0x1]  ;;  %v2310_v11 = vrot.slane %v2308_v23, 5  ;;  %v2332_v34 = vshll.u32 %v7539_v12, 16  ;;  %v9967_v8 = vrot.slane %v2314_v6, 5  ;;  %v2279_v47 = vsel %vm9314_vm4, %v2274_v22, %v2278_v3 }
  0x83   : > { %v2320_v2 = vrot.slane %v2318_v15, 4  ;;  %v2331_v21 = vrot.slane %v2329_v55, 4  ;;  %v2342_v54 = vshrl.u32 %v9951_v14, 16  ;;  %v9977_v12 = vrot.slane %v2287_v16, 4 }
  0x84   : > { %8252 = vmatmul.mubr.msk.bf16.gmra.mxu1 %vm809_vm3, %v7373_v39  ;;  %v2297_v39 = vor.u32 %v2296_v26, %v9936_v46  ;;  %v2334_v49 = vrot.slane %v2332_v34, 5  ;;  %v2324_v23 = vshll.u32 %v9948_v7, 16  ;;  %v2353_v6 = vshrl.u32 %v7542_v37, 16 }
  0x85   : > { %8255 = vmatprep.mubr.msk.bf16.mxu1 %vm809_vm3, %v7374_v51  ;;  %v2338_v51 = vshll.u32 %v9951_v14, 16  ;;  %v9986_v15 = vcombine.low %v2245_v20, %v2255_v57  ;;  %v2311_v55 = vor.u32 %v2310_v11, %v2307_v59  ;;  %v2344_v22 = vrot.slane %v2342_v54, 4 }
  0x86   : > { %v2356_v3 = vshll.u32 %v7542_v37, 16  ;;  %v9992_v16 = vcombine.low %v2269_v48, %v2279_v47  ;;  %v9994_v34 = vrot.slane %v2297_v39, 4  ;;  %v2321_v63 = vor.u32 %v2320_v2, %v9967_v8  ;;  %v7548_v39 = vld [vmem:[%s9268_s16 + $0x60] sm:$0xf] }
  0x87   : > { %v9980_v26 = vrot.slane %v2338_v51, 5  ;;  %v2335_v20 = vor.u32 %v2334_v49, %v2331_v21  ;;  %v2348_v37 = vshll.u32 %v9970_v53, 16  ;;  %v2355_v57 = vrot.slane %v2353_v6, 4 }
  0x88   : > { %v2358_v60 = vrot.slane %v2356_v3, 5  ;;  %v2366_v48 = vshrl.u32 %v9964_v19, 16  ;;  %v2377_v11 = vshrl.u32 %v7545_v52, 16  ;;  %v13387_v2 = vcombine.low %v13376_v43, %v9455_v41  ;;  %v10025_v3 = vld [vmem:[%s9268_s16 + $0x5c] sm:$0x1] }
  0x89   : > { %8294 = vmatmul.mubr.msk.bf16.gmra.mxu0 %vm809_vm3, %v7431_v17  ;;  %v2362_v17 = vshll.u32 %v9964_v19, 16  ;;  %v2345_v59 = vor.u32 %v2344_v22, %v9980_v26  ;;  %v2293_v29 = vsel %vm9314_vm4, %v9977_v12, %v9936_v46  ;;  %v2312_v42 = vrot.slane %v2311_v55, 4 }
  0x8a   : > { %8297 = vmatprep.mubr.msk.bf16.mxu0 %vm809_vm3, %v7432_v38  ;;  %v2380_v51 = vshll.u32 %v7545_v52, 16  ;;  %v2322_v47 = vrot.slane %v2321_v63, 4  ;;  %v2368_v21 = vrot.slane %v2366_v48, 4  ;;  %v2379_v49 = vrot.slane %v2377_v11, 4 }
  0x8b   : > { %v10010_v38 = vrot.slane %v2362_v17, 5  ;;  %v2386_v54 = vshll.u32 %v10004_v5, 16  ;;  %v2336_v6 = vrot.slane %v2335_v20, 4  ;;  %v2372_v22 = vshll.u32 %v9998_v10, 16  ;;  %v10029_v17 = vld [vmem:[%s9268_s16 + $0x64] sm:$0xf] }
  0x8c   : > { %8256 = vmatmul.mubr.msk.bf16.gmra.mxu1 %vm809_vm3, %v7375_v28  ;;  %v2326_v28 = vrot.slane %v2324_v23, 5  ;;  %v2382_v41 = vrot.slane %v2380_v51, 5  ;;  %v2390_v43 = vshrl.u32 %v10004_v5, 16  ;;  %v2346_v46 = vrot.slane %v2345_v59, 4  ;;  %v10059_v51 = vld [vmem:[%s9268_s16 + $0x68] sm:$0x1] }
  0x8d   : > { %8259 = vmatprep.mubr.msk.bf16.mxu1 %vm809_vm3, %v13387_v2  ;;  %v2350_v12 = vrot.slane %v2348_v37, 5  ;;  %v2359_v23 = vor.u32 %v2358_v60, %v2355_v57  ;;  %v2369_v52 = vor.u32 %v2368_v21, %v10010_v38  ;;  %v13388_v55 = vcombine.low %v9829_v0, %v9848_v40  ;;  %v7551_v57 = vld [vmem:[%s9268_s16 + $0x6c] sm:$0xf] }
  0x8e   : > { %v2383_v63 = vor.u32 %v2382_v41, %v2379_v49  ;;  %v10036_v20 = vrot.slane %v2386_v54, 5  ;;  %v2392_v48 = vrot.slane %v2390_v43, 4  ;;  %v2401_v11 = vshrl.u32 %v7548_v39, 16  ;;  %v7554_v54 = vld [vmem:[%s9268_s16 + $0x78] sm:$0xf] }
  0x8f   : > { %v13389_v2 = vcombine.low %v9836_v18, %v9861_v62  ;;  %v2303_v59 = vsel %vm9314_vm4, %v9994_v34, %v9954_v4  ;;  %v2317_v0 = vsel %vm9314_vm4, %v2312_v42, %v9967_v8  ;;  %v2404_v40 = vshll.u32 %v7548_v39, 16  ;;  %v10063_v34 = vld [vmem:[%s9268_s16 + $0x70] sm:$0xf] }
  0x90   : > { %v2410_v37 = vshll.u32 %v10029_v17, 16  ;;  %v2327_v60 = vsel %vm9314_vm4, %v2322_v47, %v2326_v28  ;;  %v2341_v18 = vsel %vm9314_vm4, %v2336_v6, %v9980_v26  ;;  %v10056_v62 = vrot.slane %v2372_v22, 5 }
  0x91   : > { %8298 = vmatmul.mubr.msk.bf16.gmra.mxu0 %vm809_vm3, %v13388_v55  ;;  %v2414_v4 = vshrl.u32 %v10029_v17, 16  ;;  %v13390_v8 = vcombine.low %v13379_v32, %v13378_v31  ;;  %v2351_v39 = vsel %vm9314_vm4, %v2346_v46, %v2350_v12  ;;  %v10071_v42 = vrot.slane %v2359_v23, 4  ;;  %v8592_v46 = vld [vmem:[%s9268_s16 + $0xc] sm:$0xff]  }
  0x92   : > { %8301 = vmatprep.mubr.msk.bf16.mxu0 %vm809_vm3, %v13389_v2  ;;  %v10073_v26 = vrot.slane %v2369_v52, 4  ;;  %v2396_v28 = vshll.u32 %v10025_v3, 16  ;;  %v13391_v47 = vcombine.low %v13382_v36, %v13381_v27  ;;  %v10080_v21 = vrot.slane %v2383_v63, 4 }
  0x93   : > { %v2393_v31 = vor.u32 %v2392_v48, %v10036_v20  ;;  %v2403_v32 = vrot.slane %v2401_v11, 4  ;;  %v2406_v49 = vrot.slane %v2404_v40, 5  ;;  %v10084_v6 = vrot.slane %v2410_v37, 5  ;;  %v10101_v11 = vld [vmem:[%s9268_s16 + $0x74] sm:$0x1] }
  0x94   : > { %8260 = vmatmul.mubr.msk.bf16.gmra.mxu1 %vm809_vm3, %v13390_v8  ;;  %v2416_v22 = vrot.slane %v2414_v4, 4  ;;  %v2425_v41 = vshrl.u32 %v7551_v57, 16  ;;  %v2428_v43 = vshll.u32 %v7551_v57, 16  ;;  %v7582_v12 = vcombine.low %v2293_v29, %v2303_v59  ;;  %v10104_v29 = vld [vmem:[%s9268_s16 + $0x7c] sm:$0xf] }
  0x95   : > { %8263 = vmatprep.mubr.msk.bf16.mxu1 %vm809_vm3, %v13391_v47  ;;  %v10087_v27 = vcombine.low %v2317_v0, %v2327_v60  ;;  %v2434_v36 = vshll.u32 %v10063_v34, 16  ;;  %v2438_v23 = vshrl.u32 %v10063_v34, 16  ;;  %v10091_v52 = vcombine.low %v2341_v18, %v2351_v39  ;;  %v7557_v57 = vld [vmem:[%s9268_s16 + $0x84] sm:$0xf]  ;;  %v10116_v18 = vld [vmem:[%s9268_s16 + $0x80] sm:$0x1] }
  0x96   : > { %v2365_v55 = vsel %vm9314_vm4, %v10071_v42, %v10010_v38  ;;  %v10097_v63 = vrot.slane %v2396_v28, 5  ;;  %v2420_v48 = vshll.u32 %v10059_v51, 16  ;;  %v13392_v2 = vcombine.low %v9911_v50, %v9915_v56 }
  0x97   : > { %v2427_v59 = vrot.slane %v2425_v41, 4  ;;  %v2430_v0 = vrot.slane %v2428_v43, 5  ;;  %v10110_v40 = vrot.slane %v2434_v36, 5  ;;  %v2440_v37 = vrot.slane %v2438_v23, 4  ;;  %v8596_v36 = vld [vmem:[%s9268_s16 + $0x24] sm:$0xff]  }
  0x98   : > { %v2394_v38 = vrot.slane %v2393_v31, 4  ;;  %v2407_v60 = vor.u32 %v2406_v49, %v2403_v32  ;;  %v2449_v4 = vshrl.u32 %v7554_v54, 16  ;;  %v2452_v8 = vshll.u32 %v7554_v54, 16  ;;  %v10136_v31 = vld [vmem:[%s9268_s16 + $0x88] sm:$0xf]  ;;  %v8594_v49 = vld [vmem:[%s9268_s16 + $0x18] sm:$0xff]  }
  0x99   : > { %8302 = vmatmul.mubr.msk.bf16.gmra.mxu0 %vm809_vm3, %v13392_v2  ;;  %v2375_v50 = vsel %vm9314_vm4, %v10073_v26, %v10056_v62  ;;  %v2389_v56 = vsel %vm9314_vm4, %v10080_v21, %v10036_v20  ;;  %v2458_v39 = vshll.u32 %v10104_v29, 16  ;;  %v13393_v42 = vcombine.low %v13384_v9, %v9583_v44  ;;  %v7560_v9 = vld [vmem:[%s9268_s16 + $0x90] sm:$0xf] }
  0x9a   : > { %8349 = vmatprep.mubr.msk.bf16.mxu0 %vm809_vm3, %v9986_v15  ;;  %v2417_v15 = vor.u32 %v2416_v22, %v10084_v6  ;;  %v10132_v28 = vrot.slane %v2420_v48, 5  ;;  %v2444_v62 = vshll.u32 %v10101_v11, 16  ;;  %v2451_v26 = vrot.slane %v2449_v4, 4 }
  0x9b   : > { %v2454_v47 = vrot.slane %v2452_v8, 5  ;;  %v2431_v20 = vor.u32 %v2430_v0, %v2427_v59  ;;  %v2441_v21 = vor.u32 %v2440_v37, %v10110_v40  ;;  %v10140_v32 = vrot.slane %v2458_v39, 5 }
  0x9c   : > { %8264 = vmatmul.mubr.msk.bf16.gmra.mxu1 %vm809_vm3, %v13393_v42  ;;  %v2462_v44 = vshrl.u32 %v10104_v29, 16  ;;  %v2399_v54 = vsel %vm9314_vm4, %v2394_v38, %v10097_v63  ;;  %v10148_v22 = vrot.slane %v2407_v60, 4  ;;  %v2473_v41 = vshrl.u32 %v7557_v57, 16  ;;  %v10167_v42 = vld [vmem:[%s9268_s16 + $0x94] sm:$0xf] }
  0x9d   : > { %8311 = vmatprep.mubr.msk.bf16.mxu1 %vm809_vm3, %v8592_v46  ;;  %v2476_v43 = vshll.u32 %v7557_v57, 16  ;;  %v8602_v46 = vld [vmem:[%s13278_s1 + $0x80] sm:$0xff]   ;;  %v2418_v23 = vrot.slane %v2417_v15, 4  ;;  %v2455_v48 = vor.u32 %v2454_v47, %v2451_v26  ;;  %v2468_v59 = vshll.u32 %v10116_v18, 16  ;;  %v8600_v57 = vld [vmem:[%s13278_s1 + $0x6c] sm:$0xff]   ;;  %13394 = vst [vmem:[#allocation4_spill] sm:$0xff] %v10167_v42 }
  0x9e   : > { %v2464_v2 = vrot.slane %v2462_v44, 4  ;;  %v2446_v0 = vrot.slane %v2444_v62, 5  ;;  %v2475_v37 = vrot.slane %v2473_v41, 4  ;;  %v2482_v63 = vshll.u32 %v10136_v31, 16  ;;  %v10163_v15 = vld [vmem:[%s9268_s16 + $0x8c] sm:$0x1] }
  0x9f   : > { %v2478_v4 = vrot.slane %v2476_v43, 5  ;;  %v2432_v38 = vrot.slane %v2431_v20, 4  ;;  %v2442_v60 = vrot.slane %v2441_v21, 4  ;;  %v2486_v39 = vshrl.u32 %v10136_v31, 16  ;;  %v7563_v20 = vld [vmem:[%s9268_s16 + $0x9c] sm:$0xf] }
  0xa0   : > { %v2465_v8 = vor.u32 %v2464_v2, %v10140_v32  ;;  %v10171_v62 = vcombine.low %v2365_v55, %v2375_v50  ;;  %v2497_v26 = vshrl.u32 %v7560_v9, 16  ;;  %v2500_v47 = vshll.u32 %v7560_v9, 16  ;;  %v10190_v9 = vld [vmem:[%s9268_s16 + $0x98] sm:$0x1] }
  0xa1   : > { %8350 = vmatmul.mubr.msk.bf16.vlgmr.msra.gmra.mxu0 %vm809_vm3, %v9992_v16  ;;  %v2479_v16 = vor.u32 %v2478_v4, %v2475_v37  ;;  %v10174_v21 = vcombine.low %v2389_v56, %v2399_v54  ;;  %v2456_v44 = vrot.slane %v2455_v48, 4  ;;  %v2470_v43 = vrot.slane %v2468_v59, 5  ;;  %13395 = vst [vmem:[#allocation5_spill] sm:$0xff] %v10190_v9  ;;  %v8608_v54 = vld [vmem:[%s13278_s1 + $0x64] sm:$0xff]  }
  0xa2   : > { %8420 = vmatpush3.bf16.msra.mxu0 %v9945_v1  ;;  %8353 = vmatprep.mubr.msk.bf16.mxu0 %vm809_vm3, %v7582_v12  ;;  %v2466_v41 = vrot.slane %v2465_v8, 4  ;;  %v8609_v1 = vld [vmem:[%s13278_s1 + $0x78] sm:$0xff]   ;;  %v2413_v12 = vsel %vm9314_vm4, %v10148_v22, %v10084_v6  ;;  %v2423_v55 = vsel %vm9314_vm4, %v2418_v23, %v10132_v28  ;;  %v10187_v50 = vrot.slane %v2482_v63, 5  ;;  %v7566_v59 = vld [vmem:[%s9268_s16 + $0xa8] sm:$0xf]  ;;  %v8597_v63 = vld [vmem:[%s9268_s16 + $0x30] sm:$0xff]  }
  0xa3   : > { %8421 = vmatprep.subr.bf16.mxu0 %v8602_v46  ;;  %v2488_v56 = vrot.slane %v2486_v39, 4  ;;  %v2437_v6 = vsel %vm9314_vm4, %v2432_v38, %v10110_v40  ;;  %v2447_v28 = vsel %vm9314_vm4, %v2442_v60, %v2446_v0  ;;  %v2506_v22 = vshll.u32 %v10167_v42, 16 }
  0xa4   : > { %8312 = vmatmul.mubr.msk.bf16.vlgmr.msra.gmra.mxu1 %vm809_vm3, %v8594_v49  ;;  %v10196_v49 = vld [vmem:[%s9268_s16 + $0xa0] sm:$0xf]  ;;  %v2510_v23 = vshrl.u32 %v10167_v42, 16  ;;  %v10207_v48 = vrot.slane %v2479_v16, 4  ;;  %v2502_v2 = vrot.slane %v2500_v47, 5  ;;  %v2461_v40 = vsel %vm9314_vm4, %v2456_v44, %v10140_v32 }
  0xa5   : > { %13396 = vst [vmem:[#allocation7_spill] sm:$0xff] %v10196_v49  ;;  %8382 = vmatpush3.bf16.msra.mxu1 %v9923_v45  ;;  %8315 = vmatprep.mubr.msk.bf16.mxu1 %vm809_vm3, %v8596_v36  ;;  %v2492_v45 = vshll.u32 %v10163_v15, 16  ;;  %v2499_v36 = vrot.slane %v2497_v26, 4  ;;  %v2471_v0 = vsel %vm9314_vm4, %v2466_v41, %v2470_v43  ;;  %v2521_v37 = vshrl.u32 %v7563_v20, 16  ;;  %v8598_v16 = vld [vmem:[%s9268_s16 + $0x3c] sm:$0xff]  }
  0xa6   : > { %8383 = vmatprep.subr.bf16.mxu1 %v8600_v57  ;;  %8422 = vmatpush3.bf16.msra.mxu0 %v8602_v46  ;;  %v2524_v4 = vshll.u32 %v7563_v20, 16  ;;  %v10217_v46 = vld [vmem:[%s9268_s16 + $0xac] sm:$0xf]  ;;  %v10220_v38 = vcombine.low %v2413_v12, %v2423_v55  ;;  %v10222_v60 = vcombine.low %v2437_v6, %v2447_v28  ;;  %v2530_v8 = vshll.u32 %v10196_v49, 16  ;;  %v10239_v41 = vld [vmem:[%s9268_s16 + $0xa4] sm:$0x1] }
  0xa7   : > { %8423 = vmatprep.subr.bf16.mxu0 %v8609_v1  ;;  %13397 = vst [vmem:[#allocation6_spill] sm:$0xff] %v10217_v46  ;;  %v2534_v39 = vshrl.u32 %v10196_v49, 16  ;;  %v10229_v32 = vld [vmem:[%s13278_s1 + $0xb0] ss:$0 sps:$4 sm:$0x33]   ;;  %v2489_v26 = vor.u32 %v2488_v56, %v10187_v50  ;;  %v10235_v47 = vrot.slane %v2506_v22, 5  ;;  %v10243_v43 = vcombine.low %v2461_v40, %v2471_v0 }
  0xa8   : > { %13398 = vst [vmem:[#allocation8_spill] sm:$0xff] %v10229_v32  ;;  %v2512_v20 = vrot.slane %v2510_v23, 4  ;;  %v2516_v44 = vshll.u32 %v10190_v9, 16  ;;  %13399 = vst [vmem:[#allocation10_spill] sm:$0xff] %v10239_v41  ;;  %v2503_v12 = vor.u32 %v2502_v2, %v2499_v36  ;;  %v7569_v55 = vld [vmem:[%s9268_s16 + $0xb4] sm:$0xf] }
  0xa9   : > { %8354 = vmatmul.mubr.msk.bf16.gmra.mxu0 %vm809_vm3, %v10087_v27  ;;  %8384 = vmatpush3.bf16.msra.mxu1 %v8600_v57  ;;  %v10249_v57 = vrot.slane %v2492_v45, 5  ;;  %v10255_v56 = vld [vmem:[%s13278_s1 + $0x9c] ss:$0 sps:$4 sm:$0x33]   ;;  %v2523_v6 = vrot.slane %v2521_v37, 4  ;;  %v10257_v28 = vrot.slane %v2530_v8, 5 }
  0xaa   : > { %8357 = vmatprep.mubr.msk.bf16.mxu0 %vm809_vm3, %v10091_v52  ;;  %8385 = vmatprep.subr.bf16.mxu1 %v8608_v54  ;;  %13400 = vst [vmem:[#allocation9_spill] sm:$0xff] %v10255_v56  ;;  %v2526_v52 = vrot.slane %v2524_v4, 5  ;;  %v10260_v22 = vld [vmem:[%s9268_s16 + $0xb0] sm:$0x1]  ;;  %v2545_v23 = vshrl.u32 %v7566_v59, 16  ;;  %v2536_v45 = vrot.slane %v2534_v39, 4  ;;  %v2513_v37 = vor.u32 %v2512_v20, %v10235_v47 }
  0xab   : > { %8424 = vmatpush3.bf16.msra.mxu0 %v8609_v1  ;;  %13401 = vst [vmem:[#allocation11_spill] sm:$0xff] %v10260_v22  ;;  %v10263_v40 = vld [vmem:[%s9268_s16 + $0xb8] sm:$0xf]  ;;  %v2548_v36 = vshll.u32 %v7566_v59, 16  ;;  %v2554_v2 = vshll.u32 %v10217_v46, 16  ;;  %v2558_v0 = vshrl.u32 %v10217_v46, 16 }
  0xac   : > { %13402 = vst [vmem:[#allocation12_spill] sm:$0xff] %v10263_v40  ;;  %8316 = vmatmul.mubr.msk.bf16.gmra.mxu1 %vm809_vm3, %v8597_v63  ;;  %8548 = vmatprep.subr.msk.bf16.mxu0 %vm858_vm0, %v10229_v32  ;;  %v10271_v1 = vrot.slane %v2489_v26, 4  ;;  %v10274_v4 = vrot.slane %v2516_v44, 5  ;;  %v2547_v63 = vrot.slane %v2545_v23, 4  ;;  %v2540_v59 = vshll.u32 %v10239_v41, 16 }
  0xad   : > { %8319 = vmatprep.mubr.msk.bf16.mxu1 %vm809_vm3, %v8598_v16  ;;  %8386 = vmatpush3.bf16.msra.mxu1 %v8608_v54  ;;  %v2550_v8 = vrot.slane %v2548_v36, 5  ;;  %v10277_v39 = vrot.slane %v2554_v2, 5  ;;  %v2560_v27 = vrot.slane %v2558_v0, 4  ;;  %v8599_v16 = vld [vmem:[%s9268_s16 + $0x48] sm:$0xff]   ;;  %v10282_v26 = vrot.slane %v2503_v12, 4 }
  0xae   : > { %8547 = vmatprep.subr.msk.bf16.mxu1 %vm858_vm0, %v10255_v56  ;;  %v2527_v20 = vor.u32 %v2526_v52, %v2523_v6  ;;  %v2569_v44 = vshrl.u32 %v7569_v55, 16  ;;  %v2572_v32 = vshll.u32 %v7569_v55, 16  ;;  %v2537_v54 = vor.u32 %v2536_v45, %v10257_v28  ;;  %v10287_v36 = vld [vmem:[%s9268_s16 + $0xbc] sm:$0x1]  ;;  %v7572_v0 = vld [vmem:[%s9268_s16 + $0xc0] sm:$0xf] }
  0xaf   : > { %v2551_v23 = vor.u32 %v2550_v8, %v2547_v63  ;;  %v2564_v46 = vshll.u32 %v10260_v22, 16  ;;  %13403 = vst [vmem:[#allocation2_spill] sm:$0xff] %v10287_v36  ;;  %v2578_v2 = vshll.u32 %v10263_v40, 16  ;;  %v8601_v56 = vld [vmem:[%s9268_s16 + $0x54] sm:$0xff]   ;;  %v2561_v12 = vor.u32 %v2560_v27, %v10277_v39  ;;  %v10297_v52 = vld [vmem:[%s9268_s16 + $0xc4] sm:$0xf] }
  0xb0   : > { %v2571_v41 = vrot.slane %v2569_v44, 4  ;;  %v2574_v6 = vrot.slane %v2572_v32, 5  ;;  %v2582_v55 = vshrl.u32 %v10263_v40, 16  ;;  %v2495_v45 = vsel %vm9314_vm4, %v10271_v1, %v10249_v57  ;;  %v10308_v9 = vld [vmem:[%s9268_s16 + $0xc8] sm:$0x1] }
  0xb1   : > { %8358 = vmatmul.mubr.msk.bf16.gmra.mxu0 %vm809_vm3, %v10171_v62  ;;  %v2514_v63 = vrot.slane %v2513_v37, 4  ;;  %v2542_v62 = vrot.slane %v2540_v59, 5  ;;  %v2580_v8 = vrot.slane %v2578_v2, 5  ;;  %v2588_v44 = vshll.u32 %v10287_v36, 16  ;;  %v8603_v36 = vld [vmem:[%s9268_s16 + $0x60] sm:$0xff]  }
  0xb2   : > { %8361 = vmatprep.mubr.msk.bf16.mxu0 %vm809_vm3, %v10174_v21  ;;  %v2575_v22 = vor.u32 %v2574_v6, %v2571_v41  ;;  %v2584_v27 = vrot.slane %v2582_v55, 4  ;;  %v2593_v32 = vshrl.u32 %v7572_v0, 16  ;;  %v2528_v40 = vrot.slane %v2527_v20, 4 }
  0xb3   : > { %v2538_v49 = vrot.slane %v2537_v54, 4  ;;  %v2596_v21 = vshll.u32 %v7572_v0, 16  ;;  %v2602_v42 = vshll.u32 %v10297_v52, 16  ;;  %v2552_v57 = vrot.slane %v2551_v23, 4 }
  0xb4   : > { %8320 = vmatmul.mubr.msk.bf16.gmra.mxu1 %vm809_vm3, %v8599_v16  ;;  %v2562_v1 = vrot.slane %v2561_v12, 4  ;;  %v2566_v37 = vrot.slane %v2564_v46, 5  ;;  %v2585_v41 = vor.u32 %v2584_v27, %v2580_v8  ;;  %v2595_v59 = vrot.slane %v2593_v32, 4 }
  0xb5   : > { %8323 = vmatprep.mubr.msk.bf16.mxu1 %vm809_vm3, %v8601_v56  ;;  %v2598_v2 = vrot.slane %v2596_v21, 5  ;;  %v10312_v6 = vrot.slane %v2602_v42, 5  ;;  %v2606_v16 = vshrl.u32 %v10297_v52, 16  ;;  %v2576_v20 = vrot.slane %v2575_v22, 4  ;;  %v8604_v22 = vld [vmem:[%s9268_s16 + $0x6c] sm:$0xff]  }
  0xb6   : > { %v2586_v54 = vrot.slane %v2585_v41, 4  ;;  %v2590_v55 = vrot.slane %v2588_v44, 5  ;;  %v2612_v0 = vshll.u32 %v10308_v9, 16  ;;  %v2509_v46 = vsel %vm9314_vm4, %v10282_v26, %v10235_v47  ;;  %v10338_v26 = vld [vmem:[%s9268_s16 + $0xc] sm:$0xe] }
  0xb7   : > { %v2519_v42 = vsel %vm9314_vm4, %v2514_v63, %v10274_v4  ;;  %v2599_v56 = vor.u32 %v2598_v2, %v2595_v59  ;;  %v2608_v23 = vrot.slane %v2606_v16, 4  ;;  %v2533_v12 = vsel %vm9314_vm4, %v2528_v40, %v10257_v28  ;;  %v7617_v63 = vld [vmem:[%s9268_s16 + $0x24] sm:$0xe]  ;;  %v7619_v41 = vld [vmem:[%s9268_s16 + $0x3c] sm:$0xe] }
  0xb8   : > { %v2543_v27 = vsel %vm9314_vm4, %v2538_v49, %v2542_v62  ;;  %v2557_v47 = vsel %vm9314_vm4, %v2552_v57, %v10277_v39  ;;  %v2567_v4 = vsel %vm9314_vm4, %v2562_v1, %v2566_v37  ;;  %v2995_v39 = vrot.slane %v9821_v61, 5  ;;  %v7618_v57 = vld [vmem:[%s9268_s16 + $0x30] sm:$0xe] }
  0xb9   : > { %8362 = vmatmul.mubr.msk.bf16.gmra.mxu0 %vm809_vm3, %v10220_v38  ;;  %v13404_v38 = vsel %vm9314_vm4, %v10207_v48, %v10187_v50  ;;  %v10347_v49 = vrot.slane %v2599_v56, 4  ;;  %v2609_v40 = vor.u32 %v2608_v23, %v10312_v6  ;;  %v10352_v62 = vcombine.low %v2509_v46, %v2519_v42  ;;  %v8605_v42 = vld [vmem:[%s9268_s16 + $0x78] sm:$0xff]  }
  0xba   : > { %8365 = vmatprep.mubr.msk.bf16.mxu0 %vm809_vm3, %v10222_v60  ;;  %v7590_v28 = vcombine.low %v13404_v38, %v2495_v45  ;;  %v2581_v44 = vsel %vm9314_vm4, %v2576_v20, %v2580_v8  ;;  %v2591_v60 = vsel %vm9314_vm4, %v2586_v54, %v2590_v55  ;;  %v10358_v32 = vrot.slane %v2612_v0, 5  ;;  %v7620_v54 = vld [vmem:[%s9268_s16 + $0x48] sm:$0xe] }
  0xbb   : > { %v10361_v50 = vcombine.low %v2533_v12, %v2543_v27  ;;  %v10363_v48 = vcombine.low %v2557_v47, %v2567_v4  ;;  %v10365_v45 = vrot.slane %v2609_v40, 4  ;;  %v7631_v21 = vrot.slane %v10338_v26, 9  ;;  %v8606_v12 = vld [vmem:[%s9268_s16 + $0x84] sm:$0xff]  }
  0xbc   : > { %8324 = vmatmul.mubr.msk.bf16.gmra.mxu1 %vm809_vm3, %v8603_v36  ;;  %v2998_v8 = vrot.slane %v9871_v25, 5  ;;  %v3002_v1 = vrot.slane %v9840_v24, 5  ;;  %v7633_v37 = vrot.slane %v7617_v63, 9  ;;  %v3009_v36 = vrot.slane %v9892_v35, 5  ;;  %v8613_v25 = vld [vmem:[%s9268_s16 + $0xc0] sm:$0xff]  }
  0xbd   : > { %8327 = vmatprep.mubr.msk.bf16.mxu1 %vm809_vm3, %v8604_v22  ;;  %v10374_v59 = vcombine.low %v2581_v44, %v2591_v60  ;;  %v2605_v2 = vsel %vm9314_vm4, %v10347_v49, %v10312_v6  ;;  %v10382_v16 = vrot.slane %v2995_v39, 4  ;;  %v3012_v20 = vrot.slane %v9903_v30, 5  ;;  %v8614_v6 = vld [vmem:[%s9268_s16 + $0x18] sm:$0xff]  }
  0xbe   : > { %v2615_v35 = vsel %vm9314_vm4, %v10365_v45, %v10358_v32  ;;  %v10392_v55 = vsel %vm9606_vm7, %v7633_v37, %v3009_v36  ;;  %v3011_v0 = vrot.slane %v3009_v36, 4  ;;  %v7634_v46 = vrot.slane %v7618_v57, 9  ;;  %v9152_v45 = vld [vmem:[%s9268_s16 + $0x20] sm:$0x1] }
  0xbf   : > { %v3016_v56 = vrot.slane %v9926_v13, 5  ;;  %v3019_v23 = vrot.slane %v9948_v7, 5  ;;  %v7635_v30 = vrot.slane %v7619_v41, 9  ;;  %v3023_v22 = vrot.slane %v9951_v14, 5  ;;  %v7621_v13 = vld [vmem:[%s9268_s16 + $0x54] sm:$0xe] }
  0xc0   : > { %v10403_v27 = vsel %vm9606_vm7, %v3011_v0, %v3012_v20  ;;  %v3026_v47 = vrot.slane %v9970_v53, 5  ;;  %v7636_v4 = vrot.slane %v7620_v54, 9  ;;  %v3030_v38 = vrot.slane %v9964_v19, 5  ;;  %v7622_v53 = vld [vmem:[%s9268_s16 + $0x60] sm:$0xe] }
  0xc1   : > { %8366 = vmatmul.mubr.msk.bf16.gmra.mxu0 %vm809_vm3, %v10243_v43  ;;  %v7654_v7 = vcombine.low %v10392_v55, %v10403_v27  ;;  %v10413_v14 = vsel %vm9606_vm7, %v7634_v46, %v3016_v56  ;;  %v3018_v43 = vrot.slane %v3016_v56, 4  ;;  %v10417_v40 = vsel %vm9606_vm7, %v7635_v30, %v3023_v22  ;;  %v7623_v41 = vld [vmem:[%s9268_s16 + $0x6c] sm:$0xe]  ;;  %v7765_v27 = vld [vmem:[%s9268_s16 + $0x30] sm:$0xf] }
  0xc2   : > { %8369 = vmatprep.mubr.msk.bf16.mxu0 %vm809_vm3, %v7590_v28  ;;  %v3025_v63 = vrot.slane %v3023_v22, 4  ;;  %v10422_v19 = vsel %vm9606_vm7, %v7636_v4, %v3030_v38  ;;  %v3032_v28 = vrot.slane %v3030_v38, 4  ;;  %v3033_v44 = vrot.slane %v9998_v10, 5 }
  0xc3   : > { %v10428_v60 = vsel %vm9606_vm7, %v3018_v43, %v3019_v23  ;;  %v7637_v57 = vrot.slane %v7621_v13, 9  ;;  %v3037_v37 = vrot.slane %v10004_v5, 5  ;;  %v3040_v36 = vrot.slane %v10025_v3, 5  ;;  %v7624_v5 = vld [vmem:[%s9268_s16 + $0x78] sm:$0xe] }
  0xc4   : > { %8328 = vmatmul.mubr.msk.bf16.gmra.mxu1 %vm809_vm3, %v8605_v42  ;;  %v7655_v20 = vcombine.low %v10413_v14, %v10428_v60  ;;  %v10438_v10 = vsel %vm9606_vm7, %v3025_v63, %v3026_v47  ;;  %v10442_v54 = vsel %vm9606_vm7, %v3032_v28, %v3033_v44  ;;  %v7638_v0 = vrot.slane %v7622_v53, 9  ;;  %v8607_v47 = vld [vmem:[%s9268_s16 + $0x90] sm:$0xff]   ;;  %v7625_v53 = vld [vmem:[%s9268_s16 + $0x84] sm:$0xe] }
  0xc5   : > { %8331 = vmatprep.mubr.msk.bf16.mxu1 %vm809_vm3, %v8606_v12  ;;  %v7656_v3 = vcombine.low %v10417_v40, %v10438_v10  ;;  %v7657_v46 = vcombine.low %v10422_v19, %v10442_v54  ;;  %v10451_v42 = vsel %vm9606_vm7, %v7637_v57, %v3037_v37  ;;  %v3039_v56 = vrot.slane %v3037_v37, 4  ;;  %v7626_v28 = vld [vmem:[%s9268_s16 + $0x90] sm:$0xe] }
  0xc6   : > { %v3044_v23 = vrot.slane %v10029_v17, 5  ;;  %v3047_v30 = vrot.slane %v10059_v51, 5  ;;  %v7639_v22 = vrot.slane %v7623_v41, 9  ;;  %v3051_v12 = vrot.slane %v10063_v34, 5  ;;  %v8610_v17 = vld [vmem:[%s9268_s16 + $0x9c] sm:$0xff]  }
  0xc7   : > { %v10459_v4 = vsel %vm9606_vm7, %v3039_v56, %v3040_v36  ;;  %v3054_v38 = vrot.slane %v10101_v11, 5  ;;  %v7640_v13 = vrot.slane %v7624_v5, 9  ;;  %v3058_v43 = vrot.slane %v10104_v29, 5  ;;  %v7627_v5 = vld [vmem:[%s9268_s16 + $0x9c] sm:$0xe]  ;;  %v13412_v51 = vld [vmem:[#allocation2_spill] sm:$0xff] }
  0xc8   : > { %v10471_v34 = vsel %vm9606_vm7, %v7638_v0, %v3044_v23  ;;  %v3046_v63 = vrot.slane %v3044_v23, 4  ;;  %v10475_v11 = vsel %vm9606_vm7, %v7639_v22, %v3051_v12  ;;  %v3053_v29 = vrot.slane %v3051_v12, 4 }
  0xc9   : > { %8370 = vmatmul.mubr.msk.bf16.gmra.mxu0 %vm809_vm3, %v10352_v62  ;;  %v10482_v62 = vsel %vm9606_vm7, %v7640_v13, %v3058_v43  ;;  %v3060_v44 = vrot.slane %v3058_v43, 4  ;;  %v3061_v57 = vrot.slane %v10116_v18, 5  ;;  %v7641_v36 = vrot.slane %v7625_v53, 9  ;;  %v13406_v13 = vld [vmem:[#allocation5_spill] sm:$0xff] }
  0xca   : > { %8373 = vmatprep.mubr.msk.bf16.mxu0 %vm809_vm3, %v10361_v50  ;;  %v10487_v37 = vsel %vm9606_vm7, %v3046_v63, %v3047_v30  ;;  %v3065_v41 = vrot.slane %v10136_v31, 5  ;;  %v3068_v0 = vrot.slane %v10163_v15, 5  ;;  %v10497_v56 = vsel %vm9606_vm7, %v3053_v29, %v3054_v38  ;;  %v7628_v31 = vld [vmem:[%s9268_s16 + $0xa8] sm:$0xe]  ;;  %v13408_v29 = vld [vmem:[#allocation10_spill] sm:$0xff] }
  0xcb   : > { %v10501_v18 = vsel %vm9606_vm7, %v3060_v44, %v3061_v57  ;;  %v7642_v23 = vrot.slane %v7626_v28, 9  ;;  %v3075_v43 = vrot.slane %v13406_v13, 5  ;;  %v7643_v53 = vrot.slane %v7627_v5, 9  ;;  %v13407_v63 = vld [vmem:[#allocation7_spill] sm:$0xff]  ;;  %v13409_v30 = vld [vmem:[#allocation6_spill] sm:$0xff] }
  0xcc   : > { %8332 = vmatmul.mubr.msk.bf16.gmra.mxu1 %vm809_vm3, %v8607_v47  ;;  %v10511_v22 = vsel %vm9606_vm7, %v7641_v36, %v3065_v41  ;;  %v3067_v12 = vrot.slane %v3065_v41, 4  ;;  %v13405_v47 = vld [vmem:[#allocation4_spill] sm:$0xff]  ;;  %v3082_v44 = vrot.slane %v13408_v29, 5  ;;  %v7644_v57 = vrot.slane %v7628_v31, 9  ;;  %v8611_v50 = vld [vmem:[%s9268_s16 + $0xa8] sm:$0xff]  }
  0xcd   : > { %8335 = vmatprep.mubr.msk.bf16.mxu1 %vm809_vm3, %v8610_v17  ;;  %v3072_v38 = vrot.slane %v13405_v47, 5  ;;  %v3079_v17 = vrot.slane %v13407_v63, 5  ;;  %v3086_v36 = vrot.slane %v13409_v30, 5  ;;  %v7629_v15 = vld [vmem:[%s9268_s16 + $0xb4] sm:$0xe]  ;;  %v13410_v29 = vld [vmem:[#allocation11_spill] sm:$0xff]  ;;  %v2999_v32 = vsel %vm9606_vm7, %v10382_v16, %v2998_v8 }
  0xce   : > { %v10518_v28 = vsel %vm9606_vm7, %v3067_v12, %v3068_v0  ;;  %v7630_v0 = vld [vmem:[%s9268_s16 + $0xc0] sm:$0xe]  ;;  %v8612_v31 = vld [vmem:[%s9268_s16 + $0xb4] sm:$0xff]   ;;  %v3089_v41 = vrot.slane %v13410_v29, 5  ;;  %v3896_v16 = vshll.u32 %v7765_v27, 16 }
  0xcf   : > { %v10528_v47 = vsel %vm9606_vm7, %v7642_v23, %v3072_v38  ;;  %v3074_v5 = vrot.slane %v3072_v38, 4  ;;  %v10532_v13 = vsel %vm9606_vm7, %v7643_v53, %v3079_v17  ;;  %v3081_v30 = vrot.slane %v3079_v17, 4  ;;  %v13411_v53 = vld [vmem:[#allocation12_spill] sm:$0xff] }
  0xd0   : > { %v10540_v12 = vsel %vm9606_vm7, %v7644_v57, %v3086_v36  ;;  %v3088_v63 = vrot.slane %v3086_v36, 4  ;;  %v7645_v38 = vrot.slane %v7629_v15, 9  ;;  %v3096_v17 = vrot.slane %v13412_v51, 5 }
  0xd1   : > { %8374 = vmatmul.mubr.msk.bf16.gmra.mxu0 %vm809_vm3, %v10363_v48  ;;  %v10547_v23 = vsel %vm9606_vm7, %v3074_v5, %v3075_v43  ;;  %v3093_v48 = vrot.slane %v13411_v53, 5  ;;  %v10555_v36 = vsel %vm9606_vm7, %v3081_v30, %v3082_v44  ;;  %v7646_v29 = vrot.slane %v7630_v0, 9  ;;  %v10620_v30 = vld [vmem:[%s9268_s16 + $0x1c] sm:$0xf]  ;;  %v8616_v53 = vld [vmem:[%s9268_s16 + $0x24] sm:$0xff]  }
  0xd2   : > { %8377 = vmatprep.mubr.msk.bf16.mxu0 %vm809_vm3, %v10374_v59  ;;  %v10559_v59 = vsel %vm9606_vm7, %v3088_v63, %v3089_v41  ;;  %v7616_v41 = vld [vmem:[%s9268_s16 + $0x18] sm:$0xe]  ;;  %v3100_v5 = vrot.slane %v10297_v52, 5  ;;  %v3103_v0 = vrot.slane %v10308_v9, 5 }
  0xd3   : > { %v10568_v43 = vsel %vm9606_vm7, %v7645_v38, %v3093_v48  ;;  %v3095_v44 = vrot.slane %v3093_v48, 4  ;;  %v7632_v49 = vrot.slane %v7616_v41, 9  ;;  %v7762_v48 = vld [vmem:[%s9268_s16 + $0x24] sm:$0xf]  ;;  %v3854_v41 = vshll.u32 %v10620_v30, 16 }
  0xd4   : > { %8336 = vmatmul.mubr.msk.bf16.gmra.mxu1 %vm809_vm3, %v8611_v50  ;;  %v7595_v50 = vcombine.low %v2605_v2, %v2615_v35  ;;  %v10604_v9 = vsel %vm9606_vm7, %v7646_v29, %v3100_v5  ;;  %v3102_v26 = vrot.slane %v3100_v5, 4  ;;  %v7759_v35 = vld [vmem:[%s9268_s16 + $0x18] sm:$0xf]  ;;  %v8618_v29 = vld [vmem:[%s9268_s16 + $0x30] sm:$0xff]   ;;  %v3858_v5 = vshrl.u32 %v10620_v30, 16 }
  0xd5   : > { %8339 = vmatprep.mubr.msk.bf16.mxu1 %vm809_vm3, %v8612_v31  ;;  %v2996_v31 = vsel %vm9606_vm7, %v7631_v21, %v2995_v39  ;;  %v10598_v52 = vsel %vm9606_vm7, %v3095_v44, %v3096_v17  ;;  %v3004_v39 = vrot.slane %v3002_v1, 4  ;;  %v3005_v21 = vrot.slane %v9152_v45, 5  ;;  %v10633_v17 = vld [vmem:[%s9268_s16 + $0x28] sm:$0xf]  ;;  %v8622_v45 = vld [vmem:[%s13278_s1 + $0x94] sm:$0xff]  }
  0xd6   : > { %v7652_v8 = vcombine.low %v2996_v31, %v2999_v32  ;;  %v10613_v2 = vsel %vm9606_vm7, %v3102_v26, %v3103_v0  ;;  %v3003_v63 = vsel %vm9606_vm7, %v7632_v49, %v3002_v1  ;;  %v3845_v44 = vshrl.u32 %v7759_v35, 16  ;;  %v13414_v0 = vld [vmem:[#allocation8_spill] sm:$0xff]  ;;  %v8624_v31 = vld [vmem:[%s13278_s1 + $0xa8] sm:$0xff]   ;;  %v13415_v49 = vld [vmem:[#allocation9_spill] sm:$0xff] }
  0xd7   : > { %13413 = vst [vmem:[#allocation3_spill] sm:$0xff] %v10613_v2  ;;  %v3006_v38 = vsel %vm9606_vm7, %v3004_v39, %v3005_v21  ;;  %v4835_v1 = vsel %vm858_vm0, %v13414_v0, 0  ;;  %v3869_v32 = vshrl.u32 %v7762_v48, 16  ;;  %v3878_v26 = vshll.u32 %v10633_v17, 16 }
  0xd8   : > { %v7653_v24 = vcombine.low %v3003_v63, %v3006_v38  ;;  %v4346_v39 = vsel %vm858_vm0, %v13415_v49, 0  ;;  %v3847_v21 = vrot.slane %v3845_v44, 4  ;;  %v3860_v63 = vrot.slane %v3858_v5, 4  ;;  %v8631_v38 = vld [vmem:[%s13278_s1 + $0xa0] sm:$0xff]  }
  0xd9   : > { %8378 = vmatmul.mubr.msk.bf16.gmra.mxu0 %vm809_vm3, %v7595_v50  ;;  %v3848_v50 = vshll.u32 %v7759_v35, 16  ;;  %v10652_v35 = vrot.slane %v3854_v41, 5  ;;  %v10659_v0 = vrot.slane %v3878_v26, 5  ;;  %v7847_v41 = vld [vmem:[%s9268_s16 + $0x18] sm:$0xe]  ;;  %v4607_v5 = vrot.slane %v10620_v30, 5 }
  0xda   : > { %8425 = vmatprep.mubr.msk.bf16.mxu0 %vm809_vm3, %v8614_v6  ;;  %v3872_v6 = vshll.u32 %v7762_v48, 16  ;;  %v3871_v48 = vrot.slane %v3869_v32, 4  ;;  %v8630_v32 = vld [vmem:[%s13278_s1 + $0x8c] sm:$0xff]   ;;  %v4614_v61 = vrot.slane %v10633_v17, 5 }
  0xdb   : > { %v3861_v26 = vor.u32 %v3860_v63, %v10652_v35  ;;  %v3893_v63 = vshrl.u32 %v7765_v27, 16  ;;  %v3898_v27 = vrot.slane %v3896_v16, 5 }
  0xdc   : > { %8340 = vmatmul.mubr.msk.bf16.gmra.mxu1 %vm809_vm3, %v8613_v25  ;;  %v3882_v25 = vshrl.u32 %v10633_v17, 16 }
  0xdd   : > { %8387 = vmatprep.mubr.msk.bf16.mxu1 %vm809_vm3, %v7652_v8  ;;  %v3850_v8 = vrot.slane %v3848_v50, 5  ;;  %v8619_v50 = vld [vmem:[%s9268_s16 + $0x3c] sm:$0xff]  }
  0xde   : > { %v3884_v44 = vrot.slane %v3882_v25, 4 }
  0xe0   : > { %v3885_v30 = vor.u32 %v3884_v44, %v10659_v0 }
  0xe1   : > { %8426 = vmatmul.mubr.msk.bf16.vlgmr.msra.gmra.mxu0 %vm809_vm3, %v8616_v53  ;;  %v7761_v53 = vld [vmem:[%s9268_s16 + $0x20] sm:$0x1] }
  0xe2   : > { %8496 = vmatpush3.bf16.msra.mxu0 %v4835_v1  ;;  %8429 = vmatprep.mubr.msk.bf16.mxu0 %vm809_vm3, %v8618_v29  ;;  %v3874_v29 = vrot.slane %v3872_v6, 5  ;;  %v10669_v1 = vld [vmem:[%s9268_s16 + $0x2c] sm:$0x1]  ;;  %v3851_v6 = vor.u32 %v3850_v8, %v3847_v21  ;;  %v3864_v55 = vshll.u32 %v7761_v53, 16  ;;  %v4609_v21 = vrot.slane %v4607_v5, 4 }
  0xe3   : > { %8497 = vmatprep.subr.bf16.mxu0 %v8624_v31  ;;  %v3888_v49 = vshll.u32 %v10669_v1, 16  ;;  %v4610_v8 = vrot.slane %v7761_v53, 5 }
  0xe4   : > { %8388 = vmatmul.mubr.msk.bf16.vlgmr.msra.gmra.mxu1 %vm809_vm3, %v7653_v24  ;;  %v8620_v24 = vld [vmem:[%s9268_s16 + $0x48] sm:$0xff]   ;;  %v3875_v25 = vor.u32 %v3874_v29, %v3871_v48  ;;  %v3852_v48 = vrot.slane %v3851_v6, 4  ;;  %v3862_v29 = vrot.slane %v3861_v26, 4  ;;  %v3866_v44 = vrot.slane %v3864_v55, 5  ;;  %v8621_v26 = vld [vmem:[%s9268_s16 + $0x54] sm:$0xff]  }
  0xe5   : > { %8458 = vmatpush3.bf16.msra.mxu1 %v4346_v39  ;;  %8391 = vmatprep.mubr.msk.bf16.mxu1 %vm809_vm3, %v7654_v7  ;;  %v7863_v7 = vrot.slane %v7847_v41, 9  ;;  %v10680_v39 = vld [vmem:[%s9268_s16 + $0x34] sm:$0xf]  ;;  %v7848_v41 = vld [vmem:[%s9268_s16 + $0x24] sm:$0xe]  ;;  %v3886_v6 = vrot.slane %v3885_v30, 4  ;;  %v10709_v60 = vsel %vm9606_vm7, %v4609_v21, %v4610_v8 }
  0xe6   : > { %8459 = vmatprep.subr.bf16.mxu1 %v8622_v45  ;;  %8498 = vmatpush3.bf16.msra.mxu0 %v8624_v31  ;;  %v10683_v31 = vpop.f32.mrf.mxu0  ;;  %v3890_v17 = vrot.slane %v3888_v49, 5  ;;  %v3895_v55 = vrot.slane %v3893_v63, 4  ;;  %v3857_v40 = vsel %vm9314_vm4, %v3852_v48, %v10652_v35  ;;  %v3867_v10 = vsel %vm9314_vm4, %v3862_v29, %v3866_v44  ;;  %v10725_v21 = vld [vmem:[%s9268_s16 + $0x40] sm:$0xf]  ;;  %v7849_v48 = vld [vmem:[%s9268_s16 + $0x30] sm:$0xe] }
  0xe7   : > { %8499 = vmatprep.subr.bf16.mxu0 %v8631_v38  ;;  %13416 = vst [vmem:[#allocation4_spill] sm:$0xff] %v10683_v31  ;;  %v10741_v44 = vcombine.low %v3857_v40, %v3867_v10  ;;  %v10753_v40 = vld [vmem:[%s9268_s16 + $0x4c] sm:$0xf]  ;;  %v10862_v31 = vld [vmem:[%s9268_s16 + $0x64] sm:$0xf] }
  0xe8   : > { %v10705_v14 = vpop.f32.mrf.mxu0  ;;  %v3891_v63 = vsel %vm9314_vm4, %v3886_v6, %v3890_v17  ;;  %v3926_v17 = vshll.u32 %v10725_v21, 16  ;;  %v8625_v10 = vld [vmem:[%s9268_s16 + $0x6c] sm:$0xff]  }
  0xe9   : > { %8430 = vmatmul.mubr.msk.bf16.gmra.mxu0 %vm809_vm3, %v8619_v50  ;;  %8460 = vmatpush3.bf16.msra.mxu1 %v8622_v45  ;;  %v3902_v45 = vshll.u32 %v10680_v39, 16  ;;  %v3906_v50 = vshrl.u32 %v10680_v39, 16  ;;  %13418 = vst [vmem:[#allocation7_spill] sm:$0xff] %v10705_v14  ;;  %13421 = vst [vmem:[#allocation11_spill] sm:$0xff] %v10741_v44  ;;  %v7777_v14 = vld [vmem:[%s9268_s16 + $0x60] sm:$0xf] }
  0xea   : > { %8433 = vmatprep.mubr.msk.bf16.mxu0 %vm809_vm3, %v8620_v24  ;;  %8461 = vmatprep.subr.bf16.mxu1 %v8630_v32  ;;  %v10694_v53 = vpop.f32.mrf.mxu1  ;;  %v10698_v24 = vsel %vm9606_vm7, %v7863_v7, %v4607_v5  ;;  %v10712_v5 = vld [vmem:[%s9268_s16 + $0x38] sm:$0x1]  ;;  %v8623_v7 = vld [vmem:[%s9268_s16 + $0x60] sm:$0xff]   ;;  %v10739_v29 = vpop.f32.mrf.mxu0  ;;  %v10790_v15 = vrot.slane %v3926_v17, 5 }
  0xeb   : > { %8500 = vmatpush3.bf16.msra.mxu0 %v8631_v38  ;;  %13417 = vst [vmem:[#allocation5_spill] sm:$0xff] %v10694_v53  ;;  %v3876_v38 = vrot.slane %v3875_v25, 4  ;;  %v4617_v25 = vrot.slane %v10669_v1, 5  ;;  %v10722_v30 = vrot.slane %v3902_v45, 5  ;;  %v3908_v49 = vrot.slane %v3906_v50, 4  ;;  %13420 = vst [vmem:[#allocation6_spill] sm:$0xff] %v10739_v29 }
  0xec   : > { %8392 = vmatmul.mubr.msk.bf16.gmra.mxu1 %vm809_vm3, %v7655_v20  ;;  %v7864_v20 = vrot.slane %v7848_v41, 9  ;;  %v10727_v8 = vpop.f32.mrf.mxu1  ;;  %v3912_v1 = vshll.u32 %v10712_v5, 16  ;;  %v4621_v45 = vrot.slane %v10680_v39, 5  ;;  %v7771_v50 = vld [vmem:[%s9268_s16 + $0x48] sm:$0xf] }
  0xed   : > { %8395 = vmatprep.mubr.msk.bf16.mxu1 %vm809_vm3, %v7656_v3  ;;  %8462 = vmatpush3.bf16.msra.mxu1 %v8630_v32  ;;  %v7768_v3 = vld [vmem:[%s9268_s16 + $0x3c] sm:$0xf]  ;;  %v4616_v32 = vrot.slane %v4614_v61, 4  ;;  %13419 = vst [vmem:[#allocation10_spill] sm:$0xff] %v10727_v8  ;;  %v3881_v35 = vsel %vm9314_vm4, %v3876_v38, %v10659_v0  ;;  %v3899_v0 = vor.u32 %v3898_v27, %v3895_v55  ;;  %v7774_v55 = vld [vmem:[%s9268_s16 + $0x54] sm:$0xf] }
  0xee   : > { %v10745_v41 = vsel %vm9606_vm7, %v7864_v20, %v4614_v61  ;;  %v3917_v38 = vshrl.u32 %v7768_v3, 16  ;;  %v3920_v6 = vshll.u32 %v7768_v3, 16  ;;  %v10756_v16 = vcombine.low %v3881_v35, %v3891_v63  ;;  %v10768_v27 = vpop.f32.mrf.mxu1 }
  0xef   : > { %v10760_v61 = vsel %vm9606_vm7, %v4616_v32, %v4617_v25  ;;  %v3909_v39 = vor.u32 %v3908_v49, %v10722_v30  ;;  %v7865_v20 = vrot.slane %v7849_v48, 9  ;;  %13423 = vst [vmem:[#allocation2_spill] sm:$0xff] %v10768_v27  ;;  %v4624_v3 = vrot.slane %v10712_v5, 5  ;;  %v10774_v32 = vld [vmem:[%s9268_s16 + $0x58] sm:$0xf]  ;;  %v10780_v49 = vpop.f32.mrf.mxu0 }
  0xf0   : > { %13422 = vst [vmem:[#allocation12_spill] sm:$0xff] %v10756_v16  ;;  %v3941_v35 = vshrl.u32 %v7771_v50, 16  ;;  %v3944_v63 = vshll.u32 %v7771_v50, 16  ;;  %v13424_v25 = vcombine.low %v10451_v42, %v10459_v4  ;;  %13425 = vst [vmem:[#allocation8_spill] sm:$0xff] %v10780_v49  ;;  %v10782_v19 = vrot.slane %v3899_v0, 4  ;;  %v8626_v48 = vld [vmem:[%s9268_s16 + $0x78] sm:$0xff]   ;;  %v10794_v27 = vpop.f32.mrf.mxu1 }
  0xf1   : > { %8434 = vmatmul.mubr.msk.bf16.gmra.mxu0 %vm809_vm3, %v8621_v26  ;;  %v3930_v26 = vshrl.u32 %v10725_v21, 16  ;;  %v4623_v54 = vrot.slane %v4621_v45, 4  ;;  %v3954_v5 = vshrl.u32 %v10753_v40, 16  ;;  %v3919_v50 = vrot.slane %v3917_v38, 4  ;;  %13426 = vst [vmem:[#allocation9_spill] sm:$0xff] %v10794_v27 }
  0xf2   : > { %8437 = vmatprep.mubr.msk.bf16.mxu0 %vm809_vm3, %v8623_v7  ;;  %v10770_v7 = vrot.slane %v3912_v1, 5  ;;  %v3950_v1 = vshll.u32 %v10753_v40, 16  ;;  %v3922_v51 = vrot.slane %v3920_v6, 5  ;;  %v3965_v4 = vshrl.u32 %v7774_v55, 16  ;;  %v10802_v38 = vld [vmem:[%s9268_s16 + $0x3c] sm:$0xe] }
  0xf3   : > { %v3932_v42 = vrot.slane %v3930_v26, 4  ;;  %v3974_v0 = vshll.u32 %v10774_v32, 16  ;;  %v3978_v57 = vshrl.u32 %v10774_v32, 16  ;;  %v10798_v8 = vsel %vm9606_vm7, %v7865_v20, %v4621_v45  ;;  %v10814_v45 = vld [vmem:[%s9268_s16 + $0x50] sm:$0x1] }
  0xf4   : > { %8396 = vmatmul.mubr.msk.bf16.gmra.mxu1 %vm809_vm3, %v7657_v46  ;;  %v10785_v46 = vld [vmem:[%s9268_s16 + $0x44] sm:$0x1]  ;;  %v3943_v6 = vrot.slane %v3941_v35, 4  ;;  %v3946_v17 = vrot.slane %v3944_v63, 5  ;;  %v10811_v27 = vrot.slane %v3909_v39, 4  ;;  %v10816_v20 = vrot.slane %v3950_v1, 5 }
  0xf5   : > { %8399 = vmatprep.mubr.msk.bf16.mxu1 %vm809_vm3, %v13424_v25  ;;  %v3968_v25 = vshll.u32 %v7774_v55, 16  ;;  %v3936_v53 = vshll.u32 %v10785_v46, 16  ;;  %v3956_v49 = vrot.slane %v3954_v5, 4  ;;  %v3923_v35 = vor.u32 %v3922_v51, %v3919_v50  ;;  %v10826_v39 = vld [vmem:[%s9268_s16 + $0x5c] sm:$0x1]  ;;  %v8627_v51 = vld [vmem:[%s9268_s16 + $0x84] sm:$0xff]  }
  0xf6   : > { %v10805_v26 = vpop.f32.mrf.mxu0  ;;  %v3933_v63 = vor.u32 %v3932_v42, %v10790_v15  ;;  %v4628_v55 = vrot.slane %v10725_v21, 5  ;;  %v10828_v1 = vrot.slane %v3974_v0, 5  ;;  %v3980_v5 = vrot.slane %v3978_v57, 4 }
  0xf7   : > { %13427 = vst [vmem:[#allocation13_spill] sm:$0xff] %v10805_v26  ;;  %v3967_v26 = vrot.slane %v3965_v4, 4  ;;  %v3970_v29 = vrot.slane %v3968_v25, 5  ;;  %v7866_v21 = vrot.slane %v10802_v38, 9  ;;  %v3947_v50 = vor.u32 %v3946_v17, %v3943_v6  ;;  %v8628_v4 = vld [vmem:[%s9268_s16 + $0x90] sm:$0xff]  }
  0xf8   : > { %v3960_v42 = vshll.u32 %v10814_v45, 16  ;;  %v13430_v57 = vcombine.low %v10475_v11, %v10497_v56  ;;  %v3957_v25 = vor.u32 %v3956_v49, %v10816_v20  ;;  %v4635_v0 = vrot.slane %v10753_v40, 5  ;;  %v7852_v11 = vld [vmem:[%s9268_s16 + $0x54] sm:$0xe] }
  0xf9   : > { %8438 = vmatmul.mubr.msk.bf16.gmra.mxu0 %vm809_vm3, %v8625_v10  ;;  %v10821_v10 = vsel %vm9606_vm7, %v4623_v54, %v4624_v3  ;;  %v10838_v54 = vrot.slane %v3936_v53, 5  ;;  %v7851_v53 = vld [vmem:[%s9268_s16 + $0x48] sm:$0xe]  ;;  %v3984_v38 = vshll.u32 %v10826_v39, 16  ;;  %v10854_v6 = vrot.slane %v3923_v35, 4 }
  0xfa   : > { %8441 = vmatprep.mubr.msk.bf16.mxu0 %vm809_vm3, %v8626_v48  ;;  %v13428_v48 = vcombine.low %v10471_v34, %v10487_v37  ;;  %v10836_v3 = vpop.f32.mrf.mxu1  ;;  %v10847_v34 = vpop.f32.mrf.mxu0  ;;  %v4631_v37 = vrot.slane %v10785_v46, 5  ;;  %v10856_v17 = vrot.slane %v3933_v63, 4  ;;  %v3989_v56 = vshrl.u32 %v7777_v14, 16 }
  0xfb   : > { %13429 = vst [vmem:[#allocation14_spill] sm:$0xff] %v10836_v3  ;;  %13431 = vst [vmem:[#allocation15_spill] sm:$0xff] %v10847_v34  ;;  %v3971_v3 = vor.u32 %v3970_v29, %v3967_v26  ;;  %v3981_v34 = vor.u32 %v3980_v5, %v10828_v1  ;;  %v4642_v46 = vrot.slane %v10774_v32, 5  ;;  %v10866_v40 = vrot.slane %v3947_v50, 4 }
  0xfc   : > { %8400 = vmatmul.mubr.msk.bf16.gmra.mxu1 %vm809_vm3, %v13428_v48  ;;  %v3992_v48 = vshll.u32 %v7777_v14, 16  ;;  %v10864_v49 = vpop.f32.mrf.mxu1  ;;  %v10868_v16 = vrot.slane %v3960_v42, 5  ;;  %v7867_v35 = vrot.slane %v7851_v53, 9  ;;  %v4638_v63 = vrot.slane %v10814_v45, 5  ;;  %v10872_v14 = vpop.f32.mrf.mxu0 }
  0xfd   : > { %8403 = vmatprep.mubr.msk.bf16.mxu1 %vm809_vm3, %v13430_v57  ;;  %v4630_v57 = vrot.slane %v4628_v55, 4  ;;  %13432 = vst [vmem:[#allocation16_spill] sm:$0xff] %v10864_v49  ;;  %v3958_v29 = vrot.slane %v3957_v25, 4  ;;  %v4637_v26 = vrot.slane %v4635_v0, 4  ;;  %v3986_v5 = vrot.slane %v3984_v38, 5  ;;  %v8632_v38 = vld [vmem:[%s9268_s16 + $0xa8] sm:$0xff]  }
  0xfe   : > { %v7868_v44 = vrot.slane %v7852_v11, 9  ;;  %v3991_v32 = vrot.slane %v3989_v56, 4  ;;  %v3994_v49 = vrot.slane %v3992_v48, 5  ;;  %v3998_v50 = vshll.u32 %v10862_v31, 16 }
  0xff   : > { %v4002_v42 = vshrl.u32 %v10862_v31, 16  ;;  %v3972_v53 = vrot.slane %v3971_v3, 4  ;;  %v3982_v2 = vrot.slane %v3981_v34, 4  ;;  %v4644_v45 = vrot.slane %v4642_v46, 4 }
 0x100   : > { %v13433_v25 = vcombine.low %v10482_v62, %v10501_v18  ;;  %v3915_v3 = vsel %vm9314_vm4, %v10811_v27, %v10770_v7  ;;  %v3929_v34 = vsel %vm9314_vm4, %v10854_v6, %v10790_v15  ;;  %v3939_v62 = vsel %vm9314_vm4, %v10856_v17, %v10838_v54  ;;  %v8629_v27 = vld [vmem:[%s9268_s16 + $0x9c] sm:$0xff]   ;;  %v10905_v7 = vpop.f32.mrf.mxu0  ;;  %v10932_v6 = vld [vmem:[%s9268_s16 + $0x68] sm:$0x1] }
 0x101   : > { %8442 = vmatmul.mubr.msk.bf16.gmra.mxu0 %vm809_vm3, %v8627_v51  ;;  %v4645_v51 = vrot.slane %v10826_v39, 5  ;;  %v10898_v18 = vsel %vm9606_vm7, %v7866_v21, %v4628_v55  ;;  %v13435_v39 = vcombine.low %v10511_v22, %v10518_v28  ;;  %v10909_v15 = vsel %vm9606_vm7, %v4630_v57, %v4631_v37  ;;  %v7780_v28 = vld [vmem:[%s9268_s16 + $0x6c] sm:$0xf]  ;;  %v10924_v21 = vld [vmem:[%s9268_s16 + $0x70] sm:$0xf] }
 0x102   : > { %8445 = vmatprep.mubr.msk.bf16.mxu0 %vm809_vm3, %v8628_v4  ;;  %v10882_v4 = vpop.f32.mrf.mxu1  ;;  %v3953_v54 = vsel %vm9314_vm4, %v10866_v40, %v10816_v20  ;;  %v3963_v55 = vsel %vm9314_vm4, %v3958_v29, %v10868_v16  ;;  %v10920_v22 = vsel %vm9606_vm7, %v7867_v35, %v4635_v0  ;;  %v10929_v37 = vsel %vm9606_vm7, %v4637_v26, %v4638_v63 }
 0x103   : > { %13434 = vst [vmem:[#allocation17_spill] sm:$0xff] %v10882_v4  ;;  %v3995_v17 = vor.u32 %v3994_v49, %v3991_v32  ;;  %v10934_v20 = vrot.slane %v3998_v50, 5  ;;  %v4004_v11 = vrot.slane %v4002_v42, 4  ;;  %v3977_v16 = vsel %vm9314_vm4, %v3972_v53, %v10828_v1  ;;  %v7783_v42 = vld [vmem:[%s9268_s16 + $0x78] sm:$0xf] }
 0x104   : > { %8404 = vmatmul.mubr.msk.bf16.gmra.mxu1 %vm809_vm3, %v13433_v25  ;;  %v3987_v0 = vsel %vm9314_vm4, %v3982_v2, %v3986_v5  ;;  %v10943_v56 = vsel %vm9606_vm7, %v7868_v44, %v4642_v46  ;;  %v10947_v48 = vsel %vm9606_vm7, %v4644_v45, %v4645_v51  ;;  %v10949_v57 = vpop.f32.mrf.mxu1  ;;  %v4013_v49 = vshrl.u32 %v7780_v28, 16  ;;  %v8633_v53 = vld [vmem:[%s9268_s16 + $0xb4] sm:$0xff]  }
 0x105   : > { %8407 = vmatprep.mubr.msk.bf16.mxu1 %vm809_vm3, %v13435_v39  ;;  %13436 = vst [vmem:[#allocation18_spill] sm:$0xff] %v10949_v57  ;;  %v4016_v40 = vshll.u32 %v7780_v28, 16  ;;  %v4022_v1 = vshll.u32 %v10924_v21, 16  ;;  %v4026_v35 = vshrl.u32 %v10924_v21, 16  ;;  %v13437_v46 = vsel %vm9314_vm4, %v10782_v19, %v10722_v30  ;;  %v10977_v19 = vld [vmem:[%s9268_s16 + $0x74] sm:$0x1] }
 0x106   : > { %v10963_v63 = vcombine.low %v13437_v46, %v3915_v3  ;;  %v4008_v26 = vshll.u32 %v10932_v6, 16  ;;  %v10969_v5 = vcombine.low %v3929_v34, %v3939_v62  ;;  %v10973_v50 = vrot.slane %v3995_v17, 4  ;;  %v7853_v34 = vld [vmem:[%s9268_s16 + $0x60] sm:$0xe]  ;;  %v10991_v62 = vld [vmem:[%s9268_s16 + $0x7c] sm:$0xf] }
 0x107   : > { %v10954_v2 = vpop.f32.mrf.mxu0  ;;  %v4005_v30 = vor.u32 %v4004_v11, %v10934_v20  ;;  %v10981_v45 = vcombine.low %v3953_v54, %v3963_v55  ;;  %v10985_v25 = vcombine.low %v3977_v16, %v3987_v0  ;;  %v13438_v39 = vcombine.low %v10528_v47, %v10547_v23  ;;  %v7786_v17 = vld [vmem:[%s9268_s16 + $0x84] sm:$0xf]  ;;  %v11042_v57 = vld [vmem:[%s9268_s16 + $0x8c] sm:$0x1] }
 0x108   : > { %v4015_v54 = vrot.slane %v4013_v49, 4  ;;  %v4018_v55 = vrot.slane %v4016_v40, 5  ;;  %v10999_v28 = vrot.slane %v4022_v1, 5  ;;  %v13440_v11 = vcombine.low %v10532_v13, %v10555_v36  ;;  %v8634_v49 = vld [vmem:[%s9268_s16 + $0xc0] sm:$0xff]   ;;  %v7854_v36 = vld [vmem:[%s9268_s16 + $0x6c] sm:$0xe] }
 0x109   : > { %8446 = vmatmul.mubr.msk.bf16.gmra.mxu0 %vm809_vm3, %v8629_v27  ;;  %v11006_v16 = vpop.f32.mrf.mxu0  ;;  %v4010_v0 = vrot.slane %v4008_v26, 5  ;;  %v4032_v47 = vshll.u32 %v10977_v19, 16  ;;  %v4037_v23 = vshrl.u32 %v7783_v42, 16  ;;  %v4040_v46 = vshll.u32 %v7783_v42, 16 }
 0x10a   : > { %8449 = vmatprep.mubr.msk.bf16.mxu0 %vm809_vm3, %v8632_v38  ;;  %v4028_v38 = vrot.slane %v4026_v35, 4  ;;  %v4001_v40 = vsel %vm9314_vm4, %v10973_v50, %v10934_v20  ;;  %v4006_v1 = vrot.slane %v4005_v30, 4  ;;  %v7869_v35 = vrot.slane %v7853_v34, 9 }
 0x10b   : > { %v4649_v13 = vrot.slane %v10862_v31, 5  ;;  %v4050_v26 = vshrl.u32 %v10991_v62, 16  ;;  %v4061_v3 = vshrl.u32 %v7786_v17, 16  ;;  %v4064_v51 = vshll.u32 %v7786_v17, 16  ;;  %v11027_v31 = vpop.f32.mrf.mxu0 }
 0x10c   : > { %8408 = vmatmul.mubr.msk.bf16.gmra.mxu1 %vm809_vm3, %v13438_v39  ;;  %v10997_v27 = vpop.f32.mrf.mxu1  ;;  %v11010_v39 = vld [vmem:[%s9268_s16 + $0x88] sm:$0xf]  ;;  %v4019_v32 = vor.u32 %v4018_v55, %v4015_v54  ;;  %v4029_v29 = vor.u32 %v4028_v38, %v10999_v28  ;;  %v11029_v50 = vrot.slane %v4032_v47, 5  ;;  %v4652_v30 = vrot.slane %v10932_v6, 5 }
 0x10d   : > { %13439 = vst [vmem:[#allocation19_spill] sm:$0xff] %v10997_v27  ;;  %8411 = vmatprep.mubr.msk.bf16.mxu1 %vm809_vm3, %v13440_v11  ;;  %v4046_v11 = vshll.u32 %v10991_v62, 16  ;;  %v4070_v44 = vshll.u32 %v11010_v39, 16  ;;  %v4074_v20 = vshrl.u32 %v11010_v39, 16  ;;  %v4039_v34 = vrot.slane %v4037_v23, 4 }
 0x10e   : > { %v11021_v42 = vpop.f32.mrf.mxu1  ;;  %v4042_v17 = vrot.slane %v4040_v46, 5  ;;  %v4011_v54 = vsel %vm9314_vm4, %v4006_v1, %v4010_v0  ;;  %v4651_v55 = vrot.slane %v4649_v13, 4  ;;  %v7870_v38 = vrot.slane %v7854_v36, 9  ;;  %v11037_v27 = vld [vmem:[%s9268_s16 + $0x80] sm:$0x1] }
 0x10f   : > { %13441 = vst [vmem:[#allocation20_spill] sm:$0xff] %v11021_v42  ;;  %v4656_v42 = vrot.slane %v10924_v21, 5  ;;  %v4052_v47 = vrot.slane %v4050_v26, 4  ;;  %v4063_v6 = vrot.slane %v4061_v3, 4  ;;  %v4066_v23 = vrot.slane %v4064_v51, 5 }
 0x110   : > { %v13442_v46 = vcombine.low %v10540_v12, %v10559_v59  ;;  %v11048_v0 = vpop.f32.mrf.mxu1  ;;  %v11052_v21 = vrot.slane %v4029_v29, 4  ;;  %v11054_v1 = vrot.slane %v4070_v44, 5  ;;  %v4076_v36 = vrot.slane %v4074_v20, 4  ;;  %v8635_v12 = vld [vmem:[%s9268_s16 + $0xcc] sm:$0xff]  }
 0x111   : > { %8450 = vmatmul.mubr.msk.bf16.gmra.mxu0 %vm809_vm3, %v8633_v53  ;;  %v11039_v53 = vrot.slane %v4046_v11, 5  ;;  %13443 = vst [vmem:[#allocation21_spill] sm:$0xff] %v11048_v0  ;;  %v11056_v11 = vpop.f32.mrf.mxu0  ;;  %v13444_v51 = vcombine.low %v10568_v43, %v10598_v52  ;;  %v11063_v59 = vcombine.low %v4001_v40, %v4011_v54  ;;  %v4043_v29 = vor.u32 %v4042_v17, %v4039_v34  ;;  %v7789_v26 = vld [vmem:[%s9268_s16 + $0x90] sm:$0xf]  ;;  %v7855_v34 = vld [vmem:[%s9268_s16 + $0x78] sm:$0xe] }
 0x112   : > { %8453 = vmatprep.mubr.msk.bf16.mxu0 %vm809_vm3, %v8634_v49  ;;  %v11050_v49 = vrot.slane %v4019_v32, 4  ;;  %v11067_v32 = vsel %vm9606_vm7, %v7869_v35, %v4649_v13  ;;  %v4056_v44 = vshll.u32 %v11037_v27, 16  ;;  %v11072_v3 = vsel %vm9606_vm7, %v4651_v55, %v4652_v30  ;;  %v11085_v54 = vld [vmem:[%s9268_s16 + $0x94] sm:$0xf]  ;;  %v11087_v30 = vpop.f32.mrf.mxu1 }
 0x113   : > { %v11076_v43 = vsel %vm9606_vm7, %v7870_v38, %v4656_v42  ;;  %v4659_v52 = vrot.slane %v10977_v19, 5  ;;  %v4080_v40 = vshll.u32 %v11042_v57, 16  ;;  %v4658_v20 = vrot.slane %v4656_v42, 4  ;;  %13445 = vst [vmem:[#allocation22_spill] sm:$0xff] %v11087_v30 }
 0x114   : > { %8412 = vmatmul.mubr.msk.bf16.gmra.mxu1 %vm809_vm3, %v13442_v46  ;;  %v4053_v35 = vor.u32 %v4052_v47, %v11039_v53  ;;  %v4067_v13 = vor.u32 %v4066_v23, %v4063_v6  ;;  %v4663_v17 = vrot.slane %v10991_v62, 5  ;;  %v4025_v19 = vsel %vm9314_vm4, %v11050_v49, %v10999_v28  ;;  %v7856_v23 = vld [vmem:[%s9268_s16 + $0x84] sm:$0xe] }
 0x115   : > { %8415 = vmatprep.mubr.msk.bf16.mxu1 %vm809_vm3, %v13444_v51  ;;  %v4035_v42 = vsel %vm9314_vm4, %v11052_v21, %v11029_v50  ;;  %v4077_v55 = vor.u32 %v4076_v36, %v11054_v1  ;;  %v4670_v38 = vrot.slane %v11010_v39, 5  ;;  %v11102_v47 = vrot.slane %v4043_v29, 4  ;;  %v7792_v51 = vld [vmem:[%s9268_s16 + $0x9c] sm:$0xf] }
 0x116   : > { %v4058_v6 = vrot.slane %v4056_v44, 5  ;;  %v4085_v46 = vshrl.u32 %v7789_v26, 16  ;;  %v4088_v28 = vshll.u32 %v7789_v26, 16  ;;  %v13447_v49 = vcombine.low %v10698_v24, %v10709_v60  ;;  %v13450_v24 = vld [vmem:[#allocation3_spill] sm:$0xff] }
 0x117   : > { %v4082_v50 = vrot.slane %v4080_v40, 5  ;;  %v7871_v21 = vrot.slane %v7855_v34, 9  ;;  %v4094_v36 = vshll.u32 %v11085_v54, 16  ;;  %v4098_v39 = vshrl.u32 %v11085_v54, 16 }
 0x118   : > { %v4054_v29 = vrot.slane %v4053_v35, 4  ;;  %v4068_v44 = vrot.slane %v4067_v13, 4  ;;  %v4665_v30 = vrot.slane %v4663_v17, 4  ;;  %v4666_v26 = vrot.slane %v11037_v27, 5  ;;  %v13452_v35 = vld [vmem:[#allocation11_spill] sm:$0xff] }
 0x119   : > { %v11099_v62 = vpop.f32.mrf.mxu0  ;;  %8454 = vmatmul.mubr.msk.bf16.gmra.mxu0 %vm809_vm3, %v8635_v12  ;;  %v13451_v60 = vcombine.low %v10604_v9, %v13450_v24  ;;  %v4078_v40 = vrot.slane %v4077_v55, 4  ;;  %v7872_v34 = vrot.slane %v7856_v23, 9  ;;  %v4673_v4 = vrot.slane %v11042_v57, 5  ;;  %v11127_v13 = vld [vmem:[%s9268_s16 + $0x98] sm:$0x1] }
 0x11a   : > { %13446 = vst [vmem:[#allocation23_spill] sm:$0xff] %v11099_v62  ;;  %8501 = vmatprep.mubr.msk.bf16.mxu0 %vm809_vm3, %v13447_v49  ;;  %v4672_v49 = vrot.slane %v4670_v38, 4  ;;  %v4087_v27 = vrot.slane %v4085_v46, 4  ;;  %v4112_v9 = vshll.u32 %v7792_v51, 16  ;;  %v11133_v55 = vsel %vm9606_vm7, %v4658_v20, %v4659_v52 }
 0x11b   : > { %v11112_v12 = vpop.f32.mrf.mxu0  ;;  %v4049_v57 = vsel %vm9314_vm4, %v11102_v47, %v11039_v53  ;;  %v11139_v23 = vrot.slane %v4094_v36, 5  ;;  %v4073_v52 = vsel %vm9314_vm4, %v4068_v44, %v11054_v1  ;;  %v11153_v20 = vsel %vm9606_vm7, %v7871_v21, %v4663_v17  ;;  %v11174_v21 = vld [vmem:[%s9268_s16 + $0xa4] sm:$0x1]  ;;  %v7857_v44 = vld [vmem:[%s9268_s16 + $0x90] sm:$0xe] }
 0x11c   : > { %13448 = vst [vmem:[#allocation24_spill] sm:$0xff] %v11112_v12  ;;  %v11115_v0 = vpop.f32.mrf.mxu1  ;;  %8416 = vmatmul.mubr.msk.bf16.gmra.mxu1 %vm809_vm3, %v13451_v60  ;;  %v4109_v12 = vshrl.u32 %v7792_v51, 16  ;;  %v4100_v60 = vrot.slane %v4098_v39, 4  ;;  %v11157_v53 = vsel %vm9606_vm7, %v4665_v30, %v4666_v26  ;;  %v4083_v36 = vsel %vm9314_vm4, %v4078_v40, %v4082_v50 }
 0x11d   : > { %13449 = vst [vmem:[#allocation25_spill] sm:$0xff] %v11115_v0  ;;  %v11122_v62 = vpop.f32.mrf.mxu0  ;;  %8463 = vmatprep.mubr.msk.bf16.mxu1 %vm809_vm3, %v13452_v35  ;;  %v4090_v0 = vrot.slane %v4088_v28, 5  ;;  %v11142_v35 = vld [vmem:[%s9268_s16 + $0xa0] sm:$0xf]  ;;  %v4059_v28 = vsel %vm9314_vm4, %v4054_v29, %v4058_v6  ;;  %v11166_v6 = vsel %vm9606_vm7, %v7872_v34, %v4670_v38  ;;  %v11170_v1 = vsel %vm9606_vm7, %v4672_v49, %v4673_v4  ;;  %v7795_v34 = vld [vmem:[%s9268_s16 + $0xa8] sm:$0xf] }
 0x11e   : > { %v11129_v24 = vpop.f32.mrf.mxu1  ;;  %v4104_v17 = vshll.u32 %v11127_v13, 16  ;;  %v13456_v39 = vcombine.low %v10745_v41, %v10760_v61  ;;  %v4111_v51 = vrot.slane %v4109_v12, 4  ;;  %v4114_v38 = vrot.slane %v4112_v9, 5 }
 0x11f   : > { %13453 = vst [vmem:[#allocation3_spill] sm:$0xff] %v11129_v24  ;;  %v11144_v46 = vpop.f32.mrf.mxu0  ;;  %v4091_v50 = vor.u32 %v4090_v0, %v4087_v27  ;;  %v4118_v29 = vshll.u32 %v11142_v35, 16  ;;  %v13458_v26 = vcombine.low %v10798_v8, %v10821_v10  ;;  %v11188_v40 = vcombine.low %v4025_v19, %v4035_v42  ;;  %v13460_v27 = vld [vmem:[#allocation12_spill] sm:$0xff] }
 0x120   : > { %13454 = vst [vmem:[#allocation11_spill] sm:$0xff] %v11144_v46  ;;  %v11160_v47 = vpop.f32.mrf.mxu1  ;;  %v4101_v0 = vor.u32 %v4100_v60, %v11139_v23  ;;  %v11202_v10 = vcombine.low %v4049_v57, %v4059_v28  ;;  %v11204_v19 = vcombine.low %v4073_v52, %v4083_v36  ;;  %v11213_v9 = vrot.slane %v4104_v17, 5  ;;  %v11218_v52 = vld [vmem:[%s9268_s16 + $0xac] sm:$0xf]  ;;  %v13461_v36 = vld [vmem:[#allocation4_spill] sm:$0xff]  ;;  %v11228_v17 = vld [vmem:[%s11200_s26] sm:$0xff] }
 0x121   : > { %13455 = vst [vmem:[#allocation26_spill] sm:$0xff] %v11160_v47  ;;  %v8275_v30 = vpop.f32.mrf.mxu0  ;;  %8502 = vmatmul.mubr.msk.bf16.vlgmr.msra.gmra.mxu0 %vm809_vm3, %v13456_v39  ;;  %v4122_v60 = vshrl.u32 %v11142_v35, 16  ;;  %v4128_v57 = vshll.u32 %v11174_v21, 16  ;;  %v7873_v28 = vrot.slane %v7857_v44, 9  ;;  %v11223_v12 = vrot.slane %v4091_v50, 4  ;;  %13462 = vst [vmem:[#allocation12_spill] sm:$0xff] %v11228_v17 }
 0x122   : > { %v11182_v4 = vpop.f32.mrf.mxu1  ;;  %8505 = vmatprep.mubr.msk.bf16.mxu0 %vm809_vm3, %v13458_v26  ;;  %13459 = vst [vmem:[#allocation28_spill] sm:$0xff] %v11204_v19  ;;  %v4115_v42 = vor.u32 %v4114_v38, %v4111_v51  ;;  %v11225_v61 = vrot.slane %v4118_v29, 5  ;;  %v11233_v41 = vrot.slane %v4101_v0, 4  ;;  %v4142_v38 = vshll.u32 %v11218_v52, 16 }
 0x123   : > { %13457 = vst [vmem:[#allocation27_spill] sm:$0xff] %v11182_v4  ;;  %v1647_v8 = vpop.f32.mrf.mxu0  ;;  %v4136_v4 = vshll.u32 %v7795_v34, 16  ;;  %v4146_v29 = vshrl.u32 %v11218_v52, 16  ;;  %v4124_v19 = vrot.slane %v4122_v60, 4  ;;  %v11241_v46 = vrot.slane %v4128_v57, 5  ;;  %v13471_v60 = vld [vmem:[#allocation8_spill] sm:$0xff] }
 0x124   : > { %v8237_v49 = vpop.f32.mrf.mxu1  ;;  %8464 = vmatmul.mubr.msk.bf16.vlgmr.msra.gmra.mxu1 %vm809_vm3, %v13460_v27  ;;  %v5133_v27 = vld [vmem:[%s13281_s4] sm:$0xff]  ;;  %v11256_v57 = vrot.slane %v4115_v42, 4 }
 0x125   : > { %v1212_v39 = vadd.f32 %v8237_v49, %v13461_v36  ;;  %v8276_v26 = vpop.f32.mrf.mxu0  ;;  %8467 = vmatprep.mubr.msk.bf16.mxu1 %vm809_vm3, %v10963_v63  ;;  %v4677_v49 = vrot.slane %v11085_v54, 5  ;;  %v4133_v36 = vshrl.u32 %v7795_v34, 16  ;;  %v13464_v63 = vld [vmem:[#allocation7_spill] sm:$0xff]  ;;  %v4680_v54 = vrot.slane %v11127_v13, 5  ;;  %v13466_v34 = vld [vmem:[#allocation6_spill] sm:$0xff] }
 0x126   : > { %v1203_v44 = vpop.f32.mrf.mxu1  ;;  %v5453_v0 = vmul.f32 %v5133_v27, %v11228_v17  ;;  %v7858_v13 = vld [vmem:[%s9268_s16 + $0x9c] sm:$0xe]  ;;  %v11274_v27 = vld [vmem:[%s9268_s16 + $0xb0] sm:$0x1] }
 0x127   : > { %v11236_v47 = vadd.f32 %v8275_v30, %v1212_v39  ;;  %v1204_v50 = vadd.f32 %v1203_v44, %v13464_v63  ;;  %v1650_v51 = vpop.f32.mrf.mxu0  ;;  %v13467_v63 = vcombine.low %v10898_v18, %v10909_v15  ;;  %v13469_v18 = vcombine.low %v10920_v22, %v10929_v37 }
 0x128   : > { %v8238_v24 = vpop.f32.mrf.mxu1  ;;  %v11271_v15 = vsel %vm9606_vm7, %v7873_v28, %v4677_v49  ;;  %v4679_v42 = vrot.slane %v4677_v49, 4  ;;  %5517 = vrot.lane.b32.xlu0 %v5453_v0, %s9193_s8  ;;  %v11280_v22 = vrot.slane %v4142_v38, 5  ;;  %v4148_v37 = vrot.slane %v4146_v29, 4  ;;  %v11284_v28 = vld [vmem:[%s11200_s26 + $0x8] sm:$0xff] }
 0x129   : > { %13463 = vst [vmem:[#allocation4_spill] sm:$0xff] %v11236_v47  ;;  %v11245_v30 = vadd.f32 %v1647_v8, %v1204_v50  ;;  %v1215_v39 = vadd.f32 %v8238_v24, %v13466_v34  ;;  %v8279_v44 = vpop.f32.mrf.mxu0  ;;  %8506 = vmatmul.mubr.msk.bf16.gmra.mxu0 %vm809_vm3, %v13467_v63  ;;  %v11260_v47 = vld [vmem:[%s11200_s26 + $0x10] sm:$0xff]  ;;  %v4135_v50 = vrot.slane %v4133_v36, 4  ;;  %v4138_v34 = vrot.slane %v4136_v4, 5  ;;  %v5134_v49 = vld [vmem:[%s13281_s4 + $0x8] sm:$0xff] }
 0x12a   : > { %13468 = vst [vmem:[#allocation6_spill] sm:$0xff] %v11260_v47  ;;  %v5135_v24 = vld [vmem:[%s13281_s4 + $0x10] sm:$0xff]  ;;  %v1206_v8 = vpop.f32.mrf.mxu1  ;;  %8509 = vmatprep.mubr.msk.bf16.mxu0 %vm809_vm3, %v13469_v18  ;;  %v4125_v36 = vor.u32 %v4124_v19, %v11225_v61  ;;  %v7874_v38 = vrot.slane %v7858_v13, 9  ;;  %v4152_v13 = vshll.u32 %v11274_v27, 16 }
 0x12b   : > { %13465 = vst [vmem:[#allocation7_spill] sm:$0xff] %v11245_v30  ;;  %v11277_v63 = vadd.f32 %v8276_v26, %v1215_v39  ;;  %v1207_v17 = vadd.f32 %v1206_v8, %v13471_v60  ;;  %v1663_v30 = vpop.f32.mrf.mxu0  ;;  %v7798_v18 = vld [vmem:[%s9268_s16 + $0xb4] sm:$0xf]  ;;  %v4107_v26 = vsel %vm9314_vm4, %v11233_v41, %v11213_v9  ;;  %v5455_v29 = vmul.f32 %v5135_v24, %v11260_v47  ;;  %v13473_v39 = vld [vmem:[#allocation13_spill] sm:$0xff] }
 0x12c   : > { %v8241_v4 = vpop.f32.mrf.mxu1  ;;  %8468 = vmatmul.mubr.msk.bf16.gmra.mxu1 %vm809_vm3, %v10969_v5  ;;  %v4121_v5 = vsel %vm9314_vm4, %v11256_v57, %v11225_v61  ;;  %v4684_v41 = vrot.slane %v11142_v35, 5  ;;  %v11308_v9 = vld [vmem:[%s9268_s16 + $0xb8] sm:$0xf]  ;;  %v5454_v24 = vmul.f32 %v5134_v49, %v11284_v28  ;;  %v4139_v61 = vor.u32 %v4138_v34, %v4135_v50 }
 0x12d   : > { %13470 = vst [vmem:[#allocation29_spill] sm:$0xff] %v11277_v63  ;;  %v11297_v0 = vadd.f32 %v1650_v51, %v1207_v17  ;;  %v1228_v60 = vadd.f32 %v8241_v4, %v13473_v39  ;;  %v8280_v8 = vpop.f32.mrf.mxu0  ;;  %8471 = vmatprep.mubr.msk.bf16.mxu1 %vm809_vm3, %v10981_v45  ;;  %v4157_v17 = vshrl.u32 %v7798_v18, 16  ;;  %v4160_v51 = vshll.u32 %v7798_v18, 16  ;;  %5521 = vrot.lane.b32.xlu1 %v5455_v29, %s9193_s8  ;;  %v13474_v45 = vld [vmem:[#allocation15_spill] sm:$0xff] }
 0x12e   : > { %v1219_v19 = vpop.f32.mrf.mxu1  ;;  %v4149_v35 = vor.u32 %v4148_v37, %v11280_v22  ;;  %v11319_v63 = vsel %vm9606_vm7, %v4679_v42, %v4680_v54  ;;  %v4166_v18 = vshll.u32 %v11308_v9, 16  ;;  %v4170_v29 = vshrl.u32 %v11308_v9, 16  ;;  %5519 = vrot.lane.b32.xlu0 %v5454_v24, %s9193_s8  ;;  %v11333_v42 = vld [vmem:[%s9268_s16 + $0xbc] sm:$0x1] }
 0x12f   : > { %13472 = vst [vmem:[#allocation8_spill] sm:$0xff] %v11297_v0  ;;  %v11313_v4 = vadd.f32 %v8279_v44, %v1228_v60  ;;  %v1220_v39 = vadd.f32 %v1219_v19, %v13474_v45  ;;  %v1666_v47 = vpop.f32.mrf.mxu0  ;;  %v4126_v0 = vrot.slane %v4125_v36, 4  ;;  %v13475_v50 = vcombine.low %v10943_v56, %v10947_v48 }
 0x130   : > { %v8242_v57 = vpop.f32.mrf.mxu1  ;;  %v4686_v34 = vrot.slane %v4684_v41, 4  ;;  %v4687_v54 = vrot.slane %v11174_v21, 5  ;;  %v13476_v36 = vcombine.low %v11067_v32, %v11072_v3  ;;  %v4159_v56 = vrot.slane %v4157_v17, 4 }
 0x131   : > { %v11324_v44 = vadd.f32 %v1663_v30, %v1220_v39  ;;  %v1231_v49 = vadd.f32 %v8242_v57, %v10872_v14  ;;  %v8283_v60 = vpop.f32.mrf.mxu0  ;;  %8510 = vmatmul.mubr.msk.bf16.gmra.mxu0 %vm809_vm3, %v13475_v50  ;;  %v11341_v14 = vsel %vm9606_vm7, %v7874_v38, %v4684_v41  ;;  %v4154_v30 = vrot.slane %v4152_v13, 5  ;;  %v7859_v57 = vld [vmem:[%s9268_s16 + $0xa8] sm:$0xe] }
 0x132   : > { %v1222_v37 = vpop.f32.mrf.mxu1  ;;  %8513 = vmatprep.mubr.msk.bf16.mxu0 %vm809_vm3, %v13476_v36  ;;  %v4162_v48 = vrot.slane %v4160_v51, 5  ;;  %v4140_v45 = vrot.slane %v4139_v61, 4  ;;  %v4150_v39 = vrot.slane %v4149_v35, 4  ;;  %v4131_v32 = vsel %vm9314_vm4, %v4126_v0, %v11241_v46 }
 0x133   : > { %v11343_v19 = vadd.f32 %v8280_v8, %v1231_v49  ;;  %v1223_v24 = vadd.f32 %v1222_v37, %v10905_v7  ;;  %v1679_v21 = vpop.f32.mrf.mxu0  ;;  %v11352_v3 = vrot.slane %v4166_v18, 5  ;;  %v4172_v38 = vrot.slane %v4170_v29, 4 }
 0x134   : > { %v8245_v50 = vpop.f32.mrf.mxu1  ;;  %8472 = vmatmul.mubr.msk.bf16.gmra.mxu1 %vm809_vm3, %v10985_v25  ;;  %v4176_v8 = vshll.u32 %v11333_v42, 16  ;;  %v11362_v25 = vsel %vm9606_vm7, %v4686_v34, %v4687_v54  ;;  %v4691_v17 = vrot.slane %v11218_v52, 5  ;;  %v7875_v51 = vrot.slane %v7859_v57, 9  ;;  %v11391_v34 = vld [vmem:[%s11200_s26 + $0x18] sm:$0xff] }
 0x135   : > { %v11355_v41 = vadd.f32 %v1666_v47, %v1223_v24  ;;  %v1244_v7 = vadd.f32 %v8245_v50, %v10954_v2  ;;  %v8284_v13 = vpop.f32.mrf.mxu0  ;;  %8475 = vmatprep.mubr.msk.bf16.mxu1 %vm809_vm3, %v11063_v59  ;;  %v13477_v47 = vsel %vm9314_vm4, %v11223_v12, %v11139_v23  ;;  %v7894_v2 = vcombine.low %v11271_v15, %v11319_v63  ;;  %v11408_v24 = vld [vmem:[%s11200_s26 + $0x20] sm:$0xff]  ;;  %v13485_v63 = vld [vmem:[#allocation11_spill] sm:$0xff] }
 0x136   : > { %v1235_v46 = vpop.f32.mrf.mxu1  ;;  %v11370_v0 = vcombine.low %v13477_v47, %v4107_v26  ;;  %v4163_v59 = vor.u32 %v4162_v48, %v4159_v56  ;;  %v4145_v18 = vsel %vm9314_vm4, %v4140_v45, %v11280_v22  ;;  %v4155_v23 = vsel %vm9314_vm4, %v4150_v39, %v4154_v30  ;;  %v5136_v22 = vld [vmem:[%s13281_s4 + $0x18] sm:$0xff]  ;;  %v11405_v48 = vld [vmem:[%s9268_s16 + $0xc4] sm:$0xf] }
 0x137   : > { %v11374_v61 = vadd.f32 %v8283_v60, %v1244_v7  ;;  %v1236_v35 = vadd.f32 %v1235_v46, %v11006_v16  ;;  %v1682_v52 = vpop.f32.mrf.mxu0  ;;  %v11382_v26 = vcombine.low %v4121_v5, %v4131_v32  ;;  %v4173_v49 = vor.u32 %v4172_v38, %v11352_v3  ;;  %v7801_v16 = vld [vmem:[%s9268_s16 + $0xc0] sm:$0xf]  ;;  %v7860_v38 = vld [vmem:[%s9268_s16 + $0xb4] sm:$0xe] }
 0x138   : > { %v8246_v12 = vpop.f32.mrf.mxu1  ;;  %v11387_v60 = vrot.slane %v4176_v8, 5  ;;  %v13478_v36 = vcombine.low %v11076_v43, %v11133_v55  ;;  %v4693_v30 = vrot.slane %v4691_v17, 4  ;;  %v4694_v56 = vrot.slane %v11274_v27, 5 }
 0x139   : > { %v11396_v54 = vadd.f32 %v1679_v21, %v1236_v35  ;;  %v1247_v37 = vadd.f32 %v8246_v12, %v11027_v31  ;;  %v8287_v5 = vpop.f32.mrf.mxu0  ;;  %v5137_v21 = vld [vmem:[%s13281_s4 + $0x20] sm:$0xff]  ;;  %v13479_v31 = vcombine.low %v11153_v20, %v11157_v53  ;;  %v11417_v43 = vcombine.low %v4145_v18, %v4155_v23  ;;  %v11454_v23 = vld [vmem:[%s11200_s26 + $0x30] sm:$0xff] }
 0x13a   : > { %8514 = vmatmul.mubr.msk.bf16.gmra.mxu0 %vm809_vm3, %v13478_v36  ;;  %v1238_v45 = vpop.f32.mrf.mxu1  ;;  %v11419_v55 = vrot.slane %v4163_v59, 4  ;;  %v11423_v27 = vsel %vm9606_vm7, %v7875_v51, %v4691_v17  ;;  %v4698_v39 = vrot.slane %v11308_v9, 5  ;;  %v4181_v20 = vshrl.u32 %v7801_v16, 16  ;;  %v13480_v59 = vld [vmem:[#allocation23_spill] sm:$0xff]  ;;  %v13481_v36 = vld [vmem:[#allocation24_spill] sm:$0xff] }
 0x13b   : > { %8517 = vmatprep.mubr.msk.bf16.mxu0 %vm809_vm3, %v13479_v31  ;;  %v11426_v57 = vadd.f32 %v8284_v13, %v1247_v37  ;;  %v1239_v50 = vadd.f32 %v1238_v45, %v11056_v11  ;;  %v1695_v32 = vpop.f32.mrf.mxu0  ;;  %v5456_v53 = vmul.f32 %v5136_v22, %v11391_v34  ;;  %v4184_v7 = vshll.u32 %v7801_v16, 16  ;;  %v11437_v13 = vld [vmem:[%s11200_s26 + $0x28] sm:$0xff] }
 0x13c   : > { %v8249_v8 = vpop.f32.mrf.mxu1  ;;  %8476 = vmatmul.mubr.msk.bf16.gmra.mxu1 %vm809_vm3, %v11188_v40  ;;  %v4190_v17 = vshll.u32 %v11405_v48, 16  ;;  %v4194_v46 = vshrl.u32 %v11405_v48, 16  ;;  %v5457_v9 = vmul.f32 %v5137_v21, %v11408_v24  ;;  %v5138_v11 = vld [vmem:[%s13281_s4 + $0x28] sm:$0xff]  ;;  %v11447_v40 = vrot.slane %v4173_v49, 4 }
 0x13d   : > { %v11442_v47 = vadd.f32 %v1682_v52, %v1239_v50  ;;  %v1260_v51 = vadd.f32 %v8249_v8, %v13480_v59  ;;  %v8288_v35 = vpop.f32.mrf.mxu0  ;;  %8479 = vmatprep.mubr.msk.bf16.mxu1 %vm809_vm3, %v11202_v10  ;;  %v11451_v18 = vsel %vm9606_vm7, %v4693_v30, %v4694_v56  ;;  %v5139_v52 = vld [vmem:[%s13281_s4 + $0x30] sm:$0xff]  ;;  %v7876_v10 = vrot.slane %v7860_v38, 9  ;;  %5523 = vrot.lane.b32.xlu1 %v5456_v53, %s9193_s8  ;;  %v11470_v21 = vld [vmem:[%s9268_s16 + $0xc8] sm:$0x1]  ;;  %v11476_v50 = vld [vmem:[%s11200_s26 + $0x38] sm:$0xff] }
 0x13e   : > { %v1251_v12 = vpop.f32.mrf.mxu1  ;;  %v4700_v49 = vrot.slane %v4698_v39, 4  ;;  %v4701_v22 = vrot.slane %v11333_v42, 5  ;;  %5525 = vrot.lane.b32.xlu0 %v5457_v9, %s9193_s8  ;;  %v11472_v45 = vrot.slane %v4181_v20, 4  ;;  %v5458_v31 = vmul.f32 %v5138_v11, %v11437_v13  ;;  %13482 = vst [vmem:[#allocation13_spill] sm:$0xff] %v11476_v50  ;;  %v5140_v42 = vld [vmem:[%s13281_s4 + $0x38] sm:$0xff]  ;;  %v11485_v59 = vld [vmem:[%s11200_s26 + $0x40] sm:$0xff] }
 0x13f   : > { %v11466_v37 = vadd.f32 %v8287_v5, %v1260_v51  ;;  %v1252_v30 = vadd.f32 %v1251_v12, %v13481_v36  ;;  %v1698_v56 = vpop.f32.mrf.mxu0  ;;  %v4186_v53 = vrot.slane %v4184_v7, 5  ;;  %v11481_v5 = vrot.slane %v4190_v17, 5  ;;  %13483 = vst [vmem:[#allocation15_spill] sm:$0xff] %v11485_v59  ;;  %v5141_v20 = vld [vmem:[%s13281_s4 + $0x40] sm:$0xff]  ;;  %v11518_v36 = vld [vmem:[%s9268_s16 + $0xd0] sm:$0xf] }
 0x140   : > { %v8250_v38 = vpop.f32.mrf.mxu1  ;;  %v4196_v8 = vrot.slane %v4194_v46, 4  ;;  %v5459_v9 = vmul.f32 %v5139_v52, %v11454_v23  ;;  %v13484_v7 = vcombine.low %v11166_v6, %v11170_v1  ;;  %v7896_v46 = vcombine.low %v11423_v27, %v11451_v18  ;;  %v7804_v52 = vld [vmem:[%s9268_s16 + $0xcc] sm:$0xf] }
 0x141   : > { %v11490_v11 = vadd.f32 %v1695_v32, %v1252_v30  ;;  %v1263_v51 = vadd.f32 %v8250_v38, %v11122_v62  ;;  %v8291_v12 = vpop.f32.mrf.mxu0  ;;  %v11510_v62 = vsel %vm9606_vm7, %v7876_v10, %v4698_v39  ;;  %v11514_v6 = vsel %vm9606_vm7, %v4700_v49, %v4701_v22  ;;  %5527 = vrot.lane.b32.xlu1 %v5458_v31, %s9193_s8  ;;  %v7861_v39 = vld [vmem:[%s9268_s16 + $0xc0] sm:$0xe]  ;;  %v11530_v22 = vld [vmem:[%s11200_s26 + $0x48] sm:$0xff] }
 0x142   : > { %8518 = vmatmul.mubr.msk.bf16.gmra.mxu0 %vm809_vm3, %v13484_v7  ;;  %v1254_v32 = vpop.f32.mrf.mxu1  ;;  %v4200_v1 = vshll.u32 %v11470_v21, 16  ;;  %v5460_v27 = vmul.f32 %v5140_v42, %v11476_v50  ;;  %v4705_v10 = vrot.slane %v11405_v48, 5  ;;  %5529 = vrot.lane.b32.xlu0 %v5459_v9, %s9193_s8  ;;  %v5461_v49 = vmul.f32 %v5141_v20, %v11485_v59  ;;  %13486 = vst [vmem:[#allocation23_spill] sm:$0xff] %v11530_v22  ;;  %v5142_v30 = vld [vmem:[%s13281_s4 + $0x48] sm:$0xff]  ;;  %v13487_v42 = vld [vmem:[#allocation28_spill] sm:$0xff]  ;;  %v11563_v59 = vld [vmem:[%s11200_s26 + $0x58] sm:$0xff] }
 0x143   : > { %8521 = vmatprep.mubr.msk.bf16.mxu0 %vm809_vm3, %v7894_v2  ;;  %v11522_v15 = vadd.f32 %v8288_v35, %v1263_v51  ;;  %v1255_v2 = vadd.f32 %v1254_v32, %v13485_v63  ;;  %v1711_v18 = vpop.f32.mrf.mxu0  ;;  %v4187_v35 = vor.u32 %v4186_v53, %v11472_v45  ;;  %v4197_v38 = vor.u32 %v4196_v8, %v11481_v5  ;;  %v11540_v7 = vld [vmem:[%s11200_s26 + $0x50] sm:$0xff]  ;;  %v13489_v32 = vld [vmem:[#allocation5_spill] sm:$0xff] }
 0x144   : > { %v8253_v31 = vpop.f32.mrf.mxu1  ;;  %8480 = vmatmul.mubr.msk.bf16.gmra.mxu1 %vm809_vm3, %v13487_v42  ;;  %v4205_v51 = vshrl.u32 %v7804_v52, 16  ;;  %v4208_v48 = vshll.u32 %v7804_v52, 16  ;;  %13488 = vst [vmem:[#allocation24_spill] sm:$0xff] %v11540_v7  ;;  %v5143_v9 = vld [vmem:[%s13281_s4 + $0x50] sm:$0xff]  ;;  %v4214_v45 = vshll.u32 %v11518_v36, 16  ;;  %v4218_v53 = vshrl.u32 %v11518_v36, 16 }
 0x145   : > { %v11545_v20 = vadd.f32 %v1698_v56, %v1255_v2  ;;  %v1276_v63 = vadd.f32 %v8253_v31, %v13489_v32  ;;  %v8292_v16 = vpop.f32.mrf.mxu0  ;;  %8483 = vmatprep.mubr.msk.bf16.mxu1 %vm809_vm3, %v11370_v0  ;;  %v11552_v52 = vrot.slane %v4200_v1, 5  ;;  %v7877_v42 = vrot.slane %v7861_v39, 9  ;;  %5531 = vrot.lane.b32.xlu1 %v5460_v27, %s9193_s8  ;;  %v13490_v31 = vld [vmem:[#allocation10_spill] sm:$0xff] }
 0x146   : > { %v1267_v8 = vpop.f32.mrf.mxu1  ;;  %v4708_v17 = vrot.slane %v11470_v21, 5  ;;  %v5462_v56 = vmul.f32 %v5142_v30, %v11530_v22  ;;  %v4707_v29 = vrot.slane %v4705_v10, 4  ;;  %5533 = vrot.lane.b32.xlu0 %v5461_v49, %s9193_s8  ;;  %v5463_v1 = vmul.f32 %v5143_v9, %v11540_v7  ;;  %v5144_v21 = vld [vmem:[%s13281_s4 + $0x58] sm:$0xff]  ;;  %v5145_v49 = vld [vmem:[%s13281_s4 + $0x60] sm:$0xff] }
 0x147   : > { %v11557_v2 = vadd.f32 %v8291_v12, %v1276_v63  ;;  %v1268_v32 = vadd.f32 %v1267_v8, %v13490_v31  ;;  %v1714_v0 = vpop.f32.mrf.mxu0  ;;  %v4188_v39 = vrot.slane %v4187_v35, 4  ;;  %v4198_v30 = vrot.slane %v4197_v38, 4  ;;  %v11569_v8 = vld [vmem:[%s11200_s26 + $0x60] sm:$0xff]  ;;  %v11582_v35 = vld [vmem:[%s9268_s16 + $0xd4] sm:$0x1] }
 0x148   : > { %v8254_v27 = vpop.f32.mrf.mxu1  ;;  %v4207_v12 = vrot.slane %v4205_v51, 4  ;;  %v4210_v63 = vrot.slane %v4208_v48, 5  ;;  %v13491_v9 = vld [vmem:[#allocation2_spill] sm:$0xff]  ;;  %v13492_v50 = vcombine.low %v11341_v14, %v11362_v25  ;;  %v11584_v38 = vrot.slane %v4214_v45, 5  ;;  %v13493_v45 = vld [vmem:[#allocation9_spill] sm:$0xff] }
 0x149   : > { %v11574_v31 = vadd.f32 %v1711_v18, %v1268_v32  ;;  %v1279_v7 = vadd.f32 %v8254_v27, %v13491_v9  ;;  %v8295_v22 = vpop.f32.mrf.mxu0  ;;  %v4220_v51 = vrot.slane %v4218_v53, 4  ;;  %v7897_v18 = vcombine.low %v11510_v62, %v11514_v6  ;;  %v7862_v27 = vld [vmem:[%s9268_s16 + $0xcc] sm:$0xe]  ;;  %5535 = vrot.lane.b32.xlu1 %v5462_v56, %s9193_s8  ;;  %v5147_v56 = vld [vmem:[%s13281_s4 + $0x70] sm:$0xff] }
 0x14a   : > { %8522 = vmatmul.mubr.msk.bf16.gmra.mxu0 %vm809_vm3, %v13492_v50  ;;  %v1270_v48 = vpop.f32.mrf.mxu1  ;;  %v4706_v32 = vsel %vm9606_vm7, %v7877_v42, %v4705_v10  ;;  %v4712_v14 = vrot.slane %v11518_v36, 5  ;;  %v5464_v25 = vmul.f32 %v5144_v21, %v11563_v59  ;;  %5537 = vrot.lane.b32.xlu0 %v5463_v1, %s9193_s8  ;;  %v5465_v62 = vmul.f32 %v5145_v49, %v11569_v8  ;;  %v11603_v6 = vld [vmem:[%s11200_s26 + $0x68] sm:$0xff]  ;;  %v11618_v42 = vld [vmem:[%s11200_s26 + $0x70] sm:$0xff] }
 0x14b   : > { %8525 = vmatprep.mubr.msk.bf16.mxu0 %vm809_vm3, %v7896_v46  ;;  %v11595_v50 = vadd.f32 %v8292_v16, %v1279_v7  ;;  %v1271_v53 = vadd.f32 %v1270_v48, %v13493_v45  ;;  %v1727_v9 = vpop.f32.mrf.mxu0  ;;  %v4709_v46 = vsel %vm9606_vm7, %v4707_v29, %v4708_v17  ;;  %v5146_v36 = vld [vmem:[%s13281_s4 + $0x68] sm:$0xff]  ;;  %v4193_v16 = vsel %vm9314_vm4, %v4188_v39, %v11481_v5  ;;  %v13495_v45 = vld [vmem:[#allocation16_spill] sm:$0xff] }
 0x14c   : > { %v8257_v10 = vpop.f32.mrf.mxu1  ;;  %8484 = vmatmul.mubr.msk.bf16.gmra.mxu1 %vm809_vm3, %v11382_v26  ;;  %v4203_v29 = vsel %vm9314_vm4, %v4198_v30, %v11552_v52  ;;  %v4211_v17 = vor.u32 %v4210_v63, %v4207_v12  ;;  %v4224_v7 = vshll.u32 %v11582_v35, 16  ;;  %v13494_v26 = vld [vmem:[#allocation14_spill] sm:$0xff]  ;;  %v4221_v5 = vor.u32 %v4220_v51, %v11584_v38  ;;  %v11638_v51 = vld [vmem:[%s11200_s26 + $0x78] sm:$0xff] }
 0x14d   : > { %v11623_v1 = vadd.f32 %v1714_v0, %v1271_v53  ;;  %v1292_v21 = vadd.f32 %v8257_v10, %v13494_v26  ;;  %v8296_v49 = vpop.f32.mrf.mxu0  ;;  %8487 = vmatprep.mubr.msk.bf16.mxu1 %vm809_vm3, %v11417_v43  ;;  %v7878_v52 = vrot.slane %v7862_v27, 9  ;;  %v7898_v30 = vcombine.low %v4706_v32, %v4709_v46  ;;  %5539 = vrot.lane.b32.xlu1 %v5464_v25, %s9193_s8  ;;  %v5148_v32 = vld [vmem:[%s13281_s4 + $0x78] sm:$0xff] }
 0x14e   : > { %v1283_v39 = vpop.f32.mrf.mxu1  ;;  %v4714_v12 = vrot.slane %v4712_v14, 4  ;;  %v4715_v63 = vrot.slane %v11582_v35, 5  ;;  %v5466_v0 = vmul.f32 %v5146_v36, %v11603_v6  ;;  %5541 = vrot.lane.b32.xlu0 %v5465_v62, %s9193_s8  ;;  %v5467_v43 = vmul.f32 %v5147_v56, %v11618_v42  ;;  %v11654_v36 = vld [vmem:[%s11200_s26 + $0x80] sm:$0xff] }
 0x14f   : > { %v11632_v48 = vadd.f32 %v8295_v22, %v1292_v21  ;;  %v1284_v53 = vadd.f32 %v1283_v39, %v13495_v45  ;;  %v1730_v10 = vpop.f32.mrf.mxu0  ;;  %v13496_v22 = vsel %vm9314_vm4, %v11447_v40, %v11387_v60  ;;  %v13497_v27 = vsel %vm9314_vm4, %v11419_v55, %v11352_v3  ;;  %v5149_v56 = vld [vmem:[%s13281_s4 + $0x80] sm:$0xff]  ;;  %v13498_v21 = vld [vmem:[#allocation17_spill] sm:$0xff] }
 0x150   : > { %v8258_v35 = vpop.f32.mrf.mxu1  ;;  %v7825_v25 = vcombine.low %v13497_v27, %v13496_v22  ;;  %v7826_v46 = vcombine.low %v4193_v16, %v4203_v29  ;;  %v4212_v62 = vrot.slane %v4211_v17, 4  ;;  %v4222_v40 = vrot.slane %v4221_v5, 4  ;;  %v13499_v17 = vld [vmem:[#allocation18_spill] sm:$0xff] }
 0x151   : > { %v11659_v26 = vadd.f32 %v1727_v9, %v1284_v53  ;;  %v1295_v39 = vadd.f32 %v8258_v35, %v13498_v21  ;;  %v8299_v60 = vpop.f32.mrf.mxu0  ;;  %v4226_v45 = vrot.slane %v4224_v7, 5  ;;  %v4713_v55 = vsel %vm9606_vm7, %v7878_v52, %v4712_v14  ;;  %5543 = vrot.lane.b32.xlu1 %v5466_v0, %s9193_s8  ;;  %v11686_v52 = vld [vmem:[%s11200_s26 + $0x90] sm:$0xff]  ;;  %v13500_v0 = vld [vmem:[#allocation19_spill] sm:$0xff]  ;;  %v11705_v21 = vld [vmem:[%s11200_s26 + $0x98] sm:$0xff] }
 0x152   : > { %8526 = vmatmul.mubr.msk.bf16.gmra.mxu0 %vm809_vm3, %v7897_v18  ;;  %v1286_v3 = vpop.f32.mrf.mxu1  ;;  %v4716_v16 = vsel %vm9606_vm7, %v4714_v12, %v4715_v63  ;;  %v5468_v9 = vmul.f32 %v5148_v32, %v11638_v51  ;;  %5545 = vrot.lane.b32.xlu0 %v5467_v43, %s9193_s8  ;;  %v5469_v7 = vmul.f32 %v5149_v56, %v11654_v36  ;;  %v5151_v12 = vld [vmem:[%s13281_s4 + $0x90] sm:$0xff] }
 0x153   : > { %8529 = vmatprep.mubr.msk.bf16.mxu0 %vm809_vm3, %v7898_v30  ;;  %v11670_v29 = vadd.f32 %v8296_v49, %v1295_v39  ;;  %v1287_v18 = vadd.f32 %v1286_v3, %v13499_v17  ;;  %v1743_v5 = vpop.f32.mrf.mxu0  ;;  %v11676_v30 = vld [vmem:[%s11200_s26 + $0x88] sm:$0xff]  ;;  %v4217_v49 = vsel %vm9314_vm4, %v4212_v62, %v11584_v38  ;;  %v4227_v32 = vsel %vm9314_vm4, %v4222_v40, %v4226_v45  ;;  %v11711_v40 = vld [vmem:[%s11200_s26 + $0xa0] sm:$0xff]  ;;  %v13502_v3 = vld [vmem:[#allocation21_spill] sm:$0xff] }
 0x154   : > { %v8261_v14 = vpop.f32.mrf.mxu1  ;;  %8488 = vmatmul.mubr.msk.bf16.gmra.mxu1 %vm809_vm3, %v7825_v25  ;;  %v7899_v35 = vcombine.low %v4713_v55, %v4716_v16  ;;  %v5470_v22 = vmul.f32 %v5150_v58, %v11676_v30  ;;  %v13501_v25 = vld [vmem:[#allocation20_spill] sm:$0xff]  ;;  %v5471_v56 = vmul.f32 %v5151_v12, %v11686_v52  ;;  %v7827_v39 = vcombine.low %v4217_v49, %v4227_v32  ;;  %v11728_v49 = vld [vmem:[%s11200_s26 + $0xa8] sm:$0xff] }
 0x155   : > { %v11691_v63 = vadd.f32 %v1730_v10, %v1287_v18  ;;  %v1308_v53 = vadd.f32 %v8261_v14, %v13500_v0  ;;  %v8300_v43 = vpop.f32.mrf.mxu0  ;;  %8491 = vmatprep.mubr.msk.bf16.mxu1 %vm809_vm3, %v7826_v46  ;;  %5547 = vrot.lane.b32.xlu1 %v5468_v9, %s9193_s8  ;;  %v5472_v17 = vmul.f32 %v5152_v33, %v11705_v21  ;;  %v5154_v12 = vld [vmem:[%s13281_s4 + $0xa8] sm:$0xff] }
 0x156   : > { %v1299_v38 = vpop.f32.mrf.mxu1  ;;  %5549 = vrot.lane.b32.xlu0 %v5469_v7, %s9193_s8  ;;  %v13503_v7 = vld [vmem:[#allocation22_spill] sm:$0xff]  ;;  %13504 = vst [vmem:[#allocation11_spill] sm:$0xff] %v11728_v49  ;;  %v13507_v33 = vld [vmem:[#allocation3_spill] sm:$0xff] }
 0x157   : > { %v11699_v27 = vadd.f32 %v8299_v60, %v1308_v53  ;;  %v1300_v10 = vadd.f32 %v1299_v38, %v13501_v25  ;;  %v1746_v62 = vpop.f32.mrf.mxu0  ;;  %v5153_v60 = vld [vmem:[%s13281_s4 + $0xa0] sm:$0xff]  ;;  %v11735_v53 = vld [vmem:[%s11200_s26 + $0xb0] sm:$0xff] }
 0x158   : > { %v8262_v46 = vpop.f32.mrf.mxu1  ;;  %13505 = vst [vmem:[#allocation28_spill] sm:$0xff] %v11735_v53 }
 0x159   : > { %v11716_v45 = vadd.f32 %v1743_v5, %v1300_v10  ;;  %v1311_v55 = vadd.f32 %v8262_v46, %v13502_v3  ;;  %v8303_v16 = vpop.f32.mrf.mxu0  ;;  %5551 = vrot.lane.b32.xlu1 %v5470_v22, %s9193_s8  ;;  %v5473_v5 = vmul.f32 %v5153_v60, %v11711_v40  ;;  %v5474_v10 = vmul.f32 %v5154_v12, %v11728_v49  ;;  %v11751_v3 = vld [vmem:[%s11200_s26 + $0xb8] sm:$0xff] }
 0x15a   : > { %8530 = vmatmul.mubr.msk.bf16.gmra.mxu0 %vm809_vm3, %v7899_v35  ;;  %v1302_v9 = vpop.f32.mrf.mxu1  ;;  %5553 = vrot.lane.b32.xlu0 %v5471_v56, %s9193_s8  ;;  %v13506_v35 = vld [vmem:[#allocation25_spill] sm:$0xff]  ;;  %13508 = vst [vmem:[#allocation5_spill] sm:$0xff] %v11751_v3 }
 0x15b   : > { %v11722_v18 = vadd.f32 %v8300_v43, %v1311_v55  ;;  %v1303_v58 = vadd.f32 %v1302_v9, %v13503_v7  ;;  %v1759_v14 = vpop.f32.mrf.mxu0  ;;  %v5155_v43 = vld [vmem:[%s13281_s4 + $0xb0] sm:$0xff]  ;;  %v11757_v9 = vld [vmem:[%s11200_s26 + $0xc0] sm:$0xff] }
 0x15c   : > { %v8265_v0 = vpop.f32.mrf.mxu1  ;;  %8492 = vmatmul.mubr.msk.bf16.gmra.mxu1 %vm809_vm3, %v7827_v39  ;;  %v5475_v60 = vmul.f32 %v5155_v43, %v11735_v53  ;;  %13509 = vst [vmem:[#allocation10_spill] sm:$0xff] %v11757_v9  ;;  %v13510_v7 = vld [vmem:[#allocation26_spill] sm:$0xff]  ;;  %v11773_v53 = vld [vmem:[%s11200_s26 + $0xc8] sm:$0xff] }
 0x15d   : > { %v11740_v32 = vadd.f32 %v1746_v62, %v1303_v58  ;;  %v1324_v38 = vadd.f32 %v8265_v0, %v13506_v35  ;;  %v8304_v22 = vpop.f32.mrf.mxu0  ;;  %5555 = vrot.lane.b32.xlu1 %v5472_v17, %s9193_s8  ;;  %v5156_v62 = vld [vmem:[%s13281_s4 + $0xb8] sm:$0xff]  ;;  %v13512_v35 = vld [vmem:[#allocation27_spill] sm:$0xff]  ;;  %13513 = vst [vmem:[#allocation9_spill] sm:$0xff] %v11773_v53 }
 0x15e   : > { %v1315_v25 = vpop.f32.mrf.mxu1  ;;  %5557 = vrot.lane.b32.xlu0 %v5473_v5, %s9193_s8  ;;  %v5476_v0 = vmul.f32 %v5156_v62, %v11751_v3 }
 0x15f   : > { %v11745_v56 = vadd.f32 %v8303_v16, %v1324_v38  ;;  %v1316_v46 = vadd.f32 %v1315_v25, %v13507_v33  ;;  %v1762_v39 = vpop.f32.mrf.mxu0  ;;  %v5157_v16 = vld [vmem:[%s13281_s4 + $0xc0] sm:$0xff] }
 0x160   : > { %v8266_v55 = vpop.f32.mrf.mxu1  ;;  %v5477_v33 = vmul.f32 %v5157_v16, %v11757_v9 }
 0x161   : > { %v11762_v17 = vadd.f32 %v1759_v14, %v1316_v46  ;;  %v1327_v58 = vadd.f32 %v8266_v55, %v13510_v7  ;;  %v8351_v5 = vpop.f32.mrf.mxu0  ;;  %5559 = vrot.lane.b32.xlu1 %v5474_v10, %s9193_s8  ;;  %v5158_v14 = vld [vmem:[%s13281_s4 + $0xc8] sm:$0xff]  ;;  %v11779_v10 = vld [vmem:[%s11200_s26 + $0xd0] sm:$0xff] }
 0x162   : > { %v1318_v12 = vpop.f32.mrf.mxu1  ;;  %5561 = vrot.lane.b32.xlu0 %v5475_v60, %s9193_s8  ;;  %13514 = vst [vmem:[#allocation14_spill] sm:$0xff] %v11779_v10  ;;  %v13516_v60 = vld [vmem:[#allocation4_spill] sm:$0xff] }
 0x163   : > { %v11767_v43 = vadd.f32 %v8304_v22, %v1327_v58  ;;  %v1319_v38 = vadd.f32 %v1318_v12, %v13512_v35  ;;  %v2770_v25 = vpop.f32.mrf.mxu0  ;;  %v5159_v22 = vld [vmem:[%s13281_s4 + $0xd0] sm:$0xff]  ;;  %v5478_v58 = vmul.f32 %v5158_v14, %v11773_v53  ;;  %v13518_v35 = vld [vmem:[#allocation7_spill] sm:$0xff] }
 0x164   : > { %v8313_v46 = vpop.f32.mrf.mxu1  ;;  %v5479_v49 = vmul.f32 %v5159_v22, %v11779_v10 }
 0x165   : > { %13511 = vst [vmem:[#allocation2_spill] sm:$0xff] %v11767_v43  ;;  %v11784_v62 = vadd.f32 %v1762_v39, %v1319_v38  ;;  %v2154_v55 = vadd.f32 %v8313_v46, %v13516_v60  ;;  %v8352_v16 = vpop.f32.mrf.mxu0  ;;  %5563 = vrot.lane.b32.xlu1 %v5476_v0, %s9193_s8  ;;  %v11795_v43 = vld [vmem:[%s11200_s26 + $0xd8] sm:$0xff]  ;;  %v11801_v0 = vld [vmem:[%s11200_s26 + $0xe0] sm:$0xff] }
 0x166   : > { %v2025_v7 = vpop.f32.mrf.mxu1  ;;  %5565 = vrot.lane.b32.xlu0 %v5477_v33, %s9193_s8  ;;  %v5160_v39 = vld [vmem:[%s13281_s4 + $0xd8] sm:$0xff]  ;;  %13519 = vst [vmem:[#allocation18_spill] sm:$0xff] %v11801_v0 }
 0x167   : > { %13515 = vst [vmem:[#allocation16_spill] sm:$0xff] %v11784_v62  ;;  %v11789_v12 = vadd.f32 %v8351_v5, %v2154_v55  ;;  %v2152_v9 = vadd.f32 %v2025_v7, %v13518_v35  ;;  %v2773_v3 = vpop.f32.mrf.mxu0  ;;  %v5161_v5 = vld [vmem:[%s13281_s4 + $0xe0] sm:$0xff]  ;;  %v13521_v33 = vld [vmem:[#allocation29_spill] sm:$0xff]  ;;  %v5480_v55 = vmul.f32 %v5160_v39, %v11795_v43  ;;  %v13522_v35 = vld [vmem:[#allocation8_spill] sm:$0xff] }
 0x168   : > { %v8314_v38 = vpop.f32.mrf.mxu1  ;;  %v5481_v53 = vmul.f32 %v5161_v5, %v11801_v0  ;;  %v11817_v62 = vld [vmem:[%s11200_s26 + $0xe8] sm:$0xff]  ;;  %v11839_v0 = vld [vmem:[%s11200_s26 + $0xf8] sm:$0xff] }
 0x169   : > { %13517 = vst [vmem:[#allocation17_spill] sm:$0xff] %v11789_v12  ;;  %v11806_v14 = vadd.f32 %v2770_v25, %v2152_v9  ;;  %v2155_v46 = vadd.f32 %v8314_v38, %v13521_v33  ;;  %v8355_v22 = vpop.f32.mrf.mxu0  ;;  %5567 = vrot.lane.b32.xlu1 %v5478_v58, %s9193_s8  ;;  %v5162_v9 = vld [vmem:[%s13281_s4 + $0xe8] sm:$0xff]  ;;  %v11823_v58 = vld [vmem:[%s11200_s26 + $0xf0] sm:$0xff] }
 0x16a   : > { %v2028_v60 = vpop.f32.mrf.mxu1  ;;  %5569 = vrot.lane.b32.xlu0 %v5479_v49, %s9193_s8  ;;  %v5482_v33 = vmul.f32 %v5162_v9, %v11817_v62 }
 0x16b   : > { %13520 = vst [vmem:[#allocation19_spill] sm:$0xff] %v11806_v14  ;;  %v11811_v7 = vadd.f32 %v8352_v16, %v2155_v46  ;;  %v2153_v12 = vadd.f32 %v2028_v60, %v13522_v35  ;;  %v2786_v10 = vpop.f32.mrf.mxu0  ;;  %v5163_v16 = vld [vmem:[%s13281_s4 + $0xf0] sm:$0xff] }
 0x16c   : > { %v8317_v25 = vpop.f32.mrf.mxu1  ;;  %v5483_v14 = vmul.f32 %v5163_v16, %v11823_v58 }
 0x16d   : > { %v11828_v39 = vadd.f32 %v2773_v3, %v2153_v12  ;;  %v2158_v49 = vadd.f32 %v8317_v25, %v11313_v4  ;;  %v8356_v38 = vpop.f32.mrf.mxu0  ;;  %5571 = vrot.lane.b32.xlu1 %v5480_v55, %s9193_s8  ;;  %v5164_v4 = vld [vmem:[%s13281_s4 + $0xf8] sm:$0xff] }
 0x16e   : > { %v2041_v5 = vpop.f32.mrf.mxu1  ;;  %5573 = vrot.lane.b32.xlu0 %v5481_v53, %s9193_s8 }
 0x16f   : > { %v11833_v46 = vadd.f32 %v8355_v22, %v2158_v49  ;;  %v2156_v60 = vadd.f32 %v2041_v5, %v11324_v44  ;;  %v2789_v35 = vpop.f32.mrf.mxu0  ;;  %v5484_v44 = vmul.f32 %v5164_v4, %v11839_v0  ;;  %v13523_v4 = vld [vmem:[#allocation12_spill] sm:$0xff] }
 0x170   : > { %v8318_v3 = vpop.f32.mrf.mxu1 }
 0x171   : > { %v11844_v12 = vadd.f32 %v2786_v10, %v2156_v60  ;;  %v2159_v55 = vadd.f32 %v8318_v3, %v11343_v19  ;;  %v8359_v22 = vpop.f32.mrf.mxu0  ;;  %5575 = vrot.lane.b32.xlu1 %v5482_v33, %s9193_s8 }
 0x172   : > { %v2044_v9 = vpop.f32.mrf.mxu1  ;;  %5577 = vrot.lane.b32.xlu0 %v5483_v14, %s9193_s8 }
 0x173   : > { %v11849_v53 = vadd.f32 %v8356_v38, %v2159_v55  ;;  %v2157_v25 = vadd.f32 %v2044_v9, %v11355_v41  ;;  %v2802_v16 = vpop.f32.mrf.mxu0 }
 0x174   : > { %v8321_v49 = vpop.f32.mrf.mxu1 }
 0x175   : > { %v11853_v5 = vadd.f32 %v2789_v35, %v2157_v25  ;;  %v2162_v10 = vadd.f32 %v8321_v49, %v11374_v61  ;;  %v8360_v60 = vpop.f32.mrf.mxu0  ;;  %5579 = vrot.lane.b32.xlu1 %v5484_v44, %s9193_s8 }
 0x176   : > { %v2057_v19 = vpop.f32.mrf.mxu1  ;;  %5901 = vrot.lane.b32.xlu0 %v13523_v4, %s9193_s8 }
 0x177   : > { %v11857_v3 = vadd.f32 %v8359_v22, %v2162_v10  ;;  %v2160_v33 = vadd.f32 %v2057_v19, %v11396_v54  ;;  %v2805_v38 = vpop.f32.mrf.mxu0  ;;  %v13524_v54 = vld [vmem:[#allocation6_spill] sm:$0xff] }
 0x178   : > { %v8322_v41 = vpop.f32.mrf.mxu1 }
 0x179   : > { %v11862_v55 = vadd.f32 %v2802_v16, %v2160_v33  ;;  %v2163_v14 = vadd.f32 %v8322_v41, %v11426_v57  ;;  %v8363_v35 = vpop.f32.mrf.mxu0  ;;  %5903 = vrot.lane.b32.xlu1 %v11284_v28, %s9193_s8 }
 0x17a   : > { %v2060_v9 = vpop.f32.mrf.mxu1  ;;  %5905 = vrot.lane.b32.xlu0 %v13524_v54, %s9193_s8 }
 0x17b   : > { %v11867_v61 = vadd.f32 %v8360_v60, %v2163_v14  ;;  %v2161_v22 = vadd.f32 %v2060_v9, %v11442_v47  ;;  %v2818_v44 = vpop.f32.mrf.mxu0 }
 0x17c   : > { %v8325_v25 = vpop.f32.mrf.mxu1 }
 0x17d   : > { %v11872_v49 = vadd.f32 %v2805_v38, %v2161_v22  ;;  %v2166_v16 = vadd.f32 %v8325_v25, %v11466_v37  ;;  %v8364_v10 = vpop.f32.mrf.mxu0  ;;  %5907 = vrot.lane.b32.xlu1 %v11391_v34, %s9193_s8  ;;  %v13525_v22 = vld [vmem:[#allocation13_spill] sm:$0xff] }
 0x17e   : > { %v2073_v57 = vpop.f32.mrf.mxu1  ;;  %5909 = vrot.lane.b32.xlu0 %v11408_v24, %s9193_s8 }
 0x17f   : > { %v11877_v19 = vadd.f32 %v8363_v35, %v2166_v16  ;;  %v2164_v28 = vadd.f32 %v2073_v57, %v11490_v11  ;;  %v2821_v60 = vpop.f32.mrf.mxu0  ;;  %v13527_v57 = vld [vmem:[#allocation23_spill] sm:$0xff] }
 0x180   : > { %v8326_v47 = vpop.f32.mrf.mxu1 }
 0x181   : > { %v11882_v33 = vadd.f32 %v2818_v44, %v2164_v28  ;;  %v2167_v38 = vadd.f32 %v8326_v47, %v11522_v15  ;;  %v8367_v4 = vpop.f32.mrf.mxu0  ;;  %5911 = vrot.lane.b32.xlu1 %v11437_v13, %s9193_s8 }
 0x182   : > { %v2076_v37 = vpop.f32.mrf.mxu1  ;;  %5913 = vrot.lane.b32.xlu0 %v11454_v23, %s9193_s8 }
 0x183   : > { %v11887_v41 = vadd.f32 %v8364_v10, %v2167_v38  ;;  %v2165_v34 = vadd.f32 %v2076_v37, %v11545_v20  ;;  %v2834_v14 = vpop.f32.mrf.mxu0  ;;  %v13526_v20 = vld [vmem:[#allocation15_spill] sm:$0xff] }
 0x184   : > { %v8329_v11 = vpop.f32.mrf.mxu1 }
 0x185   : > { %v11892_v24 = vadd.f32 %v2821_v60, %v2165_v34  ;;  %v2170_v35 = vadd.f32 %v8329_v11, %v11557_v2  ;;  %v8368_v9 = vpop.f32.mrf.mxu0  ;;  %5915 = vrot.lane.b32.xlu1 %v13525_v22, %s9193_s8 }
 0x186   : > { %v2089_v15 = vpop.f32.mrf.mxu1  ;;  %5917 = vrot.lane.b32.xlu0 %v13526_v20, %s9193_s8 }
 0x187   : > { %v11897_v44 = vadd.f32 %v8367_v4, %v2170_v35  ;;  %v2168_v13 = vadd.f32 %v2089_v15, %v11574_v31  ;;  %v2837_v54 = vpop.f32.mrf.mxu0  ;;  %v13528_v31 = vld [vmem:[#allocation24_spill] sm:$0xff] }
 0x188   : > { %v8330_v25 = vpop.f32.mrf.mxu1 }
 0x189   : > { %v11902_v23 = vadd.f32 %v2834_v14, %v2168_v13  ;;  %v2171_v16 = vadd.f32 %v8330_v25, %v11595_v50  ;;  %v8371_v10 = vpop.f32.mrf.mxu0  ;;  %5919 = vrot.lane.b32.xlu1 %v13527_v57, %s9193_s8 }
 0x18a   : > { %v2092_v2 = vpop.f32.mrf.mxu1  ;;  %5921 = vrot.lane.b32.xlu0 %v13528_v31, %s9193_s8 }
 0x18b   : > { %v11907_v28 = vadd.f32 %v8368_v9, %v2171_v16  ;;  %v2169_v60 = vadd.f32 %v2092_v2, %v11623_v1  ;;  %v2850_v47 = vpop.f32.mrf.mxu0 }
 0x18c   : > { %v8333_v38 = vpop.f32.mrf.mxu1 }
 0x18d   : > { %v11912_v4 = vadd.f32 %v2837_v54, %v2169_v60  ;;  %v2174_v37 = vadd.f32 %v8333_v38, %v11632_v48  ;;  %v8372_v34 = vpop.f32.mrf.mxu0  ;;  %5923 = vrot.lane.b32.xlu1 %v11563_v59, %s9193_s8 }
 0x18e   : > { %v2105_v50 = vpop.f32.mrf.mxu1  ;;  %5925 = vrot.lane.b32.xlu0 %v11569_v8, %s9193_s8 }
 0x18f   : > { %v11917_v14 = vadd.f32 %v8371_v10, %v2174_v37  ;;  %v2172_v11 = vadd.f32 %v2105_v50, %v11659_v26  ;;  %v2853_v35 = vpop.f32.mrf.mxu0  ;;  %v13529_v50 = vld [vmem:[#allocation2_spill] sm:$0xff] }
 0x190   : > { %v8334_v1 = vpop.f32.mrf.mxu1 }
 0x191   : > { %v11922_v9 = vadd.f32 %v2850_v47, %v2172_v11  ;;  %v2175_v15 = vadd.f32 %v8334_v1, %v11670_v29  ;;  %v8375_v22 = vpop.f32.mrf.mxu0  ;;  %5927 = vrot.lane.b32.xlu1 %v11603_v6, %s9193_s8  ;;  %v13530_v1 = vld [vmem:[#allocation11_spill] sm:$0xff] }
 0x192   : > { %v2108_v48 = vpop.f32.mrf.mxu1  ;;  %5929 = vrot.lane.b32.xlu0 %v11618_v42, %s9193_s8 }
 0x193   : > { %v11927_v13 = vadd.f32 %v8372_v34, %v2175_v15  ;;  %v2173_v59 = vadd.f32 %v2108_v48, %v11691_v63  ;;  %v2866_v54 = vpop.f32.mrf.mxu0  ;;  %v13531_v15 = vld [vmem:[#allocation16_spill] sm:$0xff] }
 0x194   : > { %v8337_v26 = vpop.f32.mrf.mxu1  ;;  %v13532_v48 = vld [vmem:[#allocation28_spill] sm:$0xff] }
 0x195   : > { %v11932_v8 = vadd.f32 %v2853_v35, %v2173_v59  ;;  %v2178_v20 = vadd.f32 %v8337_v26, %v11699_v27  ;;  %v8376_v25 = vpop.f32.mrf.mxu0  ;;  %5931 = vrot.lane.b32.xlu1 %v11638_v51, %s9193_s8 }
 0x196   : > { %v2121_v29 = vpop.f32.mrf.mxu1  ;;  %5933 = vrot.lane.b32.xlu0 %v11654_v36, %s9193_s8 }
 0x197   : > { %v11937_v16 = vadd.f32 %v8375_v22, %v2178_v20  ;;  %v2176_v6 = vadd.f32 %v2121_v29, %v11716_v45  ;;  %v2869_v10 = vpop.f32.mrf.mxu0  ;;  %v13533_v20 = vld [vmem:[#allocation5_spill] sm:$0xff]  ;;  %v13534_v29 = vld [vmem:[#allocation10_spill] sm:$0xff] }
 0x198   : > { %v8338_v63 = vpop.f32.mrf.mxu1 }
 0x199   : > { %v11942_v42 = vadd.f32 %v2866_v54, %v2176_v6  ;;  %v2179_v2 = vadd.f32 %v8338_v63, %v11722_v18  ;;  %v8379_v57 = vpop.f32.mrf.mxu0  ;;  %5935 = vrot.lane.b32.xlu1 %v11676_v30, %s9193_s8 }
 0x19a   : > { %v2124_v27 = vpop.f32.mrf.mxu1  ;;  %5937 = vrot.lane.b32.xlu0 %v11686_v52, %s9193_s8 }
 0x19b   : > { %v11947_v60 = vadd.f32 %v8376_v25, %v2179_v2  ;;  %v2177_v51 = vadd.f32 %v2124_v27, %v11740_v32  ;;  %v2882_v47 = vpop.f32.mrf.mxu0 }
 0x19c   : > { %v8341_v45 = vpop.f32.mrf.mxu1 }
 0x19d   : > { %v11952_v36 = vadd.f32 %v2869_v10, %v2177_v51  ;;  %v2182_v31 = vadd.f32 %v8341_v45, %v11745_v56  ;;  %v8380_v38 = vpop.f32.mrf.mxu0  ;;  %5939 = vrot.lane.b32.xlu1 %v11705_v21, %s9193_s8  ;;  %v13536_v45 = vld [vmem:[#allocation14_spill] sm:$0xff] }
 0x19e   : > { %v2137_v18 = vpop.f32.mrf.mxu1  ;;  %5941 = vrot.lane.b32.xlu0 %v11711_v40, %s9193_s8 }
 0x19f   : > { %v11957_v37 = vadd.f32 %v8379_v57, %v2182_v31  ;;  %v2180_v30 = vadd.f32 %v2137_v18, %v11762_v17  ;;  %v2885_v34 = vpop.f32.mrf.mxu0  ;;  %v13535_v57 = vld [vmem:[#allocation9_spill] sm:$0xff] }
 0x1a0   : > { %v8342_v32 = vpop.f32.mrf.mxu1 }
 0x1a1   : > { %v11962_v52 = vadd.f32 %v2882_v47, %v2180_v30  ;;  %v2183_v11 = vadd.f32 %v8342_v32, %v13529_v50  ;;  %v11965_v35 = vpop.f32.mrf.mxu0  ;;  %5943 = vrot.lane.b32.xlu1 %v13530_v1, %s9193_s8 }
 0x1a2   : > { %v2140_v56 = vpop.f32.mrf.mxu1  ;;  %5945 = vrot.lane.b32.xlu0 %v13532_v48, %s9193_s8 }
 0x1a3   : > { %v11969_v21 = vadd.f32 %v8380_v38, %v2183_v11  ;;  %v2181_v22 = vadd.f32 %v2140_v56, %v13531_v15  ;;  %v11972_v17 = vpop.f32.mrf.mxu0 }
 0x1a4   : > { %v11976_v40 = vpop.f32.mrf.mxu1 }
 0x1a5   : > { %v11978_v59 = vadd.f32 %v2885_v34, %v2181_v22  ;;  %v8428_v54 = vpop.f32.mrf.mxu0  ;;  %5947 = vrot.lane.b32.xlu1 %v13533_v20, %s9193_s8 }
 0x1a6   : > { %v11980_v26 = vpop.f32.mrf.mxu1  ;;  %5949 = vrot.lane.b32.xlu0 %v13534_v29, %s9193_s8 }
 0x1a7   : > { %v3640_v25 = vpop.f32.mrf.mxu0 }
 0x1a8   : > { %v8390_v6 = vpop.f32.mrf.mxu1 }
 0x1a9   : > { %v3389_v10 = vadd.f32 %v8390_v6, %v11811_v7  ;;  %v8431_v63 = vpop.f32.mrf.mxu0  ;;  %5951 = vrot.lane.b32.xlu1 %v13535_v57, %s9193_s8 }
 0x1aa   : > { %v3262_v2 = vpop.f32.mrf.mxu1  ;;  %5953 = vrot.lane.b32.xlu0 %v13536_v45, %s9193_s8 }
 0x1ab   : > { %v11989_v27 = vadd.f32 %v8428_v54, %v3389_v10  ;;  %v3387_v51 = vadd.f32 %v3262_v2, %v11828_v39  ;;  %v3653_v47 = vpop.f32.mrf.mxu0  ;;  %v13537_v39 = vld [vmem:[#allocation18_spill] sm:$0xff] }
 0x1ac   : > { %v8393_v31 = vpop.f32.mrf.mxu1 }
 0x1ad   : > { %v11994_v38 = vadd.f32 %v3640_v25, %v3387_v51  ;;  %v3392_v18 = vadd.f32 %v8393_v31, %v11833_v46  ;;  %v8432_v30 = vpop.f32.mrf.mxu0  ;;  %5955 = vrot.lane.b32.xlu1 %v11795_v43, %s9193_s8 }
 0x1ae   : > { %v3275_v7 = vpop.f32.mrf.mxu1  ;;  %5957 = vrot.lane.b32.xlu0 %v13537_v39, %s9193_s8 }
 0x1af   : > { %v11999_v34 = vadd.f32 %v8431_v63, %v3392_v18  ;;  %v3390_v32 = vadd.f32 %v3275_v7, %v11844_v12  ;;  %v3656_v50 = vpop.f32.mrf.mxu0 }
 0x1b0   : > { %v8394_v11 = vpop.f32.mrf.mxu1 }
 0x1b1   : > { %v12004_v56 = vadd.f32 %v3653_v47, %v3390_v32  ;;  %v3393_v1 = vadd.f32 %v8394_v11, %v11849_v53  ;;  %v8435_v15 = vpop.f32.mrf.mxu0  ;;  %5959 = vrot.lane.b32.xlu1 %v11817_v62, %s9193_s8 }
 0x1b2   : > { %v3278_v46 = vpop.f32.mrf.mxu1  ;;  %5961 = vrot.lane.b32.xlu0 %v11823_v58, %s9193_s8 }
 0x1b3   : > { %v12009_v22 = vadd.f32 %v8432_v30, %v3393_v1  ;;  %v3391_v43 = vadd.f32 %v3278_v46, %v11853_v5  ;;  %v3669_v48 = vpop.f32.mrf.mxu0 }
 0x1b4   : > { %v8397_v12 = vpop.f32.mrf.mxu1 }
 0x1b5   : > { %v12014_v54 = vadd.f32 %v3656_v50, %v3391_v43  ;;  %v3396_v20 = vadd.f32 %v8397_v12, %v11857_v3  ;;  %v8436_v25 = vpop.f32.mrf.mxu0  ;;  %5963 = vrot.lane.b32.xlu1 %v11839_v0, %s9193_s8 }
 0x1b6   : > { %v3291_v53 = vpop.f32.mrf.mxu1 }
 0x1b7   : > { %v12019_v29 = vadd.f32 %v8435_v15, %v3396_v20  ;;  %v3394_v62 = vadd.f32 %v3291_v53, %v11862_v55  ;;  %v3672_v6 = vpop.f32.mrf.mxu0  ;;  %v12031_v55 = vpop.permute.xlu0 %5517 }
 0x1b8   : > { %v8398_v5 = vpop.f32.mrf.mxu1 }
 0x1b9   : > { %v12022_v10 = vadd.f32 %v3669_v48, %v3394_v62  ;;  %v3397_v58 = vadd.f32 %v8398_v5, %v11867_v61  ;;  %v8439_v63 = vpop.f32.mrf.mxu0  ;;  %v12050_v62 = vpop.permute.xlu1 %5521 }
 0x1ba   : > { %v3294_v2 = vpop.f32.mrf.mxu1 }
 0x1bb   : > { %v12025_v57 = vadd.f32 %v8436_v25, %v3397_v58  ;;  %v3395_v3 = vadd.f32 %v3294_v2, %v11872_v49  ;;  %v3685_v51 = vpop.f32.mrf.mxu0  ;;  %v12042_v46 = vpop.permute.xlu0 %5519 }
 0x1bc   : > { %v8401_v47 = vpop.f32.mrf.mxu1 }
 0x1bd   : > { %v12028_v45 = vadd.f32 %v3672_v6, %v3395_v3  ;;  %v3400_v0 = vadd.f32 %v8401_v47, %v11877_v19  ;;  %v8440_v31 = vpop.f32.mrf.mxu0 }
 0x1be   : > { %v3307_v18 = vpop.f32.mrf.mxu1 }
 0x1bf   : > { %v12033_v30 = vadd.f32 %v8439_v63, %v3400_v0  ;;  %v3398_v61 = vadd.f32 %v3307_v18, %v11882_v33  ;;  %v3688_v7 = vpop.f32.mrf.mxu0  ;;  %v12055_v63 = vpop.permute.xlu0 %5525 }
 0x1c0   : > { %v8402_v32 = vpop.f32.mrf.mxu1 }
 0x1c1   : > { %v12036_v50 = vadd.f32 %v3685_v51, %v3398_v61  ;;  %v3401_v49 = vadd.f32 %v8402_v32, %v11887_v41  ;;  %v8443_v39 = vpop.f32.mrf.mxu0 }
 0x1c2   : > { %v3310_v11 = vpop.f32.mrf.mxu1 }
 0x1c3   : > { %v12039_v1 = vadd.f32 %v8440_v31, %v3401_v49  ;;  %v3399_v19 = vadd.f32 %v3310_v11, %v11892_v24  ;;  %v3701_v15 = vpop.f32.mrf.mxu0  ;;  %v12063_v31 = vpop.permute.xlu1 %5523 }
 0x1c4   : > { %v8405_v43 = vpop.f32.mrf.mxu1  ;;  %v12068_v49 = vpop.permute.xlu0 %5529 }
 0x1c5   : > { %v12044_v48 = vadd.f32 %v3688_v7, %v3399_v19  ;;  %v3404_v33 = vadd.f32 %v8405_v43, %v11897_v44  ;;  %v8444_v12 = vpop.f32.mrf.mxu0 }
 0x1c6   : > { %v3323_v20 = vpop.f32.mrf.mxu1 }
 0x1c7   : > { %v12047_v25 = vadd.f32 %v8443_v39, %v3404_v33  ;;  %v3402_v41 = vadd.f32 %v3323_v20, %v11902_v23  ;;  %v3704_v53 = vpop.f32.mrf.mxu0  ;;  %v12076_v33 = vpop.permute.xlu1 %5527 }
 0x1c8   : > { %v8406_v6 = vpop.f32.mrf.mxu1  ;;  %13538 = vst [vmem:[#allocation20_spill] sm:$0xff] %v12076_v33 }
 0x1c9   : > { %v12052_v5 = vadd.f32 %v3701_v15, %v3402_v41  ;;  %v3405_v24 = vadd.f32 %v8406_v6, %v11907_v28  ;;  %v8447_v58 = vpop.f32.mrf.mxu0 }
 0x1ca   : > { %v3326_v2 = vpop.f32.mrf.mxu1 }
 0x1cb   : > { %v12057_v3 = vadd.f32 %v8444_v12, %v3405_v24  ;;  %v3403_v44 = vadd.f32 %v3326_v2, %v11912_v4  ;;  %v3717_v51 = vpop.f32.mrf.mxu0 }
 0x1cc   : > { %v8409_v47 = vpop.f32.mrf.mxu1 }
 0x1cd   : > { %v12060_v0 = vadd.f32 %v3704_v53, %v3403_v44  ;;  %v3408_v23 = vadd.f32 %v8409_v47, %v11917_v14  ;;  %v8448_v18 = vpop.f32.mrf.mxu0  ;;  %v12081_v53 = vpop.permute.xlu0 %5533 }
 0x1ce   : > { %v3339_v61 = vpop.f32.mrf.mxu1  ;;  %13539 = vst [vmem:[#allocation21_spill] sm:$0xff] %v12081_v53 }
 0x1cf   : > { %v12065_v7 = vadd.f32 %v8447_v58, %v3408_v23  ;;  %v3406_v28 = vadd.f32 %v3339_v61, %v11922_v9  ;;  %v3720_v32 = vpop.f32.mrf.mxu0 }
 0x1d0   : > { %v8410_v39 = vpop.f32.mrf.mxu1 }
 0x1d1   : > { %v12070_v11 = vadd.f32 %v3717_v51, %v3406_v28  ;;  %v3409_v4 = vadd.f32 %v8410_v39, %v11927_v13  ;;  %v8451_v19 = vpop.f32.mrf.mxu0  ;;  %v12094_v28 = vpop.permute.xlu0 %5537 }
 0x1d2   : > { %v3342_v15 = vpop.f32.mrf.mxu1 }
 0x1d3   : > { %v12073_v43 = vadd.f32 %v8448_v18, %v3409_v4  ;;  %v3407_v14 = vadd.f32 %v3342_v15, %v11932_v8  ;;  %v3733_v12 = vpop.f32.mrf.mxu0  ;;  %v12088_v8 = vpop.permute.xlu1 %5531 }
 0x1d4   : > { %v8413_v20 = vpop.f32.mrf.mxu1 }
 0x1d5   : > { %v12078_v41 = vadd.f32 %v3720_v32, %v3407_v14  ;;  %v3412_v9 = vadd.f32 %v8413_v20, %v11937_v16  ;;  %v8452_v6 = vpop.f32.mrf.mxu0  ;;  %v13540_v14 = vld [vmem:[#allocation17_spill] sm:$0xff] }
 0x1d6   : > { %v3355_v24 = vpop.f32.mrf.mxu1 }
 0x1d7   : > { %v12083_v58 = vadd.f32 %v8451_v19, %v3412_v9  ;;  %v3410_v13 = vadd.f32 %v3355_v24, %v11942_v42  ;;  %v3736_v2 = vpop.f32.mrf.mxu0  ;;  %v13542_v24 = vld [vmem:[#allocation19_spill] sm:$0xff] }
 0x1d8   : > { %v8414_v44 = vpop.f32.mrf.mxu1 }
 0x1d9   : > { %v12086_v51 = vadd.f32 %v3733_v12, %v3410_v13  ;;  %v3413_v47 = vadd.f32 %v8414_v44, %v11947_v60  ;;  %v8455_v23 = vpop.f32.mrf.mxu0  ;;  %v3388_v12 = vadd.f32 %v11976_v40, %v13540_v14  ;;  %v12101_v60 = vpop.permute.xlu1 %5535  ;;  %v3386_v13 = vadd.f32 %v11980_v26, %v13542_v24 }
 0x1da   : > { %v3358_v18 = vpop.f32.mrf.mxu1  ;;  %13541 = vst [vmem:[#allocation22_spill] sm:$0xff] %v12101_v60  ;;  %v12110_v44 = vpop.permute.xlu0 %5541 }
 0x1db   : > { %v12091_v61 = vadd.f32 %v8452_v6, %v3413_v47  ;;  %v3411_v16 = vadd.f32 %v3358_v18, %v11952_v36  ;;  %v3749_v32 = vpop.f32.mrf.mxu0  ;;  %13543 = vst [vmem:[#allocation25_spill] sm:$0xff] %v12110_v44  ;;  %v3766_v40 = vadd.f32 %v11965_v35, %v3388_v12 }
 0x1dc   : > { %v8417_v39 = vpop.f32.mrf.mxu1 }
 0x1dd   : > { %v12096_v4 = vadd.f32 %v3736_v2, %v3411_v16  ;;  %v3416_v42 = vadd.f32 %v8417_v39, %v11957_v37  ;;  %v8456_v19 = vpop.f32.mrf.mxu0  ;;  %v3764_v39 = vadd.f32 %v11972_v17, %v3386_v13 }
 0x1de   : > { %v3371_v15 = vpop.f32.mrf.mxu1  ;;  %v12127_v12 = vpop.permute.xlu0 %5545 }
 0x1df   : > { %v12103_v20 = vadd.f32 %v8455_v23, %v3416_v42  ;;  %v3414_v9 = vadd.f32 %v3371_v15, %v11962_v52  ;;  %v3752_v36 = vpop.f32.mrf.mxu0  ;;  %v12118_v42 = vpop.permute.xlu1 %5539  ;;  %13545 = vst [vmem:[#allocation26_spill] sm:$0xff] %v12127_v12  ;;  %v9162_v12 = vld [vmem:[%s11200_s26 + $0x28] sm:$0xff] }
 0x1e0   : > { %v8418_v6 = vpop.f32.mrf.mxu1  ;;  %13544 = vst [vmem:[#allocation3_spill] sm:$0xff] %v12118_v42 }
 0x1e1   : > { %v12108_v2 = vadd.f32 %v3749_v32, %v3414_v9  ;;  %v3417_v37 = vadd.f32 %v8418_v6, %v11969_v21  ;;  %v8503_v18 = vpop.f32.mrf.mxu0  ;;  %v12125_v21 = vld [vmem:[%s13279_s2] ss:$0 sm:$0xff] }
 0x1e2   : > { %v3374_v47 = vpop.f32.mrf.mxu1 }
 0x1e3   : > { %v12114_v16 = vadd.f32 %v8456_v19, %v3417_v37  ;;  %v3415_v23 = vadd.f32 %v3374_v47, %v11978_v59  ;;  %v4871_v14 = vpop.f32.mrf.mxu0  ;;  %v12133_v13 = vpop.permute.xlu1 %5543 }
 0x1e4   : > { %v8465_v52 = vpop.f32.mrf.mxu1  ;;  %13546 = vst [vmem:[#allocation27_spill] sm:$0xff] %v12133_v13 }
 0x1e5   : > { %v12120_v26 = vadd.f32 %v3752_v36, %v3415_v23  ;;  %v4511_v32 = vadd.f32 %v8465_v52, %v3766_v40  ;;  %v8504_v6 = vpop.f32.mrf.mxu0  ;;  %v12140_v23 = vpop.permute.xlu0 %5549 }
 0x1e6   : > { %v4382_v15 = vpop.f32.mrf.mxu1  ;;  %13547 = vst [vmem:[#allocation4_spill] sm:$0xff] %v12140_v23 }
 0x1e7   : > { %v5000_v35 = vadd.f32 %v8503_v18, %v4511_v32  ;;  %v4509_v19 = vadd.f32 %v4382_v15, %v3764_v39  ;;  %v4874_v52 = vpop.f32.mrf.mxu0 }
 0x1e8   : > { %v8466_v59 = vpop.f32.mrf.mxu1 }
 0x1e9   : > { %v12130_v9 = vadd.f32 %v12125_v21, %v5000_v35  ;;  %v4998_v17 = vadd.f32 %v4871_v14, %v4509_v19  ;;  %v4512_v36 = vadd.f32 %v8466_v59, %v11989_v27  ;;  %v12147_v14 = vpop.permute.xlu1 %5547  ;;  %v8507_v35 = vpop.f32.mrf.mxu0 }
 0x1ea   : > { %v4385_v24 = vpop.f32.mrf.mxu1  ;;  %13548 = vst [vmem:[#allocation7_spill] sm:$0xff] %v12147_v14 }
 0x1eb   : > { %8636 = vtanh.f32 %v12130_v9  ;;  %v12137_v37 = vadd.f32 %v12125_v21, %v4998_v17  ;;  %v5001_v47 = vadd.f32 %v8504_v6, %v4512_v36  ;;  %v4510_v18 = vadd.f32 %v4385_v24, %v11994_v38  ;;  %v12154_v17 = vpop.permute.xlu0 %5553  ;;  %v4887_v36 = vpop.f32.mrf.mxu0 }
 0x1ec   : > { %v8469_v40 = vpop.f32.mrf.mxu1  ;;  %13549 = vst [vmem:[#allocation29_spill] sm:$0xff] %v12154_v17 }
 0x1ed   : > { %8638 = vtanh.f32 %v12137_v37  ;;  %v12144_v27 = vadd.f32 %v12125_v21, %v5001_v47  ;;  %v4515_v39 = vadd.f32 %v8469_v40, %v11999_v34  ;;  %v4999_v32 = vadd.f32 %v4874_v52, %v4510_v18  ;;  %v12156_v6 = vpop.permute.xlu1 %5551 }
 0x1ee   : > { %v4398_v15 = vpop.f32.mrf.mxu1  ;;  %13550 = vst [vmem:[#allocation8_spill] sm:$0xff] %v12156_v6 }
 0x1ef   : > { %8640 = vtanh.f32 %v12144_v27  ;;  %v5004_v19 = vadd.f32 %v8507_v35, %v4515_v39  ;;  %v4513_v38 = vadd.f32 %v4398_v15, %v12004_v56  ;;  %v12152_v59 = vadd.f32 %v12125_v21, %v4999_v32  ;;  %v12163_v18 = vpop.permute.xlu0 %5557 }
 0x1f0   : > { %13551 = vst [vmem:[#allocation12_spill] sm:$0xff] %v12163_v18  ;;  %v8470_v52 = vpop.f32.mrf.mxu1 }
 0x1f1   : > { %v12159_v34 = vadd.f32 %v12125_v21, %v5004_v19  ;;  %v5002_v24 = vadd.f32 %v4887_v36, %v4513_v38  ;;  %8642 = vtanh.f32 %v12152_v59  ;;  %v12169_v39 = vpop.permute.xlu1 %5555  ;;  %v4516_v32 = vadd.f32 %v8470_v52, %v12009_v22  ;;  %v8508_v38 = vpop.f32.mrf.mxu0 }
 0x1f2   : > { %13552 = vst [vmem:[#allocation6_spill] sm:$0xff] %v12169_v39  ;;  %v4401_v35 = vpop.f32.mrf.mxu1 }
 0x1f3   : > { %8644 = vtanh.f32 %v12159_v34  ;;  %v12167_v56 = vadd.f32 %v12125_v21, %v5002_v24  ;;  %v12174_v19 = vpop.permute.xlu0 %5561  ;;  %v5005_v36 = vadd.f32 %v8508_v38, %v4516_v32  ;;  %v4890_v39 = vpop.f32.mrf.mxu0 }
 0x1f4   : > { %13553 = vst [vmem:[#allocation13_spill] sm:$0xff] %v12174_v19  ;;  %v8473_v18 = vpop.f32.mrf.mxu1 }
 0x1f5   : > { %8646 = vtanh.f32 %v12167_v56  ;;  %v12177_v24 = vpop.permute.xlu1 %5559  ;;  %v12184_v22 = vadd.f32 %v12125_v21, %v5005_v36 }
 0x1f6   : > { %13554 = vst [vmem:[#allocation15_spill] sm:$0xff] %v12177_v24  ;;  %v4414_v23 = vpop.f32.mrf.mxu1 }
 0x1f7   : > { %8648 = vtanh.f32 %v12184_v22  ;;  %v4517_v36 = vadd.f32 %v4414_v23, %v12022_v10 }
 0x1f8   : > { %v8637_v47 = vpop.eup %8636 }
 0x1f9   : > { %6065 = vrot.lane.b32.xlu0 %v8637_v47, %s9194_s18  ;;  %v4514_v47 = vadd.f32 %v4401_v35, %v12014_v54  ;;  %v12187_v32 = vpop.permute.xlu1 %5563  ;;  %v8511_v54 = vpop.f32.mrf.mxu0 }
 0x1fa   : > { %v8639_v40 = vpop.eup %8638  ;;  %13556 = vst [vmem:[#allocation24_spill] sm:$0xff] %v12187_v32 }
 0x1fb   : > { %v5003_v19 = vadd.f32 %v4890_v39, %v4514_v47 }
 0x1fc   : > { %v8641_v15 = vpop.eup %8640 }
 0x1fd   : > { %6061 = vrot.lane.b32.xlu0 %v8639_v40, %s9194_s18  ;;  %6067 = vrot.lane.b32.xlu1 %v8641_v15, %s9194_s18  ;;  %v12180_v40 = vpop.permute.xlu0 %5565  ;;  %v4519_v15 = vadd.f32 %v8473_v18, %v12019_v29  ;;  %v12192_v38 = vadd.f32 %v12125_v21, %v5003_v19  ;;  %v4903_v29 = vpop.f32.mrf.mxu0 }
 0x1fe   : > { %v8643_v6 = vpop.eup %8642  ;;  %13555 = vst [vmem:[#allocation23_spill] sm:$0xff] %v12180_v40  ;;  %v8474_v40 = vpop.f32.mrf.mxu1  ;;  %v5006_v19 = vadd.f32 %v4903_v29, %v4517_v36 }
 0x1ff   : > { %v4520_v18 = vadd.f32 %v8474_v40, %v12025_v57  ;;  %v12199_v39 = vpop.permute.xlu1 %5567  ;;  %8650 = vtanh.f32 %v12192_v38 }
 0x200   : > { %v8645_v52 = vpop.eup %8644  ;;  %13558 = vst [vmem:[#allocation11_spill] sm:$0xff] %v12199_v39  ;;  %v12209_v23 = vadd.f32 %v12125_v21, %v5006_v19 }
 0x201   : > { %6063 = vrot.lane.b32.xlu1 %v8643_v6, %s9194_s18  ;;  %6073 = vrot.lane.b32.xlu0 %v8645_v52, %s9194_s18  ;;  %v5008_v6 = vadd.f32 %v8511_v54, %v4519_v15  ;;  %v12195_v24 = vpop.permute.xlu0 %5569  ;;  %v4417_v52 = vpop.f32.mrf.mxu1 }
 0x202   : > { %v8647_v35 = vpop.eup %8646  ;;  %13557 = vst [vmem:[#allocation2_spill] sm:$0xff] %v12195_v24  ;;  %v8512_v15 = vpop.f32.mrf.mxu0  ;;  %13560 = vst [vmem:[#allocation28_spill] sm:$0xff] %v12209_v23  ;;  %v4518_v57 = vadd.f32 %v4417_v52, %v12028_v45 }
 0x203   : > { %v12203_v47 = vadd.f32 %v12125_v21, %v5008_v6  ;;  %v5009_v10 = vadd.f32 %v8512_v15, %v4520_v18  ;;  %v12212_v40 = vpop.permute.xlu1 %5571  ;;  %v8477_v29 = vpop.f32.mrf.mxu1 }
 0x204   : > { %13561 = vst [vmem:[#allocation5_spill] sm:$0xff] %v12212_v40  ;;  %v4906_v6 = vpop.f32.mrf.mxu0  ;;  %v8649_v39 = vpop.eup %8648  ;;  %v4523_v18 = vadd.f32 %v8477_v29, %v12033_v30 }
 0x205   : > { %6069 = vrot.lane.b32.xlu0 %v8647_v35, %s9194_s18  ;;  %v12205_v54 = vpop.permute.xlu0 %5573  ;;  %8652 = vtanh.f32 %v12203_v47  ;;  %v12215_v35 = vadd.f32 %v12125_v21, %v5009_v10  ;;  %v5007_v36 = vadd.f32 %v4906_v6, %v4518_v57  ;;  %6075 = vrot.lane.b32.xlu1 %v8649_v39, %s9194_s18  ;;  %v4430_v10 = vpop.f32.mrf.mxu1 }
 0x206   : > { %13559 = vst [vmem:[#allocation16_spill] sm:$0xff] %v12205_v54  ;;  %8654 = vtanh.f32 %v12209_v23  ;;  %v8515_v52 = vpop.f32.mrf.mxu0  ;;  %v4521_v30 = vadd.f32 %v4430_v10, %v12036_v50 }
 0x207   : > { %8656 = vtanh.f32 %v12215_v35  ;;  %v12223_v45 = vpop.permute.xlu1 %5575  ;;  %v12226_v19 = vadd.f32 %v12125_v21, %v5007_v36  ;;  %v5012_v57 = vadd.f32 %v8515_v52, %v4523_v18  ;;  %v8478_v29 = vpop.f32.mrf.mxu1 }
 0x208   : > { %13563 = vst [vmem:[#allocation9_spill] sm:$0xff] %v12223_v45  ;;  %v4919_v45 = vpop.f32.mrf.mxu0 }
 0x209   : > { %v12218_v54 = vpop.permute.xlu0 %5577  ;;  %8658 = vtanh.f32 %v12226_v19  ;;  %v12237_v36 = vadd.f32 %v12125_v21, %v5012_v57  ;;  %v5010_v18 = vadd.f32 %v4919_v45, %v4521_v30 }
 0x20a   : > { %13562 = vst [vmem:[#allocation10_spill] sm:$0xff] %v12218_v54  ;;  %v8516_v52 = vpop.f32.mrf.mxu0 }
 0x20b   : > { %v12232_v6 = vpop.permute.xlu1 %5579  ;;  %8660 = vtanh.f32 %v12237_v36  ;;  %v12248_v57 = vadd.f32 %v12125_v21, %v5010_v18 }
 0x20c   : > { %v8651_v15 = vpop.eup %8650  ;;  %13565 = vst [vmem:[#allocation18_spill] sm:$0xff] %v12232_v6  ;;  %v4433_v6 = vpop.f32.mrf.mxu1 }
 0x20d   : > { %v12228_v40 = vpop.permute.xlu0 %5901  ;;  %6071 = vrot.lane.b32.xlu1 %v8651_v15, %s9194_s18  ;;  %v4524_v15 = vadd.f32 %v8478_v29, %v12039_v1  ;;  %v4922_v45 = vpop.f32.mrf.mxu0  ;;  %8662 = vtanh.f32 %v12248_v57 }
 0x20e   : > { %13564 = vst [vmem:[#allocation14_spill] sm:$0xff] %v12228_v40  ;;  %v8481_v1 = vpop.f32.mrf.mxu1 }
 0x20f   : > { %v12244_v10 = vpop.permute.xlu1 %5903  ;;  %v5013_v32 = vadd.f32 %v8516_v52, %v4524_v15  ;;  %v4527_v29 = vadd.f32 %v8481_v1, %v12047_v25 }
 0x210   : > { %13567 = vst [vmem:[#allocation19_spill] sm:$0xff] %v12244_v10  ;;  %v4446_v18 = vpop.f32.mrf.mxu1 }
 0x211   : > { %v12239_v54 = vpop.permute.xlu0 %5905 }
 0x212   : > { %v8653_v39 = vpop.eup %8652  ;;  %13566 = vst [vmem:[#allocation17_spill] sm:$0xff] %v12239_v54  ;;  %v8482_v25 = vpop.f32.mrf.mxu1 }
 0x213   : > { %6081 = vrot.lane.b32.xlu0 %v8653_v39, %s9194_s18  ;;  %v8655_v24 = vpop.eup %8654  ;;  %v4522_v39 = vadd.f32 %v4433_v6, %v12044_v48  ;;  %v12258_v52 = vpop.permute.xlu1 %5907 }
 0x214   : > { %v8657_v50 = vpop.eup %8656  ;;  %13570 = vst [vmem:[#allocation32_spill] sm:$0xff] %v12258_v52 }
 0x215   : > { %6083 = vrot.lane.b32.xlu1 %v8657_v50, %s9194_s18  ;;  %v12251_v17 = vpop.permute.xlu0 %5909  ;;  %v5011_v15 = vadd.f32 %v4922_v45, %v4522_v39  ;;  %v8519_v50 = vpop.f32.mrf.mxu0 }
 0x216   : > { %13568 = vst [vmem:[#allocation30_spill] sm:$0xff] %v12251_v17  ;;  %v8659_v30 = vpop.eup %8658  ;;  %v5016_v10 = vadd.f32 %v8519_v50, %v4527_v29 }
 0x217   : > { %6077 = vrot.lane.b32.xlu0 %v8655_v24, %s9194_s18  ;;  %v12254_v24 = vadd.f32 %v12125_v21, %v5013_v32  ;;  %v12265_v6 = vadd.f32 %v12125_v21, %v5011_v15  ;;  %v4525_v32 = vadd.f32 %v4446_v18, %v12052_v5  ;;  %v4935_v17 = vpop.f32.mrf.mxu0  ;;  %v12269_v39 = vpop.permute.xlu1 %5911  ;;  %v4528_v15 = vadd.f32 %v8482_v25, %v12057_v3 }
 0x218   : > { %v8661_v13 = vpop.eup %8660  ;;  %13572 = vst [vmem:[#allocation34_spill] sm:$0xff] %v12269_v39  ;;  %v12273_v1 = vadd.f32 %v12125_v21, %v5016_v10 }
 0x219   : > { %13569 = vst [vmem:[#allocation31_spill] sm:$0xff] %v12254_v24  ;;  %6079 = vrot.lane.b32.xlu1 %v8659_v30, %s9194_s18  ;;  %8664 = vtanh.f32 %v12254_v24  ;;  %v12262_v48 = vpop.permute.xlu0 %5913  ;;  %v5014_v45 = vadd.f32 %v4935_v17, %v4525_v32  ;;  %v8520_v52 = vpop.f32.mrf.mxu0 }
 0x21a   : > { %13571 = vst [vmem:[#allocation33_spill] sm:$0xff] %v12262_v48  ;;  %8666 = vtanh.f32 %v12265_v6  ;;  %v8663_v29 = vpop.eup %8662  ;;  %v5017_v50 = vadd.f32 %v8520_v52, %v4528_v15 }
 0x21b   : > { %6089 = vrot.lane.b32.xlu0 %v8661_v13, %s9194_s18  ;;  %8668 = vtanh.f32 %v12273_v1  ;;  %v12280_v5 = vadd.f32 %v12125_v21, %v5014_v45  ;;  %v4449_v13 = vpop.f32.mrf.mxu1  ;;  %v12282_v18 = vpop.permute.xlu1 %5915 }
 0x21c   : > { %13574 = vst [vmem:[#allocation36_spill] sm:$0xff] %v12282_v18  ;;  %v4526_v3 = vadd.f32 %v4449_v13, %v12060_v0  ;;  %v4938_v32 = vpop.f32.mrf.mxu0  ;;  %v12291_v25 = vadd.f32 %v12125_v21, %v5017_v50 }
 0x21d   : > { %v12275_v30 = vpop.permute.xlu0 %5917  ;;  %8670 = vtanh.f32 %v12280_v5  ;;  %v8485_v45 = vpop.f32.mrf.mxu1 }
 0x21e   : > { %13573 = vst [vmem:[#allocation35_spill] sm:$0xff] %v12275_v30  ;;  %v5015_v39 = vadd.f32 %v4938_v32, %v4526_v3  ;;  %v4531_v15 = vadd.f32 %v8485_v45, %v12065_v7  ;;  %8672 = vtanh.f32 %v12291_v25 }
 0x21f   : > { %6085 = vrot.lane.b32.xlu0 %v8663_v29, %s9194_s18  ;;  %v12293_v30 = vpop.permute.xlu1 %5919  ;;  %v4462_v0 = vpop.f32.mrf.mxu1 }
 0x220   : > { %13576 = vst [vmem:[#allocation38_spill] sm:$0xff] %v12293_v30  ;;  %v12301_v13 = vadd.f32 %v12125_v21, %v5015_v39  ;;  %v4529_v3 = vadd.f32 %v4462_v0, %v12070_v11 }
 0x221   : > { %v12285_v10 = vpop.permute.xlu0 %5921  ;;  %v8486_v45 = vpop.f32.mrf.mxu1 }
 0x222   : > { %13575 = vst [vmem:[#allocation37_spill] sm:$0xff] %v12285_v10  ;;  %v8523_v10 = vpop.f32.mrf.mxu0  ;;  %13578 = vst [vmem:[#allocation40_spill] sm:$0xff] %v12301_v13  ;;  %8674 = vtanh.f32 %v12301_v13 }
 0x223   : > { %v12303_v18 = vpop.permute.xlu1 %5923  ;;  %v4465_v11 = vpop.f32.mrf.mxu1 }
 0x224   : > { %13579 = vst [vmem:[#allocation41_spill] sm:$0xff] %v12303_v18  ;;  %v4951_v7 = vpop.f32.mrf.mxu0 }
 0x225   : > { %v12296_v29 = vpop.permute.xlu0 %5925  ;;  %v5018_v39 = vadd.f32 %v4951_v7, %v4529_v3 }
 0x226   : > { %v8665_v17 = vpop.eup %8664  ;;  %13577 = vst [vmem:[#allocation39_spill] sm:$0xff] %v12296_v29  ;;  %v8524_v0 = vpop.f32.mrf.mxu0 }
 0x227   : > { %6091 = vrot.lane.b32.xlu1 %v8665_v17, %s9194_s18  ;;  %v8667_v52 = vpop.eup %8666  ;;  %v5020_v17 = vadd.f32 %v8523_v10, %v4531_v15  ;;  %v4532_v10 = vadd.f32 %v8486_v45, %v12073_v43  ;;  %v12315_v15 = vpop.permute.xlu1 %5927  ;;  %v12321_v30 = vadd.f32 %v12125_v21, %v5018_v39  ;;  %v5103_v39 = vld [vmem:[%s13280_s3 + $0x10] sm:$0xff] }
 0x228   : > { %v8669_v50 = vpop.eup %8668  ;;  %13581 = vst [vmem:[#allocation43_spill] sm:$0xff] %v12315_v15  ;;  %v4954_v7 = vpop.f32.mrf.mxu0 }
 0x229   : > { %6097 = vrot.lane.b32.xlu0 %v8669_v50, %s9194_s18  ;;  %v12307_v32 = vpop.permute.xlu0 %5929  ;;  %v5021_v3 = vadd.f32 %v8524_v0, %v4532_v10 }
 0x22a   : > { %13580 = vst [vmem:[#allocation42_spill] sm:$0xff] %v12307_v32  ;;  %v8671_v29 = vpop.eup %8670 }
 0x22b   : > { %6087 = vrot.lane.b32.xlu1 %v8667_v52, %s9194_s18  ;;  %v12311_v52 = vadd.f32 %v12125_v21, %v5020_v17  ;;  %v8673_v32 = vpop.eup %8672  ;;  %v4530_v17 = vadd.f32 %v4465_v11, %v12078_v41  ;;  %v12325_v43 = vpop.permute.xlu1 %5931  ;;  %v12329_v45 = vadd.f32 %v12125_v21, %v5021_v3 }
 0x22c   : > { %13583 = vst [vmem:[#allocation45_spill] sm:$0xff] %v12325_v43  ;;  %v8527_v11 = vpop.f32.mrf.mxu0 }
 0x22d   : > { %6093 = vrot.lane.b32.xlu0 %v8671_v29, %s9194_s18  ;;  %8676 = vtanh.f32 %v12311_v52  ;;  %v12318_v50 = vpop.permute.xlu0 %5933  ;;  %v8489_v29 = vpop.f32.mrf.mxu1  ;;  %13584 = vst [vmem:[#allocation46_spill] sm:$0xff] %v12329_v45 }
 0x22e   : > { %13582 = vst [vmem:[#allocation44_spill] sm:$0xff] %v12318_v50  ;;  %8678 = vtanh.f32 %v12321_v30  ;;  %v5019_v50 = vadd.f32 %v4954_v7, %v4530_v17  ;;  %v4535_v10 = vadd.f32 %v8489_v29, %v12083_v58  ;;  %v5101_v58 = vld [vmem:[%s13280_s3] sm:$0xff] }
 0x22f   : > { %6099 = vrot.lane.b32.xlu1 %v8673_v32, %s9194_s18  ;;  %v8675_v41 = vpop.eup %8674  ;;  %v9153_v32 = vld [vmem:[%s11200_s26 + $0x10] sm:$0xff]  ;;  %8680 = vtanh.f32 %v12329_v45  ;;  %v4478_v17 = vpop.f32.mrf.mxu1 }
 0x230   : > { %v5199_v0 = vmul.f32 %v9153_v32, %v5103_v39  ;;  %v12341_v3 = vadd.f32 %v12125_v21, %v5019_v50  ;;  %v12343_v7 = vpop.permute.xlu1 %5935  ;;  %v4533_v29 = vadd.f32 %v4478_v17, %v12086_v51  ;;  %v5104_v39 = vld [vmem:[%s13280_s3 + $0x18] sm:$0xff] }
 0x231   : > { %v12331_v15 = vpop.permute.xlu0 %5937  ;;  %13587 = vst [vmem:[#allocation49_spill] sm:$0xff] %v12343_v7  ;;  %v9155_v51 = vld [vmem:[%s11200_s26 + $0x18] sm:$0xff] }
 0x232   : > { %13585 = vst [vmem:[#allocation47_spill] sm:$0xff] %v12331_v15  ;;  %13586 = vst [vmem:[#allocation48_spill] sm:$0xff] %v12341_v3  ;;  %v5024_v15 = vadd.f32 %v8527_v11, %v4535_v10  ;;  %v5231_v50 = vadd.f32 %v5199_v0, %v12130_v9  ;;  %8682 = vtanh.f32 %v12341_v3  ;;  %v8490_v10 = vpop.f32.mrf.mxu1  ;;  %v9154_v11 = vld [vmem:[%s11200_s26] sm:$0xff]  ;;  %v5200_v17 = vmul.f32 %v9155_v51, %v5104_v39  ;;  %v5107_v0 = vld [vmem:[%s13280_s3 + $0x30] sm:$0xff] }
 0x233   : > { %6095 = vrot.lane.b32.xlu1 %v8675_v41, %s9194_s18  ;;  %v4967_v41 = vpop.f32.mrf.mxu0  ;;  %v5197_v32 = vmul.f32 %v9154_v11, %v5101_v58 }
 0x234   : > { %v12361_v7 = vpop.permute.xlu1 %5939  ;;  %v5022_v48 = vadd.f32 %v4967_v41, %v4533_v29  ;;  %v7922_v14 = vmul.f32 -1.442695, %v5231_v50  ;;  %v4481_v39 = vpop.f32.mrf.mxu1  ;;  %v5232_v51 = vadd.f32 %v5200_v17, %v12144_v27 }
 0x235   : > { %v12345_v43 = vpop.permute.xlu0 %5941  ;;  %13590 = vst [vmem:[#allocation52_spill] sm:$0xff] %v12361_v7  ;;  %v8528_v44 = vpop.f32.mrf.mxu0  ;;  %v5229_v11 = vadd.f32 %v5197_v32, %v12137_v37  ;;  %v5102_v32 = vld [vmem:[%s13280_s3 + $0x8] sm:$0xff] }
 0x236   : > { %13588 = vst [vmem:[#allocation50_spill] sm:$0xff] %v12345_v43  ;;  %v12359_v43 = vadd.f32 %v12125_v21, %v5024_v15  ;;  %v9156_v15 = vld [vmem:[%s11200_s26 + $0x30] sm:$0xff]  ;;  %v12376_v29 = vadd.f32 %v12125_v21, %v5022_v48 }
 0x237   : > { %v5203_v58 = vmul.f32 %v9156_v15, %v5107_v0  ;;  %v7920_v17 = vmul.f32 -1.442695, %v5229_v11  ;;  %v4970_v0 = vpop.f32.mrf.mxu0 }
 0x238   : > { %13589 = vst [vmem:[#allocation51_spill] sm:$0xff] %v12359_v43  ;;  %8684 = vtanh.f32 %v12359_v43  ;;  %13592 = vst [vmem:[#allocation54_spill] sm:$0xff] %v12376_v29 }
 0x239   : > { %v12368_v54 = vpop.permute.xlu0 %5945  ;;  %8686 = vpow2.f32 %v7922_v14  ;;  %v5235_v48 = vadd.f32 %v5203_v58, %v12159_v34  ;;  %v9157_v14 = vld [vmem:[%s11200_s26 + $0x20] sm:$0xff] }
 0x23a   : > { %v8677_v18 = vpop.eup %8676  ;;  %13591 = vst [vmem:[#allocation53_spill] sm:$0xff] %v12368_v54  ;;  %8688 = vtanh.f32 %v12376_v29 }
 0x23b   : > { %6105 = vrot.lane.b32.xlu0 %v8677_v18, %s9194_s18  ;;  %v8679_v40 = vpop.eup %8678  ;;  %v4536_v18 = vadd.f32 %v8490_v10, %v12091_v61  ;;  %v5105_v61 = vld [vmem:[%s13280_s3 + $0x20] sm:$0xff]  ;;  %v4534_v10 = vadd.f32 %v4481_v39, %v12096_v4  ;;  %v5111_v4 = vld [vmem:[%s13280_s3 + $0x50] sm:$0xff]  ;;  %v9158_v39 = vld [vmem:[%s11200_s26 + $0x8] sm:$0xff]  ;;  %8690 = vpow2.f32 %v7920_v17 }
 0x23c   : > { %v8681_v41 = vpop.eup %8680  ;;  %v5198_v54 = vmul.f32 %v9158_v39, %v5102_v32  ;;  %v9159_v32 = vld [vmem:[%s11200_s26 + $0x50] sm:$0xff]  ;;  %v8531_v39 = vpop.f32.mrf.mxu0 }
 0x23d   : > { %v5025_v50 = vadd.f32 %v8528_v44, %v4536_v18  ;;  %6107 = vrot.lane.b32.xlu1 %v8681_v41, %s9194_s18  ;;  %v12389_v15 = vpop.permute.xlu0 %5949  ;;  %v5201_v44 = vmul.f32 %v9157_v14, %v5105_v61  ;;  %v7923_v18 = vmul.f32 -1.442695, %v5232_v51  ;;  %v5023_v41 = vadd.f32 %v4970_v0, %v4534_v10  ;;  %v5108_v51 = vld [vmem:[%s13280_s3 + $0x38] sm:$0xff] }
 0x23e   : > { %13594 = vst [vmem:[#allocation56_spill] sm:$0xff] %v12389_v15  ;;  %v7926_v61 = vmul.f32 -1.442695, %v5235_v48  ;;  %v5207_v10 = vmul.f32 %v9159_v32, %v5111_v4  ;;  %v9161_v4 = vld [vmem:[%s11200_s26 + $0x40] sm:$0xff] }
 0x23f   : > { %6101 = vrot.lane.b32.xlu0 %v8679_v40, %s9194_s18  ;;  %v12381_v40 = vpop.permute.xlu1 %5943  ;;  %v12397_v11 = vadd.f32 %v12125_v21, %v5025_v50  ;;  %v8683_v58 = vpop.eup %8682  ;;  %v5109_v50 = vld [vmem:[%s13280_s3 + $0x40] sm:$0xff]  ;;  %8692 = vpow2.f32 %v7923_v18  ;;  %v5233_v0 = vadd.f32 %v5201_v44, %v12167_v56  ;;  %v5106_v18 = vld [vmem:[%s13280_s3 + $0x28] sm:$0xff] }
 0x240   : > { %13593 = vst [vmem:[#allocation55_spill] sm:$0xff] %v12381_v40  ;;  %v8493_v40 = vpop.f32.mrf.mxu1  ;;  %v5205_v44 = vmul.f32 %v9161_v4, %v5109_v50  ;;  %v5202_v42 = vmul.f32 %v9162_v12, %v5106_v18  ;;  %v9163_v18 = vld [vmem:[%s11200_s26 + $0x58] sm:$0xff] }
 0x241   : > { %13595 = vst [vmem:[#allocation57_spill] sm:$0xff] %v12397_v11  ;;  %v4539_v14 = vadd.f32 %v8493_v40, %v12103_v20  ;;  %6103 = vrot.lane.b32.xlu1 %v8683_v58, %s9194_s18  ;;  %8694 = vtanh.f32 %v12397_v11  ;;  %v12413_v48 = vpop.permute.xlu0 %5953  ;;  %v9160_v20 = vld [vmem:[%s11200_s26 + $0x38] sm:$0xff]  ;;  %v5230_v58 = vadd.f32 %v5198_v54, %v12152_v59  ;;  %v7924_v60 = vmul.f32 -1.442695, %v5233_v0 }
 0x242   : > { %v4494_v17 = vpop.f32.mrf.mxu1  ;;  %13597 = vst [vmem:[#allocation59_spill] sm:$0xff] %v12413_v48  ;;  %v5204_v40 = vmul.f32 %v9160_v20, %v5108_v51  ;;  %8696 = vpow2.f32 %v7926_v61  ;;  %v5239_v48 = vadd.f32 %v5207_v10, %v12203_v47  ;;  %v4983_v20 = vpop.f32.mrf.mxu0 }
 0x243   : > { %v12405_v15 = vpop.permute.xlu1 %5947  ;;  %v5028_v32 = vadd.f32 %v8531_v39, %v4539_v14  ;;  %v4537_v51 = vadd.f32 %v4494_v17, %v12108_v2  ;;  %v7921_v53 = vmul.f32 -1.442695, %v5230_v58  ;;  %v5112_v14 = vld [vmem:[%s13280_s3 + $0x58] sm:$0xff]  ;;  %v5237_v2 = vadd.f32 %v5205_v44, %v12209_v23  ;;  %v5110_v17 = vld [vmem:[%s13280_s3 + $0x48] sm:$0xff]  ;;  %v5115_v44 = vld [vmem:[%s13280_s3 + $0x70] sm:$0xff] }
 0x244   : > { %13596 = vst [vmem:[#allocation58_spill] sm:$0xff] %v12405_v15  ;;  %v12418_v15 = vadd.f32 %v12125_v21, %v5023_v41  ;;  %v5236_v50 = vadd.f32 %v5204_v40, %v12184_v22  ;;  %v8494_v61 = vpop.f32.mrf.mxu1  ;;  %v7930_v12 = vmul.f32 -1.442695, %v5239_v48  ;;  %v5208_v4 = vmul.f32 %v9163_v18, %v5112_v14 }
 0x245   : > { %v8685_v7 = vpop.eup %8684  ;;  %v12439_v10 = vpop.permute.xlu0 %5957  ;;  %v5026_v0 = vadd.f32 %v4983_v20, %v4537_v51  ;;  %v4540_v58 = vadd.f32 %v8494_v61, %v12114_v16  ;;  %v5234_v48 = vadd.f32 %v5202_v42, %v12192_v38  ;;  %v7928_v51 = vmul.f32 -1.442695, %v5237_v2  ;;  %v9164_v61 = vld [vmem:[%s11200_s26 + $0x48] sm:$0xff] }
 0x246   : > { %13598 = vst [vmem:[#allocation60_spill] sm:$0xff] %v12418_v15  ;;  %6113 = vrot.lane.b32.xlu0 %v8685_v7, %s9194_s18  ;;  %v8687_v41 = vpop.eup %8686  ;;  %8698 = vtanh.f32 %v12418_v15  ;;  %v12437_v7 = vadd.f32 %v12125_v21, %v5028_v32  ;;  %13601 = vst [vmem:[#allocation63_spill] sm:$0xff] %v12439_v10  ;;  %v8532_v32 = vpop.f32.mrf.mxu0  ;;  %v5206_v14 = vmul.f32 %v9164_v61, %v5110_v17  ;;  %v9166_v61 = vld [vmem:[%s11200_s26 + $0x60] sm:$0xff] }
 0x247   : > { %v12427_v54 = vpop.permute.xlu1 %5951  ;;  %8700 = vpow2.f32 %v7924_v60  ;;  %v8689_v39 = vpop.eup %8688  ;;  %v5359_v40 = vadd.f32 1.0, %v8687_v41  ;;  %v7927_v60 = vmul.f32 -1.442695, %v5236_v50  ;;  %v12456_v18 = vadd.f32 %v12125_v21, %v5026_v0  ;;  %v9165_v50 = vld [vmem:[%s11200_s26 + $0x70] sm:$0xff] }
 0x248   : > { %13599 = vst [vmem:[#allocation61_spill] sm:$0xff] %v12427_v54  ;;  %13600 = vst [vmem:[#allocation62_spill] sm:$0xff] %v12437_v7  ;;  %8702 = vpow2.f32 %v7921_v53  ;;  %v4497_v20 = vpop.f32.mrf.mxu1  ;;  %v8691_v16 = vpop.eup %8690  ;;  %v5211_v10 = vmul.f32 %v9165_v50, %v5115_v44  ;;  %v5029_v42 = vadd.f32 %v8532_v32, %v4540_v58  ;;  %v5240_v23 = vadd.f32 %v5208_v4, %v12215_v35 }
 0x249   : > { %8704 = vtanh.f32 %v12437_v7  ;;  %13603 = vst [vmem:[#allocation65_spill] sm:$0xff] %v12456_v18  ;;  %v12459_v54 = vpop.permute.xlu0 %5961  ;;  %v5357_v33 = vadd.f32 1.0, %v8691_v16  ;;  %v5238_v44 = vadd.f32 %v5206_v14, %v12226_v19 }
 0x24a   : > { %6109 = vrot.lane.b32.xlu0 %v8689_v39, %s9194_s18  ;;  %8706 = vpow2.f32 %v7930_v12  ;;  %13604 = vst [vmem:[#allocation66_spill] sm:$0xff] %v12459_v54  ;;  %v7925_v39 = vmul.f32 -1.442695, %v5234_v48  ;;  %v4986_v12 = vpop.f32.mrf.mxu0  ;;  %v12468_v58 = vadd.f32 %v12125_v21, %v5029_v42  ;;  %v7931_v48 = vmul.f32 -1.442695, %v5240_v23 }
 0x24b   : > { %v12452_v41 = vpop.permute.xlu1 %5955  ;;  %8708 = vrcp.f32 %v5359_v40  ;;  %v5243_v40 = vadd.f32 %v5211_v10, %v12237_v36  ;;  %v7929_v16 = vmul.f32 -1.442695, %v5238_v44  ;;  %v5114_v44 = vld [vmem:[%s13280_s3 + $0x68] sm:$0xff] }
 0x24c   : > { %13602 = vst [vmem:[#allocation64_spill] sm:$0xff] %v12452_v41  ;;  %v8693_v53 = vpop.eup %8692  ;;  %8710 = vpow2.f32 %v7927_v60  ;;  %v4538_v41 = vadd.f32 %v4497_v20, %v12120_v26  ;;  %13605 = vst [vmem:[#allocation67_spill] sm:$0xff] %v12468_v58  ;;  %v5113_v60 = vld [vmem:[%s13280_s3 + $0x60] sm:$0xff] }
 0x24d   : > { %8712 = vpow2.f32 %v7928_v51  ;;  %v5360_v17 = vadd.f32 1.0, %v8693_v53  ;;  %v5209_v14 = vmul.f32 %v9166_v61, %v5113_v60  ;;  %v5116_v53 = vld [vmem:[%s13280_s3 + $0x78] sm:$0xff]  ;;  %v7934_v50 = vmul.f32 -1.442695, %v5243_v40 }
 0x24e   : > { %v8695_v2 = vpop.eup %8694  ;;  %8714 = vtanh.f32 %v12456_v18  ;;  %v5027_v32 = vadd.f32 %v4986_v12, %v4538_v41 }
 0x24f   : > { %6115 = vrot.lane.b32.xlu1 %v8695_v2, %s9194_s18  ;;  %v8697_v0 = vpop.eup %8696  ;;  %v12470_v4 = vpop.permute.xlu1 %5959  ;;  %8716 = vpow2.f32 %v7925_v39  ;;  %v9167_v39 = vld [vmem:[%s11200_s26 + $0x78] sm:$0xff] }
 0x250   : > { %13606 = vst [vmem:[#allocation68_spill] sm:$0xff] %v12470_v4  ;;  %8718 = vrcp.f32 %v5357_v33  ;;  %v5363_v20 = vadd.f32 1.0, %v8697_v0  ;;  %v12482_v23 = vadd.f32 %v12125_v21, %v5027_v32  ;;  %v5212_v12 = vmul.f32 %v9167_v39, %v5116_v53 }
 0x251   : > { %8720 = vrcp.f32 %v5360_v17  ;;  %v5241_v21 = vadd.f32 %v5209_v14, %v12248_v57  ;;  %v5119_v14 = vld [vmem:[%s13280_s3 + $0x90] sm:$0xff] }
 0x252   : > { %8722 = vtanh.f32 %v12468_v58  ;;  %13607 = vst [vmem:[#allocation69_spill] sm:$0xff] %v12482_v23  ;;  %v5244_v61 = vadd.f32 %v5212_v12, %v12254_v24 }
 0x253   : > { %v8699_v51 = vpop.eup %8698  ;;  %8724 = vpow2.f32 %v7931_v48  ;;  %v12484_v41 = vpop.permute.xlu1 %5963 }
 0x254   : > { %6111 = vrot.lane.b32.xlu1 %v8699_v51, %s9194_s18  ;;  %v8701_v10 = vpop.eup %8700  ;;  %8726 = vrcp.f32 %v5363_v20  ;;  %13608 = vst [vmem:[#allocation70_spill] sm:$0xff] %v12484_v41  ;;  %v9168_v20 = vld [vmem:[%s11200_s26 + $0x68] sm:$0xff] }
 0x255   : > { %v8703_v33 = vpop.eup %8702  ;;  %v5361_v0 = vadd.f32 1.0, %v8701_v10  ;;  %8728 = vpow2.f32 %v7929_v16  ;;  %v5210_v10 = vmul.f32 %v9168_v20, %v5114_v44  ;;  %v9169_v20 = vld [vmem:[%s11200_s26 + $0x90] sm:$0xff] }
 0x256   : > { %v8705_v2 = vpop.eup %8704  ;;  %8730 = vpow2.f32 %v7934_v50  ;;  %v5358_v60 = vadd.f32 1.0, %v8703_v33  ;;  %v7932_v50 = vmul.f32 -1.442695, %v5241_v21  ;;  %v5215_v21 = vmul.f32 %v9169_v20, %v5119_v14 }
 0x257   : > { %v8707_v17 = vpop.eup %8706  ;;  %6121 = vrot.lane.b32.xlu0 %v8705_v2, %s9194_s18  ;;  %8732 = vtanh.f32 %v12482_v23  ;;  %v5242_v12 = vadd.f32 %v5210_v10, %v12265_v6 }
 0x258   : > { %v8709_v40 = vpop.eup %8708  ;;  %8734 = vrcp.f32 %v5361_v0  ;;  %v5367_v16 = vadd.f32 1.0, %v8707_v17  ;;  %v7935_v0 = vmul.f32 -1.442695, %v5244_v61  ;;  %v5247_v14 = vadd.f32 %v5215_v21, %v12273_v1 }
 0x259   : > { %v8711_v48 = vpop.eup %8710  ;;  %8736 = vrcp.f32 %v5358_v60  ;;  %v5117_v60 = vld [vmem:[%s13280_s3 + $0x80] sm:$0xff] }
 0x25a   : > { %v8713_v51 = vpop.eup %8712  ;;  %v5364_v33 = vadd.f32 1.0, %v8711_v48  ;;  %8738 = vrcp.f32 %v5367_v16  ;;  %v7933_v16 = vmul.f32 -1.442695, %v5242_v12  ;;  %v7938_v12 = vmul.f32 -1.442695, %v5247_v14 }
 0x25b   : > { %v8715_v53 = vpop.eup %8714  ;;  %v5365_v41 = vadd.f32 1.0, %v8713_v51  ;;  %8740 = vpow2.f32 %v7932_v50 }
 0x25c   : > { %6117 = vrot.lane.b32.xlu0 %v8715_v53, %s9194_s18  ;;  %v8717_v4 = vpop.eup %8716  ;;  %8742 = vrcp.f32 %v5364_v33  ;;  %v9170_v53 = vld [vmem:[%s11200_s26 + $0x80] sm:$0xff] }
 0x25d   : > { %v8719_v44 = vpop.eup %8718  ;;  %8744 = vrcp.f32 %v5365_v41  ;;  %v5213_v50 = vmul.f32 %v9170_v53, %v5117_v60 }
 0x25e   : > { %v8721_v17 = vpop.eup %8720  ;;  %8746 = vpow2.f32 %v7935_v0 }
 0x25f   : > { %v8723_v24 = vpop.eup %8722  ;;  %v5245_v21 = vadd.f32 %v5213_v50, %v12280_v5  ;;  %v5118_v50 = vld [vmem:[%s13280_s3 + $0x88] sm:$0xff] }
 0x260   : > { %v8725_v48 = vpop.eup %8724  ;;  %6123 = vrot.lane.b32.xlu1 %v8723_v24, %s9194_s18  ;;  %v5120_v24 = vld [vmem:[%s13280_s3 + $0x98] sm:$0xff] }
 0x261   : > { %v8727_v10 = vpop.eup %8726  ;;  %v5368_v33 = vadd.f32 1.0, %v8725_v48  ;;  %v9171_v48 = vld [vmem:[%s11200_s26 + $0x98] sm:$0xff] }
 0x262   : > { %v8729_v61 = vpop.eup %8728 }
 0x263   : > { %v8731_v20 = vpop.eup %8730 }
 0x26b   : > { %v6066_v26 = vpop.permute.xlu0 %6065 }
 0x26c   : > { %v6159_v2 = vmul.f32 %v8709_v40, %v6066_v26  ;;  %v5362_v26 = vadd.f32 1.0, %v8717_v4 }
 0x26e   : > { %6225 = vrot.lane.b32.xlu0 %v6159_v2, %s9193_s8  ;;  %8748 = vrcp.f32 %v5362_v26  ;;  %v5366_v2 = vadd.f32 1.0, %v8729_v61  ;;  %v5371_v26 = vadd.f32 1.0, %v8731_v20 }
 0x26f   : > { %v6062_v42 = vpop.permute.xlu0 %6061  ;;  %v6068_v32 = vpop.permute.xlu1 %6067  ;;  %8750 = vpow2.f32 %v7933_v16 }
 0x270   : > { %v6157_v40 = vmul.f32 %v8719_v44, %v6062_v42  ;;  %v8733_v42 = vpop.eup %8732  ;;  %v6160_v44 = vmul.f32 %v8721_v17, %v6068_v32  ;;  %8752 = vrcp.f32 %v5368_v33  ;;  %v7936_v32 = vmul.f32 -1.442695, %v5245_v21  ;;  %v5123_v21 = vld [vmem:[%s13280_s3 + $0xb0] sm:$0xff] }
 0x271   : > { %6119 = vrot.lane.b32.xlu1 %v8733_v42, %s9194_s18  ;;  %v8735_v0 = vpop.eup %8734  ;;  %8754 = vrcp.f32 %v5366_v2 }
 0x272   : > { %6221 = vrot.lane.b32.xlu0 %v6157_v40, %s9193_s8  ;;  %v8737_v40 = vpop.eup %8736  ;;  %8756 = vpow2.f32 %v7938_v12 }
 0x273   : > { %v6074_v39 = vpop.permute.xlu0 %6073  ;;  %v6064_v54 = vpop.permute.xlu1 %6063  ;;  %8758 = vrcp.f32 %v5371_v26 }
 0x274   : > { %v6163_v4 = vmul.f32 %v8727_v10, %v6074_v39  ;;  %v5216_v10 = vmul.f32 %v9171_v48, %v5120_v24  ;;  %v6158_v16 = vmul.f32 %v8737_v40, %v6064_v54  ;;  %v8739_v61 = vpop.eup %8738  ;;  %v9172_v24 = vld [vmem:[%s11200_s26 + $0x88] sm:$0xff]  ;;  %8760 = vpow2.f32 %v7936_v32  ;;  %v5121_v32 = vld [vmem:[%s13280_s3 + $0xa0] sm:$0xff] }
 0x275   : > { %6227 = vrot.lane.b32.xlu1 %v6160_v44, %s9193_s8  ;;  %v8741_v53 = vpop.eup %8740  ;;  %v5214_v2 = vmul.f32 %v9172_v24, %v5118_v50 }
 0x276   : > { %6233 = vrot.lane.b32.xlu0 %v6163_v4, %s9193_s8  ;;  %v8743_v14 = vpop.eup %8742  ;;  %v5248_v20 = vadd.f32 %v5216_v10, %v12291_v25  ;;  %v5369_v44 = vadd.f32 1.0, %v8741_v53  ;;  %v9173_v10 = vld [vmem:[%s11200_s26 + $0xb0] sm:$0xff] }
 0x277   : > { %v6070_v51 = vpop.permute.xlu0 %6069  ;;  %v6076_v41 = vpop.permute.xlu1 %6075  ;;  %v5246_v48 = vadd.f32 %v5214_v2, %v12301_v13 }
 0x278   : > { %v6161_v39 = vmul.f32 %v8735_v0, %v6070_v51  ;;  %v8745_v4 = vpop.eup %8744  ;;  %v6164_v54 = vmul.f32 %v8743_v14, %v6076_v41  ;;  %8762 = vrcp.f32 %v5369_v44 }
 0x279   : > { %6223 = vrot.lane.b32.xlu1 %v6158_v16, %s9193_s8  ;;  %v8747_v42 = vpop.eup %8746  ;;  %v5219_v16 = vmul.f32 %v9173_v10, %v5123_v21 }
 0x27a   : > { %6229 = vrot.lane.b32.xlu0 %v6161_v39, %s9193_s8  ;;  %v5372_v39 = vadd.f32 1.0, %v8747_v42 }
 0x27b   : > { %v8749_v12 = vpop.eup %8748 }
 0x27c   : > { %v8751_v40 = vpop.eup %8750 }
 0x27d   : > { %6235 = vrot.lane.b32.xlu1 %v6164_v54, %s9193_s8  ;;  %v5370_v53 = vadd.f32 1.0, %v8751_v40  ;;  %v9174_v54 = vld [vmem:[%s11200_s26 + $0xa0] sm:$0xff] }
 0x27e   : > { %v5217_v42 = vmul.f32 %v9174_v54, %v5121_v32 }
 0x27f   : > { %v6072_v17 = vpop.permute.xlu1 %6071 }
 0x280   : > { %v6162_v41 = vmul.f32 %v8749_v12, %v6072_v17 }
 0x282   : > { %6231 = vrot.lane.b32.xlu1 %v6162_v41, %s9193_s8  ;;  %v9175_v41 = vld [vmem:[%s11200_s26 + $0xb8] sm:$0xff] }
 0x285   : > { %v6082_v60 = vpop.permute.xlu0 %6081 }
 0x286   : > { %v6167_v51 = vmul.f32 %v8739_v61, %v6082_v60  ;;  %v7939_v60 = vmul.f32 -1.442695, %v5248_v20  ;;  %v8753_v61 = vpop.eup %8752 }
 0x287   : > { %v6084_v26 = vpop.permute.xlu1 %6083  ;;  %v8755_v50 = vpop.eup %8754 }
 0x288   : > { %6241 = vrot.lane.b32.xlu0 %v6167_v51, %s9193_s8  ;;  %8764 = vpow2.f32 %v7939_v60  ;;  %v6168_v17 = vmul.f32 %v8753_v61, %v6084_v26  ;;  %v7937_v51 = vmul.f32 -1.442695, %v5246_v48  ;;  %v8757_v20 = vpop.eup %8756  ;;  %v5249_v26 = vadd.f32 %v5217_v42, %v12321_v30  ;;  %v9176_v61 = vld [vmem:[%s11200_s26 + $0xa8] sm:$0xff] }
 0x289   : > { %v6078_v33 = vpop.permute.xlu0 %6077  ;;  %8766 = vrcp.f32 %v5372_v39  ;;  %v5375_v12 = vadd.f32 1.0, %v8757_v20  ;;  %v5122_v39 = vld [vmem:[%s13280_s3 + $0xa8] sm:$0xff] }
 0x28a   : > { %v6165_v0 = vmul.f32 %v8745_v4, %v6078_v33  ;;  %v5251_v33 = vadd.f32 %v5219_v16, %v12311_v52  ;;  %v8759_v4 = vpop.eup %8758  ;;  %8768 = vrcp.f32 %v5370_v53  ;;  %6243 = vrot.lane.b32.xlu1 %v6168_v17, %s9193_s8  ;;  %v5218_v32 = vmul.f32 %v9176_v61, %v5122_v39 }
 0x28b   : > { %v6080_v14 = vpop.permute.xlu1 %6079  ;;  %8770 = vpow2.f32 %v7937_v51  ;;  %v8761_v21 = vpop.eup %8760  ;;  %v7940_v53 = vmul.f32 -1.442695, %v5249_v26 }
 0x28c   : > { %6237 = vrot.lane.b32.xlu0 %v6165_v0, %s9193_s8  ;;  %v6166_v2 = vmul.f32 %v8755_v50, %v6080_v14  ;;  %v5124_v0 = vld [vmem:[%s13280_s3 + $0xb8] sm:$0xff]  ;;  %v7942_v60 = vmul.f32 -1.442695, %v5251_v33  ;;  %8772 = vrcp.f32 %v5375_v12  ;;  %v5373_v48 = vadd.f32 1.0, %v8761_v21  ;;  %v8763_v10 = vpop.eup %8762  ;;  %v5127_v33 = vld [vmem:[%s13280_s3 + $0xd0] sm:$0xff] }
 0x28d   : > { %v6090_v24 = vpop.permute.xlu0 %6089  ;;  %v5220_v40 = vmul.f32 %v9175_v41, %v5124_v0  ;;  %v5250_v42 = vadd.f32 %v5218_v32, %v12341_v3 }
 0x28e   : > { %v6171_v44 = vmul.f32 %v8759_v4, %v6090_v24  ;;  %6239 = vrot.lane.b32.xlu1 %v6166_v2, %s9193_s8  ;;  %8774 = vpow2.f32 %v7942_v60  ;;  %v5125_v60 = vld [vmem:[%s13280_s3 + $0xc0] sm:$0xff] }
 0x28f   : > { %v5252_v51 = vadd.f32 %v5220_v40, %v12329_v45  ;;  %8776 = vrcp.f32 %v5373_v48  ;;  %v7941_v26 = vmul.f32 -1.442695, %v5250_v42 }
 0x290   : > { %6249 = vrot.lane.b32.xlu0 %v6171_v44, %s9193_s8  ;;  %8778 = vpow2.f32 %v7940_v53  ;;  %v9177_v44 = vld [vmem:[%s11200_s26 + $0xd0] sm:$0xff] }
 0x291   : > { %v6086_v16 = vpop.permute.xlu0 %6085  ;;  %v7943_v24 = vmul.f32 -1.442695, %v5252_v51  ;;  %v5223_v0 = vmul.f32 %v9177_v44, %v5127_v33 }
 0x292   : > { %v6169_v17 = vmul.f32 %v8763_v10, %v6086_v16  ;;  %v9178_v10 = vld [vmem:[%s11200_s26 + $0xc0] sm:$0xff] }
 0x293   : > { %v5255_v40 = vadd.f32 %v5223_v0, %v12359_v43  ;;  %v5221_v16 = vmul.f32 %v9178_v10, %v5125_v60  ;;  %v9180_v60 = vld [vmem:[%s11200_s26 + $0xc8] sm:$0xff] }
 0x294   : > { %6245 = vrot.lane.b32.xlu0 %v6169_v17, %s9193_s8  ;;  %v5128_v17 = vld [vmem:[%s13280_s3 + $0xd8] sm:$0xff] }
 0x295   : > { %v8765_v50 = vpop.eup %8764 }
 0x296   : > { %v8767_v14 = vpop.eup %8766  ;;  %v5376_v54 = vadd.f32 1.0, %v8765_v50  ;;  %v7946_v50 = vmul.f32 -1.442695, %v5255_v40 }
 0x297   : > { %v8769_v2 = vpop.eup %8768 }
 0x298   : > { %v8771_v12 = vpop.eup %8770  ;;  %8780 = vrcp.f32 %v5376_v54 }
 0x299   : > { %v6092_v20 = vpop.permute.xlu1 %6091  ;;  %8782 = vpow2.f32 %v7943_v24  ;;  %v5374_v41 = vadd.f32 1.0, %v8771_v12  ;;  %v8773_v48 = vpop.eup %8772 }
 0x29a   : > { %v6172_v4 = vmul.f32 %v8767_v14, %v6092_v20  ;;  %8784 = vpow2.f32 %v7941_v26  ;;  %v5253_v20 = vadd.f32 %v5221_v16, %v12376_v29 }
 0x29b   : > { %v6098_v61 = vpop.permute.xlu0 %6097  ;;  %v8775_v32 = vpop.eup %8774  ;;  %8786 = vrcp.f32 %v5374_v41 }
 0x29c   : > { %6251 = vrot.lane.b32.xlu1 %v6172_v4, %s9193_s8  ;;  %v6175_v53 = vmul.f32 %v8773_v48, %v6098_v61  ;;  %v8777_v51 = vpop.eup %8776  ;;  %v5379_v14 = vadd.f32 1.0, %v8775_v32  ;;  %v9179_v4 = vld [vmem:[%s11200_s26 + $0xd8] sm:$0xff]  ;;  %8788 = vpow2.f32 %v7946_v50  ;;  %v7944_v44 = vmul.f32 -1.442695, %v5253_v20  ;;  %v5131_v48 = vld [vmem:[%s13280_s3 + $0xf0] sm:$0xff] }
 0x29d   : > { %v6088_v21 = vpop.permute.xlu1 %6087  ;;  %v5224_v54 = vmul.f32 %v9179_v4, %v5128_v17  ;;  %v8779_v24 = vpop.eup %8778  ;;  %v9181_v17 = vld [vmem:[%s11200_s26 + $0xf0] sm:$0xff] }
 0x29e   : > { %v6170_v39 = vmul.f32 %v8769_v2, %v6088_v21  ;;  %6257 = vrot.lane.b32.xlu0 %v6175_v53, %s9193_s8  ;;  %v5126_v2 = vld [vmem:[%s13280_s3 + $0xc8] sm:$0xff]  ;;  %8790 = vrcp.f32 %v5379_v14  ;;  %v5377_v0 = vadd.f32 1.0, %v8779_v24  ;;  %v5227_v50 = vmul.f32 %v9181_v17, %v5131_v48 }
 0x29f   : > { %v6094_v33 = vpop.permute.xlu0 %6093  ;;  %v5256_v12 = vadd.f32 %v5224_v54, %v12397_v11  ;;  %v5222_v26 = vmul.f32 %v9180_v60, %v5126_v2  ;;  %8792 = vpow2.f32 %v7944_v44  ;;  %v9182_v2 = vld [vmem:[%s11200_s26 + $0xe0] sm:$0xff]  ;;  %v5132_v60 = vld [vmem:[%s13280_s3 + $0xf8] sm:$0xff]  ;;  %v5613_v17 = vadd.f32 %v12031_v55, %v12137_v37 }
 0x2a0   : > { %6247 = vrot.lane.b32.xlu1 %v6170_v39, %s9193_s8  ;;  %v6173_v42 = vmul.f32 %v8777_v51, %v6094_v33  ;;  %8794 = vrcp.f32 %v5377_v0  ;;  %v5129_v33 = vld [vmem:[%s13280_s3 + $0xe0] sm:$0xff]  ;;  %v5616_v55 = vadd.f32 %v12063_v31, %v12144_v27  ;;  %v5614_v31 = vadd.f32 %v12042_v46, %v12152_v59 }
 0x2a1   : > { %v6100_v39 = vpop.permute.xlu1 %6099  ;;  %v7947_v10 = vmul.f32 -1.442695, %v5256_v12  ;;  %v5254_v32 = vadd.f32 %v5222_v26, %v12418_v15  ;;  %v5225_v44 = vmul.f32 %v9182_v2, %v5129_v33  ;;  %v5615_v12 = vadd.f32 %v12050_v62, %v12130_v9 }
 0x2a2   : > { %6253 = vrot.lane.b32.xlu0 %v6173_v42, %s9193_s8  ;;  %v5259_v42 = vadd.f32 %v5227_v50, %v12437_v7  ;;  %v7952_v2 = vmul.f32 -1.442695, %v5613_v17 }
 0x2a3   : > { %8796 = vpow2.f32 %v7947_v10  ;;  %v7945_v4 = vmul.f32 -1.442695, %v5254_v32  ;;  %v9183_v10 = vld [vmem:[%s11200_s26 + $0xf8] sm:$0xff] }
 0x2a5   : > { %v8781_v21 = vpop.eup %8780  ;;  %v6096_v51 = vpop.permute.xlu1 %6095 }
 0x2a6   : > { %v8783_v41 = vpop.eup %8782  ;;  %v6176_v40 = vmul.f32 %v8781_v21, %v6100_v39  ;;  %v7950_v39 = vmul.f32 -1.442695, %v5259_v42  ;;  %v5619_v42 = vadd.f32 %v12068_v49, %v12159_v34 }
 0x2a7   : > { %v8785_v16 = vpop.eup %8784  ;;  %v5380_v61 = vadd.f32 1.0, %v8783_v41 }
 0x2a8   : > { %6259 = vrot.lane.b32.xlu1 %v6176_v40, %s9193_s8  ;;  %v8787_v53 = vpop.eup %8786  ;;  %v5378_v14 = vadd.f32 1.0, %v8785_v16  ;;  %v5257_v40 = vadd.f32 %v5225_v44, %v12456_v18  ;;  %v5228_v16 = vmul.f32 %v9183_v10, %v5132_v60 }
 0x2a9   : > { %v6174_v20 = vmul.f32 %v8787_v53, %v6096_v51  ;;  %8798 = vrcp.f32 %v5380_v61  ;;  %v8789_v54 = vpop.eup %8788  ;;  %v7954_v61 = vmul.f32 -1.442695, %v5615_v12  ;;  %v5130_v53 = vld [vmem:[%s13280_s3 + $0xe8] sm:$0xff] }
 0x2aa   : > { %8800 = vrcp.f32 %v5378_v14  ;;  %v5383_v26 = vadd.f32 1.0, %v8789_v54  ;;  %v7948_v51 = vmul.f32 -1.442695, %v5257_v40  ;;  %v7955_v40 = vmul.f32 -1.442695, %v5616_v55 }
 0x2ab   : > { %v8791_v24 = vpop.eup %8790  ;;  %8802 = vpow2.f32 %v7945_v4  ;;  %v9184_v4 = vld [vmem:[%s11200_s26 + $0xe8] sm:$0xff]  ;;  %s9195_s26 = smov 96  }
 0x2ac   : > { %6255 = vrot.lane.b32.xlu1 %v6174_v20, %s9193_s8  ;;  %v8793_v41 = vpop.eup %8792  ;;  %8804 = vrcp.f32 %v5383_v26  ;;  %v5260_v20 = vadd.f32 %v5228_v16, %v12468_v58  ;;  %v5226_v54 = vmul.f32 %v9184_v4, %v5130_v53  ;;  %v7958_v26 = vmul.f32 -1.442695, %v5619_v42 }
 0x2ad   : > { %v6106_v0 = vpop.permute.xlu0 %6105  ;;  %v8795_v48 = vpop.eup %8794  ;;  %v5381_v50 = vadd.f32 1.0, %v8793_v41  ;;  %8806 = vpow2.f32 %v7950_v39 }
 0x2ae   : > { %v6179_v21 = vmul.f32 %v8791_v24, %v6106_v0  ;;  %8808 = vpow2.f32 %v7954_v61  ;;  %v5258_v39 = vadd.f32 %v5226_v54, %v12482_v23  ;;  %v13609_v54 = vld [vmem:[#allocation20_spill] sm:$0xff] }
 0x2af   : > { %v6108_v24 = vpop.permute.xlu1 %6107  ;;  %8810 = vrcp.f32 %v5381_v50  ;;  %v5618_v42 = vadd.f32 %v13609_v54, %v12192_v38 }
 0x2b0   : > { %6265 = vrot.lane.b32.xlu0 %v6179_v21, %s9193_s8  ;;  %v8797_v14 = vpop.eup %8796  ;;  %8812 = vpow2.f32 %v7948_v51  ;;  %v7951_v21 = vmul.f32 -1.442695, %v5260_v20  ;;  %v7949_v16 = vmul.f32 -1.442695, %v5258_v39  ;;  %v7953_v51 = vmul.f32 -1.442695, %v5614_v31 }
 0x2b1   : > { %v6102_v32 = vpop.permute.xlu0 %6101  ;;  %v5384_v0 = vadd.f32 1.0, %v8797_v14  ;;  %8814 = vpow2.f32 %v7952_v2  ;;  %v5623_v14 = vadd.f32 %v12094_v28, %v12203_v47  ;;  %v13610_v39 = vld [vmem:[#allocation28_spill] sm:$0xff] }
 0x2b2   : > { %v6177_v62 = vmul.f32 %v8795_v48, %v6102_v32  ;;  %v5617_v48 = vadd.f32 %v12055_v63, %v12167_v56  ;;  %v5620_v63 = vadd.f32 %v12088_v8, %v12184_v22 }
 0x2b3   : > { %v6104_v41 = vpop.permute.xlu1 %6103  ;;  %8816 = vrcp.f32 %v5384_v0  ;;  %v7962_v55 = vmul.f32 -1.442695, %v5623_v14 }
 0x2b4   : > { %6261 = vrot.lane.b32.xlu0 %v6177_v62, %s9193_s8  ;;  %8818 = vpow2.f32 %v7951_v21  ;;  %v7956_v62 = vmul.f32 -1.442695, %v5617_v48  ;;  %v7959_v2 = vmul.f32 -1.442695, %v5620_v63 }
 0x2b5   : > { %8820 = vpow2.f32 %v7958_v26 }
 0x2b6   : > { %v8799_v33 = vpop.eup %8798  ;;  %8822 = vpow2.f32 %v7955_v40 }
 0x2b7   : > { %v6180_v44 = vmul.f32 %v8799_v33, %v6108_v24  ;;  %v8801_v12 = vpop.eup %8800 }
 0x2b8   : > { %v8803_v60 = vpop.eup %8802  ;;  %v6178_v49 = vmul.f32 %v8801_v12, %v6104_v41  ;;  %v6114_v53 = vpop.permute.xlu0 %6113  ;;  %v7957_v12 = vmul.f32 -1.442695, %v5618_v42  ;;  %v13611_v41 = vld [vmem:[#allocation21_spill] sm:$0xff]  ;;  %v13613_v42 = vld [vmem:[#allocation26_spill] sm:$0xff] }
 0x2b9   : > { %6267 = vrot.lane.b32.xlu1 %v6180_v44, %s9193_s8  ;;  %v5382_v10 = vadd.f32 1.0, %v8803_v60  ;;  %v8805_v61 = vpop.eup %8804 }
 0x2ba   : > { %v8807_v32 = vpop.eup %8806  ;;  %v6183_v17 = vmul.f32 %v8805_v61, %v6114_v53 }
 0x2bb   : > { %8824 = vrcp.f32 %v5382_v10  ;;  %v8809_v50 = vpop.eup %8808  ;;  %v5387_v20 = vadd.f32 1.0, %v8807_v32  ;;  %v13612_v10 = vld [vmem:[#allocation3_spill] sm:$0xff] }
 0x2bc   : > { %8826 = vpow2.f32 %v7949_v16  ;;  %6273 = vrot.lane.b32.xlu0 %v6183_v17, %s9193_s8  ;;  %v8811_v46 = vpop.eup %8810  ;;  %v5743_v4 = vadd.f32 1.0, %v8809_v50  ;;  %v6110_v24 = vpop.permute.xlu0 %6109  ;;  %v5624_v31 = vadd.f32 %v13612_v10, %v12215_v35 }
 0x2bd   : > { %6263 = vrot.lane.b32.xlu1 %v6178_v49, %s9193_s8  ;;  %8828 = vpow2.f32 %v7956_v62  ;;  %v8813_v33 = vpop.eup %8812  ;;  %v6181_v44 = vmul.f32 %v8811_v46, %v6110_v24  ;;  %v5621_v49 = vadd.f32 %v13611_v41, %v13610_v39  ;;  %v5627_v24 = vadd.f32 %v13613_v42, %v12237_v36 }
 0x2be   : > { %8830 = vpow2.f32 %v7953_v51  ;;  %v8815_v8 = vpop.eup %8814  ;;  %v5385_v0 = vadd.f32 1.0, %v8813_v33  ;;  %v7963_v51 = vmul.f32 -1.442695, %v5624_v31 }
 0x2bf   : > { %8832 = vrcp.f32 %v5387_v20  ;;  %v5741_v48 = vadd.f32 1.0, %v8815_v8  ;;  %v7960_v17 = vmul.f32 -1.442695, %v5621_v49 }
 0x2c0   : > { %6269 = vrot.lane.b32.xlu0 %v6181_v44, %s9193_s8  ;;  %v8817_v28 = vpop.eup %8816  ;;  %8834 = vrcp.f32 %v5743_v4  ;;  %v13614_v44 = vld [vmem:[#allocation22_spill] sm:$0xff] }
 0x2c1   : > { %v8819_v21 = vpop.eup %8818  ;;  %8836 = vpow2.f32 %v7959_v2  ;;  %v6116_v60 = vpop.permute.xlu1 %6115 }
 0x2c2   : > { %v8821_v26 = vpop.eup %8820  ;;  %8838 = vpow2.f32 %v7962_v55  ;;  %v6184_v40 = vmul.f32 %v8817_v28, %v6116_v60  ;;  %v5388_v61 = vadd.f32 1.0, %v8819_v21  ;;  %v5622_v55 = vadd.f32 %v13614_v44, %v12226_v19 }
 0x2c3   : > { %8840 = vrcp.f32 %v5385_v0  ;;  %v8823_v16 = vpop.eup %8822  ;;  %v5747_v62 = vadd.f32 1.0, %v8821_v26  ;;  %v7966_v60 = vmul.f32 -1.442695, %v5627_v24 }
 0x2c4   : > { %8842 = vpow2.f32 %v7957_v12  ;;  %6275 = vrot.lane.b32.xlu1 %v6184_v40, %s9193_s8  ;;  %v5744_v20 = vadd.f32 1.0, %v8823_v16  ;;  %v7961_v41 = vmul.f32 -1.442695, %v5622_v55  ;;  %v13615_v16 = vld [vmem:[#allocation25_spill] sm:$0xff] }
 0x2c5   : > { %8844 = vrcp.f32 %v5741_v48 }
 0x2c6   : > { %v6112_v50 = vpop.permute.xlu1 %6111  ;;  %8846 = vrcp.f32 %v5388_v61  ;;  %v5625_v61 = vadd.f32 %v13615_v16, %v12248_v57 }
 0x2c7   : > { %8848 = vrcp.f32 %v5747_v62 }
 0x2c8   : > { %v8825_v32 = vpop.eup %8824  ;;  %8850 = vpow2.f32 %v7960_v17  ;;  %v7964_v24 = vmul.f32 -1.442695, %v5625_v61 }
 0x2c9   : > { %v8827_v53 = vpop.eup %8826  ;;  %v6182_v63 = vmul.f32 %v8825_v32, %v6112_v50  ;;  %8852 = vpow2.f32 %v7963_v51  ;;  %v6122_v2 = vpop.permute.xlu0 %6121  ;;  %v13616_v32 = vld [vmem:[#allocation17_spill] sm:$0xff]  ;;  %v13617_v50 = vld [vmem:[#allocation31_spill] sm:$0xff] }
 0x2ca   : > { %v8829_v14 = vpop.eup %8828  ;;  %v5386_v46 = vadd.f32 1.0, %v8827_v53  ;;  %8854 = vrcp.f32 %v5744_v20  ;;  %v13618_v51 = vld [vmem:[#allocation7_spill] sm:$0xff] }
 0x2cb   : > { %6271 = vrot.lane.b32.xlu1 %v6182_v63, %s9193_s8  ;;  %v8831_v33 = vpop.eup %8830  ;;  %v5745_v54 = vadd.f32 1.0, %v8829_v14  ;;  %v5628_v63 = vadd.f32 %v13618_v51, %v13617_v50 }
 0x2cc   : > { %v8833_v4 = vpop.eup %8832  ;;  %v5742_v28 = vadd.f32 1.0, %v8831_v33  ;;  %8856 = vrcp.f32 %v5386_v46 }
 0x2cd   : > { %v6187_v8 = vmul.f32 %v8833_v4, %v6122_v2  ;;  %v8835_v0 = vpop.eup %8834  ;;  %8858 = vrcp.f32 %v5745_v54  ;;  %v13620_v2 = vld [vmem:[#allocation14_spill] sm:$0xff] }
 0x2ce   : > { %v8837_v12 = vpop.eup %8836  ;;  %v6118_v49 = vpop.permute.xlu0 %6117  ;;  %8860 = vrcp.f32 %v5742_v28  ;;  %v5999_v62 = vmul.f32 %v8835_v0, %v13616_v32  ;;  %v13621_v0 = vld [vmem:[#allocation27_spill] sm:$0xff] }
 0x2cf   : > { %6281 = vrot.lane.b32.xlu0 %v6187_v8, %s9193_s8  ;;  %v8839_v21 = vpop.eup %8838  ;;  %v5748_v48 = vadd.f32 1.0, %v8837_v12  ;;  %8862 = vpow2.f32 %v7966_v60  ;;  %v7967_v8 = vmul.f32 -1.442695, %v5628_v63  ;;  %v5626_v28 = vadd.f32 %v13621_v0, %v12265_v6 }
 0x2d0   : > { %v8841_v26 = vpop.eup %8840  ;;  %v5751_v31 = vadd.f32 1.0, %v8839_v21  ;;  %8864 = vpow2.f32 %v7961_v41 }
 0x2d1   : > { %v8843_v40 = vpop.eup %8842  ;;  %v6185_v10 = vmul.f32 %v8841_v26, %v6118_v49  ;;  %8866 = vrcp.f32 %v5748_v48  ;;  %v13623_v49 = vld [vmem:[#allocation29_spill] sm:$0xff] }
 0x2d2   : > { %v8845_v53 = vpop.eup %8844  ;;  %v5746_v17 = vadd.f32 1.0, %v8843_v40  ;;  %v6124_v46 = vpop.permute.xlu1 %6123  ;;  %8868 = vrcp.f32 %v5751_v31  ;;  %v5631_v40 = vadd.f32 %v13623_v49, %v12273_v1  ;;  %v13624_v31 = vld [vmem:[#allocation33_spill] sm:$0xff] }
 0x2d3   : > { %6277 = vrot.lane.b32.xlu0 %v6185_v10, %s9193_s8  ;;  %v8847_v20 = vpop.eup %8846  ;;  %v5997_v44 = vmul.f32 %v8845_v53, %v13620_v2 }
 0x2d4   : > { %v8849_v4 = vpop.eup %8848  ;;  %v6188_v54 = vmul.f32 %v8847_v20, %v6124_v46  ;;  %8870 = vrcp.f32 %v5746_v17  ;;  %v13625_v17 = vld [vmem:[#allocation32_spill] sm:$0xff]  ;;  %v7970_v20 = vmul.f32 -1.442695, %v5631_v40 }
 0x2d5   : > { %v8851_v42 = vpop.eup %8850  ;;  %v6003_v16 = vmul.f32 %v8849_v4, %v13624_v31  ;;  %v13627_v4 = vld [vmem:[#allocation30_spill] sm:$0xff] }
 0x2d6   : > { %v8853_v55 = vpop.eup %8852  ;;  %6283 = vrot.lane.b32.xlu1 %v6188_v54, %s9193_s8  ;;  %v5749_v41 = vadd.f32 1.0, %v8851_v42 }
 0x2d7   : > { %v8855_v21 = vpop.eup %8854  ;;  %v5752_v10 = vadd.f32 1.0, %v8853_v55  ;;  %v13629_v55 = vld [vmem:[#allocation19_spill] sm:$0xff] }
 0x2d8   : > { %v6000_v51 = vmul.f32 %v8855_v21, %v13625_v17 }
 0x2d9   : > { %v8857_v26 = vpop.eup %8856 }
 0x2da   : > { %v8859_v32 = vpop.eup %8858 }
 0x2db   : > { %v6001_v54 = vmul.f32 %v8859_v32, %v13627_v4 }
 0x2e0   : > { %v6226_v14 = vpop.permute.xlu0 %6225 }
 0x2e1   : > { %v12640_v33 = vadd.f32 %v6226_v14, %v5999_v62  ;;  %v7965_v62 = vmul.f32 -1.442695, %v5626_v28  ;;  %v8861_v14 = vpop.eup %8860 }
 0x2e3   : > { %13619 = vst [vmem:[#allocation20_spill] sm:$0xff] %v12640_v33  ;;  %6385 = vrot.lane.b32.xlu0 %v12640_v33, %s9195_s26  ;;  %8872 = vtanh.f32 %v12640_v33  ;;  %v6120_v48 = vpop.permute.xlu1 %6119 }
 0x2e4   : > { %v6222_v12 = vpop.permute.xlu0 %6221  ;;  %8874 = vpow2.f32 %v7964_v24  ;;  %v6186_v61 = vmul.f32 %v8857_v26, %v6120_v48  ;;  %v8863_v24 = vpop.eup %8862 }
 0x2e5   : > { %v12649_v60 = vadd.f32 %v6222_v12, %v5997_v44  ;;  %8876 = vpow2.f32 %v7967_v8  ;;  %v8865_v44 = vpop.eup %8864  ;;  %v5998_v8 = vmul.f32 %v8861_v14, %v13629_v55  ;;  %v13631_v12 = vld [vmem:[#allocation4_spill] sm:$0xff]  ;;  %v13635_v14 = vld [vmem:[#allocation37_spill] sm:$0xff] }
 0x2e6   : > { %6279 = vrot.lane.b32.xlu1 %v6186_v61, %s9193_s8  ;;  %8878 = vrcp.f32 %v5749_v41  ;;  %v8867_v28 = vpop.eup %8866  ;;  %v5629_v21 = vadd.f32 %v13631_v12, %v12280_v5  ;;  %v5755_v41 = vadd.f32 1.0, %v8863_v24  ;;  %v5750_v48 = vadd.f32 1.0, %v8865_v44  ;;  %v13634_v61 = vld [vmem:[#allocation36_spill] sm:$0xff] }
 0x2e7   : > { %13622 = vst [vmem:[#allocation28_spill] sm:$0xff] %v12649_v60  ;;  %6381 = vrot.lane.b32.xlu0 %v12649_v60, %s9195_s26  ;;  %v6228_v46 = vpop.permute.xlu1 %6227  ;;  %8880 = vrcp.f32 %v5752_v10  ;;  %v8869_v40 = vpop.eup %8868  ;;  %v13633_v10 = vld [vmem:[#allocation6_spill] sm:$0xff]  ;;  %v6004_v32 = vmul.f32 %v8867_v28, %v13634_v61 }
 0x2e8   : > { %v6234_v53 = vpop.permute.xlu0 %6233  ;;  %v12661_v42 = vadd.f32 %v6228_v46, %v6000_v51  ;;  %8882 = vpow2.f32 %v7965_v62  ;;  %v5632_v31 = vadd.f32 %v13633_v10, %v12291_v25  ;;  %v13641_v10 = vld [vmem:[#allocation8_spill] sm:$0xff] }
 0x2e9   : > { %v12658_v63 = vadd.f32 %v6234_v53, %v6003_v16  ;;  %8884 = vtanh.f32 %v12649_v60  ;;  %v8871_v16 = vpop.eup %8870  ;;  %v7968_v53 = vmul.f32 -1.442695, %v5629_v21  ;;  %v5180_v60 = vld [vmem:[%s13282_s5 + $0x78] sm:$0xff] }
 0x2ea   : > { %13628 = vst [vmem:[#allocation3_spill] sm:$0xff] %v12661_v42  ;;  %6387 = vrot.lane.b32.xlu1 %v12661_v42, %s9195_s26  ;;  %8886 = vpow2.f32 %v7970_v20  ;;  %v6007_v20 = vmul.f32 %v8869_v40, %v13635_v14 }
 0x2eb   : > { %13626 = vst [vmem:[#allocation21_spill] sm:$0xff] %v12658_v63  ;;  %6393 = vrot.lane.b32.xlu0 %v12658_v63, %s9195_s26  ;;  %v6224_v26 = vpop.permute.xlu1 %6223  ;;  %8888 = vtanh.f32 %v12661_v42  ;;  %v5174_v42 = vld [vmem:[%s13282_s5 + $0x48] sm:$0xff] }
 0x2ec   : > { %v6230_v2 = vpop.permute.xlu0 %6229  ;;  %v12674_v49 = vadd.f32 %v6224_v26, %v5998_v8  ;;  %8890 = vrcp.f32 %v5755_v41  ;;  %v13639_v8 = vld [vmem:[#allocation13_spill] sm:$0xff] }
 0x2ed   : > { %v12669_v0 = vadd.f32 %v6230_v2, %v6001_v54  ;;  %8892 = vrcp.f32 %v5750_v48  ;;  %v7971_v54 = vmul.f32 -1.442695, %v5632_v31  ;;  %v13637_v2 = vld [vmem:[#allocation34_spill] sm:$0xff]  ;;  %v5635_v28 = vadd.f32 %v13639_v8, %v12311_v52 }
 0x2ee   : > { %13632 = vst [vmem:[#allocation22_spill] sm:$0xff] %v12674_v49  ;;  %6383 = vrot.lane.b32.xlu1 %v12674_v49, %s9195_s26  ;;  %v6002_v44 = vmul.f32 %v8871_v16, %v13637_v2  ;;  %8894 = vtanh.f32 %v12658_v63  ;;  %v5630_v31 = vadd.f32 %v13641_v10, %v12301_v13  ;;  %v13644_v2 = vld [vmem:[#allocation41_spill] sm:$0xff] }
 0x2ef   : > { %13630 = vst [vmem:[#allocation26_spill] sm:$0xff] %v12669_v0  ;;  %6389 = vrot.lane.b32.xlu0 %v12669_v0, %s9195_s26  ;;  %v6236_v17 = vpop.permute.xlu1 %6235  ;;  %8896 = vpow2.f32 %v7968_v53 }
 0x2f0   : > { %v8873_v62 = vpop.eup %8872  ;;  %v12684_v46 = vadd.f32 %v6236_v17, %v6004_v32  ;;  %8898 = vtanh.f32 %v12674_v49  ;;  %v7974_v32 = vmul.f32 -1.442695, %v5635_v28  ;;  %v13642_v17 = vld [vmem:[#allocation35_spill] sm:$0xff] }
 0x2f1   : > { %v8875_v4 = vpop.eup %8874  ;;  %8900 = vpow2.f32 %v7971_v54 }
 0x2f2   : > { %13636 = vst [vmem:[#allocation25_spill] sm:$0xff] %v12684_v46  ;;  %v8877_v24 = vpop.eup %8876  ;;  %6395 = vrot.lane.b32.xlu1 %v12684_v46, %s9195_s26  ;;  %v5753_v26 = vadd.f32 1.0, %v8875_v4  ;;  %v13643_v4 = vld [vmem:[#allocation12_spill] sm:$0xff] }
 0x2f3   : > { %6929 = vrot.lane.b32.xlu0 %v8873_v62, %s9194_s18  ;;  %v8879_v21 = vpop.eup %8878  ;;  %v5756_v48 = vadd.f32 1.0, %v8877_v24  ;;  %v5633_v54 = vadd.f32 %v13643_v4, %v12321_v30 }
 0x2f4   : > { %v6232_v12 = vpop.permute.xlu1 %6231  ;;  %v8881_v40 = vpop.eup %8880  ;;  %8902 = vrcp.f32 %v5753_v26 }
 0x2f5   : > { %v12696_v41 = vadd.f32 %v6232_v12, %v6002_v44  ;;  %v8883_v16 = vpop.eup %8882  ;;  %8904 = vrcp.f32 %v5756_v48  ;;  %v6008_v44 = vmul.f32 %v8881_v40, %v13644_v2  ;;  %v13646_v12 = vld [vmem:[#allocation24_spill] sm:$0xff]  ;;  %v7972_v10 = vmul.f32 -1.442695, %v5633_v54 }
 0x2f6   : > { %v8885_v61 = vpop.eup %8884  ;;  %8906 = vtanh.f32 %v12669_v0  ;;  %v5754_v28 = vadd.f32 1.0, %v8883_v16 }
 0x2f7   : > { %13640 = vst [vmem:[#allocation31_spill] sm:$0xff] %v12696_v41  ;;  %6391 = vrot.lane.b32.xlu1 %v12696_v41, %s9195_s26  ;;  %v8887_v53 = vpop.eup %8886  ;;  %8908 = vpow2.f32 %v7974_v32 }
 0x2f8   : > { %v8889_v14 = vpop.eup %8888  ;;  %v5759_v26 = vadd.f32 1.0, %v8887_v53  ;;  %8910 = vtanh.f32 %v12684_v46  ;;  %v13648_v53 = vld [vmem:[#allocation42_spill] sm:$0xff] }
 0x2f9   : > { %v8891_v40 = vpop.eup %8890 }
 0x2fa   : > { %v6242_v51 = vpop.permute.xlu0 %6241 }
 0x2fb   : > { %v12691_v55 = vadd.f32 %v6242_v51, %v6007_v20  ;;  %v6005_v51 = vmul.f32 %v8879_v21, %v13642_v17  ;;  %v7969_v20 = vmul.f32 -1.442695, %v5630_v31  ;;  %6931 = vrot.lane.b32.xlu1 %v8889_v14, %s9194_s18  ;;  %v5636_v21 = vadd.f32 %v13646_v12, %v12329_v45  ;;  %v8893_v31 = vpop.eup %8892 }
 0x2fc   : > { %v6244_v24 = vpop.permute.xlu1 %6243  ;;  %v8895_v16 = vpop.eup %8894  ;;  %v6011_v17 = vmul.f32 %v8891_v40, %v13648_v53 }
 0x2fd   : > { %13638 = vst [vmem:[#allocation17_spill] sm:$0xff] %v12691_v55  ;;  %6401 = vrot.lane.b32.xlu0 %v12691_v55, %s9195_s26  ;;  %v12716_v48 = vadd.f32 %v6244_v24, %v6008_v44  ;;  %8912 = vpow2.f32 %v7969_v20  ;;  %v13649_v20 = vld [vmem:[#allocation38_spill] sm:$0xff] }
 0x2fe   : > { %v6238_v62 = vpop.permute.xlu0 %6237  ;;  %8914 = vrcp.f32 %v5754_v28  ;;  %v6006_v54 = vmul.f32 %v8893_v31, %v13649_v20 }
 0x2ff   : > { %v12710_v8 = vadd.f32 %v6238_v62, %v6005_v51  ;;  %13647 = vst [vmem:[#allocation14_spill] sm:$0xff] %v12716_v48  ;;  %6403 = vrot.lane.b32.xlu1 %v12716_v48, %s9195_s26  ;;  %v8897_v62 = vpop.eup %8896  ;;  %8916 = vrcp.f32 %v5759_v26 }
 0x300   : > { %v8899_v51 = vpop.eup %8898  ;;  %8918 = vpow2.f32 %v7972_v10  ;;  %v6240_v14 = vpop.permute.xlu1 %6239  ;;  %v5757_v2 = vadd.f32 1.0, %v8897_v62  ;;  %v13653_v10 = vld [vmem:[#allocation2_spill] sm:$0xff]  ;;  %v13654_v62 = vld [vmem:[#allocation39_spill] sm:$0xff] }
 0x301   : > { %6925 = vrot.lane.b32.xlu0 %v8885_v61, %s9194_s18  ;;  %13645 = vst [vmem:[#allocation7_spill] sm:$0xff] %v12710_v8  ;;  %v7975_v61 = vmul.f32 -1.442695, %v5636_v21  ;;  %v8901_v4 = vpop.eup %8900  ;;  %8920 = vtanh.f32 %v12691_v55  ;;  %v12730_v44 = vadd.f32 %v6240_v14, %v6006_v54  ;;  %v13652_v21 = vld [vmem:[#allocation15_spill] sm:$0xff]  ;;  %v5639_v31 = vadd.f32 %v13653_v10, %v12359_v43  ;;  %v13655_v54 = vld [vmem:[#allocation45_spill] sm:$0xff] }
 0x302   : > { %v6250_v32 = vpop.permute.xlu0 %6249  ;;  %v8903_v28 = vpop.eup %8902  ;;  %v5760_v12 = vadd.f32 1.0, %v8901_v4  ;;  %v5634_v26 = vadd.f32 %v13652_v21, %v12341_v3 }
 0x303   : > { %v12726_v24 = vadd.f32 %v6250_v32, %v6011_v17  ;;  %6927 = vrot.lane.b32.xlu1 %v8899_v51, %s9194_s18  ;;  %8922 = vpow2.f32 %v7975_v61  ;;  %13651 = vst [vmem:[#allocation29_spill] sm:$0xff] %v12730_v44  ;;  %v8905_v40 = vpop.eup %8904  ;;  %v6009_v53 = vmul.f32 %v8903_v28, %v13654_v62  ;;  %v7978_v20 = vmul.f32 -1.442695, %v5639_v31 }
 0x304   : > { %8924 = vtanh.f32 %v12696_v41  ;;  %v7973_v51 = vmul.f32 -1.442695, %v5634_v26  ;;  %v6012_v21 = vmul.f32 %v8905_v40, %v13655_v54 }
 0x305   : > { %6397 = vrot.lane.b32.xlu0 %v12710_v8, %s9195_s26  ;;  %13650 = vst [vmem:[#allocation27_spill] sm:$0xff] %v12726_v24  ;;  %8926 = vrcp.f32 %v5757_v2  ;;  %v13657_v2 = vld [vmem:[#allocation23_spill] sm:$0xff] }
 0x306   : > { %v6246_v61 = vpop.permute.xlu0 %6245  ;;  %8928 = vrcp.f32 %v5760_v12  ;;  %v5637_v41 = vadd.f32 %v13657_v2, %v12376_v29  ;;  %v13661_v2 = vld [vmem:[#allocation43_spill] sm:$0xff]  ;;  %v5188_v29 = vld [vmem:[%s13282_s5 + $0xb8] sm:$0xff] }
 0x307   : > { %6399 = vrot.lane.b32.xlu1 %v12730_v44, %s9195_s26  ;;  %8930 = vtanh.f32 %v12710_v8  ;;  %v12744_v10 = vadd.f32 %v6246_v61, %v6009_v53 }
 0x308   : > { %8932 = vtanh.f32 %v12716_v48  ;;  %v7976_v61 = vmul.f32 -1.442695, %v5637_v41 }
 0x309   : > { %6937 = vrot.lane.b32.xlu0 %v8895_v16, %s9194_s18  ;;  %v8907_v16 = vpop.eup %8906  ;;  %13656 = vst [vmem:[#allocation33_spill] sm:$0xff] %v12744_v10  ;;  %8934 = vpow2.f32 %v7973_v51 }
 0x30a   : > { %v8909_v32 = vpop.eup %8908  ;;  %8936 = vpow2.f32 %v7978_v20 }
 0x30b   : > { %v8911_v17 = vpop.eup %8910  ;;  %v5763_v62 = vadd.f32 1.0, %v8909_v32  ;;  %v13659_v32 = vld [vmem:[#allocation47_spill] sm:$0xff] }
 0x30c   : > { %v8913_v4 = vpop.eup %8912  ;;  %6939 = vrot.lane.b32.xlu1 %v8911_v17, %s9194_s18 }
 0x30d   : > { %6409 = vrot.lane.b32.xlu0 %v12726_v24, %s9195_s26  ;;  %v8915_v28 = vpop.eup %8914  ;;  %v5758_v40 = vadd.f32 1.0, %v8913_v4  ;;  %8938 = vrcp.f32 %v5763_v62 }
 0x30e   : > { %v6252_v14 = vpop.permute.xlu1 %6251  ;;  %v8917_v26 = vpop.eup %8916  ;;  %v6010_v20 = vmul.f32 %v8915_v28, %v13661_v2  ;;  %v13663_v28 = vld [vmem:[#allocation11_spill] sm:$0xff]  ;;  %v13665_v2 = vld [vmem:[#allocation52_spill] sm:$0xff] }
 0x30f   : > { %v12750_v12 = vadd.f32 %v6252_v14, %v6012_v21  ;;  %v8919_v31 = vpop.eup %8918  ;;  %v6015_v54 = vmul.f32 %v8917_v26, %v13659_v32  ;;  %8940 = vrcp.f32 %v5758_v40  ;;  %v13660_v21 = vld [vmem:[#allocation5_spill] sm:$0xff] }
 0x310   : > { %v6258_v53 = vpop.permute.xlu0 %6257  ;;  %v5640_v4 = vadd.f32 %v13660_v21, %v12397_v11  ;;  %8942 = vtanh.f32 %v12726_v24  ;;  %v5761_v41 = vadd.f32 1.0, %v8919_v31  ;;  %v5638_v21 = vadd.f32 %v13663_v28, %v12418_v15  ;;  %v5182_v15 = vld [vmem:[%s13282_s5 + $0x88] sm:$0xff] }
 0x311   : > { %6933 = vrot.lane.b32.xlu0 %v8907_v16, %s9194_s18  ;;  %13658 = vst [vmem:[#allocation32_spill] sm:$0xff] %v12750_v12  ;;  %6411 = vrot.lane.b32.xlu1 %v12750_v12, %s9195_s26  ;;  %v8921_v16 = vpop.eup %8920  ;;  %v12762_v48 = vadd.f32 %v6258_v53, %v6015_v54  ;;  %8944 = vpow2.f32 %v7976_v61  ;;  %v13664_v61 = vld [vmem:[#allocation44_spill] sm:$0xff] }
 0x312   : > { %v8923_v17 = vpop.eup %8922  ;;  %v6248_v51 = vpop.permute.xlu1 %6247  ;;  %8946 = vtanh.f32 %v12730_v44 }
 0x313   : > { %v8925_v14 = vpop.eup %8924  ;;  %v5764_v62 = vadd.f32 1.0, %v8923_v17  ;;  %v12766_v26 = vadd.f32 %v6248_v51, %v6010_v20  ;;  %8948 = vrcp.f32 %v5761_v41 }
 0x314   : > { %v8927_v40 = vpop.eup %8926  ;;  %v6254_v31 = vpop.permute.xlu0 %6253 }
 0x315   : > { %6405 = vrot.lane.b32.xlu0 %v12744_v10, %s9195_s26  ;;  %6935 = vrot.lane.b32.xlu1 %v8925_v14, %s9194_s18  ;;  %13662 = vst [vmem:[#allocation30_spill] sm:$0xff] %v12766_v26  ;;  %v8929_v32 = vpop.eup %8928  ;;  %8950 = vrcp.f32 %v5764_v62  ;;  %v6013_v17 = vmul.f32 %v8927_v40, %v13664_v61  ;;  %v13666_v62 = vld [vmem:[#allocation10_spill] sm:$0xff] }
 0x316   : > { %v8931_v53 = vpop.eup %8930  ;;  %v6016_v20 = vmul.f32 %v8929_v32, %v13665_v2  ;;  %v5643_v44 = vadd.f32 %v13666_v62, %v12437_v7 }
 0x317   : > { %v8933_v54 = vpop.eup %8932  ;;  %v12778_v28 = vadd.f32 %v6254_v31, %v6013_v17 }
 0x318   : > { %v8935_v51 = vpop.eup %8934  ;;  %v7982_v61 = vmul.f32 -1.442695, %v5643_v44 }
 0x319   : > { %6945 = vrot.lane.b32.xlu0 %v8921_v16, %s9194_s18  ;;  %v7979_v16 = vmul.f32 -1.442695, %v5640_v4  ;;  %6407 = vrot.lane.b32.xlu1 %v12766_v26, %s9195_s26  ;;  %v7977_v4 = vmul.f32 -1.442695, %v5638_v21  ;;  %v8937_v41 = vpop.eup %8936  ;;  %v5762_v21 = vadd.f32 1.0, %v8935_v51 }
 0x31a   : > { %v6260_v14 = vpop.permute.xlu1 %6259 }
 0x31b   : > { %8952 = vpow2.f32 %v7979_v16  ;;  %v12784_v40 = vadd.f32 %v6260_v14, %v6016_v20  ;;  %v8939_v16 = vpop.eup %8938  ;;  %v13668_v20 = vld [vmem:[#allocation16_spill] sm:$0xff] }
 0x31c   : > { %8954 = vtanh.f32 %v12744_v10  ;;  %v8941_v32 = vpop.eup %8940  ;;  %v5641_v62 = vadd.f32 %v13668_v20, %v12456_v18  ;;  %v5184_v18 = vld [vmem:[%s13282_s5 + $0x98] sm:$0xff] }
 0x31d   : > { %6417 = vrot.lane.b32.xlu0 %v12762_v48, %s9195_s26  ;;  %6947 = vrot.lane.b32.xlu1 %v8933_v54, %s9194_s18  ;;  %8956 = vtanh.f32 %v12750_v12  ;;  %v8943_v31 = vpop.eup %8942  ;;  %v13667_v54 = vld [vmem:[#allocation53_spill] sm:$0xff] }
 0x31e   : > { %8958 = vpow2.f32 %v7977_v4  ;;  %v8945_v17 = vpop.eup %8944  ;;  %v6019_v2 = vmul.f32 %v8939_v16, %v13667_v54  ;;  %v6256_v51 = vpop.permute.xlu1 %6255 }
 0x31f   : > { %v8947_v14 = vpop.eup %8946  ;;  %8960 = vrcp.f32 %v5762_v21  ;;  %v5765_v24 = vadd.f32 1.0, %v8945_v17  ;;  %v13671_v17 = vld [vmem:[#allocation50_spill] sm:$0xff] }
 0x320   : > { %v8949_v44 = vpop.eup %8948 }
 0x321   : > { %6941 = vrot.lane.b32.xlu0 %v8931_v53, %s9194_s18  ;;  %v5767_v53 = vadd.f32 1.0, %v8937_v41  ;;  %6419 = vrot.lane.b32.xlu1 %v12784_v40, %s9195_s26  ;;  %v13669_v41 = vld [vmem:[#allocation49_spill] sm:$0xff] }
 0x322   : > { %v6266_v12 = vpop.permute.xlu0 %6265  ;;  %v6014_v4 = vmul.f32 %v8941_v32, %v13669_v41  ;;  %v8951_v21 = vpop.eup %8950  ;;  %v13672_v41 = vld [vmem:[#allocation58_spill] sm:$0xff] }
 0x323   : > { %8962 = vrcp.f32 %v5767_v53  ;;  %v12795_v10 = vadd.f32 %v6266_v12, %v6019_v2  ;;  %v13670_v53 = vld [vmem:[#allocation18_spill] sm:$0xff]  ;;  %v6017_v2 = vmul.f32 %v8949_v44, %v13671_v17 }
 0x324   : > { %8964 = vpow2.f32 %v7982_v61  ;;  %v12799_v16 = vadd.f32 %v6256_v51, %v6014_v4  ;;  %v5644_v32 = vadd.f32 %v13670_v53, %v12468_v58 }
 0x325   : > { %6413 = vrot.lane.b32.xlu0 %v12778_v28, %s9195_s26  ;;  %6943 = vrot.lane.b32.xlu1 %v8947_v14, %s9194_s18  ;;  %8966 = vtanh.f32 %v12766_v26  ;;  %v13673_v26 = vld [vmem:[#allocation9_spill] sm:$0xff] }
 0x326   : > { %v6262_v61 = vpop.permute.xlu0 %6261  ;;  %8968 = vrcp.f32 %v5765_v24  ;;  %v7983_v51 = vmul.f32 -1.442695, %v5644_v32  ;;  %v5642_v8 = vadd.f32 %v13673_v26, %v12482_v23  ;;  %v13674_v26 = vld [vmem:[#allocation55_spill] sm:$0xff] }
 0x327   : > { %v12810_v4 = vadd.f32 %v6262_v61, %v6017_v2  ;;  %v13675_v2 = vld [vmem:[#allocation59_spill] sm:$0xff] }
 0x328   : > { %v8953_v54 = vpop.eup %8952  ;;  %v5178_v23 = vld [vmem:[%s13282_s5 + $0x68] sm:$0xff] }
 0x329   : > { %6953 = vrot.lane.b32.xlu0 %v8943_v31, %s9194_s18  ;;  %v7980_v31 = vmul.f32 -1.442695, %v5641_v62  ;;  %6415 = vrot.lane.b32.xlu1 %v12799_v16, %s9195_s26  ;;  %v8955_v12 = vpop.eup %8954  ;;  %v5768_v20 = vadd.f32 1.0, %v8953_v54  ;;  %v6020_v62 = vmul.f32 %v8951_v21, %v13672_v41  ;;  %v7981_v54 = vmul.f32 -1.442695, %v5642_v8 }
 0x32a   : > { %v8957_v14 = vpop.eup %8956 }
 0x32b   : > { %8970 = vpow2.f32 %v7980_v31  ;;  %v8959_v53 = vpop.eup %8958  ;;  %v6268_v55 = vpop.permute.xlu1 %6267 }
 0x32c   : > { %v12815_v24 = vadd.f32 %v6268_v55, %v6020_v62  ;;  %8972 = vrcp.f32 %v5768_v20  ;;  %v8961_v44 = vpop.eup %8960  ;;  %v5766_v31 = vadd.f32 1.0, %v8959_v53 }
 0x32d   : > { %6425 = vrot.lane.b32.xlu0 %v12795_v10, %s9195_s26  ;;  %6955 = vrot.lane.b32.xlu1 %v8957_v14, %s9194_s18  ;;  %8974 = vpow2.f32 %v7983_v51  ;;  %v6018_v17 = vmul.f32 %v8961_v44, %v13674_v26  ;;  %v13676_v44 = vld [vmem:[#allocation56_spill] sm:$0xff] }
 0x32e   : > { %8976 = vrcp.f32 %v5766_v31  ;;  %v6274_v41 = vpop.permute.xlu0 %6273  ;;  %v13677_v26 = vld [vmem:[#allocation64_spill] sm:$0xff] }
 0x32f   : > { %v6264_v61 = vpop.permute.xlu1 %6263  ;;  %8978 = vpow2.f32 %v7981_v54 }
 0x330   : > { %v8963_v21 = vpop.eup %8962  ;;  %v12824_v20 = vadd.f32 %v6264_v61, %v6018_v17 }
 0x331   : > { %6949 = vrot.lane.b32.xlu0 %v8955_v12, %s9194_s18  ;;  %6427 = vrot.lane.b32.xlu1 %v12815_v24, %s9195_s26  ;;  %v8965_v32 = vpop.eup %8964  ;;  %v6023_v14 = vmul.f32 %v8963_v21, %v13675_v2 }
 0x332   : > { %v8967_v12 = vpop.eup %8966  ;;  %v5771_v55 = vadd.f32 1.0, %v8965_v32  ;;  %v6270_v32 = vpop.permute.xlu0 %6269 }
 0x333   : > { %v8969_v51 = vpop.eup %8968  ;;  %v12826_v53 = vadd.f32 %v6274_v41, %v6023_v14 }
 0x334   : > { %8980 = vrcp.f32 %v5771_v55  ;;  %v6021_v31 = vmul.f32 %v8969_v51, %v13676_v44 }
 0x335   : > { %6421 = vrot.lane.b32.xlu0 %v12810_v4, %s9195_s26  ;;  %6951 = vrot.lane.b32.xlu1 %v8967_v12, %s9194_s18 }
 0x336   : > { %v12833_v12 = vadd.f32 %v6270_v32, %v6021_v31  ;;  %v6276_v55 = vpop.permute.xlu1 %6275 }
 0x338   : > { %v8971_v62 = vpop.eup %8970 }
 0x339   : > { %6423 = vrot.lane.b32.xlu1 %v12824_v20, %s9195_s26  ;;  %6433 = vrot.lane.b32.xlu0 %v12826_v53, %s9195_s26  ;;  %v5769_v8 = vadd.f32 1.0, %v8971_v62  ;;  %v8973_v54 = vpop.eup %8972  ;;  %v13678_v62 = vld [vmem:[#allocation61_spill] sm:$0xff] }
 0x33a   : > { %v8975_v21 = vpop.eup %8974  ;;  %v6024_v17 = vmul.f32 %v8973_v54, %v13677_v26  ;;  %v13679_v54 = vld [vmem:[#allocation66_spill] sm:$0xff] }
 0x33b   : > { %8982 = vrcp.f32 %v5769_v8  ;;  %v5772_v61 = vadd.f32 1.0, %v8975_v21  ;;  %v8977_v2 = vpop.eup %8976 }
 0x33c   : > { %v8979_v14 = vpop.eup %8978  ;;  %v12838_v41 = vadd.f32 %v6276_v55, %v6024_v17  ;;  %v6022_v44 = vmul.f32 %v8977_v2, %v13678_v62 }
 0x33d   : > { %6429 = vrot.lane.b32.xlu0 %v12833_v12, %s9195_s26  ;;  %8984 = vrcp.f32 %v5772_v61  ;;  %v5770_v51 = vadd.f32 1.0, %v8979_v14  ;;  %v6272_v31 = vpop.permute.xlu1 %6271  ;;  %v13680_v61 = vld [vmem:[#allocation63_spill] sm:$0xff] }
 0x33e   : > { %6435 = vrot.lane.b32.xlu1 %v12838_v41, %s9195_s26  ;;  %v12843_v32 = vadd.f32 %v6272_v31, %v6022_v44  ;;  %v13681_v44 = vld [vmem:[#allocation70_spill] sm:$0xff] }
 0x33f   : > { %8986 = vrcp.f32 %v5770_v51  ;;  %v5167_v51 = vld [vmem:[%s13282_s5 + $0x10] sm:$0xff] }
 0x340   : > { %8988 = vtanh.f32 %v12778_v28 }
 0x341   : > { %v8981_v8 = vpop.eup %8980  ;;  %v6282_v26 = vpop.permute.xlu0 %6281  ;;  %8990 = vtanh.f32 %v12762_v48 }
 0x342   : > { %6431 = vrot.lane.b32.xlu1 %v12843_v32, %s9195_s26  ;;  %v6027_v21 = vmul.f32 %v8981_v8, %v13679_v54  ;;  %8992 = vtanh.f32 %v12810_v4 }
 0x343   : > { %8994 = vtanh.f32 %v12799_v16 }
 0x344   : > { %v12848_v55 = vadd.f32 %v6282_v26, %v6027_v21  ;;  %8996 = vtanh.f32 %v12795_v10 }
 0x345   : > { %v6278_v2 = vpop.permute.xlu0 %6277  ;;  %8998 = vtanh.f32 %v12784_v40 }
 0x346   : > { %6441 = vrot.lane.b32.xlu0 %v12848_v55, %s9195_s26  ;;  %9000 = vtanh.f32 %v12833_v12 }
 0x348   : > { %v8983_v17 = vpop.eup %8982  ;;  %v6284_v54 = vpop.permute.xlu1 %6283 }
 0x349   : > { %v6025_v14 = vmul.f32 %v8983_v17, %v13680_v61  ;;  %v5165_v17 = vld [vmem:[%s13282_s5] sm:$0xff] }
 0x34a   : > { %v8985_v62 = vpop.eup %8984 }
 0x34b   : > { %v12853_v46 = vadd.f32 %v6278_v2, %v6025_v14  ;;  %v6028_v31 = vmul.f32 %v8985_v62, %v13681_v44  ;;  %v13682_v14 = vld [vmem:[#allocation68_spill] sm:$0xff] }
 0x34c   : > { %v8987_v26 = vpop.eup %8986 }
 0x34d   : > { %6437 = vrot.lane.b32.xlu0 %v12853_v46, %s9195_s26  ;;  %v12861_v49 = vadd.f32 %v6284_v54, %v6028_v31  ;;  %v6026_v2 = vmul.f32 %v8987_v26, %v13682_v14  ;;  %v5168_v31 = vld [vmem:[%s13282_s5 + $0x18] sm:$0xff]  ;;  %v5169_v26 = vld [vmem:[%s13282_s5 + $0x20] sm:$0xff] }
 0x34f   : > { %6443 = vrot.lane.b32.xlu1 %v12861_v49, %s9195_s26 }
 0x355   : > { %v6386_v8 = vpop.permute.xlu0 %6385 }
 0x356   : > { %v6479_v21 = vmul.f32 %v6386_v8, %v5167_v51  ;;  %v5171_v51 = vld [vmem:[%s13282_s5 + $0x30] sm:$0xff] }
 0x358   : > { %6545 = vrot.lane.b32.xlu0 %v6479_v21, %s9195_s26  ;;  %v6280_v62 = vpop.permute.xlu1 %6279 }
 0x359   : > { %v6382_v61 = vpop.permute.xlu0 %6381  ;;  %v12873_v44 = vadd.f32 %v6280_v62, %v6026_v2 }
 0x35a   : > { %v6477_v0 = vmul.f32 %v6382_v61, %v5165_v17 }
 0x35b   : > { %6439 = vrot.lane.b32.xlu1 %v12873_v44, %s9195_s26 }
 0x35c   : > { %6541 = vrot.lane.b32.xlu0 %v6477_v0, %s9195_s26  ;;  %v6388_v21 = vpop.permute.xlu1 %6387  ;;  %v5166_v0 = vld [vmem:[%s13282_s5 + $0x8] sm:$0xff] }
 0x35d   : > { %v6394_v8 = vpop.permute.xlu0 %6393  ;;  %v6480_v17 = vmul.f32 %v6388_v21, %v5168_v31 }
 0x35e   : > { %v6483_v54 = vmul.f32 %v6394_v8, %v5171_v51  ;;  %v5172_v51 = vld [vmem:[%s13282_s5 + $0x38] sm:$0xff] }
 0x35f   : > { %6547 = vrot.lane.b32.xlu1 %v6480_v17, %s9195_s26 }
 0x360   : > { %6553 = vrot.lane.b32.xlu0 %v6483_v54, %s9195_s26  ;;  %v6384_v2 = vpop.permute.xlu1 %6383  ;;  %v5175_v54 = vld [vmem:[%s13282_s5 + $0x50] sm:$0xff] }
 0x361   : > { %v6390_v61 = vpop.permute.xlu0 %6389  ;;  %v6478_v62 = vmul.f32 %v6384_v2, %v5166_v0 }
 0x362   : > { %v6481_v14 = vmul.f32 %v6390_v61, %v5169_v26  ;;  %v5170_v26 = vld [vmem:[%s13282_s5 + $0x28] sm:$0xff] }
 0x363   : > { %6543 = vrot.lane.b32.xlu1 %v6478_v62, %s9195_s26 }
 0x364   : > { %6549 = vrot.lane.b32.xlu0 %v6481_v14, %s9195_s26  ;;  %v6396_v31 = vpop.permute.xlu1 %6395 }
 0x365   : > { %v12893_v8 = vpop.permute.xlu0 %6929  ;;  %v6484_v21 = vmul.f32 %v6396_v31, %v5172_v51  ;;  %v5173_v51 = vld [vmem:[%s13282_s5 + $0x40] sm:$0xff]  ;;  %v5176_v31 = vld [vmem:[%s13282_s5 + $0x58] sm:$0xff] }
 0x367   : > { %6555 = vrot.lane.b32.xlu1 %v6484_v21, %s9195_s26 }
 0x369   : > { %v6392_v61 = vpop.permute.xlu1 %6391 }
 0x36a   : > { %v6482_v14 = vmul.f32 %v6392_v61, %v5170_v26 }
 0x36c   : > { %6551 = vrot.lane.b32.xlu1 %v6482_v14, %s9195_s26  ;;  %v5179_v14 = vld [vmem:[%s13282_s5 + $0x70] sm:$0xff] }
 0x36d   : > { %v12907_v62 = vpop.permute.xlu1 %6931 }
 0x36f   : > { %v6402_v17 = vpop.permute.xlu0 %6401 }
 0x370   : > { %v6487_v0 = vmul.f32 %v6402_v17, %v5175_v54 }
 0x371   : > { %v6404_v17 = vpop.permute.xlu1 %6403 }
 0x372   : > { %6561 = vrot.lane.b32.xlu0 %v6487_v0, %s9195_s26  ;;  %v6488_v26 = vmul.f32 %v6404_v17, %v5176_v31 }
 0x373   : > { %v12904_v2 = vpop.permute.xlu0 %6925 }
 0x374   : > { %6563 = vrot.lane.b32.xlu1 %v6488_v26, %s9195_s26  ;;  %v5177_v26 = vld [vmem:[%s13282_s5 + $0x60] sm:$0xff] }
 0x375   : > { %v12919_v61 = vpop.permute.xlu1 %6927 }
 0x377   : > { %v6398_v21 = vpop.permute.xlu0 %6397 }
 0x378   : > { %v6485_v54 = vmul.f32 %v6398_v21, %v5173_v51 }
 0x379   : > { %v6400_v21 = vpop.permute.xlu1 %6399 }
 0x37a   : > { %6557 = vrot.lane.b32.xlu0 %v6485_v54, %s9195_s26  ;;  %v6486_v31 = vmul.f32 %v6400_v21, %v5174_v42 }
 0x37b   : > { %v12916_v0 = vpop.permute.xlu0 %6937 }
 0x37c   : > { %6559 = vrot.lane.b32.xlu1 %v6486_v31, %s9195_s26  ;;  %v5183_v31 = vld [vmem:[%s13282_s5 + $0x90] sm:$0xff] }
 0x37e   : > { %v12931_v17 = vpop.permute.xlu1 %6939 }
 0x37f   : > { %v6410_v63 = vpop.permute.xlu0 %6409 }
 0x380   : > { %v6491_v51 = vmul.f32 %v6410_v63, %v5179_v14 }
 0x382   : > { %6569 = vrot.lane.b32.xlu0 %v6491_v51, %s9195_s26 }
 0x383   : > { %v12928_v54 = vpop.permute.xlu0 %6933  ;;  %v6412_v14 = vpop.permute.xlu1 %6411 }
 0x384   : > { %v6492_v42 = vmul.f32 %v6412_v14, %v5180_v60 }
 0x386   : > { %6571 = vrot.lane.b32.xlu1 %v6492_v42, %s9195_s26  ;;  %v5181_v42 = vld [vmem:[%s13282_s5 + $0x80] sm:$0xff] }
 0x387   : > { %v6406_v33 = vpop.permute.xlu0 %6405  ;;  %v12943_v21 = vpop.permute.xlu1 %6935 }
 0x388   : > { %v6489_v63 = vmul.f32 %v6406_v33, %v5177_v26 }
 0x38a   : > { %6565 = vrot.lane.b32.xlu0 %v6489_v63, %s9195_s26 }
 0x38b   : > { %v12940_v51 = vpop.permute.xlu0 %6945  ;;  %v6408_v26 = vpop.permute.xlu1 %6407 }
 0x38c   : > { %v6490_v60 = vmul.f32 %v6408_v26, %v5178_v23 }
 0x38e   : > { %6567 = vrot.lane.b32.xlu1 %v6490_v60, %s9195_s26  ;;  %v5187_v60 = vld [vmem:[%s13282_s5 + $0xb0] sm:$0xff] }
 0x38f   : > { %v6418_v58 = vpop.permute.xlu0 %6417  ;;  %v12955_v14 = vpop.permute.xlu1 %6947 }
 0x390   : > { %v6495_v33 = vmul.f32 %v6418_v58, %v5183_v31 }
 0x392   : > { %6577 = vrot.lane.b32.xlu0 %v6495_v33, %s9195_s26 }
 0x393   : > { %v12952_v63 = vpop.permute.xlu0 %6941  ;;  %v6420_v31 = vpop.permute.xlu1 %6419 }
 0x394   : > { %v6496_v23 = vmul.f32 %v6420_v31, %v5184_v18 }
 0x396   : > { %6579 = vrot.lane.b32.xlu1 %v6496_v23, %s9195_s26  ;;  %v5185_v23 = vld [vmem:[%s13282_s5 + $0xa0] sm:$0xff] }
 0x397   : > { %v6414_v7 = vpop.permute.xlu0 %6413  ;;  %v12967_v26 = vpop.permute.xlu1 %6943 }
 0x398   : > { %v6493_v58 = vmul.f32 %v6414_v7, %v5181_v42 }
 0x39a   : > { %6573 = vrot.lane.b32.xlu0 %v6493_v58, %s9195_s26 }
 0x39b   : > { %v12964_v33 = vpop.permute.xlu0 %6953  ;;  %v6416_v42 = vpop.permute.xlu1 %6415 }
 0x39c   : > { %v6494_v18 = vmul.f32 %v6416_v42, %v5182_v15  ;;  %v5186_v42 = vld [vmem:[%s13282_s5 + $0xa8] sm:$0xff] }
 0x39e   : > { %6575 = vrot.lane.b32.xlu1 %v6494_v18, %s9195_s26  ;;  %v5191_v18 = vld [vmem:[%s13282_s5 + $0xd0] sm:$0xff] }
 0x39f   : > { %v6426_v11 = vpop.permute.xlu0 %6425  ;;  %v12979_v31 = vpop.permute.xlu1 %6955 }
 0x3a0   : > { %v6499_v7 = vmul.f32 %v6426_v11, %v5187_v60 }
 0x3a2   : > { %6585 = vrot.lane.b32.xlu0 %v6499_v7, %s9195_s26 }
 0x3a3   : > { %v12976_v58 = vpop.permute.xlu0 %6949  ;;  %v6428_v60 = vpop.permute.xlu1 %6427 }
 0x3a4   : > { %v6500_v15 = vmul.f32 %v6428_v60, %v5188_v29  ;;  %v5189_v29 = vld [vmem:[%s13282_s5 + $0xc0] sm:$0xff]  ;;  %v5192_v60 = vld [vmem:[%s13282_s5 + $0xd8] sm:$0xff] }
 0x3a6   : > { %6587 = vrot.lane.b32.xlu1 %v6500_v15, %s9195_s26 }
 0x3a7   : > { %v6422_v3 = vpop.permute.xlu0 %6421  ;;  %v12989_v7 = vpop.permute.xlu1 %6951 }
 0x3a8   : > { %v6497_v11 = vmul.f32 %v6422_v3, %v5185_v23 }
 0x3aa   : > { %6581 = vrot.lane.b32.xlu0 %v6497_v11, %s9195_s26 }
 0x3ab   : > { %v6424_v43 = vpop.permute.xlu1 %6423  ;;  %v6434_v13 = vpop.permute.xlu0 %6433 }
 0x3ac   : > { %v6498_v45 = vmul.f32 %v6424_v43, %v5186_v42  ;;  %v6503_v3 = vmul.f32 %v6434_v13, %v5191_v18  ;;  %v5190_v13 = vld [vmem:[%s13282_s5 + $0xc8] sm:$0xff]  ;;  %v5195_v18 = vld [vmem:[%s13282_s5 + $0xf0] sm:$0xff] }
 0x3ae   : > { %6583 = vrot.lane.b32.xlu1 %v6498_v45, %s9195_s26  ;;  %6593 = vrot.lane.b32.xlu0 %v6503_v3, %s9195_s26 }
 0x3af   : > { %v6430_v23 = vpop.permute.xlu0 %6429 }
 0x3b0   : > { %v6501_v11 = vmul.f32 %v6430_v23, %v5189_v29  ;;  %v6436_v15 = vpop.permute.xlu1 %6435  ;;  %v5193_v23 = vld [vmem:[%s13282_s5 + $0xe0] sm:$0xff] }
 0x3b1   : > { %v6504_v43 = vmul.f32 %v6436_v15, %v5192_v60  ;;  %v5196_v15 = vld [vmem:[%s13282_s5 + $0xf8] sm:$0xff] }
 0x3b2   : > { %6589 = vrot.lane.b32.xlu0 %v6501_v11, %s9195_s26 }
 0x3b3   : > { %6595 = vrot.lane.b32.xlu1 %v6504_v43, %s9195_s26 }
 0x3b4   : > { %v6432_v45 = vpop.permute.xlu1 %6431 }
 0x3b5   : > { %v6502_v42 = vmul.f32 %v6432_v45, %v5190_v13 }
 0x3b7   : > { %6591 = vrot.lane.b32.xlu1 %v6502_v42, %s9195_s26  ;;  %v8989_v42 = vpop.eup %8988 }
 0x3b8   : > { %v6442_v3 = vpop.permute.xlu0 %6441 }
 0x3b9   : > { %v6507_v29 = vmul.f32 %v6442_v3, %v5195_v18 }
 0x3bb   : > { %6601 = vrot.lane.b32.xlu0 %v6507_v29, %s9195_s26  ;;  %v5194_v29 = vld [vmem:[%s13282_s5 + $0xe8] sm:$0xff] }
 0x3bf   : > { %v6438_v11 = vpop.permute.xlu0 %6437 }
 0x3c0   : > { %v6505_v60 = vmul.f32 %v6438_v11, %v5193_v23 }
 0x3c1   : > { %v6444_v13 = vpop.permute.xlu1 %6443 }
 0x3c2   : > { %6597 = vrot.lane.b32.xlu0 %v6505_v60, %s9195_s26  ;;  %v6508_v18 = vmul.f32 %v6444_v13, %v5196_v15 }
 0x3c4   : > { %6603 = vrot.lane.b32.xlu1 %v6508_v18, %s9195_s26 }
 0x3c6   : > { %6957 = vrot.lane.b32.xlu0 %v8989_v42, %s9194_s18 }
 0x3ca   : > { %v6546_v43 = vpop.permute.xlu0 %6545 }
 0x3cb   : > { %v6639_v45 = vadd.f32 %v6546_v43, %v12130_v9  ;;  %v8991_v9 = vpop.eup %8990 }
 0x3cc   : > { %6961 = vrot.lane.b32.xlu0 %v8991_v9, %s9194_s18  ;;  %v8993_v42 = vpop.eup %8992 }
 0x3cd   : > { %v7986_v3 = vmul.f32 -1.442695, %v6639_v45  ;;  %v6440_v60 = vpop.permute.xlu1 %6439 }
 0x3ce   : > { %v6542_v23 = vpop.permute.xlu0 %6541  ;;  %v6506_v15 = vmul.f32 %v6440_v60, %v5194_v29  ;;  %v8995_v29 = vpop.eup %8994 }
 0x3cf   : > { %9002 = vpow2.f32 %v7986_v3  ;;  %v6637_v11 = vadd.f32 %v6542_v23, %v12137_v37 }
 0x3d0   : > { %9004 = vtanh.f32 %v12824_v20  ;;  %6599 = vrot.lane.b32.xlu1 %v6506_v15, %s9195_s26  ;;  %6965 = vrot.lane.b32.xlu0 %v8993_v42, %s9194_s18 }
 0x3d1   : > { %v7984_v43 = vmul.f32 -1.442695, %v6637_v11  ;;  %9006 = vtanh.f32 %v12826_v53  ;;  %v6548_v18 = vpop.permute.xlu1 %6547 }
 0x3d2   : > { %v6554_v13 = vpop.permute.xlu0 %6553  ;;  %v6640_v37 = vadd.f32 %v6548_v18, %v12144_v27 }
 0x3d3   : > { %9008 = vpow2.f32 %v7984_v43  ;;  %v6643_v45 = vadd.f32 %v6554_v13, %v12159_v34  ;;  %v8997_v34 = vpop.eup %8996 }
 0x3d4   : > { %9010 = vtanh.f32 %v12815_v24  ;;  %6959 = vrot.lane.b32.xlu1 %v8995_v29, %s9194_s18  ;;  %v7987_v11 = vmul.f32 -1.442695, %v6640_v37  ;;  %6969 = vrot.lane.b32.xlu0 %v8997_v34, %s9194_s18  ;;  %v8999_v43 = vpop.eup %8998 }
 0x3d5   : > { %v7990_v3 = vmul.f32 -1.442695, %v6643_v45  ;;  %9012 = vtanh.f32 %v12853_v46  ;;  %v6544_v60 = vpop.permute.xlu1 %6543  ;;  %v9001_v13 = vpop.eup %9000 }
 0x3d6   : > { %v6550_v23 = vpop.permute.xlu0 %6549  ;;  %v6638_v27 = vadd.f32 %v6544_v60, %v12152_v59 }
 0x3d7   : > { %9014 = vpow2.f32 %v7990_v3  ;;  %v6641_v9 = vadd.f32 %v6550_v23, %v12167_v56 }
 0x3d8   : > { %9016 = vtanh.f32 %v12843_v32  ;;  %6963 = vrot.lane.b32.xlu1 %v8999_v43, %s9194_s18  ;;  %v7985_v45 = vmul.f32 -1.442695, %v6638_v27  ;;  %6973 = vrot.lane.b32.xlu0 %v9001_v13, %s9194_s18 }
 0x3d9   : > { %9018 = vpow2.f32 %v7987_v11  ;;  %v7988_v15 = vmul.f32 -1.442695, %v6641_v9  ;;  %v6556_v56 = vpop.permute.xlu1 %6555 }
 0x3da   : > { %9020 = vtanh.f32 %v12848_v55  ;;  %v6644_v37 = vadd.f32 %v6556_v56, %v12184_v22 }
 0x3db   : > { %9022 = vpow2.f32 %v7988_v15 }
 0x3dc   : > { %v9003_v42 = vpop.eup %9002  ;;  %9024 = vtanh.f32 %v12838_v41  ;;  %v7991_v23 = vmul.f32 -1.442695, %v6644_v37 }
 0x3dd   : > { %v6767_v18 = vadd.f32 1.0, %v9003_v42  ;;  %9026 = vpow2.f32 %v7985_v45  ;;  %v9005_v59 = vpop.eup %9004 }
 0x3de   : > { %v9007_v29 = vpop.eup %9006  ;;  %6967 = vrot.lane.b32.xlu1 %v9005_v59, %s9194_s18  ;;  %v6552_v34 = vpop.permute.xlu1 %6551 }
 0x3df   : > { %9028 = vrcp.f32 %v6767_v18  ;;  %6977 = vrot.lane.b32.xlu0 %v9007_v29, %s9194_s18  ;;  %v6642_v27 = vadd.f32 %v6552_v34, %v12192_v38 }
 0x3e0   : > { %v9009_v9 = vpop.eup %9008  ;;  %9030 = vtanh.f32 %v12873_v44 }
 0x3e1   : > { %v6765_v60 = vadd.f32 1.0, %v9009_v9  ;;  %9032 = vpow2.f32 %v7991_v23  ;;  %v9011_v15 = vpop.eup %9010  ;;  %v7989_v13 = vmul.f32 -1.442695, %v6642_v27 }
 0x3e2   : > { %9034 = vtanh.f32 %v12861_v49  ;;  %v9013_v43 = vpop.eup %9012  ;;  %6971 = vrot.lane.b32.xlu1 %v9011_v15, %s9194_s18 }
 0x3e3   : > { %9036 = vrcp.f32 %v6765_v60  ;;  %6981 = vrot.lane.b32.xlu0 %v9013_v43, %s9194_s18 }
 0x3e4   : > { %v6562_v3 = vpop.permute.xlu0 %6561 }
 0x3e5   : > { %v6647_v11 = vadd.f32 %v6562_v3, %v12203_v47  ;;  %v9015_v47 = vpop.eup %9014 }
 0x3e6   : > { %v9017_v45 = vpop.eup %9016  ;;  %v6771_v42 = vadd.f32 1.0, %v9015_v47  ;;  %v6564_v29 = vpop.permute.xlu1 %6563 }
 0x3e7   : > { %v7994_v22 = vmul.f32 -1.442695, %v6647_v11  ;;  %v9019_v56 = vpop.eup %9018  ;;  %6975 = vrot.lane.b32.xlu1 %v9017_v45, %s9194_s18  ;;  %v6648_v9 = vadd.f32 %v6564_v29, %v12215_v35 }
 0x3e8   : > { %v9021_v37 = vpop.eup %9020  ;;  %v6768_v38 = vadd.f32 1.0, %v9019_v56 }
 0x3e9   : > { %9038 = vpow2.f32 %v7994_v22  ;;  %v9023_v3 = vpop.eup %9022  ;;  %6985 = vrot.lane.b32.xlu0 %v9021_v37, %s9194_s18  ;;  %v7995_v22 = vmul.f32 -1.442695, %v6648_v9 }
 0x3ea   : > { %9040 = vpow2.f32 %v7989_v13  ;;  %v9025_v23 = vpop.eup %9024  ;;  %v6769_v11 = vadd.f32 1.0, %v9023_v3 }
 0x3eb   : > { %9042 = vrcp.f32 %v6771_v42  ;;  %v9027_v60 = vpop.eup %9026  ;;  %6979 = vrot.lane.b32.xlu1 %v9025_v23, %s9194_s18 }
 0x3ec   : > { %v6558_v18 = vpop.permute.xlu0 %6557  ;;  %9044 = vrcp.f32 %v6768_v38  ;;  %v6766_v27 = vadd.f32 1.0, %v9027_v60  ;;  %v9029_v15 = vpop.eup %9028 }
 0x3ed   : > { %v6645_v59 = vadd.f32 %v6558_v18, %v13610_v39  ;;  %9046 = vrcp.f32 %v6769_v11  ;;  %v9031_v43 = vpop.eup %9030  ;;  %v7023_v39 = vmul.f32 %v9029_v15, %v12893_v8 }
 0x3ee   : > { %v9033_v13 = vpop.eup %9032  ;;  %v6560_v18 = vpop.permute.xlu1 %6559 }
 0x3ef   : > { %v7992_v34 = vmul.f32 -1.442695, %v6645_v59  ;;  %v9035_v45 = vpop.eup %9034  ;;  %6983 = vrot.lane.b32.xlu1 %v9031_v43, %s9194_s18  ;;  %v6772_v35 = vadd.f32 1.0, %v9033_v13  ;;  %7089 = vrot.lane.b32.xlu0 %v7023_v39, %s9193_s8  ;;  %v6646_v38 = vadd.f32 %v6560_v18, %v12226_v19 }
 0x3f0   : > { %v9037_v56 = vpop.eup %9036 }
 0x3f1   : > { %9048 = vpow2.f32 %v7992_v34  ;;  %v7021_v8 = vmul.f32 %v9037_v56, %v12904_v2  ;;  %v7993_v11 = vmul.f32 -1.442695, %v6646_v38 }
 0x3f2   : > { %9050 = vrcp.f32 %v6766_v27 }
 0x3f3   : > { %9052 = vpow2.f32 %v7995_v22  ;;  %6987 = vrot.lane.b32.xlu1 %v9035_v45, %s9194_s18  ;;  %7085 = vrot.lane.b32.xlu0 %v7021_v8, %s9193_s8 }
 0x3f4   : > { %v6570_v47 = vpop.permute.xlu0 %6569  ;;  %9054 = vrcp.f32 %v6772_v35 }
 0x3f5   : > { %v6651_v42 = vadd.f32 %v6570_v47, %v12237_v36 }
 0x3f6   : > { %v9039_v37 = vpop.eup %9038 }
 0x3f7   : > { %v7998_v59 = vmul.f32 -1.442695, %v6651_v42  ;;  %v9041_v3 = vpop.eup %9040  ;;  %v6775_v29 = vadd.f32 1.0, %v9039_v37 }
 0x3f8   : > { %v6770_v23 = vadd.f32 1.0, %v9041_v3  ;;  %v9043_v36 = vpop.eup %9042  ;;  %v6572_v22 = vpop.permute.xlu1 %6571 }
 0x3f9   : > { %9056 = vpow2.f32 %v7998_v59  ;;  %v7027_v9 = vmul.f32 %v9043_v36, %v12916_v0  ;;  %v9045_v34 = vpop.eup %9044  ;;  %v6652_v43 = vadd.f32 %v6572_v22, %v13617_v50 }
 0x3fa   : > { %9058 = vrcp.f32 %v6775_v29  ;;  %v7024_v60 = vmul.f32 %v9045_v34, %v12907_v62  ;;  %v9047_v27 = vpop.eup %9046 }
 0x3fb   : > { %9060 = vrcp.f32 %v6770_v23  ;;  %7097 = vrot.lane.b32.xlu0 %v7027_v9, %s9193_s8  ;;  %v7025_v13 = vmul.f32 %v9047_v27, %v12928_v54  ;;  %v7999_v35 = vmul.f32 -1.442695, %v6652_v43 }
 0x3fc   : > { %9062 = vpow2.f32 %v7993_v11  ;;  %v6566_v19 = vpop.permute.xlu0 %6565  ;;  %7091 = vrot.lane.b32.xlu1 %v7024_v60, %s9193_s8 }
 0x3fd   : > { %v6649_v2 = vadd.f32 %v6566_v19, %v12248_v57 }
 0x3fe   : > { %v9049_v15 = vpop.eup %9048 }
 0x3ff   : > { %v7996_v39 = vmul.f32 -1.442695, %v6649_v2  ;;  %v9051_v0 = vpop.eup %9050  ;;  %v6773_v47 = vadd.f32 1.0, %v9049_v15  ;;  %7093 = vrot.lane.b32.xlu0 %v7025_v13, %s9193_s8 }
 0x400   : > { %v9053_v45 = vpop.eup %9052  ;;  %v7022_v62 = vmul.f32 %v9051_v0, %v12919_v61  ;;  %v6568_v54 = vpop.permute.xlu1 %6567 }
 0x401   : > { %9064 = vpow2.f32 %v7996_v39  ;;  %v6776_v57 = vadd.f32 1.0, %v9053_v45  ;;  %v9055_v50 = vpop.eup %9054  ;;  %v6650_v38 = vadd.f32 %v6568_v54, %v12265_v6 }
 0x402   : > { %9066 = vrcp.f32 %v6773_v47  ;;  %7087 = vrot.lane.b32.xlu1 %v7022_v62, %s9193_s8  ;;  %v7028_v42 = vmul.f32 %v9055_v50, %v12931_v17 }
 0x403   : > { %9068 = vpow2.f32 %v7999_v35  ;;  %v7997_v3 = vmul.f32 -1.442695, %v6650_v38 }
 0x404   : > { %9070 = vrcp.f32 %v6776_v57  ;;  %v6578_v60 = vpop.permute.xlu0 %6577 }
 0x405   : > { %v6655_v47 = vadd.f32 %v6578_v60, %v12273_v1 }
 0x406   : > { %v9057_v56 = vpop.eup %9056  ;;  %7099 = vrot.lane.b32.xlu1 %v7028_v42, %s9193_s8 }
 0x407   : > { %v9059_v18 = vpop.eup %9058  ;;  %v6779_v37 = vadd.f32 1.0, %v9057_v56 }
 0x408   : > { %v9061_v61 = vpop.eup %9060  ;;  %v7031_v59 = vmul.f32 %v9059_v18, %v12940_v51  ;;  %v6580_v45 = vpop.permute.xlu1 %6579 }
 0x409   : > { %v9063_v8 = vpop.eup %9062  ;;  %9072 = vrcp.f32 %v6779_v37  ;;  %v7026_v29 = vmul.f32 %v9061_v61, %v12943_v21  ;;  %v6656_v57 = vadd.f32 %v6580_v45, %v12291_v25  ;;  %v13683_v61 = vld [vmem:[#allocation40_spill] sm:$0xff] }
 0x40a   : > { %v6774_v23 = vadd.f32 1.0, %v9063_v8  ;;  %7105 = vrot.lane.b32.xlu0 %v7031_v59, %s9193_s8  ;;  %9074 = vpow2.f32 %v7997_v3  ;;  %v13685_v3 = vld [vmem:[#allocation51_spill] sm:$0xff] }
 0x40b   : > { %7095 = vrot.lane.b32.xlu1 %v7026_v29, %s9193_s8  ;;  %v8003_v54 = vmul.f32 -1.442695, %v6656_v57 }
 0x40c   : > { %9076 = vrcp.f32 %v6774_v23  ;;  %v6574_v43 = vpop.permute.xlu0 %6573  ;;  %v13686_v23 = vld [vmem:[#allocation48_spill] sm:$0xff] }
 0x40d   : > { %v6653_v35 = vadd.f32 %v6574_v43, %v12280_v5 }
 0x40e   : > { %v9065_v17 = vpop.eup %9064 }
 0x40f   : > { %v9067_v11 = vpop.eup %9066  ;;  %v6777_v6 = vadd.f32 1.0, %v9065_v17 }
 0x410   : > { %v9069_v36 = vpop.eup %9068  ;;  %v7029_v9 = vmul.f32 %v9067_v11, %v12952_v63  ;;  %v6576_v50 = vpop.permute.xlu1 %6575 }
 0x411   : > { %v9071_v34 = vpop.eup %9070  ;;  %v6780_v51 = vadd.f32 1.0, %v9069_v36  ;;  %9078 = vrcp.f32 %v6777_v6  ;;  %v6654_v59 = vadd.f32 %v6576_v50, %v13683_v61 }
 0x412   : > { %v7032_v19 = vmul.f32 %v9071_v34, %v12955_v14  ;;  %7101 = vrot.lane.b32.xlu0 %v7029_v9, %s9193_s8 }
 0x413   : > { %9080 = vrcp.f32 %v6780_v51  ;;  %v8001_v11 = vmul.f32 -1.442695, %v6654_v59 }
 0x414   : > { %7107 = vrot.lane.b32.xlu1 %v7032_v19, %s9193_s8  ;;  %v6586_v39 = vpop.permute.xlu0 %6585 }
 0x415   : > { %v6659_v42 = vadd.f32 %v6586_v39, %v12311_v52  ;;  %v13684_v52 = vld [vmem:[#allocation46_spill] sm:$0xff] }
 0x416   : > { %v9073_v21 = vpop.eup %9072 }
 0x417   : > { %v7035_v2 = vmul.f32 %v9073_v21, %v12964_v33  ;;  %v9075_v27 = vpop.eup %9074  ;;  %v8006_v5 = vmul.f32 -1.442695, %v6659_v42 }
 0x418   : > { %v6778_v15 = vadd.f32 1.0, %v9075_v27 }
 0x419   : > { %v9077_v22 = vpop.eup %9076  ;;  %7113 = vrot.lane.b32.xlu0 %v7035_v2, %s9193_s8 }
 0x41a   : > { %v7030_v63 = vmul.f32 %v9077_v22, %v12967_v26  ;;  %9082 = vrcp.f32 %v6778_v15  ;;  %v8002_v26 = vmul.f32 -1.442695, %v6655_v47  ;;  %v13688_v22 = vld [vmem:[#allocation57_spill] sm:$0xff]  ;;  %v13689_v47 = vld [vmem:[#allocation60_spill] sm:$0xff] }
 0x41c   : > { %7103 = vrot.lane.b32.xlu1 %v7030_v63, %s9193_s8  ;;  %v6582_v62 = vpop.permute.xlu0 %6581  ;;  %9084 = vpow2.f32 %v8002_v26 }
 0x41d   : > { %v6657_v56 = vadd.f32 %v6582_v62, %v12321_v30 }
 0x41e   : > { %v9079_v14 = vpop.eup %9078 }
 0x41f   : > { %v7033_v13 = vmul.f32 %v9079_v14, %v12976_v58  ;;  %v8000_v58 = vmul.f32 -1.442695, %v6653_v35  ;;  %v8004_v38 = vmul.f32 -1.442695, %v6657_v56  ;;  %v13690_v35 = vld [vmem:[#allocation62_spill] sm:$0xff]  ;;  %v13691_v56 = vld [vmem:[#allocation65_spill] sm:$0xff] }
 0x420   : > { %v9081_v0 = vpop.eup %9080  ;;  %v6594_v18 = vpop.permute.xlu0 %6593 }
 0x421   : > { %v7036_v33 = vmul.f32 %v9081_v0, %v12979_v31  ;;  %7109 = vrot.lane.b32.xlu0 %v7033_v13, %s9193_s8  ;;  %v6588_v31 = vpop.permute.xlu1 %6587  ;;  %9086 = vpow2.f32 %v8000_v58  ;;  %v6663_v29 = vadd.f32 %v6594_v18, %v13685_v3 }
 0x422   : > { %9088 = vpow2.f32 %v8003_v54  ;;  %v6660_v8 = vadd.f32 %v6588_v31, %v13684_v52 }
 0x423   : > { %7115 = vrot.lane.b32.xlu1 %v7036_v33, %s9193_s8  ;;  %9090 = vpow2.f32 %v8006_v5  ;;  %v8010_v34 = vmul.f32 -1.442695, %v6663_v29 }
 0x424   : > { %9092 = vpow2.f32 %v8004_v38  ;;  %v6590_v30 = vpop.permute.xlu0 %6589  ;;  %v8007_v36 = vmul.f32 -1.442695, %v6660_v8  ;;  %v13692_v8 = vld [vmem:[#allocation67_spill] sm:$0xff] }
 0x425   : > { %v6584_v25 = vpop.permute.xlu1 %6583  ;;  %9094 = vpow2.f32 %v8001_v11 }
 0x426   : > { %v6658_v17 = vadd.f32 %v6584_v25, %v13686_v23  ;;  %9096 = vpow2.f32 %v8007_v36 }
 0x427   : > { %v9083_v1 = vpop.eup %9082  ;;  %9098 = vpow2.f32 %v8010_v34  ;;  %v13693_v34 = vld [vmem:[#allocation69_spill] sm:$0xff] }
 0x428   : > { %v7034_v37 = vmul.f32 %v9083_v1, %v12989_v7  ;;  %v13687_v7 = vld [vmem:[#allocation54_spill] sm:$0xff]  ;;  %v8005_v19 = vmul.f32 -1.442695, %v6658_v17 }
 0x429   : > { %v6661_v6 = vadd.f32 %v6590_v30, %v13687_v7  ;;  %v6596_v9 = vpop.permute.xlu1 %6595  ;;  %v9085_v51 = vpop.eup %9084 }
 0x42a   : > { %7111 = vrot.lane.b32.xlu1 %v7034_v37, %s9193_s8  ;;  %v6783_v2 = vadd.f32 1.0, %v9085_v51  ;;  %9100 = vpow2.f32 %v8005_v19  ;;  %v6664_v15 = vadd.f32 %v6596_v9, %v13688_v22 }
 0x42b   : > { %v8008_v21 = vmul.f32 -1.442695, %v6661_v6 }
 0x42c   : > { %v8011_v33 = vmul.f32 -1.442695, %v6664_v15 }
 0x42d   : > { %v6592_v63 = vpop.permute.xlu1 %6591  ;;  %9102 = vpow2.f32 %v8008_v21  ;;  %v6602_v0 = vpop.permute.xlu0 %6601 }
 0x42e   : > { %v9087_v60 = vpop.eup %9086  ;;  %9104 = vrcp.f32 %v6783_v2  ;;  %v6662_v45 = vadd.f32 %v6592_v63, %v13689_v47  ;;  %v6667_v62 = vadd.f32 %v6602_v0, %v13690_v35 }
 0x42f   : > { %v9089_v27 = vpop.eup %9088  ;;  %v6781_v14 = vadd.f32 1.0, %v9087_v60 }
 0x430   : > { %v9091_v43 = vpop.eup %9090  ;;  %v6784_v13 = vadd.f32 1.0, %v9089_v27  ;;  %v8009_v50 = vmul.f32 -1.442695, %v6662_v45  ;;  %v8014_v42 = vmul.f32 -1.442695, %v6667_v62 }
 0x431   : > { %v9093_v39 = vpop.eup %9092  ;;  %v6787_v26 = vadd.f32 1.0, %v9091_v43  ;;  %9106 = vrcp.f32 %v6781_v14 }
 0x432   : > { %v6785_v57 = vadd.f32 1.0, %v9093_v39  ;;  %9108 = vrcp.f32 %v6784_v13  ;;  %v9095_v54 = vpop.eup %9094 }
 0x433   : > { %9110 = vpow2.f32 %v8011_v33  ;;  %v9097_v31 = vpop.eup %9096  ;;  %v6782_v25 = vadd.f32 1.0, %v9095_v54 }
 0x434   : > { %v6598_v58 = vpop.permute.xlu0 %6597  ;;  %9112 = vrcp.f32 %v6787_v26  ;;  %v9099_v37 = vpop.eup %9098  ;;  %v6788_v52 = vadd.f32 1.0, %v9097_v31 }
 0x435   : > { %v6665_v1 = vadd.f32 %v6598_v58, %v13691_v56  ;;  %9114 = vrcp.f32 %v6785_v57  ;;  %v6791_v3 = vadd.f32 1.0, %v9099_v37 }
 0x436   : > { %9116 = vpow2.f32 %v8009_v50  ;;  %v6604_v61 = vpop.permute.xlu1 %6603 }
 0x437   : > { %v8012_v18 = vmul.f32 -1.442695, %v6665_v1  ;;  %9118 = vpow2.f32 %v8014_v42  ;;  %v9101_v38 = vpop.eup %9100  ;;  %v6668_v30 = vadd.f32 %v6604_v61, %v13692_v8 }
 0x438   : > { %v6958_v5 = vpop.permute.xlu0 %6957  ;;  %v6786_v23 = vadd.f32 1.0, %v9101_v38 }
 0x439   : > { %9120 = vpow2.f32 %v8012_v18  ;;  %v8015_v6 = vmul.f32 -1.442695, %v6668_v30 }
 0x43a   : > { %v9103_v59 = vpop.eup %9102  ;;  %9122 = vrcp.f32 %v6782_v25 }
 0x43b   : > { %v9105_v29 = vpop.eup %9104  ;;  %v6789_v11 = vadd.f32 1.0, %v9103_v59  ;;  %9124 = vrcp.f32 %v6788_v52 }
 0x43c   : > { %9126 = vrcp.f32 %v6791_v3 }
 0x43d   : > { %9128 = vrcp.f32 %v6786_v23 }
 0x43e   : > { %v6962_v17 = vpop.permute.xlu0 %6961  ;;  %v9107_v9 = vpop.eup %9106  ;;  %9130 = vrcp.f32 %v6789_v11 }
 0x43f   : > { %v7039_v7 = vmul.f32 %v9105_v29, %v6962_v17  ;;  %v9109_v19 = vpop.eup %9108  ;;  %v7037_v2 = vmul.f32 %v9107_v9, %v6958_v5  ;;  %9132 = vpow2.f32 %v8015_v6 }
 0x440   : > { %v9111_v60 = vpop.eup %9110 }
 0x441   : > { %7121 = vrot.lane.b32.xlu0 %v7039_v7, %s9193_s8  ;;  %v9113_v22 = vpop.eup %9112  ;;  %v6792_v14 = vadd.f32 1.0, %v9111_v60 }
 0x442   : > { %v6600_v36 = vpop.permute.xlu1 %6599  ;;  %v6966_v21 = vpop.permute.xlu0 %6965 }
 0x443   : > { %v6666_v51 = vadd.f32 %v6600_v36, %v13693_v34  ;;  %v9115_v63 = vpop.eup %9114 }
 0x444   : > { %v9117_v43 = vpop.eup %9116  ;;  %v7041_v50 = vmul.f32 %v9115_v63, %v6966_v21  ;;  %v13695_v63 = vld [vmem:[#allocation28_spill] sm:$0xff] }
 0x445   : > { %v8013_v27 = vmul.f32 -1.442695, %v6666_v51  ;;  %7117 = vrot.lane.b32.xlu0 %v7037_v2, %s9193_s8  ;;  %v9119_v13 = vpop.eup %9118  ;;  %v6790_v33 = vadd.f32 1.0, %v9117_v43 }
 0x446   : > { %v6960_v15 = vpop.permute.xlu1 %6959  ;;  %v6970_v39 = vpop.permute.xlu0 %6969  ;;  %v6795_v57 = vadd.f32 1.0, %v9119_v13 }
 0x447   : > { %9134 = vpow2.f32 %v8013_v27  ;;  %v7043_v0 = vmul.f32 %v9113_v22, %v6970_v39  ;;  %v9121_v47 = vpop.eup %9120  ;;  %v13694_v27 = vld [vmem:[#allocation20_spill] sm:$0xff] }
 0x448   : > { %v6793_v35 = vadd.f32 1.0, %v9121_v47  ;;  %9136 = vrcp.f32 %v6792_v14  ;;  %v9123_v42 = vpop.eup %9122  ;;  %v13696_v47 = vld [vmem:[#allocation21_spill] sm:$0xff] }
 0x449   : > { %7129 = vrot.lane.b32.xlu0 %v7043_v0, %s9193_s8  ;;  %v9125_v56 = vpop.eup %9124  ;;  %v7038_v1 = vmul.f32 %v9123_v42, %v6960_v15  ;;  %v13698_v42 = vld [vmem:[#allocation26_spill] sm:$0xff] }
 0x44a   : > { %v6964_v45 = vpop.permute.xlu1 %6963  ;;  %v6974_v26 = vpop.permute.xlu0 %6973  ;;  %9138 = vrcp.f32 %v6793_v35 }
 0x44b   : > { %v7040_v62 = vmul.f32 %v9109_v19, %v6964_v45  ;;  %9140 = vrcp.f32 %v6790_v33  ;;  %v9127_v54 = vpop.eup %9126 }
 0x44c   : > { %v9129_v18 = vpop.eup %9128  ;;  %9142 = vrcp.f32 %v6795_v57 }
 0x44d   : > { %7123 = vrot.lane.b32.xlu1 %v7040_v62, %s9193_s8  ;;  %7125 = vrot.lane.b32.xlu0 %v7041_v50, %s9193_s8  ;;  %v9131_v5 = vpop.eup %9130 }
 0x44e   : > { %v9133_v25 = vpop.eup %9132  ;;  %v7045_v30 = vmul.f32 %v9131_v5, %v6974_v26  ;;  %v13697_v26 = vld [vmem:[#allocation3_spill] sm:$0xff] }
 0x44f   : > { %v6796_v29 = vadd.f32 1.0, %v9133_v25  ;;  %v13701_v25 = vld [vmem:[#allocation17_spill] sm:$0xff] }
 0x450   : > { %v6968_v58 = vpop.permute.xlu1 %6967 }
 0x451   : > { %v6978_v31 = vpop.permute.xlu0 %6977  ;;  %7119 = vrot.lane.b32.xlu1 %v7038_v1, %s9193_s8  ;;  %v7042_v23 = vmul.f32 %v9129_v18, %v6968_v58  ;;  %v13699_v1 = vld [vmem:[#allocation22_spill] sm:$0xff]  ;;  %v13700_v18 = vld [vmem:[#allocation25_spill] sm:$0xff] }
 0x452   : > { %v7047_v37 = vmul.f32 %v9127_v54, %v6978_v31 }
 0x454   : > { %v6972_v38 = vpop.permute.xlu1 %6971  ;;  %7137 = vrot.lane.b32.xlu0 %v7047_v37, %s9193_s8  ;;  %v9135_v59 = vpop.eup %9134 }
 0x455   : > { %v7044_v61 = vmul.f32 %v9125_v56, %v6972_v38  ;;  %v6982_v52 = vpop.permute.xlu0 %6981  ;;  %v6794_v8 = vadd.f32 1.0, %v9135_v59  ;;  %v9137_v17 = vpop.eup %9136  ;;  %v13702_v59 = vld [vmem:[#allocation31_spill] sm:$0xff] }
 0x457   : > { %7131 = vrot.lane.b32.xlu1 %v7044_v61, %s9193_s8  ;;  %9144 = vrcp.f32 %v6794_v8  ;;  %v9139_v11 = vpop.eup %9138 }
 0x458   : > { %7133 = vrot.lane.b32.xlu0 %v7045_v30, %s9193_s8  ;;  %9146 = vrcp.f32 %v6796_v29  ;;  %v7049_v36 = vmul.f32 %v9139_v11, %v6982_v52  ;;  %v9141_v34 = vpop.eup %9140  ;;  %v13703_v30 = vld [vmem:[#allocation7_spill] sm:$0xff] }
 0x459   : > { %v6976_v3 = vpop.permute.xlu1 %6975  ;;  %v9143_v51 = vpop.eup %9142 }
 0x45a   : > { %v7046_v60 = vmul.f32 %v9141_v34, %v6976_v3 }
 0x45b   : > { %7127 = vrot.lane.b32.xlu1 %v7042_v23, %s9193_s8  ;;  %v6986_v6 = vpop.permute.xlu0 %6985  ;;  %v13704_v23 = vld [vmem:[#allocation14_spill] sm:$0xff] }
 0x45c   : > { %7141 = vrot.lane.b32.xlu0 %v7049_v36, %s9193_s8  ;;  %v7051_v2 = vmul.f32 %v9143_v51, %v6986_v6 }
 0x45d   : > { %v6980_v7 = vpop.permute.xlu1 %6979 }
 0x45e   : > { %v7048_v9 = vmul.f32 %v9137_v17, %v6980_v7  ;;  %v13705_v7 = vld [vmem:[#allocation27_spill] sm:$0xff] }
 0x460   : > { %7139 = vrot.lane.b32.xlu1 %v7048_v9, %s9193_s8  ;;  %7145 = vrot.lane.b32.xlu0 %v7051_v2, %s9193_s8  ;;  %v13706_v9 = vld [vmem:[#allocation29_spill] sm:$0xff]  ;;  %v13708_v2 = vld [vmem:[#allocation32_spill] sm:$0xff] }
 0x461   : > { %v6984_v19 = vpop.permute.xlu1 %6983  ;;  %v7090_v21 = vpop.permute.xlu0 %7089 }
 0x462   : > { %v7184_v22 = vsel %vm7181_vm8, %v7090_v21, %v13694_v27 }
 0x463   : > { %7217 = vst.msk [vmem:[%s13140_s10 + $0x10] sm:$0xff] %vm7214_vm9, %v7184_v22 }
 0x464   : > { %7135 = vrot.lane.b32.xlu1 %v7046_v60, %s9193_s8  ;;  %v9145_v14 = vpop.eup %9144 }
 0x465   : > { %v7086_v15 = vpop.permute.xlu0 %7085  ;;  %v6988_v39 = vpop.permute.xlu1 %6987  ;;  %v7050_v13 = vmul.f32 %v9145_v14, %v6984_v19  ;;  %v13707_v19 = vld [vmem:[#allocation33_spill] sm:$0xff] }
 0x466   : > { %v7182_v43 = vsel %vm7181_vm8, %v7086_v15, %v13695_v63  ;;  %v9147_v33 = vpop.eup %9146  ;;  %v13709_v15 = vld [vmem:[#allocation30_spill] sm:$0xff] }
 0x467   : > { %7215 = vst.msk [vmem:[%s13140_s10] sm:$0xff] %vm7214_vm9, %v7182_v43  ;;  %v7052_v62 = vmul.f32 %v9147_v33, %v6988_v39 }
 0x468   : > { %7143 = vrot.lane.b32.xlu1 %v7050_v13, %s9193_s8 }
 0x46c   : > { %7147 = vrot.lane.b32.xlu1 %v7052_v62, %s9193_s8 }
 0x46d   : > { %v7098_v0 = vpop.permute.xlu0 %7097 }
 0x46e   : > { %v7188_v45 = vsel %vm7181_vm8, %v7098_v0, %v13696_v47  ;;  %v7092_v35 = vpop.permute.xlu1 %7091 }
 0x46f   : > { %7221 = vst.msk [vmem:[%s13140_s10 + $0x30] sm:$0xff] %vm7214_vm9, %v7188_v45  ;;  %v7185_v57 = vsel %vm7181_vm8, %v7092_v35, %v13697_v26 }
 0x470   : > { %7218 = vst.msk [vmem:[%s13140_s10 + $0x18] sm:$0xff] %vm7214_vm9, %v7185_v57 }
 0x471   : > { %v7094_v50 = vpop.permute.xlu0 %7093 }
 0x472   : > { %v7186_v58 = vsel %vm7181_vm8, %v7094_v50, %v13698_v42 }
 0x473   : > { %7219 = vst.msk [vmem:[%s13140_s10 + $0x20] sm:$0xff] %vm7214_vm9, %v7186_v58 }
 0x474   : > { %v7088_v56 = vpop.permute.xlu1 %7087 }
 0x475   : > { %v7183_v54 = vsel %vm7181_vm8, %v7088_v56, %v13699_v1 }
 0x476   : > { %7216 = vst.msk [vmem:[%s13140_s10 + $0x8] sm:$0xff] %vm7214_vm9, %v7183_v54 }
 0x478   : > { %v7100_v31 = vpop.permute.xlu1 %7099 }
 0x479   : > { %v7189_v37 = vsel %vm7181_vm8, %v7100_v31, %v13700_v18 }
 0x47a   : > { %7222 = vst.msk [vmem:[%s13140_s10 + $0x38] sm:$0xff] %vm7214_vm9, %v7189_v37 }
 0x47c   : > { %v7106_v5 = vpop.permute.xlu0 %7105 }
 0x47d   : > { %v7096_v38 = vpop.permute.xlu1 %7095  ;;  %v7192_v61 = vsel %vm7181_vm8, %v7106_v5, %v13701_v25 }
 0x47e   : > { %v7187_v52 = vsel %vm7181_vm8, %v7096_v38, %v13702_v59  ;;  %7225 = vst.msk [vmem:[%s13140_s10 + $0x50] sm:$0xff] %vm7214_vm9, %v7192_v61 }
 0x47f   : > { %7220 = vst.msk [vmem:[%s13140_s10 + $0x28] sm:$0xff] %vm7214_vm9, %v7187_v52 }
 0x484   : > { %v7102_v8 = vpop.permute.xlu0 %7101 }
 0x485   : > { %v7190_v3 = vsel %vm7181_vm8, %v7102_v8, %v13703_v30 }
 0x486   : > { %v7108_v29 = vpop.permute.xlu1 %7107  ;;  %7223 = vst.msk [vmem:[%s13140_s10 + $0x40] sm:$0xff] %vm7214_vm9, %v7190_v3 }
 0x487   : > { %v7193_v17 = vsel %vm7181_vm8, %v7108_v29, %v13704_v23 }
 0x488   : > { %7226 = vst.msk [vmem:[%s13140_s10 + $0x58] sm:$0xff] %vm7214_vm9, %v7193_v17 }
 0x48b   : > { %v7114_v11 = vpop.permute.xlu0 %7113 }
 0x48c   : > { %v7196_v6 = vsel %vm7181_vm8, %v7114_v11, %v13705_v7 }
 0x48d   : > { %7229 = vst.msk [vmem:[%s13140_s10 + $0x70] sm:$0xff] %vm7214_vm9, %v7196_v6 }
 0x48e   : > { %v7104_v36 = vpop.permute.xlu1 %7103 }
 0x48f   : > { %v7191_v34 = vsel %vm7181_vm8, %v7104_v36, %v13706_v9 }
 0x490   : > { %7224 = vst.msk [vmem:[%s13140_s10 + $0x48] sm:$0xff] %vm7214_vm9, %v7191_v34 }
 0x493   : > { %v7110_v51 = vpop.permute.xlu0 %7109 }
 0x494   : > { %v7194_v21 = vsel %vm7181_vm8, %v7110_v51, %v13707_v19 }
 0x495   : > { %v7116_v60 = vpop.permute.xlu1 %7115  ;;  %7227 = vst.msk [vmem:[%s13140_s10 + $0x60] sm:$0xff] %vm7214_vm9, %v7194_v21 }
 0x496   : > { %v7197_v27 = vsel %vm7181_vm8, %v7116_v60, %v13708_v2 }
 0x497   : > { %7230 = vst.msk [vmem:[%s13140_s10 + $0x78] sm:$0xff] %vm7214_vm9, %v7197_v27 }
 0x49c   : > { %v7112_v22 = vpop.permute.xlu1 %7111 }
 0x49d   : > { %v7195_v63 = vsel %vm7181_vm8, %v7112_v22, %v13709_v15 }
 0x49e   : > { %7228 = vst.msk [vmem:[%s13140_s10 + $0x68] sm:$0xff] %vm7214_vm9, %v7195_v63 }
 0x4b3   : > { %v7122_v43 = vpop.permute.xlu0 %7121 }
 0x4b4   : > { %v7200_v14 = vsel %vm7181_vm8, %v7122_v43, %v12762_v48 }
 0x4b5   : > { %7233 = vst.msk [vmem:[%s13140_s10 + $0x90] sm:$0xff] %vm7214_vm9, %v7200_v14 }
 0x4b7   : > { %v7118_v39 = vpop.permute.xlu0 %7117 }
 0x4b8   : > { %v7198_v13 = vsel %vm7181_vm8, %v7118_v39, %v12778_v28 }
 0x4b9   : > { %7231 = vst.msk [vmem:[%s13140_s10 + $0x80] sm:$0xff] %vm7214_vm9, %v7198_v13 }
 0x4bb   : > { %v7130_v0 = vpop.permute.xlu0 %7129 }
 0x4bc   : > { %v7204_v47 = vsel %vm7181_vm8, %v7130_v0, %v12795_v10 }
 0x4bd   : > { %7237 = vst.msk [vmem:[%s13140_s10 + $0xb0] sm:$0xff] %vm7214_vm9, %v7204_v47 }
 0x4bf   : > { %v7124_v45 = vpop.permute.xlu1 %7123  ;;  %v7126_v33 = vpop.permute.xlu0 %7125 }
 0x4c0   : > { %v7201_v48 = vsel %vm7181_vm8, %v7124_v45, %v12784_v40  ;;  %v7202_v28 = vsel %vm7181_vm8, %v7126_v33, %v12810_v4 }
 0x4c1   : > { %7234 = vst.msk [vmem:[%s13140_s10 + $0x98] sm:$0xff] %vm7214_vm9, %v7201_v48  ;;  %7235 = vst.msk [vmem:[%s13140_s10 + $0xa0] sm:$0xff] %vm7214_vm9, %v7202_v28 }
 0x4c3   : > { %v7120_v35 = vpop.permute.xlu1 %7119 }
 0x4c4   : > { %v7199_v10 = vsel %vm7181_vm8, %v7120_v35, %v12799_v16 }
 0x4c5   : > { %7232 = vst.msk [vmem:[%s13140_s10 + $0x88] sm:$0xff] %vm7214_vm9, %v7199_v10 }
 0x4c6   : > { %v7138_v62 = vpop.permute.xlu0 %7137 }
 0x4c7   : > { %v7208_v40 = vsel %vm7181_vm8, %v7138_v62, %v12826_v53 }
 0x4c8   : > { %7241 = vst.msk [vmem:[%s13140_s10 + $0xd0] sm:$0xff] %vm7214_vm9, %v7208_v40 }
 0x4c9   : > { %v7132_v26 = vpop.permute.xlu1 %7131 }
 0x4ca   : > { %v7205_v4 = vsel %vm7181_vm8, %v7132_v26, %v12815_v24  ;;  %v7134_v57 = vpop.permute.xlu0 %7133 }
 0x4cb   : > { %7238 = vst.msk [vmem:[%s13140_s10 + $0xb8] sm:$0xff] %vm7214_vm9, %v7205_v4  ;;  %v7206_v16 = vsel %vm7181_vm8, %v7134_v57, %v12833_v12 }
 0x4cc   : > { %7239 = vst.msk [vmem:[%s13140_s10 + $0xc0] sm:$0xff] %vm7214_vm9, %v7206_v16 }
 0x4cd   : > { %v7128_v50 = vpop.permute.xlu1 %7127 }
 0x4ce   : > { %v7203_v53 = vsel %vm7181_vm8, %v7128_v50, %v12824_v20  ;;  %v7142_v58 = vpop.permute.xlu0 %7141 }
 0x4cf   : > { %7236 = vst.msk [vmem:[%s13140_s10 + $0xa8] sm:$0xff] %vm7214_vm9, %v7203_v53  ;;  %v7210_v56 = vsel %vm7181_vm8, %v7142_v58, %v12853_v46 }
 0x4d0   : > { %7243 = vst.msk [vmem:[%s13140_s10 + $0xe0] sm:$0xff] %vm7214_vm9, %v7210_v56 }
 0x4d2   : > { %v7140_v42 = vpop.permute.xlu1 %7139  ;;  %v7146_v1 = vpop.permute.xlu0 %7145 }
 0x4d3   : > { %v7209_v24 = vsel %vm7181_vm8, %v7140_v42, %v12838_v41  ;;  %v7212_v54 = vsel %vm7181_vm8, %v7146_v1, %v12848_v55 }
 0x4d4   : > { %7242 = vst.msk [vmem:[%s13140_s10 + $0xd8] sm:$0xff] %vm7214_vm9, %v7209_v24  ;;  %7245 = vst.msk [vmem:[%s13140_s10 + $0xf0] sm:$0xff] %vm7214_vm9, %v7212_v54 }
 0x4d6   : > { %v7136_v12 = vpop.permute.xlu1 %7135 }
 0x4d7   : > { %v7207_v20 = vsel %vm7181_vm8, %v7136_v12, %v12843_v32 }
 0x4d8   : > { %7240 = vst.msk [vmem:[%s13140_s10 + $0xc8] sm:$0xff] %vm7214_vm9, %v7207_v20 }
 0x4da   : > { %v7144_v41 = vpop.permute.xlu1 %7143 }
 0x4db   : > { %v7211_v46 = vsel %vm7181_vm8, %v7144_v41, %v12873_v44 }
 0x4dc   : > { %7244 = vst.msk [vmem:[%s13140_s10 + $0xe8] sm:$0xff] %vm7214_vm9, %v7211_v46 }
 0x4de   : > { %v7148_v31 = vpop.permute.xlu1 %7147 }
 0x4df   : > { %v7213_v18 = vsel %vm7181_vm8, %v7148_v31, %v12861_v49 }
 0x4e0   : > { %7246 = vst.msk [vmem:[%s13140_s10 + $0xf8] sm:$0xff] %vm7214_vm9, %v7213_v18 }
 0x4e1 PF: > { %s17_s24 = sadd.s32 1, %s9191_s24  }
 0x4e2   : > { %p14_p4 = scmp.ge.s32.totalorder %s17_s24, 4  }
 0x4e4   :  { %16 = sbr.rel (!%p14_p4) target bundleno = 1 (0x1), region = 91 }

</bundles_post_ra>
